<compile_context>
chip_gen: v7x
topology: tpu7x:2x2x1
jax: 0.10.0
libtpu: 0.0.40
codegen_flags: <defaults>
</compile_context>

<pallas_src>
import functools

import jax
import jax.numpy as jnp
from jax import lax
from jax.experimental import pallas as pl
from jax.experimental.pallas import tpu as pltpu

_VMEM = pl.BlockSpec(memory_space=pltpu.MemorySpace.VMEM)
BF16 = jnp.bfloat16
F32 = jnp.float32


# ------------------------------ Pallas kernel ---------------------------------

def _fused_kernel(n_actions, batch,
                  p1_ref, xl_ref,
                  w1_ref, b1_ref, w2_ref, b2_ref, w3_ref, b3_ref,
                  wm1_ref, bm1_ref, wm2_ref, bm2_ref,
                  wh1h_ref, wh1x_ref, bh1_ref, wh2_ref, bh2_ref,
                  q_ref,
                  h1_s, p2_s, p3_s, feat_s):
    """conv1+conv2+conv3+med MLP+concat+dueling heads, fully fused in VMEM.

    p1 rows are ordered (r1, col-group, b) where col-groups list the 8 even
    output columns first, then the 7 odd ones.  With that ordering every conv2
    kernel position maps to a *contiguous* static row block of h1, and every
    conv3 kernel position maps to a contiguous block of h2 (rows (r2, c2, b)).
    """
    B = batch
    A = n_actions

    # ---- conv1: ONE (225B,256)@(256,32) MXU call; activations parked in VMEM. ----
    h1 = jnp.dot(p1_ref[...], w1_ref[...], preferred_element_type=jnp.float32)
    h1_s[...] = jnp.maximum(h1 + b1_ref[...], 0.0)                  # (225B, 32) f32

    # ---- conv2: assemble the (36B, 512) im2col patch matrix in VMEM from
    # contiguous row blocks, then ONE K=512 matmul. ----
    for r2 in range(6):
        dst = r2 * 6 * B
        for i in range(4):
            r1 = 2 * r2 + i
            for j in range(4):
                k = i * 4 + j
                cg0 = 8 * (j % 2) + j // 2               # first column-group used
                src = (r1 * 15 + cg0) * B
                p2_s[dst:dst + 6 * B, k * 32:(k + 1) * 32] = \
                    h1_s[src:src + 6 * B, :]
    h2 = jnp.dot(p2_s[...].astype(BF16), w2_ref[...],
                 preferred_element_type=jnp.float32)
    h2 = jnp.maximum(h2 + b2_ref[...], 0.0)                         # (36B, 64) f32

    # ---- conv3: same trick, (16B, 576) patches + ONE K=576 matmul. ----
    for r3 in range(4):
        dst = r3 * 4 * B
        for i in range(3):
            for j in range(3):
                k = i * 3 + j
                src = ((r3 + i) * 6 + j) * B
                p3_s[dst:dst + 4 * B, k * 64:(k + 1) * 64] = h2[src:src + 4 * B, :]
    h3 = jnp.dot(p3_s[...].astype(BF16), w3_ref[...],
                 preferred_element_type=jnp.float32)
    h3 = jnp.maximum(h3 + b3_ref[...], 0.0)                         # (16B, 64) f32

    # ---- flatten to (B, 1024) in (h, w, c) order (wm1 rows pre-permuted). ----
    for p3 in range(16):
        feat_s[:, p3 * 64:(p3 + 1) * 64] = h3[p3 * B:(p3 + 1) * B, :]

    # ---- med MLP: ONE K=1024 matmul + relu, then 512->256 (no output relu). ----
    hm = jnp.maximum(
        jnp.dot(feat_s[...].astype(BF16), wm1_ref[...],
                preferred_element_type=jnp.float32) + bm1_ref[...], 0.0)
    h_med = (jnp.dot(hm.astype(BF16), wm2_ref[...],
                     preferred_element_type=jnp.float32)
             + bm2_ref[...]).astype(BF16)                           # (B, 256)

    # ---- dueling heads, merged: cat([h_med, x_last]) @ [Wa1|Wv1] as two split
    # dots + one relu, then ONE block-diagonal (512, A+1) matmul -> [ya | ys]. ----
    xl = xl_ref[...]                                                # (B, 64) bf16
    hh = jnp.maximum(
        jnp.dot(h_med, wh1h_ref[...], preferred_element_type=jnp.float32)
        + jnp.dot(xl, wh1x_ref[...], preferred_element_type=jnp.float32)
        + bh1_ref[...], 0.0).astype(BF16)                           # (B, 512)
    y = jnp.dot(hh, wh2_ref[...], preferred_element_type=jnp.float32) + bh2_ref[...]
    ya = y[:, :A]
    ys = y[:, A:A + 1]
    mean = jnp.sum(ya, axis=1, keepdims=True) * (1.0 / A)
    q_ref[...] = (ya - mean) + ys          # the only narrow (B, A) HBM store


def _fused_forward(p1, x_last, pk, n_actions):
    batch = x_last.shape[0]
    args = (p1, x_last,
            pk["w1"], pk["b1"], pk["w2"], pk["b2"], pk["w3"], pk["b3"],
            pk["wm1"], pk["bm1"], pk["wm2"], pk["bm2"],
            pk["wh1h"], pk["wh1x"], pk["bh1"], pk["wh2"], pk["bh2"])
    return pl.pallas_call(
        functools.partial(_fused_kernel, n_actions, batch),
        out_shape=jax.ShapeDtypeStruct((batch, n_actions), F32),
        in_specs=[_VMEM] * len(args),
        out_specs=_VMEM,
        scratch_shapes=[
            pltpu.VMEM((225 * batch, 32), F32),    # h1  (conv1 activations)
            pltpu.VMEM((36 * batch, 512), F32),    # conv2 im2col patches
            pltpu.VMEM((16 * batch, 576), F32),    # conv3 im2col patches
            pltpu.VMEM((batch, 1024), F32),        # flattened conv3 output
        ],
    )(*args)


# ------------------------------- JAX glue --------------------------------------

def _conv1_patches(x_nhwc):
    """(B,64,64,4) NHWC -> (15*15*B, 256) conv1 im2col patches.

    Rows ordered (r1, col-group, b): the 8 even output columns first, the 7 odd
    ones after, so every conv2 kernel position becomes a contiguous in-kernel
    row block.  Features ordered (kh, kw, cin) to match the packed conv weight.
    """
    b = x_nhwc.shape[0]
    cols = []
    for di in range(8):
        for dj in range(8):
            cols.append(x_nhwc[:, di:di + 57:4, dj:dj + 57:4, :])   # (B,15,15,4)
    p = jnp.stack(cols, axis=3).reshape(b, 15, 15, 256)
    p = jnp.concatenate([p[:, :, 0::2, :], p[:, :, 1::2, :]], axis=2)
    return jnp.transpose(p, (1, 2, 0, 3)).reshape(15 * 15 * b, 256)


def dueling_dqn_med_forward(packed, x, n_actions):
    # Single layout change (NCHW -> NHWC) + one XLA im2col pass; everything
    # else runs inside the fused Pallas kernel.
    x_nhwc = jnp.transpose(x, (0, 2, 3, 1))
    p1 = _conv1_patches(x_nhwc).astype(BF16)                  # (225B, 256)
    x_last = x[:, -1, 0, :].astype(BF16)                      # (B, 64)
    # TODO(synk): DiscreteActionValue is a thin wrapper class; we return raw Q-values.
    return _fused_forward(p1, x_last, packed, n_actions)


# ----------------------------- parameters --------------------------------------

def init_params(key, n_actions, n_input_channels=4, conv_bias=0.1):
    """Deterministic synthetic parameters in PyTorch layouts:
    conv w (Cout, Cin, KH, KW) with constant bias 0.1; Linear w (out, in), bias 0."""
    keys = jax.random.split(key, 9)

    def lecun(k, fan_in, shape):
        return (jax.random.normal(k, shape, F32) / jnp.sqrt(fan_in)).astype(F32)

    conv_cfg = [(n_input_channels, 32, 8), (32, 64, 4), (64, 64, 3)]
    conv = []
    for idx, (cin, cout, k) in enumerate(conv_cfg):
        w = lecun(keys[idx], cin * k * k, (cout, cin, k, k))
        conv.append((w, jnp.full((cout,), conv_bias, F32)))

    def linear(k, fan_in, fan_out):
        return lecun(k, fan_in, (fan_out, fan_in)), jnp.zeros((fan_out,), F32)

    return {
        "conv": conv,
        "med": (linear(keys[3], 1024, 512), linear(keys[4], 512, 256)),
        "a": (linear(keys[5], 320, 256), linear(keys[6], 256, n_actions)),
        "v": (linear(keys[7], 320, 256), linear(keys[8], 256, 1)),
    }


def pack_params(params):
    """One-time repack of PyTorch-layout params into kernel layouts (done once,
    OUTSIDE the jitted forward):
      conv w   -> (KH*KW*Cin, Cout) bf16   (matches the im2col feature order)
      linear w -> (in, out) bf16
      med w1   -> input rows permuted from PyTorch's C-major flatten to HWC
      head w1  -> [a|v] merged along the output dim, split into h_med / x_last halves
      head w2  -> block-diagonal (512, A+1) producing [ya | ys] in one matmul
      biases   -> f32, shape (1, n)
    """
    (w1c, b1c), (w2c, b2c), (w3c, b3c) = params["conv"]
    (wm1, bm1), (wm2, bm2) = params["med"]
    (wa1, ba1), (wa2, ba2) = params["a"]
    (wv1, bv1), (wv2, bv2) = params["v"]
    n_actions = wa2.shape[0]

    def conv_pack(w):                  # (Cout, Cin, KH, KW) -> (KH*KW*Cin, Cout)
        co, ci, kh, kw = w.shape
        return w.transpose(2, 3, 1, 0).reshape(kh * kw * ci, co).astype(BF16)

    def bias(b):
        return b.reshape(1, -1).astype(F32)

    # med w1: PyTorch flatten of conv3 output is (C=64, H=4, W=4); ours is
    # (H, W, C).  New input row p*64 + c  <-  old input column c*16 + p.
    hout = wm1.shape[0]
    wm1_hwc = wm1.reshape(hout, 64, 16).transpose(2, 1, 0).reshape(1024, hout)

    # Merged dueling-head weights.
    wh1h = jnp.concatenate([wa1[:, :256].T, wv1[:, :256].T], axis=1)   # (256, 512)
    wh1x = jnp.concatenate([wa1[:, 256:].T, wv1[:, 256:].T], axis=1)   # (64, 512)
    bh1 = jnp.concatenate([ba1, bv1])                                  # (512,)
    wh2 = jnp.zeros((512, n_actions + 1), F32)
    wh2 = wh2.at[:256, :n_actions].set(wa2.T)
    wh2 = wh2.at[256:, n_actions:].set(wv2.T)
    bh2 = jnp.concatenate([ba2, bv2])                                  # (A+1,)

    return {
        "w1": conv_pack(w1c), "b1": bias(b1c),
        "w2": conv_pack(w2c), "b2": bias(b2c),
        "w3": conv_pack(w3c), "b3": bias(b3c),
        "wm1": wm1_hwc.astype(BF16), "bm1": bias(bm1),
        "wm2": wm2.T.astype(BF16), "bm2": bias(bm2),
        "wh1h": wh1h.astype(BF16), "wh1x": wh1x.astype(BF16), "bh1": bias(bh1),
        "wh2": wh2.astype(BF16), "bh2": bias(bh2),
    }


# ---------------------------- pure-JAX reference -------------------------------

def _reference_forward(params, x, n_actions):
    dot = functools.partial(jnp.dot, precision=lax.Precision.HIGHEST)
    h = x
    for (w, bias), s in zip(params["conv"], (4, 2, 1)):
        h = lax.conv_general_dilated(
            h, w, window_strides=(s, s), padding="VALID",
            dimension_numbers=("NCHW", "OIHW", "NCHW"),
            precision=lax.Precision.HIGHEST)
        h = jnp.maximum(h + bias[None, :, None, None], 0.0)
    b = x.shape[0]
    h = h.reshape(b, -1)
    (w1, b1), (w2, b2) = params["med"]
    h = dot(jnp.maximum(dot(h, w1.T) + b1, 0.0), w2.T) + b2
    h = jnp.concatenate([h, x[:, -1, 0, :]], axis=1)
    (wa1, ba1), (wa2, ba2) = params["a"]
    (wv1, bv1), (wv2, bv2) = params["v"]
    ya = dot(jnp.maximum(dot(h, wa1.T) + ba1, 0.0), wa2.T) + ba2
    ys = dot(jnp.maximum(dot(h, wv1.T) + bv1, 0.0), wv2.T) + bv2
    mean = jnp.sum(ya, axis=1, keepdims=True) / n_actions
    return (ya - mean) + ys


if __name__ == "__main__":
    n_actions = 6
    key = jax.random.PRNGKey(0)
    kx, kp = jax.random.split(key)

    x = jax.random.normal(kx, (2, 4, 64, 64), F32)
    params = init_params(kp, n_actions)           # PyTorch-layout params
    packed = pack_params(params)                  # one-time kernel-layout repack

    fwd = jax.jit(functools.partial(dueling_dqn_med_forward, n_actions=n_actions))
    q = jax.block_until_ready(fwd(packed, x))
    assert q.shape == (2, n_actions) and q.dtype == F32

    q_ref = _reference_forward(params, x, n_actions)
    # bf16 MXU operands (f32 accumulation) vs a full-f32 reference.
    assert jnp.allclose(q, q_ref, atol=5e-2, rtol=5e-2), (q, q_ref)

    print("KERNEL_OK")
</pallas_src>

<mosaic_0001>
module attributes {stable_mosaic.version = 11 : i64} {
  func.func @_fused_kernel(%arg0: memref<450x256xbf16, #tpu.memory_space<vmem>>, %arg1: memref<2x64xbf16, #tpu.memory_space<vmem>>, %arg2: memref<256x32xbf16, #tpu.memory_space<vmem>>, %arg3: memref<1x32xf32, #tpu.memory_space<vmem>>, %arg4: memref<512x64xbf16, #tpu.memory_space<vmem>>, %arg5: memref<1x64xf32, #tpu.memory_space<vmem>>, %arg6: memref<576x64xbf16, #tpu.memory_space<vmem>>, %arg7: memref<1x64xf32, #tpu.memory_space<vmem>>, %arg8: memref<1024x512xbf16, #tpu.memory_space<vmem>>, %arg9: memref<1x512xf32, #tpu.memory_space<vmem>>, %arg10: memref<512x256xbf16, #tpu.memory_space<vmem>>, %arg11: memref<1x256xf32, #tpu.memory_space<vmem>>, %arg12: memref<256x512xbf16, #tpu.memory_space<vmem>>, %arg13: memref<64x512xbf16, #tpu.memory_space<vmem>>, %arg14: memref<1x512xf32, #tpu.memory_space<vmem>>, %arg15: memref<512x7xbf16, #tpu.memory_space<vmem>>, %arg16: memref<1x7xf32, #tpu.memory_space<vmem>>, %arg17: memref<2x6xf32, #tpu.memory_space<vmem>>, %arg18: memref<450x32xf32, #tpu.memory_space<vmem>>, %arg19: memref<72x512xf32, #tpu.memory_space<vmem>>, %arg20: memref<32x576xf32, #tpu.memory_space<vmem>>, %arg21: memref<2x1024xf32, #tpu.memory_space<vmem>>) attributes {dimension_semantics = [], scalar_prefetch = 0 : i64, scratch_operands = 4 : i64, tpu.core_type = #tpu.core_type<tc>} {
    %c0 = arith.constant 0 : index
    %c0_0 = arith.constant 0 : index
    %0 = vector.load %arg0[%c0, %c0_0] : memref<450x256xbf16, #tpu.memory_space<vmem>>, vector<450x256xbf16>
    %c0_1 = arith.constant 0 : index
    %c0_2 = arith.constant 0 : index
    %1 = vector.load %arg2[%c0_1, %c0_2] : memref<256x32xbf16, #tpu.memory_space<vmem>>, vector<256x32xbf16>
    %cst = arith.constant dense<0.000000e+00> : vector<450x32xf32>
    %2 = tpu.matmul %0, %1, %cst {dimension_numbers = #tpu.dot_dimension_numbers<[1], [0], [0], [1], [0, 0, 1, 1], [], []>} : vector<450x256xbf16>, vector<256x32xbf16>, vector<450x32xf32> -> vector<450x32xf32>
    %c0_3 = arith.constant 0 : index
    %c0_4 = arith.constant 0 : index
    %3 = vector.load %arg3[%c0_3, %c0_4] : memref<1x32xf32, #tpu.memory_space<vmem>>, vector<1x32xf32>
    %4 = vector.broadcast %3 : vector<1x32xf32> to vector<450x32xf32>
    %5 = arith.addf %2, %4 : vector<450x32xf32>
    %cst_5 = arith.constant 0.000000e+00 : f32
    %6 = vector.broadcast %cst_5 : f32 to vector<450x32xf32>
    %7 = arith.maximumf %5, %6 : vector<450x32xf32>
    %c0_6 = arith.constant 0 : index
    %c0_7 = arith.constant 0 : index
    %8 = vector.load %arg18[%c0_6, %c0_7] : memref<450x32xf32, #tpu.memory_space<vmem>>, vector<450x32xf32>
    tpu.vector_store %arg18[%c0_6, %c0_7], %7 {strides = array<i32>} : memref<450x32xf32, #tpu.memory_space<vmem>>, vector<450x32xf32>,
    %c0_8 = arith.constant 0 : index
    %c0_9 = arith.constant 0 : index
    %9 = vector.load %arg18[%c0_8, %c0_9] : memref<450x32xf32, #tpu.memory_space<vmem>>, vector<12x32xf32>
    %c0_10 = arith.constant 0 : index
    %c0_11 = arith.constant 0 : index
    %10 = vector.load %arg19[%c0_10, %c0_11] : memref<72x512xf32, #tpu.memory_space<vmem>>, vector<12x32xf32>
    tpu.vector_store %arg19[%c0_10, %c0_11], %9 {strides = array<i32>} : memref<72x512xf32, #tpu.memory_space<vmem>>, vector<12x32xf32>,
    %c16 = arith.constant 16 : index
    %c0_12 = arith.constant 0 : index
    %11 = vector.load %arg18[%c16, %c0_12] : memref<450x32xf32, #tpu.memory_space<vmem>>, vector<12x32xf32>
    %c0_13 = arith.constant 0 : index
    %c32 = arith.constant 32 : index
    %12 = vector.load %arg19[%c0_13, %c32] : memref<72x512xf32, #tpu.memory_space<vmem>>, vector<12x32xf32>
    tpu.vector_store %arg19[%c0_13, %c32], %11 {strides = array<i32>} : memref<72x512xf32, #tpu.memory_space<vmem>>, vector<12x32xf32>,
    %c2 = arith.constant 2 : index
    %c0_14 = arith.constant 0 : index
    %13 = vector.load %arg18[%c2, %c0_14] : memref<450x32xf32, #tpu.memory_space<vmem>>, vector<12x32xf32>
    %c0_15 = arith.constant 0 : index
    %c64 = arith.constant 64 : index
    %14 = vector.load %arg19[%c0_15, %c64] : memref<72x512xf32, #tpu.memory_space<vmem>>, vector<12x32xf32>
    tpu.vector_store %arg19[%c0_15, %c64], %13 {strides = array<i32>} : memref<72x512xf32, #tpu.memory_space<vmem>>, vector<12x32xf32>,
    %c18 = arith.constant 18 : index
    %c0_16 = arith.constant 0 : index
    %15 = vector.load %arg18[%c18, %c0_16] : memref<450x32xf32, #tpu.memory_space<vmem>>, vector<12x32xf32>
    %c0_17 = arith.constant 0 : index
    %c96 = arith.constant 96 : index
    %16 = vector.load %arg19[%c0_17, %c96] : memref<72x512xf32, #tpu.memory_space<vmem>>, vector<12x32xf32>
    tpu.vector_store %arg19[%c0_17, %c96], %15 {strides = array<i32>} : memref<72x512xf32, #tpu.memory_space<vmem>>, vector<12x32xf32>,
    %c30 = arith.constant 30 : index
    %c0_18 = arith.constant 0 : index
    %17 = vector.load %arg18[%c30, %c0_18] : memref<450x32xf32, #tpu.memory_space<vmem>>, vector<12x32xf32>
    %c0_19 = arith.constant 0 : index
    %c128 = arith.constant 128 : index
    %18 = vector.load %arg19[%c0_19, %c128] : memref<72x512xf32, #tpu.memory_space<vmem>>, vector<12x32xf32>
    tpu.vector_store %arg19[%c0_19, %c128], %17 {strides = array<i32>} : memref<72x512xf32, #tpu.memory_space<vmem>>, vector<12x32xf32>,
    %c46 = arith.constant 46 : index
    %c0_20 = arith.constant 0 : index
    %19 = vector.load %arg18[%c46, %c0_20] : memref<450x32xf32, #tpu.memory_space<vmem>>, vector<12x32xf32>
    %c0_21 = arith.constant 0 : index
    %c160 = arith.constant 160 : index
    %20 = vector.load %arg19[%c0_21, %c160] : memref<72x512xf32, #tpu.memory_space<vmem>>, vector<12x32xf32>
    tpu.vector_store %arg19[%c0_21, %c160], %19 {strides = array<i32>} : memref<72x512xf32, #tpu.memory_space<vmem>>, vector<12x32xf32>,
    %c32_22 = arith.constant 32 : index
    %c0_23 = arith.constant 0 : index
    %21 = vector.load %arg18[%c32_22, %c0_23] : memref<450x32xf32, #tpu.memory_space<vmem>>, vector<12x32xf32>
    %c0_24 = arith.constant 0 : index
    %c192 = arith.constant 192 : index
    %22 = vector.load %arg19[%c0_24, %c192] : memref<72x512xf32, #tpu.memory_space<vmem>>, vector<12x32xf32>
    tpu.vector_store %arg19[%c0_24, %c192], %21 {strides = array<i32>} : memref<72x512xf32, #tpu.memory_space<vmem>>, vector<12x32xf32>,
    %c48 = arith.constant 48 : index
    %c0_25 = arith.constant 0 : index
    %23 = vector.load %arg18[%c48, %c0_25] : memref<450x32xf32, #tpu.memory_space<vmem>>, vector<12x32xf32>
    %c0_26 = arith.constant 0 : index
    %c224 = arith.constant 224 : index
    %24 = vector.load %arg19[%c0_26, %c224] : memref<72x512xf32, #tpu.memory_space<vmem>>, vector<12x32xf32>
    tpu.vector_store %arg19[%c0_26, %c224], %23 {strides = array<i32>} : memref<72x512xf32, #tpu.memory_space<vmem>>, vector<12x32xf32>,
    %c60 = arith.constant 60 : index
    %c0_27 = arith.constant 0 : index
    %25 = vector.load %arg18[%c60, %c0_27] : memref<450x32xf32, #tpu.memory_space<vmem>>, vector<12x32xf32>
    %c0_28 = arith.constant 0 : index
    %c256 = arith.constant 256 : index
    %26 = vector.load %arg19[%c0_28, %c256] : memref<72x512xf32, #tpu.memory_space<vmem>>, vector<12x32xf32>
    tpu.vector_store %arg19[%c0_28, %c256], %25 {strides = array<i32>} : memref<72x512xf32, #tpu.memory_space<vmem>>, vector<12x32xf32>,
    %c76 = arith.constant 76 : index
    %c0_29 = arith.constant 0 : index
    %27 = vector.load %arg18[%c76, %c0_29] : memref<450x32xf32, #tpu.memory_space<vmem>>, vector<12x32xf32>
    %c0_30 = arith.constant 0 : index
    %c288 = arith.constant 288 : index
    %28 = vector.load %arg19[%c0_30, %c288] : memref<72x512xf32, #tpu.memory_space<vmem>>, vector<12x32xf32>
    tpu.vector_store %arg19[%c0_30, %c288], %27 {strides = array<i32>} : memref<72x512xf32, #tpu.memory_space<vmem>>, vector<12x32xf32>,
    %c62 = arith.constant 62 : index
    %c0_31 = arith.constant 0 : index
    %29 = vector.load %arg18[%c62, %c0_31] : memref<450x32xf32, #tpu.memory_space<vmem>>, vector<12x32xf32>
    %c0_32 = arith.constant 0 : index
    %c320 = arith.constant 320 : index
    %30 = vector.load %arg19[%c0_32, %c320] : memref<72x512xf32, #tpu.memory_space<vmem>>, vector<12x32xf32>
    tpu.vector_store %arg19[%c0_32, %c320], %29 {strides = array<i32>} : memref<72x512xf32, #tpu.memory_space<vmem>>, vector<12x32xf32>,
    %c78 = arith.constant 78 : index
    %c0_33 = arith.constant 0 : index
    %31 = vector.load %arg18[%c78, %c0_33] : memref<450x32xf32, #tpu.memory_space<vmem>>, vector<12x32xf32>
    %c0_34 = arith.constant 0 : index
    %c352 = arith.constant 352 : index
    %32 = vector.load %arg19[%c0_34, %c352] : memref<72x512xf32, #tpu.memory_space<vmem>>, vector<12x32xf32>
    tpu.vector_store %arg19[%c0_34, %c352], %31 {strides = array<i32>} : memref<72x512xf32, #tpu.memory_space<vmem>>, vector<12x32xf32>,
    %c90 = arith.constant 90 : index
    %c0_35 = arith.constant 0 : index
    %33 = vector.load %arg18[%c90, %c0_35] : memref<450x32xf32, #tpu.memory_space<vmem>>, vector<12x32xf32>
    %c0_36 = arith.constant 0 : index
    %c384 = arith.constant 384 : index
    %34 = vector.load %arg19[%c0_36, %c384] : memref<72x512xf32, #tpu.memory_space<vmem>>, vector<12x32xf32>
    tpu.vector_store %arg19[%c0_36, %c384], %33 {strides = array<i32>} : memref<72x512xf32, #tpu.memory_space<vmem>>, vector<12x32xf32>,
    %c106 = arith.constant 106 : index
    %c0_37 = arith.constant 0 : index
    %35 = vector.load %arg18[%c106, %c0_37] : memref<450x32xf32, #tpu.memory_space<vmem>>, vector<12x32xf32>
    %c0_38 = arith.constant 0 : index
    %c416 = arith.constant 416 : index
    %36 = vector.load %arg19[%c0_38, %c416] : memref<72x512xf32, #tpu.memory_space<vmem>>, vector<12x32xf32>
    tpu.vector_store %arg19[%c0_38, %c416], %35 {strides = array<i32>} : memref<72x512xf32, #tpu.memory_space<vmem>>, vector<12x32xf32>,
    %c92 = arith.constant 92 : index
    %c0_39 = arith.constant 0 : index
    %37 = vector.load %arg18[%c92, %c0_39] : memref<450x32xf32, #tpu.memory_space<vmem>>, vector<12x32xf32>
    %c0_40 = arith.constant 0 : index
    %c448 = arith.constant 448 : index
    %38 = vector.load %arg19[%c0_40, %c448] : memref<72x512xf32, #tpu.memory_space<vmem>>, vector<12x32xf32>
    tpu.vector_store %arg19[%c0_40, %c448], %37 {strides = array<i32>} : memref<72x512xf32, #tpu.memory_space<vmem>>, vector<12x32xf32>,
    %c108 = arith.constant 108 : index
    %c0_41 = arith.constant 0 : index
    %39 = vector.load %arg18[%c108, %c0_41] : memref<450x32xf32, #tpu.memory_space<vmem>>, vector<12x32xf32>
    %c0_42 = arith.constant 0 : index
    %c480 = arith.constant 480 : index
    %40 = vector.load %arg19[%c0_42, %c480] : memref<72x512xf32, #tpu.memory_space<vmem>>, vector<12x32xf32>
    tpu.vector_store %arg19[%c0_42, %c480], %39 {strides = array<i32>} : memref<72x512xf32, #tpu.memory_space<vmem>>, vector<12x32xf32>,
    %c60_43 = arith.constant 60 : index
    %c0_44 = arith.constant 0 : index
    %41 = vector.load %arg18[%c60_43, %c0_44] : memref<450x32xf32, #tpu.memory_space<vmem>>, vector<12x32xf32>
    %c12 = arith.constant 12 : index
    %c0_45 = arith.constant 0 : index
    %42 = vector.load %arg19[%c12, %c0_45] : memref<72x512xf32, #tpu.memory_space<vmem>>, vector<12x32xf32>
    tpu.vector_store %arg19[%c12, %c0_45], %41 {strides = array<i32>} : memref<72x512xf32, #tpu.memory_space<vmem>>, vector<12x32xf32>,
    %c76_46 = arith.constant 76 : index
    %c0_47 = arith.constant 0 : index
    %43 = vector.load %arg18[%c76_46, %c0_47] : memref<450x32xf32, #tpu.memory_space<vmem>>, vector<12x32xf32>
    %c12_48 = arith.constant 12 : index
    %c32_49 = arith.constant 32 : index
    %44 = vector.load %arg19[%c12_48, %c32_49] : memref<72x512xf32, #tpu.memory_space<vmem>>, vector<12x32xf32>
    tpu.vector_store %arg19[%c12_48, %c32_49], %43 {strides = array<i32>} : memref<72x512xf32, #tpu.memory_space<vmem>>, vector<12x32xf32>,
    %c62_50 = arith.constant 62 : index
    %c0_51 = arith.constant 0 : index
    %45 = vector.load %arg18[%c62_50, %c0_51] : memref<450x32xf32, #tpu.memory_space<vmem>>, vector<12x32xf32>
    %c12_52 = arith.constant 12 : index
    %c64_53 = arith.constant 64 : index
    %46 = vector.load %arg19[%c12_52, %c64_53] : memref<72x512xf32, #tpu.memory_space<vmem>>, vector<12x32xf32>
    tpu.vector_store %arg19[%c12_52, %c64_53], %45 {strides = array<i32>} : memref<72x512xf32, #tpu.memory_space<vmem>>, vector<12x32xf32>,
    %c78_54 = arith.constant 78 : index
    %c0_55 = arith.constant 0 : index
    %47 = vector.load %arg18[%c78_54, %c0_55] : memref<450x32xf32, #tpu.memory_space<vmem>>, vector<12x32xf32>
    %c12_56 = arith.constant 12 : index
    %c96_57 = arith.constant 96 : index
    %48 = vector.load %arg19[%c12_56, %c96_57] : memref<72x512xf32, #tpu.memory_space<vmem>>, vector<12x32xf32>
    tpu.vector_store %arg19[%c12_56, %c96_57], %47 {strides = array<i32>} : memref<72x512xf32, #tpu.memory_space<vmem>>, vector<12x32xf32>,
    %c90_58 = arith.constant 90 : index
    %c0_59 = arith.constant 0 : index
    %49 = vector.load %arg18[%c90_58, %c0_59] : memref<450x32xf32, #tpu.memory_space<vmem>>, vector<12x32xf32>
    %c12_60 = arith.constant 12 : index
    %c128_61 = arith.constant 128 : index
    %50 = vector.load %arg19[%c12_60, %c128_61] : memref<72x512xf32, #tpu.memory_space<vmem>>, vector<12x32xf32>
    tpu.vector_store %arg19[%c12_60, %c128_61], %49 {strides = array<i32>} : memref<72x512xf32, #tpu.memory_space<vmem>>, vector<12x32xf32>,
    %c106_62 = arith.constant 106 : index
    %c0_63 = arith.constant 0 : index
    %51 = vector.load %arg18[%c106_62, %c0_63] : memref<450x32xf32, #tpu.memory_space<vmem>>, vector<12x32xf32>
    %c12_64 = arith.constant 12 : index
    %c160_65 = arith.constant 160 : index
    %52 = vector.load %arg19[%c12_64, %c160_65] : memref<72x512xf32, #tpu.memory_space<vmem>>, vector<12x32xf32>
    tpu.vector_store %arg19[%c12_64, %c160_65], %51 {strides = array<i32>} : memref<72x512xf32, #tpu.memory_space<vmem>>, vector<12x32xf32>,
    %c92_66 = arith.constant 92 : index
    %c0_67 = arith.constant 0 : index
    %53 = vector.load %arg18[%c92_66, %c0_67] : memref<450x32xf32, #tpu.memory_space<vmem>>, vector<12x32xf32>
    %c12_68 = arith.constant 12 : index
    %c192_69 = arith.constant 192 : index
    %54 = vector.load %arg19[%c12_68, %c192_69] : memref<72x512xf32, #tpu.memory_space<vmem>>, vector<12x32xf32>
    tpu.vector_store %arg19[%c12_68, %c192_69], %53 {strides = array<i32>} : memref<72x512xf32, #tpu.memory_space<vmem>>, vector<12x32xf32>,
    %c108_70 = arith.constant 108 : index
    %c0_71 = arith.constant 0 : index
    %55 = vector.load %arg18[%c108_70, %c0_71] : memref<450x32xf32, #tpu.memory_space<vmem>>, vector<12x32xf32>
    %c12_72 = arith.constant 12 : index
    %c224_73 = arith.constant 224 : index
    %56 = vector.load %arg19[%c12_72, %c224_73] : memref<72x512xf32, #tpu.memory_space<vmem>>, vector<12x32xf32>
    tpu.vector_store %arg19[%c12_72, %c224_73], %55 {strides = array<i32>} : memref<72x512xf32, #tpu.memory_space<vmem>>, vector<12x32xf32>,
    %c120 = arith.constant 120 : index
    %c0_74 = arith.constant 0 : index
    %57 = vector.load %arg18[%c120, %c0_74] : memref<450x32xf32, #tpu.memory_space<vmem>>, vector<12x32xf32>
    %c12_75 = arith.constant 12 : index
    %c256_76 = arith.constant 256 : index
    %58 = vector.load %arg19[%c12_75, %c256_76] : memref<72x512xf32, #tpu.memory_space<vmem>>, vector<12x32xf32>
    tpu.vector_store %arg19[%c12_75, %c256_76], %57 {strides = array<i32>} : memref<72x512xf32, #tpu.memory_space<vmem>>, vector<12x32xf32>,
    %c136 = arith.constant 136 : index
    %c0_77 = arith.constant 0 : index
    %59 = vector.load %arg18[%c136, %c0_77] : memref<450x32xf32, #tpu.memory_space<vmem>>, vector<12x32xf32>
    %c12_78 = arith.constant 12 : index
    %c288_79 = arith.constant 288 : index
    %60 = vector.load %arg19[%c12_78, %c288_79] : memref<72x512xf32, #tpu.memory_space<vmem>>, vector<12x32xf32>
    tpu.vector_store %arg19[%c12_78, %c288_79], %59 {strides = array<i32>} : memref<72x512xf32, #tpu.memory_space<vmem>>, vector<12x32xf32>,
    %c122 = arith.constant 122 : index
    %c0_80 = arith.constant 0 : index
    %61 = vector.load %arg18[%c122, %c0_80] : memref<450x32xf32, #tpu.memory_space<vmem>>, vector<12x32xf32>
    %c12_81 = arith.constant 12 : index
    %c320_82 = arith.constant 320 : index
    %62 = vector.load %arg19[%c12_81, %c320_82] : memref<72x512xf32, #tpu.memory_space<vmem>>, vector<12x32xf32>
    tpu.vector_store %arg19[%c12_81, %c320_82], %61 {strides = array<i32>} : memref<72x512xf32, #tpu.memory_space<vmem>>, vector<12x32xf32>,
    %c138 = arith.constant 138 : index
    %c0_83 = arith.constant 0 : index
    %63 = vector.load %arg18[%c138, %c0_83] : memref<450x32xf32, #tpu.memory_space<vmem>>, vector<12x32xf32>
    %c12_84 = arith.constant 12 : index
    %c352_85 = arith.constant 352 : index
    %64 = vector.load %arg19[%c12_84, %c352_85] : memref<72x512xf32, #tpu.memory_space<vmem>>, vector<12x32xf32>
    tpu.vector_store %arg19[%c12_84, %c352_85], %63 {strides = array<i32>} : memref<72x512xf32, #tpu.memory_space<vmem>>, vector<12x32xf32>,
    %c150 = arith.constant 150 : index
    %c0_86 = arith.constant 0 : index
    %65 = vector.load %arg18[%c150, %c0_86] : memref<450x32xf32, #tpu.memory_space<vmem>>, vector<12x32xf32>
    %c12_87 = arith.constant 12 : index
    %c384_88 = arith.constant 384 : index
    %66 = vector.load %arg19[%c12_87, %c384_88] : memref<72x512xf32, #tpu.memory_space<vmem>>, vector<12x32xf32>
    tpu.vector_store %arg19[%c12_87, %c384_88], %65 {strides = array<i32>} : memref<72x512xf32, #tpu.memory_space<vmem>>, vector<12x32xf32>,
    %c166 = arith.constant 166 : index
    %c0_89 = arith.constant 0 : index
    %67 = vector.load %arg18[%c166, %c0_89] : memref<450x32xf32, #tpu.memory_space<vmem>>, vector<12x32xf32>
    %c12_90 = arith.constant 12 : index
    %c416_91 = arith.constant 416 : index
    %68 = vector.load %arg19[%c12_90, %c416_91] : memref<72x512xf32, #tpu.memory_space<vmem>>, vector<12x32xf32>
    tpu.vector_store %arg19[%c12_90, %c416_91], %67 {strides = array<i32>} : memref<72x512xf32, #tpu.memory_space<vmem>>, vector<12x32xf32>,
    %c152 = arith.constant 152 : index
    %c0_92 = arith.constant 0 : index
    %69 = vector.load %arg18[%c152, %c0_92] : memref<450x32xf32, #tpu.memory_space<vmem>>, vector<12x32xf32>
    %c12_93 = arith.constant 12 : index
    %c448_94 = arith.constant 448 : index
    %70 = vector.load %arg19[%c12_93, %c448_94] : memref<72x512xf32, #tpu.memory_space<vmem>>, vector<12x32xf32>
    tpu.vector_store %arg19[%c12_93, %c448_94], %69 {strides = array<i32>} : memref<72x512xf32, #tpu.memory_space<vmem>>, vector<12x32xf32>,
    %c168 = arith.constant 168 : index
    %c0_95 = arith.constant 0 : index
    %71 = vector.load %arg18[%c168, %c0_95] : memref<450x32xf32, #tpu.memory_space<vmem>>, vector<12x32xf32>
    %c12_96 = arith.constant 12 : index
    %c480_97 = arith.constant 480 : index
    %72 = vector.load %arg19[%c12_96, %c480_97] : memref<72x512xf32, #tpu.memory_space<vmem>>, vector<12x32xf32>
    tpu.vector_store %arg19[%c12_96, %c480_97], %71 {strides = array<i32>} : memref<72x512xf32, #tpu.memory_space<vmem>>, vector<12x32xf32>,
    %c120_98 = arith.constant 120 : index
    %c0_99 = arith.constant 0 : index
    %73 = vector.load %arg18[%c120_98, %c0_99] : memref<450x32xf32, #tpu.memory_space<vmem>>, vector<12x32xf32>
    %c24 = arith.constant 24 : index
    %c0_100 = arith.constant 0 : index
    %74 = vector.load %arg19[%c24, %c0_100] : memref<72x512xf32, #tpu.memory_space<vmem>>, vector<12x32xf32>
    tpu.vector_store %arg19[%c24, %c0_100], %73 {strides = array<i32>} : memref<72x512xf32, #tpu.memory_space<vmem>>, vector<12x32xf32>,
    %c136_101 = arith.constant 136 : index
    %c0_102 = arith.constant 0 : index
    %75 = vector.load %arg18[%c136_101, %c0_102] : memref<450x32xf32, #tpu.memory_space<vmem>>, vector<12x32xf32>
    %c24_103 = arith.constant 24 : index
    %c32_104 = arith.constant 32 : index
    %76 = vector.load %arg19[%c24_103, %c32_104] : memref<72x512xf32, #tpu.memory_space<vmem>>, vector<12x32xf32>
    tpu.vector_store %arg19[%c24_103, %c32_104], %75 {strides = array<i32>} : memref<72x512xf32, #tpu.memory_space<vmem>>, vector<12x32xf32>,
    %c122_105 = arith.constant 122 : index
    %c0_106 = arith.constant 0 : index
    %77 = vector.load %arg18[%c122_105, %c0_106] : memref<450x32xf32, #tpu.memory_space<vmem>>, vector<12x32xf32>
    %c24_107 = arith.constant 24 : index
    %c64_108 = arith.constant 64 : index
    %78 = vector.load %arg19[%c24_107, %c64_108] : memref<72x512xf32, #tpu.memory_space<vmem>>, vector<12x32xf32>
    tpu.vector_store %arg19[%c24_107, %c64_108], %77 {strides = array<i32>} : memref<72x512xf32, #tpu.memory_space<vmem>>, vector<12x32xf32>,
    %c138_109 = arith.constant 138 : index
    %c0_110 = arith.constant 0 : index
    %79 = vector.load %arg18[%c138_109, %c0_110] : memref<450x32xf32, #tpu.memory_space<vmem>>, vector<12x32xf32>
    %c24_111 = arith.constant 24 : index
    %c96_112 = arith.constant 96 : index
    %80 = vector.load %arg19[%c24_111, %c96_112] : memref<72x512xf32, #tpu.memory_space<vmem>>, vector<12x32xf32>
    tpu.vector_store %arg19[%c24_111, %c96_112], %79 {strides = array<i32>} : memref<72x512xf32, #tpu.memory_space<vmem>>, vector<12x32xf32>,
    %c150_113 = arith.constant 150 : index
    %c0_114 = arith.constant 0 : index
    %81 = vector.load %arg18[%c150_113, %c0_114] : memref<450x32xf32, #tpu.memory_space<vmem>>, vector<12x32xf32>
    %c24_115 = arith.constant 24 : index
    %c128_116 = arith.constant 128 : index
    %82 = vector.load %arg19[%c24_115, %c128_116] : memref<72x512xf32, #tpu.memory_space<vmem>>, vector<12x32xf32>
    tpu.vector_store %arg19[%c24_115, %c128_116], %81 {strides = array<i32>} : memref<72x512xf32, #tpu.memory_space<vmem>>, vector<12x32xf32>,
    %c166_117 = arith.constant 166 : index
    %c0_118 = arith.constant 0 : index
    %83 = vector.load %arg18[%c166_117, %c0_118] : memref<450x32xf32, #tpu.memory_space<vmem>>, vector<12x32xf32>
    %c24_119 = arith.constant 24 : index
    %c160_120 = arith.constant 160 : index
    %84 = vector.load %arg19[%c24_119, %c160_120] : memref<72x512xf32, #tpu.memory_space<vmem>>, vector<12x32xf32>
    tpu.vector_store %arg19[%c24_119, %c160_120], %83 {strides = array<i32>} : memref<72x512xf32, #tpu.memory_space<vmem>>, vector<12x32xf32>,
    %c152_121 = arith.constant 152 : index
    %c0_122 = arith.constant 0 : index
    %85 = vector.load %arg18[%c152_121, %c0_122] : memref<450x32xf32, #tpu.memory_space<vmem>>, vector<12x32xf32>
    %c24_123 = arith.constant 24 : index
    %c192_124 = arith.constant 192 : index
    %86 = vector.load %arg19[%c24_123, %c192_124] : memref<72x512xf32, #tpu.memory_space<vmem>>, vector<12x32xf32>
    tpu.vector_store %arg19[%c24_123, %c192_124], %85 {strides = array<i32>} : memref<72x512xf32, #tpu.memory_space<vmem>>, vector<12x32xf32>,
    %c168_125 = arith.constant 168 : index
    %c0_126 = arith.constant 0 : index
    %87 = vector.load %arg18[%c168_125, %c0_126] : memref<450x32xf32, #tpu.memory_space<vmem>>, vector<12x32xf32>
    %c24_127 = arith.constant 24 : index
    %c224_128 = arith.constant 224 : index
    %88 = vector.load %arg19[%c24_127, %c224_128] : memref<72x512xf32, #tpu.memory_space<vmem>>, vector<12x32xf32>
    tpu.vector_store %arg19[%c24_127, %c224_128], %87 {strides = array<i32>} : memref<72x512xf32, #tpu.memory_space<vmem>>, vector<12x32xf32>,
    %c180 = arith.constant 180 : index
    %c0_129 = arith.constant 0 : index
    %89 = vector.load %arg18[%c180, %c0_129] : memref<450x32xf32, #tpu.memory_space<vmem>>, vector<12x32xf32>
    %c24_130 = arith.constant 24 : index
    %c256_131 = arith.constant 256 : index
    %90 = vector.load %arg19[%c24_130, %c256_131] : memref<72x512xf32, #tpu.memory_space<vmem>>, vector<12x32xf32>
    tpu.vector_store %arg19[%c24_130, %c256_131], %89 {strides = array<i32>} : memref<72x512xf32, #tpu.memory_space<vmem>>, vector<12x32xf32>,
    %c196 = arith.constant 196 : index
    %c0_132 = arith.constant 0 : index
    %91 = vector.load %arg18[%c196, %c0_132] : memref<450x32xf32, #tpu.memory_space<vmem>>, vector<12x32xf32>
    %c24_133 = arith.constant 24 : index
    %c288_134 = arith.constant 288 : index
    %92 = vector.load %arg19[%c24_133, %c288_134] : memref<72x512xf32, #tpu.memory_space<vmem>>, vector<12x32xf32>
    tpu.vector_store %arg19[%c24_133, %c288_134], %91 {strides = array<i32>} : memref<72x512xf32, #tpu.memory_space<vmem>>, vector<12x32xf32>,
    %c182 = arith.constant 182 : index
    %c0_135 = arith.constant 0 : index
    %93 = vector.load %arg18[%c182, %c0_135] : memref<450x32xf32, #tpu.memory_space<vmem>>, vector<12x32xf32>
    %c24_136 = arith.constant 24 : index
    %c320_137 = arith.constant 320 : index
    %94 = vector.load %arg19[%c24_136, %c320_137] : memref<72x512xf32, #tpu.memory_space<vmem>>, vector<12x32xf32>
    tpu.vector_store %arg19[%c24_136, %c320_137], %93 {strides = array<i32>} : memref<72x512xf32, #tpu.memory_space<vmem>>, vector<12x32xf32>,
    %c198 = arith.constant 198 : index
    %c0_138 = arith.constant 0 : index
    %95 = vector.load %arg18[%c198, %c0_138] : memref<450x32xf32, #tpu.memory_space<vmem>>, vector<12x32xf32>
    %c24_139 = arith.constant 24 : index
    %c352_140 = arith.constant 352 : index
    %96 = vector.load %arg19[%c24_139, %c352_140] : memref<72x512xf32, #tpu.memory_space<vmem>>, vector<12x32xf32>
    tpu.vector_store %arg19[%c24_139, %c352_140], %95 {strides = array<i32>} : memref<72x512xf32, #tpu.memory_space<vmem>>, vector<12x32xf32>,
    %c210 = arith.constant 210 : index
    %c0_141 = arith.constant 0 : index
    %97 = vector.load %arg18[%c210, %c0_141] : memref<450x32xf32, #tpu.memory_space<vmem>>, vector<12x32xf32>
    %c24_142 = arith.constant 24 : index
    %c384_143 = arith.constant 384 : index
    %98 = vector.load %arg19[%c24_142, %c384_143] : memref<72x512xf32, #tpu.memory_space<vmem>>, vector<12x32xf32>
    tpu.vector_store %arg19[%c24_142, %c384_143], %97 {strides = array<i32>} : memref<72x512xf32, #tpu.memory_space<vmem>>, vector<12x32xf32>,
    %c226 = arith.constant 226 : index
    %c0_144 = arith.constant 0 : index
    %99 = vector.load %arg18[%c226, %c0_144] : memref<450x32xf32, #tpu.memory_space<vmem>>, vector<12x32xf32>
    %c24_145 = arith.constant 24 : index
    %c416_146 = arith.constant 416 : index
    %100 = vector.load %arg19[%c24_145, %c416_146] : memref<72x512xf32, #tpu.memory_space<vmem>>, vector<12x32xf32>
    tpu.vector_store %arg19[%c24_145, %c416_146], %99 {strides = array<i32>} : memref<72x512xf32, #tpu.memory_space<vmem>>, vector<12x32xf32>,
    %c212 = arith.constant 212 : index
    %c0_147 = arith.constant 0 : index
    %101 = vector.load %arg18[%c212, %c0_147] : memref<450x32xf32, #tpu.memory_space<vmem>>, vector<12x32xf32>
    %c24_148 = arith.constant 24 : index
    %c448_149 = arith.constant 448 : index
    %102 = vector.load %arg19[%c24_148, %c448_149] : memref<72x512xf32, #tpu.memory_space<vmem>>, vector<12x32xf32>
    tpu.vector_store %arg19[%c24_148, %c448_149], %101 {strides = array<i32>} : memref<72x512xf32, #tpu.memory_space<vmem>>, vector<12x32xf32>,
    %c228 = arith.constant 228 : index
    %c0_150 = arith.constant 0 : index
    %103 = vector.load %arg18[%c228, %c0_150] : memref<450x32xf32, #tpu.memory_space<vmem>>, vector<12x32xf32>
    %c24_151 = arith.constant 24 : index
    %c480_152 = arith.constant 480 : index
    %104 = vector.load %arg19[%c24_151, %c480_152] : memref<72x512xf32, #tpu.memory_space<vmem>>, vector<12x32xf32>
    tpu.vector_store %arg19[%c24_151, %c480_152], %103 {strides = array<i32>} : memref<72x512xf32, #tpu.memory_space<vmem>>, vector<12x32xf32>,
    %c180_153 = arith.constant 180 : index
    %c0_154 = arith.constant 0 : index
    %105 = vector.load %arg18[%c180_153, %c0_154] : memref<450x32xf32, #tpu.memory_space<vmem>>, vector<12x32xf32>
    %c36 = arith.constant 36 : index
    %c0_155 = arith.constant 0 : index
    %106 = vector.load %arg19[%c36, %c0_155] : memref<72x512xf32, #tpu.memory_space<vmem>>, vector<12x32xf32>
    tpu.vector_store %arg19[%c36, %c0_155], %105 {strides = array<i32>} : memref<72x512xf32, #tpu.memory_space<vmem>>, vector<12x32xf32>,
    %c196_156 = arith.constant 196 : index
    %c0_157 = arith.constant 0 : index
    %107 = vector.load %arg18[%c196_156, %c0_157] : memref<450x32xf32, #tpu.memory_space<vmem>>, vector<12x32xf32>
    %c36_158 = arith.constant 36 : index
    %c32_159 = arith.constant 32 : index
    %108 = vector.load %arg19[%c36_158, %c32_159] : memref<72x512xf32, #tpu.memory_space<vmem>>, vector<12x32xf32>
    tpu.vector_store %arg19[%c36_158, %c32_159], %107 {strides = array<i32>} : memref<72x512xf32, #tpu.memory_space<vmem>>, vector<12x32xf32>,
    %c182_160 = arith.constant 182 : index
    %c0_161 = arith.constant 0 : index
    %109 = vector.load %arg18[%c182_160, %c0_161] : memref<450x32xf32, #tpu.memory_space<vmem>>, vector<12x32xf32>
    %c36_162 = arith.constant 36 : index
    %c64_163 = arith.constant 64 : index
    %110 = vector.load %arg19[%c36_162, %c64_163] : memref<72x512xf32, #tpu.memory_space<vmem>>, vector<12x32xf32>
    tpu.vector_store %arg19[%c36_162, %c64_163], %109 {strides = array<i32>} : memref<72x512xf32, #tpu.memory_space<vmem>>, vector<12x32xf32>,
    %c198_164 = arith.constant 198 : index
    %c0_165 = arith.constant 0 : index
    %111 = vector.load %arg18[%c198_164, %c0_165] : memref<450x32xf32, #tpu.memory_space<vmem>>, vector<12x32xf32>
    %c36_166 = arith.constant 36 : index
    %c96_167 = arith.constant 96 : index
    %112 = vector.load %arg19[%c36_166, %c96_167] : memref<72x512xf32, #tpu.memory_space<vmem>>, vector<12x32xf32>
    tpu.vector_store %arg19[%c36_166, %c96_167], %111 {strides = array<i32>} : memref<72x512xf32, #tpu.memory_space<vmem>>, vector<12x32xf32>,
    %c210_168 = arith.constant 210 : index
    %c0_169 = arith.constant 0 : index
    %113 = vector.load %arg18[%c210_168, %c0_169] : memref<450x32xf32, #tpu.memory_space<vmem>>, vector<12x32xf32>
    %c36_170 = arith.constant 36 : index
    %c128_171 = arith.constant 128 : index
    %114 = vector.load %arg19[%c36_170, %c128_171] : memref<72x512xf32, #tpu.memory_space<vmem>>, vector<12x32xf32>
    tpu.vector_store %arg19[%c36_170, %c128_171], %113 {strides = array<i32>} : memref<72x512xf32, #tpu.memory_space<vmem>>, vector<12x32xf32>,
    %c226_172 = arith.constant 226 : index
    %c0_173 = arith.constant 0 : index
    %115 = vector.load %arg18[%c226_172, %c0_173] : memref<450x32xf32, #tpu.memory_space<vmem>>, vector<12x32xf32>
    %c36_174 = arith.constant 36 : index
    %c160_175 = arith.constant 160 : index
    %116 = vector.load %arg19[%c36_174, %c160_175] : memref<72x512xf32, #tpu.memory_space<vmem>>, vector<12x32xf32>
    tpu.vector_store %arg19[%c36_174, %c160_175], %115 {strides = array<i32>} : memref<72x512xf32, #tpu.memory_space<vmem>>, vector<12x32xf32>,
    %c212_176 = arith.constant 212 : index
    %c0_177 = arith.constant 0 : index
    %117 = vector.load %arg18[%c212_176, %c0_177] : memref<450x32xf32, #tpu.memory_space<vmem>>, vector<12x32xf32>
    %c36_178 = arith.constant 36 : index
    %c192_179 = arith.constant 192 : index
    %118 = vector.load %arg19[%c36_178, %c192_179] : memref<72x512xf32, #tpu.memory_space<vmem>>, vector<12x32xf32>
    tpu.vector_store %arg19[%c36_178, %c192_179], %117 {strides = array<i32>} : memref<72x512xf32, #tpu.memory_space<vmem>>, vector<12x32xf32>,
    %c228_180 = arith.constant 228 : index
    %c0_181 = arith.constant 0 : index
    %119 = vector.load %arg18[%c228_180, %c0_181] : memref<450x32xf32, #tpu.memory_space<vmem>>, vector<12x32xf32>
    %c36_182 = arith.constant 36 : index
    %c224_183 = arith.constant 224 : index
    %120 = vector.load %arg19[%c36_182, %c224_183] : memref<72x512xf32, #tpu.memory_space<vmem>>, vector<12x32xf32>
    tpu.vector_store %arg19[%c36_182, %c224_183], %119 {strides = array<i32>} : memref<72x512xf32, #tpu.memory_space<vmem>>, vector<12x32xf32>,
    %c240 = arith.constant 240 : index
    %c0_184 = arith.constant 0 : index
    %121 = vector.load %arg18[%c240, %c0_184] : memref<450x32xf32, #tpu.memory_space<vmem>>, vector<12x32xf32>
    %c36_185 = arith.constant 36 : index
    %c256_186 = arith.constant 256 : index
    %122 = vector.load %arg19[%c36_185, %c256_186] : memref<72x512xf32, #tpu.memory_space<vmem>>, vector<12x32xf32>
    tpu.vector_store %arg19[%c36_185, %c256_186], %121 {strides = array<i32>} : memref<72x512xf32, #tpu.memory_space<vmem>>, vector<12x32xf32>,
    %c256_187 = arith.constant 256 : index
    %c0_188 = arith.constant 0 : index
    %123 = vector.load %arg18[%c256_187, %c0_188] : memref<450x32xf32, #tpu.memory_space<vmem>>, vector<12x32xf32>
    %c36_189 = arith.constant 36 : index
    %c288_190 = arith.constant 288 : index
    %124 = vector.load %arg19[%c36_189, %c288_190] : memref<72x512xf32, #tpu.memory_space<vmem>>, vector<12x32xf32>
    tpu.vector_store %arg19[%c36_189, %c288_190], %123 {strides = array<i32>} : memref<72x512xf32, #tpu.memory_space<vmem>>, vector<12x32xf32>,
    %c242 = arith.constant 242 : index
    %c0_191 = arith.constant 0 : index
    %125 = vector.load %arg18[%c242, %c0_191] : memref<450x32xf32, #tpu.memory_space<vmem>>, vector<12x32xf32>
    %c36_192 = arith.constant 36 : index
    %c320_193 = arith.constant 320 : index
    %126 = vector.load %arg19[%c36_192, %c320_193] : memref<72x512xf32, #tpu.memory_space<vmem>>, vector<12x32xf32>
    tpu.vector_store %arg19[%c36_192, %c320_193], %125 {strides = array<i32>} : memref<72x512xf32, #tpu.memory_space<vmem>>, vector<12x32xf32>,
    %c258 = arith.constant 258 : index
    %c0_194 = arith.constant 0 : index
    %127 = vector.load %arg18[%c258, %c0_194] : memref<450x32xf32, #tpu.memory_space<vmem>>, vector<12x32xf32>
    %c36_195 = arith.constant 36 : index
    %c352_196 = arith.constant 352 : index
    %128 = vector.load %arg19[%c36_195, %c352_196] : memref<72x512xf32, #tpu.memory_space<vmem>>, vector<12x32xf32>
    tpu.vector_store %arg19[%c36_195, %c352_196], %127 {strides = array<i32>} : memref<72x512xf32, #tpu.memory_space<vmem>>, vector<12x32xf32>,
    %c270 = arith.constant 270 : index
    %c0_197 = arith.constant 0 : index
    %129 = vector.load %arg18[%c270, %c0_197] : memref<450x32xf32, #tpu.memory_space<vmem>>, vector<12x32xf32>
    %c36_198 = arith.constant 36 : index
    %c384_199 = arith.constant 384 : index
    %130 = vector.load %arg19[%c36_198, %c384_199] : memref<72x512xf32, #tpu.memory_space<vmem>>, vector<12x32xf32>
    tpu.vector_store %arg19[%c36_198, %c384_199], %129 {strides = array<i32>} : memref<72x512xf32, #tpu.memory_space<vmem>>, vector<12x32xf32>,
    %c286 = arith.constant 286 : index
    %c0_200 = arith.constant 0 : index
    %131 = vector.load %arg18[%c286, %c0_200] : memref<450x32xf32, #tpu.memory_space<vmem>>, vector<12x32xf32>
    %c36_201 = arith.constant 36 : index
    %c416_202 = arith.constant 416 : index
    %132 = vector.load %arg19[%c36_201, %c416_202] : memref<72x512xf32, #tpu.memory_space<vmem>>, vector<12x32xf32>
    tpu.vector_store %arg19[%c36_201, %c416_202], %131 {strides = array<i32>} : memref<72x512xf32, #tpu.memory_space<vmem>>, vector<12x32xf32>,
    %c272 = arith.constant 272 : index
    %c0_203 = arith.constant 0 : index
    %133 = vector.load %arg18[%c272, %c0_203] : memref<450x32xf32, #tpu.memory_space<vmem>>, vector<12x32xf32>
    %c36_204 = arith.constant 36 : index
    %c448_205 = arith.constant 448 : index
    %134 = vector.load %arg19[%c36_204, %c448_205] : memref<72x512xf32, #tpu.memory_space<vmem>>, vector<12x32xf32>
    tpu.vector_store %arg19[%c36_204, %c448_205], %133 {strides = array<i32>} : memref<72x512xf32, #tpu.memory_space<vmem>>, vector<12x32xf32>,
    %c288_206 = arith.constant 288 : index
    %c0_207 = arith.constant 0 : index
    %135 = vector.load %arg18[%c288_206, %c0_207] : memref<450x32xf32, #tpu.memory_space<vmem>>, vector<12x32xf32>
    %c36_208 = arith.constant 36 : index
    %c480_209 = arith.constant 480 : index
    %136 = vector.load %arg19[%c36_208, %c480_209] : memref<72x512xf32, #tpu.memory_space<vmem>>, vector<12x32xf32>
    tpu.vector_store %arg19[%c36_208, %c480_209], %135 {strides = array<i32>} : memref<72x512xf32, #tpu.memory_space<vmem>>, vector<12x32xf32>,
    %c240_210 = arith.constant 240 : index
    %c0_211 = arith.constant 0 : index
    %137 = vector.load %arg18[%c240_210, %c0_211] : memref<450x32xf32, #tpu.memory_space<vmem>>, vector<12x32xf32>
    %c48_212 = arith.constant 48 : index
    %c0_213 = arith.constant 0 : index
    %138 = vector.load %arg19[%c48_212, %c0_213] : memref<72x512xf32, #tpu.memory_space<vmem>>, vector<12x32xf32>
    tpu.vector_store %arg19[%c48_212, %c0_213], %137 {strides = array<i32>} : memref<72x512xf32, #tpu.memory_space<vmem>>, vector<12x32xf32>,
    %c256_214 = arith.constant 256 : index
    %c0_215 = arith.constant 0 : index
    %139 = vector.load %arg18[%c256_214, %c0_215] : memref<450x32xf32, #tpu.memory_space<vmem>>, vector<12x32xf32>
    %c48_216 = arith.constant 48 : index
    %c32_217 = arith.constant 32 : index
    %140 = vector.load %arg19[%c48_216, %c32_217] : memref<72x512xf32, #tpu.memory_space<vmem>>, vector<12x32xf32>
    tpu.vector_store %arg19[%c48_216, %c32_217], %139 {strides = array<i32>} : memref<72x512xf32, #tpu.memory_space<vmem>>, vector<12x32xf32>,
    %c242_218 = arith.constant 242 : index
    %c0_219 = arith.constant 0 : index
    %141 = vector.load %arg18[%c242_218, %c0_219] : memref<450x32xf32, #tpu.memory_space<vmem>>, vector<12x32xf32>
    %c48_220 = arith.constant 48 : index
    %c64_221 = arith.constant 64 : index
    %142 = vector.load %arg19[%c48_220, %c64_221] : memref<72x512xf32, #tpu.memory_space<vmem>>, vector<12x32xf32>
    tpu.vector_store %arg19[%c48_220, %c64_221], %141 {strides = array<i32>} : memref<72x512xf32, #tpu.memory_space<vmem>>, vector<12x32xf32>,
    %c258_222 = arith.constant 258 : index
    %c0_223 = arith.constant 0 : index
    %143 = vector.load %arg18[%c258_222, %c0_223] : memref<450x32xf32, #tpu.memory_space<vmem>>, vector<12x32xf32>
    %c48_224 = arith.constant 48 : index
    %c96_225 = arith.constant 96 : index
    %144 = vector.load %arg19[%c48_224, %c96_225] : memref<72x512xf32, #tpu.memory_space<vmem>>, vector<12x32xf32>
    tpu.vector_store %arg19[%c48_224, %c96_225], %143 {strides = array<i32>} : memref<72x512xf32, #tpu.memory_space<vmem>>, vector<12x32xf32>,
    %c270_226 = arith.constant 270 : index
    %c0_227 = arith.constant 0 : index
    %145 = vector.load %arg18[%c270_226, %c0_227] : memref<450x32xf32, #tpu.memory_space<vmem>>, vector<12x32xf32>
    %c48_228 = arith.constant 48 : index
    %c128_229 = arith.constant 128 : index
    %146 = vector.load %arg19[%c48_228, %c128_229] : memref<72x512xf32, #tpu.memory_space<vmem>>, vector<12x32xf32>
    tpu.vector_store %arg19[%c48_228, %c128_229], %145 {strides = array<i32>} : memref<72x512xf32, #tpu.memory_space<vmem>>, vector<12x32xf32>,
    %c286_230 = arith.constant 286 : index
    %c0_231 = arith.constant 0 : index
    %147 = vector.load %arg18[%c286_230, %c0_231] : memref<450x32xf32, #tpu.memory_space<vmem>>, vector<12x32xf32>
    %c48_232 = arith.constant 48 : index
    %c160_233 = arith.constant 160 : index
    %148 = vector.load %arg19[%c48_232, %c160_233] : memref<72x512xf32, #tpu.memory_space<vmem>>, vector<12x32xf32>
    tpu.vector_store %arg19[%c48_232, %c160_233], %147 {strides = array<i32>} : memref<72x512xf32, #tpu.memory_space<vmem>>, vector<12x32xf32>,
    %c272_234 = arith.constant 272 : index
    %c0_235 = arith.constant 0 : index
    %149 = vector.load %arg18[%c272_234, %c0_235] : memref<450x32xf32, #tpu.memory_space<vmem>>, vector<12x32xf32>
    %c48_236 = arith.constant 48 : index
    %c192_237 = arith.constant 192 : index
    %150 = vector.load %arg19[%c48_236, %c192_237] : memref<72x512xf32, #tpu.memory_space<vmem>>, vector<12x32xf32>
    tpu.vector_store %arg19[%c48_236, %c192_237], %149 {strides = array<i32>} : memref<72x512xf32, #tpu.memory_space<vmem>>, vector<12x32xf32>,
    %c288_238 = arith.constant 288 : index
    %c0_239 = arith.constant 0 : index
    %151 = vector.load %arg18[%c288_238, %c0_239] : memref<450x32xf32, #tpu.memory_space<vmem>>, vector<12x32xf32>
    %c48_240 = arith.constant 48 : index
    %c224_241 = arith.constant 224 : index
    %152 = vector.load %arg19[%c48_240, %c224_241] : memref<72x512xf32, #tpu.memory_space<vmem>>, vector<12x32xf32>
    tpu.vector_store %arg19[%c48_240, %c224_241], %151 {strides = array<i32>} : memref<72x512xf32, #tpu.memory_space<vmem>>, vector<12x32xf32>,
    %c300 = arith.constant 300 : index
    %c0_242 = arith.constant 0 : index
    %153 = vector.load %arg18[%c300, %c0_242] : memref<450x32xf32, #tpu.memory_space<vmem>>, vector<12x32xf32>
    %c48_243 = arith.constant 48 : index
    %c256_244 = arith.constant 256 : index
    %154 = vector.load %arg19[%c48_243, %c256_244] : memref<72x512xf32, #tpu.memory_space<vmem>>, vector<12x32xf32>
    tpu.vector_store %arg19[%c48_243, %c256_244], %153 {strides = array<i32>} : memref<72x512xf32, #tpu.memory_space<vmem>>, vector<12x32xf32>,
    %c316 = arith.constant 316 : index
    %c0_245 = arith.constant 0 : index
    %155 = vector.load %arg18[%c316, %c0_245] : memref<450x32xf32, #tpu.memory_space<vmem>>, vector<12x32xf32>
    %c48_246 = arith.constant 48 : index
    %c288_247 = arith.constant 288 : index
    %156 = vector.load %arg19[%c48_246, %c288_247] : memref<72x512xf32, #tpu.memory_space<vmem>>, vector<12x32xf32>
    tpu.vector_store %arg19[%c48_246, %c288_247], %155 {strides = array<i32>} : memref<72x512xf32, #tpu.memory_space<vmem>>, vector<12x32xf32>,
    %c302 = arith.constant 302 : index
    %c0_248 = arith.constant 0 : index
    %157 = vector.load %arg18[%c302, %c0_248] : memref<450x32xf32, #tpu.memory_space<vmem>>, vector<12x32xf32>
    %c48_249 = arith.constant 48 : index
    %c320_250 = arith.constant 320 : index
    %158 = vector.load %arg19[%c48_249, %c320_250] : memref<72x512xf32, #tpu.memory_space<vmem>>, vector<12x32xf32>
    tpu.vector_store %arg19[%c48_249, %c320_250], %157 {strides = array<i32>} : memref<72x512xf32, #tpu.memory_space<vmem>>, vector<12x32xf32>,
    %c318 = arith.constant 318 : index
    %c0_251 = arith.constant 0 : index
    %159 = vector.load %arg18[%c318, %c0_251] : memref<450x32xf32, #tpu.memory_space<vmem>>, vector<12x32xf32>
    %c48_252 = arith.constant 48 : index
    %c352_253 = arith.constant 352 : index
    %160 = vector.load %arg19[%c48_252, %c352_253] : memref<72x512xf32, #tpu.memory_space<vmem>>, vector<12x32xf32>
    tpu.vector_store %arg19[%c48_252, %c352_253], %159 {strides = array<i32>} : memref<72x512xf32, #tpu.memory_space<vmem>>, vector<12x32xf32>,
    %c330 = arith.constant 330 : index
    %c0_254 = arith.constant 0 : index
    %161 = vector.load %arg18[%c330, %c0_254] : memref<450x32xf32, #tpu.memory_space<vmem>>, vector<12x32xf32>
    %c48_255 = arith.constant 48 : index
    %c384_256 = arith.constant 384 : index
    %162 = vector.load %arg19[%c48_255, %c384_256] : memref<72x512xf32, #tpu.memory_space<vmem>>, vector<12x32xf32>
    tpu.vector_store %arg19[%c48_255, %c384_256], %161 {strides = array<i32>} : memref<72x512xf32, #tpu.memory_space<vmem>>, vector<12x32xf32>,
    %c346 = arith.constant 346 : index
    %c0_257 = arith.constant 0 : index
    %163 = vector.load %arg18[%c346, %c0_257] : memref<450x32xf32, #tpu.memory_space<vmem>>, vector<12x32xf32>
    %c48_258 = arith.constant 48 : index
    %c416_259 = arith.constant 416 : index
    %164 = vector.load %arg19[%c48_258, %c416_259] : memref<72x512xf32, #tpu.memory_space<vmem>>, vector<12x32xf32>
    tpu.vector_store %arg19[%c48_258, %c416_259], %163 {strides = array<i32>} : memref<72x512xf32, #tpu.memory_space<vmem>>, vector<12x32xf32>,
    %c332 = arith.constant 332 : index
    %c0_260 = arith.constant 0 : index
    %165 = vector.load %arg18[%c332, %c0_260] : memref<450x32xf32, #tpu.memory_space<vmem>>, vector<12x32xf32>
    %c48_261 = arith.constant 48 : index
    %c448_262 = arith.constant 448 : index
    %166 = vector.load %arg19[%c48_261, %c448_262] : memref<72x512xf32, #tpu.memory_space<vmem>>, vector<12x32xf32>
    tpu.vector_store %arg19[%c48_261, %c448_262], %165 {strides = array<i32>} : memref<72x512xf32, #tpu.memory_space<vmem>>, vector<12x32xf32>,
    %c348 = arith.constant 348 : index
    %c0_263 = arith.constant 0 : index
    %167 = vector.load %arg18[%c348, %c0_263] : memref<450x32xf32, #tpu.memory_space<vmem>>, vector<12x32xf32>
    %c48_264 = arith.constant 48 : index
    %c480_265 = arith.constant 480 : index
    %168 = vector.load %arg19[%c48_264, %c480_265] : memref<72x512xf32, #tpu.memory_space<vmem>>, vector<12x32xf32>
    tpu.vector_store %arg19[%c48_264, %c480_265], %167 {strides = array<i32>} : memref<72x512xf32, #tpu.memory_space<vmem>>, vector<12x32xf32>,
    %c300_266 = arith.constant 300 : index
    %c0_267 = arith.constant 0 : index
    %169 = vector.load %arg18[%c300_266, %c0_267] : memref<450x32xf32, #tpu.memory_space<vmem>>, vector<12x32xf32>
    %c60_268 = arith.constant 60 : index
    %c0_269 = arith.constant 0 : index
    %170 = vector.load %arg19[%c60_268, %c0_269] : memref<72x512xf32, #tpu.memory_space<vmem>>, vector<12x32xf32>
    tpu.vector_store %arg19[%c60_268, %c0_269], %169 {strides = array<i32>} : memref<72x512xf32, #tpu.memory_space<vmem>>, vector<12x32xf32>,
    %c316_270 = arith.constant 316 : index
    %c0_271 = arith.constant 0 : index
    %171 = vector.load %arg18[%c316_270, %c0_271] : memref<450x32xf32, #tpu.memory_space<vmem>>, vector<12x32xf32>
    %c60_272 = arith.constant 60 : index
    %c32_273 = arith.constant 32 : index
    %172 = vector.load %arg19[%c60_272, %c32_273] : memref<72x512xf32, #tpu.memory_space<vmem>>, vector<12x32xf32>
    tpu.vector_store %arg19[%c60_272, %c32_273], %171 {strides = array<i32>} : memref<72x512xf32, #tpu.memory_space<vmem>>, vector<12x32xf32>,
    %c302_274 = arith.constant 302 : index
    %c0_275 = arith.constant 0 : index
    %173 = vector.load %arg18[%c302_274, %c0_275] : memref<450x32xf32, #tpu.memory_space<vmem>>, vector<12x32xf32>
    %c60_276 = arith.constant 60 : index
    %c64_277 = arith.constant 64 : index
    %174 = vector.load %arg19[%c60_276, %c64_277] : memref<72x512xf32, #tpu.memory_space<vmem>>, vector<12x32xf32>
    tpu.vector_store %arg19[%c60_276, %c64_277], %173 {strides = array<i32>} : memref<72x512xf32, #tpu.memory_space<vmem>>, vector<12x32xf32>,
    %c318_278 = arith.constant 318 : index
    %c0_279 = arith.constant 0 : index
    %175 = vector.load %arg18[%c318_278, %c0_279] : memref<450x32xf32, #tpu.memory_space<vmem>>, vector<12x32xf32>
    %c60_280 = arith.constant 60 : index
    %c96_281 = arith.constant 96 : index
    %176 = vector.load %arg19[%c60_280, %c96_281] : memref<72x512xf32, #tpu.memory_space<vmem>>, vector<12x32xf32>
    tpu.vector_store %arg19[%c60_280, %c96_281], %175 {strides = array<i32>} : memref<72x512xf32, #tpu.memory_space<vmem>>, vector<12x32xf32>,
    %c330_282 = arith.constant 330 : index
    %c0_283 = arith.constant 0 : index
    %177 = vector.load %arg18[%c330_282, %c0_283] : memref<450x32xf32, #tpu.memory_space<vmem>>, vector<12x32xf32>
    %c60_284 = arith.constant 60 : index
    %c128_285 = arith.constant 128 : index
    %178 = vector.load %arg19[%c60_284, %c128_285] : memref<72x512xf32, #tpu.memory_space<vmem>>, vector<12x32xf32>
    tpu.vector_store %arg19[%c60_284, %c128_285], %177 {strides = array<i32>} : memref<72x512xf32, #tpu.memory_space<vmem>>, vector<12x32xf32>,
    %c346_286 = arith.constant 346 : index
    %c0_287 = arith.constant 0 : index
    %179 = vector.load %arg18[%c346_286, %c0_287] : memref<450x32xf32, #tpu.memory_space<vmem>>, vector<12x32xf32>
    %c60_288 = arith.constant 60 : index
    %c160_289 = arith.constant 160 : index
    %180 = vector.load %arg19[%c60_288, %c160_289] : memref<72x512xf32, #tpu.memory_space<vmem>>, vector<12x32xf32>
    tpu.vector_store %arg19[%c60_288, %c160_289], %179 {strides = array<i32>} : memref<72x512xf32, #tpu.memory_space<vmem>>, vector<12x32xf32>,
    %c332_290 = arith.constant 332 : index
    %c0_291 = arith.constant 0 : index
    %181 = vector.load %arg18[%c332_290, %c0_291] : memref<450x32xf32, #tpu.memory_space<vmem>>, vector<12x32xf32>
    %c60_292 = arith.constant 60 : index
    %c192_293 = arith.constant 192 : index
    %182 = vector.load %arg19[%c60_292, %c192_293] : memref<72x512xf32, #tpu.memory_space<vmem>>, vector<12x32xf32>
    tpu.vector_store %arg19[%c60_292, %c192_293], %181 {strides = array<i32>} : memref<72x512xf32, #tpu.memory_space<vmem>>, vector<12x32xf32>,
    %c348_294 = arith.constant 348 : index
    %c0_295 = arith.constant 0 : index
    %183 = vector.load %arg18[%c348_294, %c0_295] : memref<450x32xf32, #tpu.memory_space<vmem>>, vector<12x32xf32>
    %c60_296 = arith.constant 60 : index
    %c224_297 = arith.constant 224 : index
    %184 = vector.load %arg19[%c60_296, %c224_297] : memref<72x512xf32, #tpu.memory_space<vmem>>, vector<12x32xf32>
    tpu.vector_store %arg19[%c60_296, %c224_297], %183 {strides = array<i32>} : memref<72x512xf32, #tpu.memory_space<vmem>>, vector<12x32xf32>,
    %c360 = arith.constant 360 : index
    %c0_298 = arith.constant 0 : index
    %185 = vector.load %arg18[%c360, %c0_298] : memref<450x32xf32, #tpu.memory_space<vmem>>, vector<12x32xf32>
    %c60_299 = arith.constant 60 : index
    %c256_300 = arith.constant 256 : index
    %186 = vector.load %arg19[%c60_299, %c256_300] : memref<72x512xf32, #tpu.memory_space<vmem>>, vector<12x32xf32>
    tpu.vector_store %arg19[%c60_299, %c256_300], %185 {strides = array<i32>} : memref<72x512xf32, #tpu.memory_space<vmem>>, vector<12x32xf32>,
    %c376 = arith.constant 376 : index
    %c0_301 = arith.constant 0 : index
    %187 = vector.load %arg18[%c376, %c0_301] : memref<450x32xf32, #tpu.memory_space<vmem>>, vector<12x32xf32>
    %c60_302 = arith.constant 60 : index
    %c288_303 = arith.constant 288 : index
    %188 = vector.load %arg19[%c60_302, %c288_303] : memref<72x512xf32, #tpu.memory_space<vmem>>, vector<12x32xf32>
    tpu.vector_store %arg19[%c60_302, %c288_303], %187 {strides = array<i32>} : memref<72x512xf32, #tpu.memory_space<vmem>>, vector<12x32xf32>,
    %c362 = arith.constant 362 : index
    %c0_304 = arith.constant 0 : index
    %189 = vector.load %arg18[%c362, %c0_304] : memref<450x32xf32, #tpu.memory_space<vmem>>, vector<12x32xf32>
    %c60_305 = arith.constant 60 : index
    %c320_306 = arith.constant 320 : index
    %190 = vector.load %arg19[%c60_305, %c320_306] : memref<72x512xf32, #tpu.memory_space<vmem>>, vector<12x32xf32>
    tpu.vector_store %arg19[%c60_305, %c320_306], %189 {strides = array<i32>} : memref<72x512xf32, #tpu.memory_space<vmem>>, vector<12x32xf32>,
    %c378 = arith.constant 378 : index
    %c0_307 = arith.constant 0 : index
    %191 = vector.load %arg18[%c378, %c0_307] : memref<450x32xf32, #tpu.memory_space<vmem>>, vector<12x32xf32>
    %c60_308 = arith.constant 60 : index
    %c352_309 = arith.constant 352 : index
    %192 = vector.load %arg19[%c60_308, %c352_309] : memref<72x512xf32, #tpu.memory_space<vmem>>, vector<12x32xf32>
    tpu.vector_store %arg19[%c60_308, %c352_309], %191 {strides = array<i32>} : memref<72x512xf32, #tpu.memory_space<vmem>>, vector<12x32xf32>,
    %c390 = arith.constant 390 : index
    %c0_310 = arith.constant 0 : index
    %193 = vector.load %arg18[%c390, %c0_310] : memref<450x32xf32, #tpu.memory_space<vmem>>, vector<12x32xf32>
    %c60_311 = arith.constant 60 : index
    %c384_312 = arith.constant 384 : index
    %194 = vector.load %arg19[%c60_311, %c384_312] : memref<72x512xf32, #tpu.memory_space<vmem>>, vector<12x32xf32>
    tpu.vector_store %arg19[%c60_311, %c384_312], %193 {strides = array<i32>} : memref<72x512xf32, #tpu.memory_space<vmem>>, vector<12x32xf32>,
    %c406 = arith.constant 406 : index
    %c0_313 = arith.constant 0 : index
    %195 = vector.load %arg18[%c406, %c0_313] : memref<450x32xf32, #tpu.memory_space<vmem>>, vector<12x32xf32>
    %c60_314 = arith.constant 60 : index
    %c416_315 = arith.constant 416 : index
    %196 = vector.load %arg19[%c60_314, %c416_315] : memref<72x512xf32, #tpu.memory_space<vmem>>, vector<12x32xf32>
    tpu.vector_store %arg19[%c60_314, %c416_315], %195 {strides = array<i32>} : memref<72x512xf32, #tpu.memory_space<vmem>>, vector<12x32xf32>,
    %c392 = arith.constant 392 : index
    %c0_316 = arith.constant 0 : index
    %197 = vector.load %arg18[%c392, %c0_316] : memref<450x32xf32, #tpu.memory_space<vmem>>, vector<12x32xf32>
    %c60_317 = arith.constant 60 : index
    %c448_318 = arith.constant 448 : index
    %198 = vector.load %arg19[%c60_317, %c448_318] : memref<72x512xf32, #tpu.memory_space<vmem>>, vector<12x32xf32>
    tpu.vector_store %arg19[%c60_317, %c448_318], %197 {strides = array<i32>} : memref<72x512xf32, #tpu.memory_space<vmem>>, vector<12x32xf32>,
    %c408 = arith.constant 408 : index
    %c0_319 = arith.constant 0 : index
    %199 = vector.load %arg18[%c408, %c0_319] : memref<450x32xf32, #tpu.memory_space<vmem>>, vector<12x32xf32>
    %c60_320 = arith.constant 60 : index
    %c480_321 = arith.constant 480 : index
    %200 = vector.load %arg19[%c60_320, %c480_321] : memref<72x512xf32, #tpu.memory_space<vmem>>, vector<12x32xf32>
    tpu.vector_store %arg19[%c60_320, %c480_321], %199 {strides = array<i32>} : memref<72x512xf32, #tpu.memory_space<vmem>>, vector<12x32xf32>,
    %c0_322 = arith.constant 0 : index
    %c0_323 = arith.constant 0 : index
    %201 = vector.load %arg19[%c0_322, %c0_323] : memref<72x512xf32, #tpu.memory_space<vmem>>, vector<72x512xf32>
    %202 = arith.truncf %201 : vector<72x512xf32> to vector<72x512xbf16>
    %c0_324 = arith.constant 0 : index
    %c0_325 = arith.constant 0 : index
    %203 = vector.load %arg4[%c0_324, %c0_325] : memref<512x64xbf16, #tpu.memory_space<vmem>>, vector<512x64xbf16>
    %cst_326 = arith.constant dense<0.000000e+00> : vector<72x64xf32>
    %204 = tpu.matmul %202, %203, %cst_326 {dimension_numbers = #tpu.dot_dimension_numbers<[1], [0], [0], [1], [0, 0, 1, 1], [], []>} : vector<72x512xbf16>, vector<512x64xbf16>, vector<72x64xf32> -> vector<72x64xf32>
    %c0_327 = arith.constant 0 : index
    %c0_328 = arith.constant 0 : index
    %205 = vector.load %arg5[%c0_327, %c0_328] : memref<1x64xf32, #tpu.memory_space<vmem>>, vector<1x64xf32>
    %206 = vector.broadcast %205 : vector<1x64xf32> to vector<72x64xf32>
    %207 = arith.addf %204, %206 : vector<72x64xf32>
    %cst_329 = arith.constant 0.000000e+00 : f32
    %208 = vector.broadcast %cst_329 : f32 to vector<72x64xf32>
    %209 = arith.maximumf %207, %208 : vector<72x64xf32>
    %210 = vector.extract_strided_slice %209 {offsets = [0, 0], sizes = [8, 64], strides = [1, 1]} : vector<72x64xf32> to vector<8x64xf32>
    %c0_330 = arith.constant 0 : index
    %c0_331 = arith.constant 0 : index
    %211 = vector.load %arg20[%c0_330, %c0_331] : memref<32x576xf32, #tpu.memory_space<vmem>>, vector<8x64xf32>
    tpu.vector_store %arg20[%c0_330, %c0_331], %210 {strides = array<i32>} : memref<32x576xf32, #tpu.memory_space<vmem>>, vector<8x64xf32>,
    %212 = vector.extract_strided_slice %209 {offsets = [2, 0], sizes = [8, 64], strides = [1, 1]} : vector<72x64xf32> to vector<8x64xf32>
    %c0_332 = arith.constant 0 : index
    %c64_333 = arith.constant 64 : index
    %213 = vector.load %arg20[%c0_332, %c64_333] : memref<32x576xf32, #tpu.memory_space<vmem>>, vector<8x64xf32>
    tpu.vector_store %arg20[%c0_332, %c64_333], %212 {strides = array<i32>} : memref<32x576xf32, #tpu.memory_space<vmem>>, vector<8x64xf32>,
    %214 = vector.extract_strided_slice %209 {offsets = [4, 0], sizes = [8, 64], strides = [1, 1]} : vector<72x64xf32> to vector<8x64xf32>
    %c0_334 = arith.constant 0 : index
    %c128_335 = arith.constant 128 : index
    %215 = vector.load %arg20[%c0_334, %c128_335] : memref<32x576xf32, #tpu.memory_space<vmem>>, vector<8x64xf32>
    tpu.vector_store %arg20[%c0_334, %c128_335], %214 {strides = array<i32>} : memref<32x576xf32, #tpu.memory_space<vmem>>, vector<8x64xf32>,
    %216 = vector.extract_strided_slice %209 {offsets = [12, 0], sizes = [8, 64], strides = [1, 1]} : vector<72x64xf32> to vector<8x64xf32>
    %c0_336 = arith.constant 0 : index
    %c192_337 = arith.constant 192 : index
    %217 = vector.load %arg20[%c0_336, %c192_337] : memref<32x576xf32, #tpu.memory_space<vmem>>, vector<8x64xf32>
    tpu.vector_store %arg20[%c0_336, %c192_337], %216 {strides = array<i32>} : memref<32x576xf32, #tpu.memory_space<vmem>>, vector<8x64xf32>,
    %218 = vector.extract_strided_slice %209 {offsets = [14, 0], sizes = [8, 64], strides = [1, 1]} : vector<72x64xf32> to vector<8x64xf32>
    %c0_338 = arith.constant 0 : index
    %c256_339 = arith.constant 256 : index
    %219 = vector.load %arg20[%c0_338, %c256_339] : memref<32x576xf32, #tpu.memory_space<vmem>>, vector<8x64xf32>
    tpu.vector_store %arg20[%c0_338, %c256_339], %218 {strides = array<i32>} : memref<32x576xf32, #tpu.memory_space<vmem>>, vector<8x64xf32>,
    %220 = vector.extract_strided_slice %209 {offsets = [16, 0], sizes = [8, 64], strides = [1, 1]} : vector<72x64xf32> to vector<8x64xf32>
    %c0_340 = arith.constant 0 : index
    %c320_341 = arith.constant 320 : index
    %221 = vector.load %arg20[%c0_340, %c320_341] : memref<32x576xf32, #tpu.memory_space<vmem>>, vector<8x64xf32>
    tpu.vector_store %arg20[%c0_340, %c320_341], %220 {strides = array<i32>} : memref<32x576xf32, #tpu.memory_space<vmem>>, vector<8x64xf32>,
    %222 = vector.extract_strided_slice %209 {offsets = [24, 0], sizes = [8, 64], strides = [1, 1]} : vector<72x64xf32> to vector<8x64xf32>
    %c0_342 = arith.constant 0 : index
    %c384_343 = arith.constant 384 : index
    %223 = vector.load %arg20[%c0_342, %c384_343] : memref<32x576xf32, #tpu.memory_space<vmem>>, vector<8x64xf32>
    tpu.vector_store %arg20[%c0_342, %c384_343], %222 {strides = array<i32>} : memref<32x576xf32, #tpu.memory_space<vmem>>, vector<8x64xf32>,
    %224 = vector.extract_strided_slice %209 {offsets = [26, 0], sizes = [8, 64], strides = [1, 1]} : vector<72x64xf32> to vector<8x64xf32>
    %c0_344 = arith.constant 0 : index
    %c448_345 = arith.constant 448 : index
    %225 = vector.load %arg20[%c0_344, %c448_345] : memref<32x576xf32, #tpu.memory_space<vmem>>, vector<8x64xf32>
    tpu.vector_store %arg20[%c0_344, %c448_345], %224 {strides = array<i32>} : memref<32x576xf32, #tpu.memory_space<vmem>>, vector<8x64xf32>,
    %226 = vector.extract_strided_slice %209 {offsets = [28, 0], sizes = [8, 64], strides = [1, 1]} : vector<72x64xf32> to vector<8x64xf32>
    %c0_346 = arith.constant 0 : index
    %c512 = arith.constant 512 : index
    %227 = vector.load %arg20[%c0_346, %c512] : memref<32x576xf32, #tpu.memory_space<vmem>>, vector<8x64xf32>
    tpu.vector_store %arg20[%c0_346, %c512], %226 {strides = array<i32>} : memref<32x576xf32, #tpu.memory_space<vmem>>, vector<8x64xf32>,
    %228 = vector.extract_strided_slice %209 {offsets = [12, 0], sizes = [8, 64], strides = [1, 1]} : vector<72x64xf32> to vector<8x64xf32>
    %c8 = arith.constant 8 : index
    %c0_347 = arith.constant 0 : index
    %229 = vector.load %arg20[%c8, %c0_347] : memref<32x576xf32, #tpu.memory_space<vmem>>, vector<8x64xf32>
    tpu.vector_store %arg20[%c8, %c0_347], %228 {strides = array<i32>} : memref<32x576xf32, #tpu.memory_space<vmem>>, vector<8x64xf32>,
    %230 = vector.extract_strided_slice %209 {offsets = [14, 0], sizes = [8, 64], strides = [1, 1]} : vector<72x64xf32> to vector<8x64xf32>
    %c8_348 = arith.constant 8 : index
    %c64_349 = arith.constant 64 : index
    %231 = vector.load %arg20[%c8_348, %c64_349] : memref<32x576xf32, #tpu.memory_space<vmem>>, vector<8x64xf32>
    tpu.vector_store %arg20[%c8_348, %c64_349], %230 {strides = array<i32>} : memref<32x576xf32, #tpu.memory_space<vmem>>, vector<8x64xf32>,
    %232 = vector.extract_strided_slice %209 {offsets = [16, 0], sizes = [8, 64], strides = [1, 1]} : vector<72x64xf32> to vector<8x64xf32>
    %c8_350 = arith.constant 8 : index
    %c128_351 = arith.constant 128 : index
    %233 = vector.load %arg20[%c8_350, %c128_351] : memref<32x576xf32, #tpu.memory_space<vmem>>, vector<8x64xf32>
    tpu.vector_store %arg20[%c8_350, %c128_351], %232 {strides = array<i32>} : memref<32x576xf32, #tpu.memory_space<vmem>>, vector<8x64xf32>,
    %234 = vector.extract_strided_slice %209 {offsets = [24, 0], sizes = [8, 64], strides = [1, 1]} : vector<72x64xf32> to vector<8x64xf32>
    %c8_352 = arith.constant 8 : index
    %c192_353 = arith.constant 192 : index
    %235 = vector.load %arg20[%c8_352, %c192_353] : memref<32x576xf32, #tpu.memory_space<vmem>>, vector<8x64xf32>
    tpu.vector_store %arg20[%c8_352, %c192_353], %234 {strides = array<i32>} : memref<32x576xf32, #tpu.memory_space<vmem>>, vector<8x64xf32>,
    %236 = vector.extract_strided_slice %209 {offsets = [26, 0], sizes = [8, 64], strides = [1, 1]} : vector<72x64xf32> to vector<8x64xf32>
    %c8_354 = arith.constant 8 : index
    %c256_355 = arith.constant 256 : index
    %237 = vector.load %arg20[%c8_354, %c256_355] : memref<32x576xf32, #tpu.memory_space<vmem>>, vector<8x64xf32>
    tpu.vector_store %arg20[%c8_354, %c256_355], %236 {strides = array<i32>} : memref<32x576xf32, #tpu.memory_space<vmem>>, vector<8x64xf32>,
    %238 = vector.extract_strided_slice %209 {offsets = [28, 0], sizes = [8, 64], strides = [1, 1]} : vector<72x64xf32> to vector<8x64xf32>
    %c8_356 = arith.constant 8 : index
    %c320_357 = arith.constant 320 : index
    %239 = vector.load %arg20[%c8_356, %c320_357] : memref<32x576xf32, #tpu.memory_space<vmem>>, vector<8x64xf32>
    tpu.vector_store %arg20[%c8_356, %c320_357], %238 {strides = array<i32>} : memref<32x576xf32, #tpu.memory_space<vmem>>, vector<8x64xf32>,
    %240 = vector.extract_strided_slice %209 {offsets = [36, 0], sizes = [8, 64], strides = [1, 1]} : vector<72x64xf32> to vector<8x64xf32>
    %c8_358 = arith.constant 8 : index
    %c384_359 = arith.constant 384 : index
    %241 = vector.load %arg20[%c8_358, %c384_359] : memref<32x576xf32, #tpu.memory_space<vmem>>, vector<8x64xf32>
    tpu.vector_store %arg20[%c8_358, %c384_359], %240 {strides = array<i32>} : memref<32x576xf32, #tpu.memory_space<vmem>>, vector<8x64xf32>,
    %242 = vector.extract_strided_slice %209 {offsets = [38, 0], sizes = [8, 64], strides = [1, 1]} : vector<72x64xf32> to vector<8x64xf32>
    %c8_360 = arith.constant 8 : index
    %c448_361 = arith.constant 448 : index
    %243 = vector.load %arg20[%c8_360, %c448_361] : memref<32x576xf32, #tpu.memory_space<vmem>>, vector<8x64xf32>
    tpu.vector_store %arg20[%c8_360, %c448_361], %242 {strides = array<i32>} : memref<32x576xf32, #tpu.memory_space<vmem>>, vector<8x64xf32>,
    %244 = vector.extract_strided_slice %209 {offsets = [40, 0], sizes = [8, 64], strides = [1, 1]} : vector<72x64xf32> to vector<8x64xf32>
    %c8_362 = arith.constant 8 : index
    %c512_363 = arith.constant 512 : index
    %245 = vector.load %arg20[%c8_362, %c512_363] : memref<32x576xf32, #tpu.memory_space<vmem>>, vector<8x64xf32>
    tpu.vector_store %arg20[%c8_362, %c512_363], %244 {strides = array<i32>} : memref<32x576xf32, #tpu.memory_space<vmem>>, vector<8x64xf32>,
    %246 = vector.extract_strided_slice %209 {offsets = [24, 0], sizes = [8, 64], strides = [1, 1]} : vector<72x64xf32> to vector<8x64xf32>
    %c16_364 = arith.constant 16 : index
    %c0_365 = arith.constant 0 : index
    %247 = vector.load %arg20[%c16_364, %c0_365] : memref<32x576xf32, #tpu.memory_space<vmem>>, vector<8x64xf32>
    tpu.vector_store %arg20[%c16_364, %c0_365], %246 {strides = array<i32>} : memref<32x576xf32, #tpu.memory_space<vmem>>, vector<8x64xf32>,
    %248 = vector.extract_strided_slice %209 {offsets = [26, 0], sizes = [8, 64], strides = [1, 1]} : vector<72x64xf32> to vector<8x64xf32>
    %c16_366 = arith.constant 16 : index
    %c64_367 = arith.constant 64 : index
    %249 = vector.load %arg20[%c16_366, %c64_367] : memref<32x576xf32, #tpu.memory_space<vmem>>, vector<8x64xf32>
    tpu.vector_store %arg20[%c16_366, %c64_367], %248 {strides = array<i32>} : memref<32x576xf32, #tpu.memory_space<vmem>>, vector<8x64xf32>,
    %250 = vector.extract_strided_slice %209 {offsets = [28, 0], sizes = [8, 64], strides = [1, 1]} : vector<72x64xf32> to vector<8x64xf32>
    %c16_368 = arith.constant 16 : index
    %c128_369 = arith.constant 128 : index
    %251 = vector.load %arg20[%c16_368, %c128_369] : memref<32x576xf32, #tpu.memory_space<vmem>>, vector<8x64xf32>
    tpu.vector_store %arg20[%c16_368, %c128_369], %250 {strides = array<i32>} : memref<32x576xf32, #tpu.memory_space<vmem>>, vector<8x64xf32>,
    %252 = vector.extract_strided_slice %209 {offsets = [36, 0], sizes = [8, 64], strides = [1, 1]} : vector<72x64xf32> to vector<8x64xf32>
    %c16_370 = arith.constant 16 : index
    %c192_371 = arith.constant 192 : index
    %253 = vector.load %arg20[%c16_370, %c192_371] : memref<32x576xf32, #tpu.memory_space<vmem>>, vector<8x64xf32>
    tpu.vector_store %arg20[%c16_370, %c192_371], %252 {strides = array<i32>} : memref<32x576xf32, #tpu.memory_space<vmem>>, vector<8x64xf32>,
    %254 = vector.extract_strided_slice %209 {offsets = [38, 0], sizes = [8, 64], strides = [1, 1]} : vector<72x64xf32> to vector<8x64xf32>
    %c16_372 = arith.constant 16 : index
    %c256_373 = arith.constant 256 : index
    %255 = vector.load %arg20[%c16_372, %c256_373] : memref<32x576xf32, #tpu.memory_space<vmem>>, vector<8x64xf32>
    tpu.vector_store %arg20[%c16_372, %c256_373], %254 {strides = array<i32>} : memref<32x576xf32, #tpu.memory_space<vmem>>, vector<8x64xf32>,
    %256 = vector.extract_strided_slice %209 {offsets = [40, 0], sizes = [8, 64], strides = [1, 1]} : vector<72x64xf32> to vector<8x64xf32>
    %c16_374 = arith.constant 16 : index
    %c320_375 = arith.constant 320 : index
    %257 = vector.load %arg20[%c16_374, %c320_375] : memref<32x576xf32, #tpu.memory_space<vmem>>, vector<8x64xf32>
    tpu.vector_store %arg20[%c16_374, %c320_375], %256 {strides = array<i32>} : memref<32x576xf32, #tpu.memory_space<vmem>>, vector<8x64xf32>,
    %258 = vector.extract_strided_slice %209 {offsets = [48, 0], sizes = [8, 64], strides = [1, 1]} : vector<72x64xf32> to vector<8x64xf32>
    %c16_376 = arith.constant 16 : index
    %c384_377 = arith.constant 384 : index
    %259 = vector.load %arg20[%c16_376, %c384_377] : memref<32x576xf32, #tpu.memory_space<vmem>>, vector<8x64xf32>
    tpu.vector_store %arg20[%c16_376, %c384_377], %258 {strides = array<i32>} : memref<32x576xf32, #tpu.memory_space<vmem>>, vector<8x64xf32>,
    %260 = vector.extract_strided_slice %209 {offsets = [50, 0], sizes = [8, 64], strides = [1, 1]} : vector<72x64xf32> to vector<8x64xf32>
    %c16_378 = arith.constant 16 : index
    %c448_379 = arith.constant 448 : index
    %261 = vector.load %arg20[%c16_378, %c448_379] : memref<32x576xf32, #tpu.memory_space<vmem>>, vector<8x64xf32>
    tpu.vector_store %arg20[%c16_378, %c448_379], %260 {strides = array<i32>} : memref<32x576xf32, #tpu.memory_space<vmem>>, vector<8x64xf32>,
    %262 = vector.extract_strided_slice %209 {offsets = [52, 0], sizes = [8, 64], strides = [1, 1]} : vector<72x64xf32> to vector<8x64xf32>
    %c16_380 = arith.constant 16 : index
    %c512_381 = arith.constant 512 : index
    %263 = vector.load %arg20[%c16_380, %c512_381] : memref<32x576xf32, #tpu.memory_space<vmem>>, vector<8x64xf32>
    tpu.vector_store %arg20[%c16_380, %c512_381], %262 {strides = array<i32>} : memref<32x576xf32, #tpu.memory_space<vmem>>, vector<8x64xf32>,
    %264 = vector.extract_strided_slice %209 {offsets = [36, 0], sizes = [8, 64], strides = [1, 1]} : vector<72x64xf32> to vector<8x64xf32>
    %c24_382 = arith.constant 24 : index
    %c0_383 = arith.constant 0 : index
    %265 = vector.load %arg20[%c24_382, %c0_383] : memref<32x576xf32, #tpu.memory_space<vmem>>, vector<8x64xf32>
    tpu.vector_store %arg20[%c24_382, %c0_383], %264 {strides = array<i32>} : memref<32x576xf32, #tpu.memory_space<vmem>>, vector<8x64xf32>,
    %266 = vector.extract_strided_slice %209 {offsets = [38, 0], sizes = [8, 64], strides = [1, 1]} : vector<72x64xf32> to vector<8x64xf32>
    %c24_384 = arith.constant 24 : index
    %c64_385 = arith.constant 64 : index
    %267 = vector.load %arg20[%c24_384, %c64_385] : memref<32x576xf32, #tpu.memory_space<vmem>>, vector<8x64xf32>
    tpu.vector_store %arg20[%c24_384, %c64_385], %266 {strides = array<i32>} : memref<32x576xf32, #tpu.memory_space<vmem>>, vector<8x64xf32>,
    %268 = vector.extract_strided_slice %209 {offsets = [40, 0], sizes = [8, 64], strides = [1, 1]} : vector<72x64xf32> to vector<8x64xf32>
    %c24_386 = arith.constant 24 : index
    %c128_387 = arith.constant 128 : index
    %269 = vector.load %arg20[%c24_386, %c128_387] : memref<32x576xf32, #tpu.memory_space<vmem>>, vector<8x64xf32>
    tpu.vector_store %arg20[%c24_386, %c128_387], %268 {strides = array<i32>} : memref<32x576xf32, #tpu.memory_space<vmem>>, vector<8x64xf32>,
    %270 = vector.extract_strided_slice %209 {offsets = [48, 0], sizes = [8, 64], strides = [1, 1]} : vector<72x64xf32> to vector<8x64xf32>
    %c24_388 = arith.constant 24 : index
    %c192_389 = arith.constant 192 : index
    %271 = vector.load %arg20[%c24_388, %c192_389] : memref<32x576xf32, #tpu.memory_space<vmem>>, vector<8x64xf32>
    tpu.vector_store %arg20[%c24_388, %c192_389], %270 {strides = array<i32>} : memref<32x576xf32, #tpu.memory_space<vmem>>, vector<8x64xf32>,
    %272 = vector.extract_strided_slice %209 {offsets = [50, 0], sizes = [8, 64], strides = [1, 1]} : vector<72x64xf32> to vector<8x64xf32>
    %c24_390 = arith.constant 24 : index
    %c256_391 = arith.constant 256 : index
    %273 = vector.load %arg20[%c24_390, %c256_391] : memref<32x576xf32, #tpu.memory_space<vmem>>, vector<8x64xf32>
    tpu.vector_store %arg20[%c24_390, %c256_391], %272 {strides = array<i32>} : memref<32x576xf32, #tpu.memory_space<vmem>>, vector<8x64xf32>,
    %274 = vector.extract_strided_slice %209 {offsets = [52, 0], sizes = [8, 64], strides = [1, 1]} : vector<72x64xf32> to vector<8x64xf32>
    %c24_392 = arith.constant 24 : index
    %c320_393 = arith.constant 320 : index
    %275 = vector.load %arg20[%c24_392, %c320_393] : memref<32x576xf32, #tpu.memory_space<vmem>>, vector<8x64xf32>
    tpu.vector_store %arg20[%c24_392, %c320_393], %274 {strides = array<i32>} : memref<32x576xf32, #tpu.memory_space<vmem>>, vector<8x64xf32>,
    %276 = vector.extract_strided_slice %209 {offsets = [60, 0], sizes = [8, 64], strides = [1, 1]} : vector<72x64xf32> to vector<8x64xf32>
    %c24_394 = arith.constant 24 : index
    %c384_395 = arith.constant 384 : index
    %277 = vector.load %arg20[%c24_394, %c384_395] : memref<32x576xf32, #tpu.memory_space<vmem>>, vector<8x64xf32>
    tpu.vector_store %arg20[%c24_394, %c384_395], %276 {strides = array<i32>} : memref<32x576xf32, #tpu.memory_space<vmem>>, vector<8x64xf32>,
    %278 = vector.extract_strided_slice %209 {offsets = [62, 0], sizes = [8, 64], strides = [1, 1]} : vector<72x64xf32> to vector<8x64xf32>
    %c24_396 = arith.constant 24 : index
    %c448_397 = arith.constant 448 : index
    %279 = vector.load %arg20[%c24_396, %c448_397] : memref<32x576xf32, #tpu.memory_space<vmem>>, vector<8x64xf32>
    tpu.vector_store %arg20[%c24_396, %c448_397], %278 {strides = array<i32>} : memref<32x576xf32, #tpu.memory_space<vmem>>, vector<8x64xf32>,
    %280 = vector.extract_strided_slice %209 {offsets = [64, 0], sizes = [8, 64], strides = [1, 1]} : vector<72x64xf32> to vector<8x64xf32>
    %c24_398 = arith.constant 24 : index
    %c512_399 = arith.constant 512 : index
    %281 = vector.load %arg20[%c24_398, %c512_399] : memref<32x576xf32, #tpu.memory_space<vmem>>, vector<8x64xf32>
    tpu.vector_store %arg20[%c24_398, %c512_399], %280 {strides = array<i32>} : memref<32x576xf32, #tpu.memory_space<vmem>>, vector<8x64xf32>,
    %c0_400 = arith.constant 0 : index
    %c0_401 = arith.constant 0 : index
    %282 = vector.load %arg20[%c0_400, %c0_401] : memref<32x576xf32, #tpu.memory_space<vmem>>, vector<32x576xf32>
    %283 = arith.truncf %282 : vector<32x576xf32> to vector<32x576xbf16>
    %c0_402 = arith.constant 0 : index
    %c0_403 = arith.constant 0 : index
    %284 = vector.load %arg6[%c0_402, %c0_403] : memref<576x64xbf16, #tpu.memory_space<vmem>>, vector<576x64xbf16>
    %cst_404 = arith.constant dense<0.000000e+00> : vector<32x64xf32>
    %285 = tpu.matmul %283, %284, %cst_404 {dimension_numbers = #tpu.dot_dimension_numbers<[1], [0], [0], [1], [0, 0, 1, 1], [], []>} : vector<32x576xbf16>, vector<576x64xbf16>, vector<32x64xf32> -> vector<32x64xf32>
    %c0_405 = arith.constant 0 : index
    %c0_406 = arith.constant 0 : index
    %286 = vector.load %arg7[%c0_405, %c0_406] : memref<1x64xf32, #tpu.memory_space<vmem>>, vector<1x64xf32>
    %287 = vector.broadcast %286 : vector<1x64xf32> to vector<32x64xf32>
    %288 = arith.addf %285, %287 : vector<32x64xf32>
    %cst_407 = arith.constant 0.000000e+00 : f32
    %289 = vector.broadcast %cst_407 : f32 to vector<32x64xf32>
    %290 = arith.maximumf %288, %289 : vector<32x64xf32>
    %291 = vector.extract_strided_slice %290 {offsets = [0, 0], sizes = [2, 64], strides = [1, 1]} : vector<32x64xf32> to vector<2x64xf32>
    %c0_408 = arith.constant 0 : index
    %c0_409 = arith.constant 0 : index
    %292 = vector.load %arg21[%c0_408, %c0_409] : memref<2x1024xf32, #tpu.memory_space<vmem>>, vector<2x64xf32>
    tpu.vector_store %arg21[%c0_408, %c0_409], %291 {strides = array<i32>} : memref<2x1024xf32, #tpu.memory_space<vmem>>, vector<2x64xf32>,
    %293 = vector.extract_strided_slice %290 {offsets = [2, 0], sizes = [2, 64], strides = [1, 1]} : vector<32x64xf32> to vector<2x64xf32>
    %c0_410 = arith.constant 0 : index
    %c64_411 = arith.constant 64 : index
    %294 = vector.load %arg21[%c0_410, %c64_411] : memref<2x1024xf32, #tpu.memory_space<vmem>>, vector<2x64xf32>
    tpu.vector_store %arg21[%c0_410, %c64_411], %293 {strides = array<i32>} : memref<2x1024xf32, #tpu.memory_space<vmem>>, vector<2x64xf32>,
    %295 = vector.extract_strided_slice %290 {offsets = [4, 0], sizes = [2, 64], strides = [1, 1]} : vector<32x64xf32> to vector<2x64xf32>
    %c0_412 = arith.constant 0 : index
    %c128_413 = arith.constant 128 : index
    %296 = vector.load %arg21[%c0_412, %c128_413] : memref<2x1024xf32, #tpu.memory_space<vmem>>, vector<2x64xf32>
    tpu.vector_store %arg21[%c0_412, %c128_413], %295 {strides = array<i32>} : memref<2x1024xf32, #tpu.memory_space<vmem>>, vector<2x64xf32>,
    %297 = vector.extract_strided_slice %290 {offsets = [6, 0], sizes = [2, 64], strides = [1, 1]} : vector<32x64xf32> to vector<2x64xf32>
    %c0_414 = arith.constant 0 : index
    %c192_415 = arith.constant 192 : index
    %298 = vector.load %arg21[%c0_414, %c192_415] : memref<2x1024xf32, #tpu.memory_space<vmem>>, vector<2x64xf32>
    tpu.vector_store %arg21[%c0_414, %c192_415], %297 {strides = array<i32>} : memref<2x1024xf32, #tpu.memory_space<vmem>>, vector<2x64xf32>,
    %299 = vector.extract_strided_slice %290 {offsets = [8, 0], sizes = [2, 64], strides = [1, 1]} : vector<32x64xf32> to vector<2x64xf32>
    %c0_416 = arith.constant 0 : index
    %c256_417 = arith.constant 256 : index
    %300 = vector.load %arg21[%c0_416, %c256_417] : memref<2x1024xf32, #tpu.memory_space<vmem>>, vector<2x64xf32>
    tpu.vector_store %arg21[%c0_416, %c256_417], %299 {strides = array<i32>} : memref<2x1024xf32, #tpu.memory_space<vmem>>, vector<2x64xf32>,
    %301 = vector.extract_strided_slice %290 {offsets = [10, 0], sizes = [2, 64], strides = [1, 1]} : vector<32x64xf32> to vector<2x64xf32>
    %c0_418 = arith.constant 0 : index
    %c320_419 = arith.constant 320 : index
    %302 = vector.load %arg21[%c0_418, %c320_419] : memref<2x1024xf32, #tpu.memory_space<vmem>>, vector<2x64xf32>
    tpu.vector_store %arg21[%c0_418, %c320_419], %301 {strides = array<i32>} : memref<2x1024xf32, #tpu.memory_space<vmem>>, vector<2x64xf32>,
    %303 = vector.extract_strided_slice %290 {offsets = [12, 0], sizes = [2, 64], strides = [1, 1]} : vector<32x64xf32> to vector<2x64xf32>
    %c0_420 = arith.constant 0 : index
    %c384_421 = arith.constant 384 : index
    %304 = vector.load %arg21[%c0_420, %c384_421] : memref<2x1024xf32, #tpu.memory_space<vmem>>, vector<2x64xf32>
    tpu.vector_store %arg21[%c0_420, %c384_421], %303 {strides = array<i32>} : memref<2x1024xf32, #tpu.memory_space<vmem>>, vector<2x64xf32>,
    %305 = vector.extract_strided_slice %290 {offsets = [14, 0], sizes = [2, 64], strides = [1, 1]} : vector<32x64xf32> to vector<2x64xf32>
    %c0_422 = arith.constant 0 : index
    %c448_423 = arith.constant 448 : index
    %306 = vector.load %arg21[%c0_422, %c448_423] : memref<2x1024xf32, #tpu.memory_space<vmem>>, vector<2x64xf32>
    tpu.vector_store %arg21[%c0_422, %c448_423], %305 {strides = array<i32>} : memref<2x1024xf32, #tpu.memory_space<vmem>>, vector<2x64xf32>,
    %307 = vector.extract_strided_slice %290 {offsets = [16, 0], sizes = [2, 64], strides = [1, 1]} : vector<32x64xf32> to vector<2x64xf32>
    %c0_424 = arith.constant 0 : index
    %c512_425 = arith.constant 512 : index
    %308 = vector.load %arg21[%c0_424, %c512_425] : memref<2x1024xf32, #tpu.memory_space<vmem>>, vector<2x64xf32>
    tpu.vector_store %arg21[%c0_424, %c512_425], %307 {strides = array<i32>} : memref<2x1024xf32, #tpu.memory_space<vmem>>, vector<2x64xf32>,
    %309 = vector.extract_strided_slice %290 {offsets = [18, 0], sizes = [2, 64], strides = [1, 1]} : vector<32x64xf32> to vector<2x64xf32>
    %c0_426 = arith.constant 0 : index
    %c576 = arith.constant 576 : index
    %310 = vector.load %arg21[%c0_426, %c576] : memref<2x1024xf32, #tpu.memory_space<vmem>>, vector<2x64xf32>
    tpu.vector_store %arg21[%c0_426, %c576], %309 {strides = array<i32>} : memref<2x1024xf32, #tpu.memory_space<vmem>>, vector<2x64xf32>,
    %311 = vector.extract_strided_slice %290 {offsets = [20, 0], sizes = [2, 64], strides = [1, 1]} : vector<32x64xf32> to vector<2x64xf32>
    %c0_427 = arith.constant 0 : index
    %c640 = arith.constant 640 : index
    %312 = vector.load %arg21[%c0_427, %c640] : memref<2x1024xf32, #tpu.memory_space<vmem>>, vector<2x64xf32>
    tpu.vector_store %arg21[%c0_427, %c640], %311 {strides = array<i32>} : memref<2x1024xf32, #tpu.memory_space<vmem>>, vector<2x64xf32>,
    %313 = vector.extract_strided_slice %290 {offsets = [22, 0], sizes = [2, 64], strides = [1, 1]} : vector<32x64xf32> to vector<2x64xf32>
    %c0_428 = arith.constant 0 : index
    %c704 = arith.constant 704 : index
    %314 = vector.load %arg21[%c0_428, %c704] : memref<2x1024xf32, #tpu.memory_space<vmem>>, vector<2x64xf32>
    tpu.vector_store %arg21[%c0_428, %c704], %313 {strides = array<i32>} : memref<2x1024xf32, #tpu.memory_space<vmem>>, vector<2x64xf32>,
    %315 = vector.extract_strided_slice %290 {offsets = [24, 0], sizes = [2, 64], strides = [1, 1]} : vector<32x64xf32> to vector<2x64xf32>
    %c0_429 = arith.constant 0 : index
    %c768 = arith.constant 768 : index
    %316 = vector.load %arg21[%c0_429, %c768] : memref<2x1024xf32, #tpu.memory_space<vmem>>, vector<2x64xf32>
    tpu.vector_store %arg21[%c0_429, %c768], %315 {strides = array<i32>} : memref<2x1024xf32, #tpu.memory_space<vmem>>, vector<2x64xf32>,
    %317 = vector.extract_strided_slice %290 {offsets = [26, 0], sizes = [2, 64], strides = [1, 1]} : vector<32x64xf32> to vector<2x64xf32>
    %c0_430 = arith.constant 0 : index
    %c832 = arith.constant 832 : index
    %318 = vector.load %arg21[%c0_430, %c832] : memref<2x1024xf32, #tpu.memory_space<vmem>>, vector<2x64xf32>
    tpu.vector_store %arg21[%c0_430, %c832], %317 {strides = array<i32>} : memref<2x1024xf32, #tpu.memory_space<vmem>>, vector<2x64xf32>,
    %319 = vector.extract_strided_slice %290 {offsets = [28, 0], sizes = [2, 64], strides = [1, 1]} : vector<32x64xf32> to vector<2x64xf32>
    %c0_431 = arith.constant 0 : index
    %c896 = arith.constant 896 : index
    %320 = vector.load %arg21[%c0_431, %c896] : memref<2x1024xf32, #tpu.memory_space<vmem>>, vector<2x64xf32>
    tpu.vector_store %arg21[%c0_431, %c896], %319 {strides = array<i32>} : memref<2x1024xf32, #tpu.memory_space<vmem>>, vector<2x64xf32>,
    %321 = vector.extract_strided_slice %290 {offsets = [30, 0], sizes = [2, 64], strides = [1, 1]} : vector<32x64xf32> to vector<2x64xf32>
    %c0_432 = arith.constant 0 : index
    %c960 = arith.constant 960 : index
    %322 = vector.load %arg21[%c0_432, %c960] : memref<2x1024xf32, #tpu.memory_space<vmem>>, vector<2x64xf32>
    tpu.vector_store %arg21[%c0_432, %c960], %321 {strides = array<i32>} : memref<2x1024xf32, #tpu.memory_space<vmem>>, vector<2x64xf32>,
    %c0_433 = arith.constant 0 : index
    %c0_434 = arith.constant 0 : index
    %323 = vector.load %arg21[%c0_433, %c0_434] : memref<2x1024xf32, #tpu.memory_space<vmem>>, vector<2x1024xf32>
    %324 = arith.truncf %323 : vector<2x1024xf32> to vector<2x1024xbf16>
    %c0_435 = arith.constant 0 : index
    %c0_436 = arith.constant 0 : index
    %325 = vector.load %arg8[%c0_435, %c0_436] : memref<1024x512xbf16, #tpu.memory_space<vmem>>, vector<1024x512xbf16>
    %cst_437 = arith.constant dense<0.000000e+00> : vector<2x512xf32>
    %326 = tpu.matmul %324, %325, %cst_437 {dimension_numbers = #tpu.dot_dimension_numbers<[1], [0], [0], [1], [0, 0, 1, 1], [], []>} : vector<2x1024xbf16>, vector<1024x512xbf16>, vector<2x512xf32> -> vector<2x512xf32>
    %c0_438 = arith.constant 0 : index
    %c0_439 = arith.constant 0 : index
    %327 = vector.load %arg9[%c0_438, %c0_439] : memref<1x512xf32, #tpu.memory_space<vmem>>, vector<1x512xf32>
    %328 = vector.broadcast %327 : vector<1x512xf32> to vector<2x512xf32>
    %329 = arith.addf %326, %328 : vector<2x512xf32>
    %cst_440 = arith.constant 0.000000e+00 : f32
    %330 = vector.broadcast %cst_440 : f32 to vector<2x512xf32>
    %331 = arith.maximumf %329, %330 : vector<2x512xf32>
    %332 = arith.truncf %331 : vector<2x512xf32> to vector<2x512xbf16>
    %c0_441 = arith.constant 0 : index
    %c0_442 = arith.constant 0 : index
    %333 = vector.load %arg10[%c0_441, %c0_442] : memref<512x256xbf16, #tpu.memory_space<vmem>>, vector<512x256xbf16>
    %cst_443 = arith.constant dense<0.000000e+00> : vector<2x256xf32>
    %334 = tpu.matmul %332, %333, %cst_443 {dimension_numbers = #tpu.dot_dimension_numbers<[1], [0], [0], [1], [0, 0, 1, 1], [], []>} : vector<2x512xbf16>, vector<512x256xbf16>, vector<2x256xf32> -> vector<2x256xf32>
    %c0_444 = arith.constant 0 : index
    %c0_445 = arith.constant 0 : index
    %335 = vector.load %arg11[%c0_444, %c0_445] : memref<1x256xf32, #tpu.memory_space<vmem>>, vector<1x256xf32>
    %336 = vector.broadcast %335 : vector<1x256xf32> to vector<2x256xf32>
    %337 = arith.addf %334, %336 : vector<2x256xf32>
    %338 = arith.truncf %337 : vector<2x256xf32> to vector<2x256xbf16>
    %c0_446 = arith.constant 0 : index
    %c0_447 = arith.constant 0 : index
    %339 = vector.load %arg1[%c0_446, %c0_447] : memref<2x64xbf16, #tpu.memory_space<vmem>>, vector<2x64xbf16>
    %c0_448 = arith.constant 0 : index
    %c0_449 = arith.constant 0 : index
    %340 = vector.load %arg12[%c0_448, %c0_449] : memref<256x512xbf16, #tpu.memory_space<vmem>>, vector<256x512xbf16>
    %cst_450 = arith.constant dense<0.000000e+00> : vector<2x512xf32>
    %341 = tpu.matmul %338, %340, %cst_450 {dimension_numbers = #tpu.dot_dimension_numbers<[1], [0], [0], [1], [0, 0, 1, 1], [], []>} : vector<2x256xbf16>, vector<256x512xbf16>, vector<2x512xf32> -> vector<2x512xf32>
    %c0_451 = arith.constant 0 : index
    %c0_452 = arith.constant 0 : index
    %342 = vector.load %arg13[%c0_451, %c0_452] : memref<64x512xbf16, #tpu.memory_space<vmem>>, vector<64x512xbf16>
    %cst_453 = arith.constant dense<0.000000e+00> : vector<2x512xf32>
    %343 = tpu.matmul %339, %342, %cst_453 {dimension_numbers = #tpu.dot_dimension_numbers<[1], [0], [0], [1], [0, 0, 1, 1], [], []>} : vector<2x64xbf16>, vector<64x512xbf16>, vector<2x512xf32> -> vector<2x512xf32>
    %344 = arith.addf %341, %343 : vector<2x512xf32>
    %c0_454 = arith.constant 0 : index
    %c0_455 = arith.constant 0 : index
    %345 = vector.load %arg14[%c0_454, %c0_455] : memref<1x512xf32, #tpu.memory_space<vmem>>, vector<1x512xf32>
    %346 = vector.broadcast %345 : vector<1x512xf32> to vector<2x512xf32>
    %347 = arith.addf %344, %346 : vector<2x512xf32>
    %cst_456 = arith.constant 0.000000e+00 : f32
    %348 = vector.broadcast %cst_456 : f32 to vector<2x512xf32>
    %349 = arith.maximumf %347, %348 : vector<2x512xf32>
    %350 = arith.truncf %349 : vector<2x512xf32> to vector<2x512xbf16>
    %c0_457 = arith.constant 0 : index
    %c0_458 = arith.constant 0 : index
    %351 = vector.load %arg15[%c0_457, %c0_458] : memref<512x7xbf16, #tpu.memory_space<vmem>>, vector<512x7xbf16>
    %cst_459 = arith.constant dense<0.000000e+00> : vector<2x7xf32>
    %352 = tpu.matmul %350, %351, %cst_459 {dimension_numbers = #tpu.dot_dimension_numbers<[1], [0], [0], [1], [0, 0, 1, 1], [], []>} : vector<2x512xbf16>, vector<512x7xbf16>, vector<2x7xf32> -> vector<2x7xf32>
    %c0_460 = arith.constant 0 : index
    %c0_461 = arith.constant 0 : index
    %353 = vector.load %arg16[%c0_460, %c0_461] : memref<1x7xf32, #tpu.memory_space<vmem>>, vector<1x7xf32>
    %354 = vector.broadcast %353 : vector<1x7xf32> to vector<2x7xf32>
    %355 = arith.addf %352, %354 : vector<2x7xf32>
    %356 = vector.extract_strided_slice %355 {offsets = [0, 0], sizes = [2, 6], strides = [1, 1]} : vector<2x7xf32> to vector<2x6xf32>
    %357 = vector.extract_strided_slice %355 {offsets = [0, 6], sizes = [2, 1], strides = [1, 1]} : vector<2x7xf32> to vector<2x1xf32>
    %cst_462 = arith.constant dense<0.000000e+00> : vector<2xf32>
    %358 = vector.multi_reduction <add>, %356, %cst_462 [1] : vector<2x6xf32> to vector<2xf32>
    %359 = vector.shape_cast %358 : vector<2xf32> to vector<2x1xf32>
    %cst_463 = arith.constant 0.166666672 : f32
    %360 = vector.broadcast %cst_463 : f32 to vector<2x1xf32>
    %361 = arith.mulf %359, %360 : vector<2x1xf32>
    %362 = vector.broadcast %361 : vector<2x1xf32> to vector<2x6xf32>
    %363 = arith.subf %356, %362 : vector<2x6xf32>
    %364 = vector.broadcast %357 : vector<2x1xf32> to vector<2x6xf32>
    %365 = arith.addf %363, %364 : vector<2x6xf32>
    %c0_464 = arith.constant 0 : index
    %c0_465 = arith.constant 0 : index
    %366 = vector.load %arg17[%c0_464, %c0_465] : memref<2x6xf32, #tpu.memory_space<vmem>>, vector<2x6xf32>
    tpu.vector_store %arg17[%c0_464, %c0_465], %365 {strides = array<i32>} : memref<2x6xf32, #tpu.memory_space<vmem>>, vector<2x6xf32>,
    return
  }
}

</mosaic_0001>

<bundles_post_ra>
// kernel: dueling_dqn_med_forward.1
= control target key start
LH: loop header
LB: loop body
LE: loop exit
PB: predicated region body
PF: predicated region fallthrough
CT: control target
= control target key end

     0   :  { %s11062_s0 = inlined_call_operand.vmem [shape: bf16[450,256], index: 0, kind: input, shape index: {}]   ;;  %s11063_s1 = inlined_call_operand.vmem [shape: bf16[2,64], index: 1, kind: input, shape index: {}]   ;;  %s11064_s2 = inlined_call_operand.vmem [shape: bf16[256,32], index: 2, kind: input, shape index: {}]   ;;  %s11065_s3 = inlined_call_operand.vmem [shape: f32[1,32], index: 3, kind: input, shape index: {}]   ;;  %s11066_s4 = inlined_call_operand.vmem [shape: bf16[512,64], index: 4, kind: input, shape index: {}]   ;;  %s11067_s5 = inlined_call_operand.vmem [shape: f32[1,64], index: 5, kind: input, shape index: {}]   ;;  %s11068_s6 = inlined_call_operand.vmem [shape: bf16[576,64], index: 6, kind: input, shape index: {}]   ;;  %s11069_s7 = inlined_call_operand.vmem [shape: f32[1,64], index: 7, kind: input, shape index: {}]   ;;  %s11070_s8 = inlined_call_operand.vmem [shape: bf16[1024,512], index: 8, kind: input, shape index: {}]   ;;  %s11071_s9 = inlined_call_operand.vmem [shape: f32[1,512], index: 9, kind: input, shape index: {}]   ;;  %s11072_s10 = inlined_call_operand.vmem [shape: bf16[512,256], index: 10, kind: input, shape index: {}]   ;;  %s11073_s11 = inlined_call_operand.vmem [shape: f32[1,256], index: 11, kind: input, shape index: {}]   ;;  %s11074_s12 = inlined_call_operand.vmem [shape: bf16[256,512], index: 12, kind: input, shape index: {}]   ;;  %s11075_s13 = inlined_call_operand.vmem [shape: bf16[64,512], index: 13, kind: input, shape index: {}]   ;;  %s11076_s14 = inlined_call_operand.vmem [shape: f32[1,512], index: 14, kind: input, shape index: {}]   ;;  %s11077_s15 = inlined_call_operand.vmem [shape: bf16[512,7], index: 15, kind: input, shape index: {}]   ;;  %s11078_s16 = inlined_call_operand.vmem [shape: f32[1,7], index: 16, kind: input, shape index: {}]   ;;  %s11079_s17 = inlined_call_operand.hbm [shape: f32[2,6], index: 17, kind: output, shape index: {}]  }
   0x1   :  { %11081 = sst [smem:[#allocation9_spill]] %s11062_s0 }
   0x2   :  { %11082 = sst [smem:[#allocation10_spill]] %s11063_s1 }
   0x3   :  { %v7602_v0 = vld [vmem:[%s11064_s2] sm:$0xff]   ;;  %v8432_v1 = vmov 0   ;;  %v7603_v2 = vld [vmem:[%s11064_s2 + $0x8] sm:$0xff]   ;;  %v7604_v3 = vld [vmem:[%s11064_s2 + $0x10] sm:$0xff]   ;;  %s11083_s21 = sld [smem:[#allocation9_spill]] }
   0x4   :  { %537 = vmatprep.subr.bf16.mxu0 %v8432_v1  ;;  %v7605_v4 = vld [vmem:[%s11064_s2 + $0x18] sm:$0xff]   ;;  %v7606_v5 = vld [vmem:[%s11064_s2 + $0x20] sm:$0xff]   ;;  %v7607_v7 = vld [vmem:[%s11064_s2 + $0x28] sm:$0xff]  }
   0x5   :  { %538 = vmatpush1.bf16.msra.mxu0 %v7602_v0  ;;  %v7608_v8 = vld [vmem:[%s11064_s2 + $0x30] sm:$0xff]   ;;  %v7609_v9 = vld [vmem:[%s11064_s2 + $0x38] sm:$0xff]   ;;  %v7610_v10 = vld [vmem:[%s11064_s2 + $0x40] sm:$0xff]  }
   0x6   :  { %539 = vmatprep.subr.bf16.mxu0 %v8432_v1  ;;  %v7611_v11 = vld [vmem:[%s11064_s2 + $0x48] sm:$0xff]   ;;  %v7612_v12 = vld [vmem:[%s11064_s2 + $0x50] sm:$0xff]   ;;  %v7613_v13 = vld [vmem:[%s11064_s2 + $0x58] sm:$0xff]  }
   0x7   :  { %v7614_v14 = vld [vmem:[%s11064_s2 + $0x60] sm:$0xff]   ;;  %v7615_v15 = vld [vmem:[%s11064_s2 + $0x68] sm:$0xff]   ;;  %v7616_v16 = vld [vmem:[%s11064_s2 + $0x70] sm:$0xff]  }
   0x8   :  { %v7617_v17 = vld [vmem:[%s11064_s2 + $0x78] sm:$0xff]  }
   0x9   :  { %540 = vmatpush1.bf16.msra.mxu0 %v7603_v2  ;;  %v7620_v6 = vld [vmem:[%s11083_s21 + $0x4] ss:$8 sps:$4 sm:$0xff]   ;;  %v7618_v18 = vld [vmem:[%s11083_s21] ss:$8 sps:$4 sm:$0xff]   ;;  %v7621_v19 = vld [vmem:[%s11083_s21 + $0x14] ss:$8 sps:$4 sm:$0xff]  }
   0xa   :  { %541 = vmatprep.subr.bf16.mxu0 %v8432_v1  ;;  %569 = vmatprep.mubr.bf16.mxu0 %v7620_v6  ;;  %v7623_v20 = vld [vmem:[%s11083_s21 + $0x10] ss:$8 sps:$4 sm:$0xff]   ;;  %v7624_v21 = vld [vmem:[%s11083_s21 + $0x24] ss:$8 sps:$4 sm:$0xff]   ;;  %v7626_v22 = vld [vmem:[%s11083_s21 + $0x20] ss:$8 sps:$4 sm:$0xff]  }
   0xb   :  { %v7627_v23 = vld [vmem:[%s11083_s21 + $0x34] ss:$8 sps:$4 sm:$0xff]   ;;  %v7629_v24 = vld [vmem:[%s11083_s21 + $0x30] ss:$8 sps:$4 sm:$0xff]   ;;  %v7630_v25 = vld [vmem:[%s11083_s21 + $0x44] ss:$8 sps:$4 sm:$0xff]  }
   0xc   :  { %v7632_v26 = vld [vmem:[%s11083_s21 + $0x40] ss:$8 sps:$4 sm:$0xff]   ;;  %v7633_v27 = vld [vmem:[%s11083_s21 + $0x54] ss:$8 sps:$4 sm:$0xff]   ;;  %v7635_v28 = vld [vmem:[%s11083_s21 + $0x50] ss:$8 sps:$4 sm:$0xff]  }
   0xd   :  { %542 = vmatpush1.bf16.msra.mxu0 %v7604_v3  ;;  %v7636_v29 = vld [vmem:[%s11083_s21 + $0x64] ss:$8 sps:$4 sm:$0xff]   ;;  %v7638_v30 = vld [vmem:[%s11083_s21 + $0x60] ss:$8 sps:$4 sm:$0xff]   ;;  %v7639_v31 = vld [vmem:[%s11083_s21 + $0x74] ss:$8 sps:$4 sm:$0xff]  }
   0xe   :  { %543 = vmatprep.subr.bf16.mxu0 %v8432_v1  ;;  %v7641_v32 = vld [vmem:[%s11083_s21 + $0x70] ss:$8 sps:$4 sm:$0xff]   ;;  %v7642_v33 = vld [vmem:[%s11083_s21 + $0x84] ss:$8 sps:$4 sm:$0xff]   ;;  %v7644_v34 = vld [vmem:[%s11083_s21 + $0x80] ss:$8 sps:$4 sm:$0xff]  }
   0xf   :  { %v7645_v35 = vld [vmem:[%s11083_s21 + $0x94] ss:$8 sps:$4 sm:$0xff]   ;;  %v7647_v36 = vld [vmem:[%s11083_s21 + $0x90] ss:$8 sps:$4 sm:$0xff]   ;;  %v7648_v37 = vld [vmem:[%s11083_s21 + $0xa4] ss:$8 sps:$4 sm:$0xff]  }
  0x10   :  { %v7650_v38 = vld [vmem:[%s11083_s21 + $0xa0] ss:$8 sps:$4 sm:$0xff]   ;;  %v7651_v39 = vld [vmem:[%s11083_s21 + $0xb4] ss:$8 sps:$4 sm:$0xff]   ;;  %v7653_v40 = vld [vmem:[%s11083_s21 + $0xb0] ss:$8 sps:$4 sm:$0xff]  }
  0x11   :  { %544 = vmatpush1.bf16.msra.mxu0 %v7605_v4  ;;  %v7654_v41 = vld [vmem:[%s11083_s21 + $0xc4] ss:$8 sps:$4 sm:$0xff]   ;;  %v7656_v42 = vld [vmem:[%s11083_s21 + $0xc0] ss:$8 sps:$4 sm:$0xff]   ;;  %v7657_v43 = vld [vmem:[%s11083_s21 + $0xd4] ss:$8 sps:$4 sm:$0xff]  }
  0x12   :  { %545 = vmatprep.subr.bf16.mxu0 %v8432_v1  ;;  %v7659_v44 = vld [vmem:[%s11083_s21 + $0xd0] ss:$8 sps:$4 sm:$0xff]   ;;  %v7660_v45 = vld [vmem:[%s11083_s21 + $0xe4] ss:$8 sps:$4 sm:$0xff]   ;;  %v7662_v46 = vld [vmem:[%s11083_s21 + $0xe0] ss:$8 sps:$4 sm:$0xff]  }
  0x13   :  { %v7663_v47 = vld [vmem:[%s11083_s21 + $0xf4] ss:$8 sps:$4 sm:$0xff]   ;;  %v7665_v48 = vld [vmem:[%s11083_s21 + $0xf0] ss:$8 sps:$4 sm:$0xff]   ;;  %v7666_v49 = vld [vmem:[%s11083_s21 + $0x104] ss:$8 sps:$4 sm:$0xff]  }
  0x14   :  { %v7668_v50 = vld [vmem:[%s11083_s21 + $0x100] ss:$8 sps:$4 sm:$0xff]   ;;  %v7669_v51 = vld [vmem:[%s11083_s21 + $0x114] ss:$8 sps:$4 sm:$0xff]   ;;  %v7671_v52 = vld [vmem:[%s11083_s21 + $0x110] ss:$8 sps:$4 sm:$0xff]  }
  0x15   :  { %546 = vmatpush1.bf16.msra.mxu0 %v7606_v5  ;;  %v7672_v53 = vld [vmem:[%s11083_s21 + $0x124] ss:$8 sps:$4 sm:$0xff]   ;;  %v7674_v54 = vld [vmem:[%s11083_s21 + $0x120] ss:$8 sps:$4 sm:$0xff]   ;;  %v7675_v55 = vld [vmem:[%s11083_s21 + $0x134] ss:$8 sps:$4 sm:$0xff]  }
  0x16   :  { %547 = vmatprep.subr.bf16.mxu0 %v8432_v1  ;;  %v7677_v56 = vld [vmem:[%s11083_s21 + $0x130] ss:$8 sps:$4 sm:$0xff]   ;;  %v7678_v57 = vld [vmem:[%s11083_s21 + $0x144] ss:$8 sps:$4 sm:$0xff]   ;;  %v7680_v58 = vld [vmem:[%s11083_s21 + $0x140] ss:$8 sps:$4 sm:$0xff]  }
  0x17   :  { %v7681_v59 = vld [vmem:[%s11083_s21 + $0x154] ss:$8 sps:$4 sm:$0xff]   ;;  %v7683_v60 = vld [vmem:[%s11083_s21 + $0x150] ss:$8 sps:$4 sm:$0xff]   ;;  %v7684_v61 = vld [vmem:[%s11083_s21 + $0x164] ss:$8 sps:$4 sm:$0xff]  }
  0x18   :  { %v7686_v62 = vld [vmem:[%s11083_s21 + $0x160] ss:$8 sps:$4 sm:$0xff]   ;;  %v7687_v63 = vld [vmem:[%s11083_s21 + $0x174] ss:$8 sps:$4 sm:$0xff]   ;;  %v7689_v0 = vld [vmem:[%s11083_s21 + $0x170] ss:$8 sps:$4 sm:$0xff]  }
  0x19   :  { %548 = vmatpush1.bf16.msra.mxu0 %v7607_v7  ;;  %v7690_v2 = vld [vmem:[%s11083_s21 + $0x184] ss:$8 sps:$4 sm:$0xff]   ;;  %v7692_v3 = vld [vmem:[%s11083_s21 + $0x180] ss:$8 sps:$4 sm:$0xff]  }
  0x1a   :  { %549 = vmatprep.subr.bf16.mxu0 %v8432_v1 }
  0x1d   :  { %550 = vmatpush1.bf16.msra.mxu0 %v7608_v8 }
  0x1e   :  { %551 = vmatprep.subr.bf16.mxu0 %v8432_v1 }
  0x21   :  { %552 = vmatpush1.bf16.msra.mxu0 %v7609_v9 }
  0x22   :  { %553 = vmatprep.subr.bf16.mxu0 %v8432_v1 }
  0x25   :  { %554 = vmatpush1.bf16.msra.mxu0 %v7610_v10 }
  0x26   :  { %555 = vmatprep.subr.bf16.mxu0 %v8432_v1 }
  0x29   :  { %556 = vmatpush1.bf16.msra.mxu0 %v7611_v11 }
  0x2a   :  { %557 = vmatprep.subr.bf16.mxu0 %v8432_v1 }
  0x2d   :  { %558 = vmatpush1.bf16.msra.mxu0 %v7612_v12 }
  0x2e   :  { %559 = vmatprep.subr.bf16.mxu0 %v8432_v1 }
  0x31   :  { %560 = vmatpush1.bf16.msra.mxu0 %v7613_v13 }
  0x32   :  { %561 = vmatprep.subr.bf16.mxu0 %v8432_v1 }
  0x35   :  { %562 = vmatpush1.bf16.msra.mxu0 %v7614_v14 }
  0x36   :  { %563 = vmatprep.subr.bf16.mxu0 %v8432_v1 }
  0x39   :  { %564 = vmatpush1.bf16.msra.mxu0 %v7615_v15 }
  0x3a   :  { %565 = vmatprep.subr.bf16.mxu0 %v8432_v1 }
  0x3d   :  { %566 = vmatpush1.bf16.msra.mxu0 %v7616_v16 }
  0x3e   :  { %567 = vmatprep.subr.bf16.mxu0 %v8432_v1 }
  0x41   :  { %568 = vmatpush1.bf16.msra.mxu0 %v7617_v17 }
  0x44   :  { %570 = vmatmul.mubr.bf16.vlgmr.msra.gmra.mrb[0].mxu0 %v7618_v18 }
  0x45   :  { %577 = vmatprep.mubr.bf16.mxu0 %v7621_v19 }
  0x4c   :  { %578 = vmatmul.mubr.bf16.gmra.mrb[4].mxu0 %v7623_v20 }
  0x4d   :  { %585 = vmatprep.mubr.bf16.mxu0 %v7624_v21 }
  0x54   :  { %586 = vmatmul.mubr.bf16.gmra.mrb[8].mxu0 %v7626_v22 }
  0x55   :  { %593 = vmatprep.mubr.bf16.mxu0 %v7627_v23 }
  0x5c   :  { %594 = vmatmul.mubr.bf16.gmra.mrb[12].mxu0 %v7629_v24 }
  0x5d   :  { %601 = vmatprep.mubr.bf16.mxu0 %v7630_v25 }
  0x64   :  { %602 = vmatmul.mubr.bf16.gmra.mrb[16].mxu0 %v7632_v26 }
  0x65   :  { %609 = vmatprep.mubr.bf16.mxu0 %v7633_v27 }
  0x6c   :  { %610 = vmatmul.mubr.bf16.gmra.mrb[20].mxu0 %v7635_v28 }
  0x6d   :  { %617 = vmatprep.mubr.bf16.mxu0 %v7636_v29 }
  0x74   :  { %618 = vmatmul.mubr.bf16.gmra.mrb[24].mxu0 %v7638_v30 }
  0x75   :  { %625 = vmatprep.mubr.bf16.mxu0 %v7639_v31 }
  0x7c   :  { %626 = vmatmul.mubr.bf16.gmra.mrb[28].mxu0 %v7641_v32 }
  0x7d   :  { %633 = vmatprep.mubr.bf16.mxu0 %v7642_v33 }
  0x84   :  { %634 = vmatmul.mubr.bf16.gmra.mrb[32].mxu0 %v7644_v34 }
  0x85   :  { %641 = vmatprep.mubr.bf16.mxu0 %v7645_v35 }
  0x8c   :  { %642 = vmatmul.mubr.bf16.gmra.mrb[36].mxu0 %v7647_v36 }
  0x8d   :  { %649 = vmatprep.mubr.bf16.mxu0 %v7648_v37 }
  0x94   :  { %650 = vmatmul.mubr.bf16.gmra.mrb[40].mxu0 %v7650_v38 }
  0x95   :  { %657 = vmatprep.mubr.bf16.mxu0 %v7651_v39 }
  0x9c   :  { %658 = vmatmul.mubr.bf16.gmra.mrb[44].mxu0 %v7653_v40 }
  0x9d   :  { %665 = vmatprep.mubr.bf16.mxu0 %v7654_v41 }
  0xa4   :  { %666 = vmatmul.mubr.bf16.gmra.mrb[48].mxu0 %v7656_v42 }
  0xa5   :  { %673 = vmatprep.mubr.bf16.mxu0 %v7657_v43 }
  0xac   :  { %674 = vmatmul.mubr.bf16.gmra.mrb[52].mxu0 %v7659_v44 }
  0xad   :  { %681 = vmatprep.mubr.bf16.mxu0 %v7660_v45 }
  0xb4   :  { %682 = vmatmul.mubr.bf16.gmra.mrb[56].mxu0 %v7662_v46 }
  0xb5   :  { %689 = vmatprep.mubr.bf16.mxu0 %v7663_v47 }
  0xbc   :  { %690 = vmatmul.mubr.bf16.gmra.mrb[60].mxu0 %v7665_v48 }
  0xbd   :  { %697 = vmatprep.mubr.bf16.mxu0 %v7666_v49 }
  0xc4   :  { %698 = vmatmul.mubr.bf16.gmra.mrb[64].mxu0 %v7668_v50 }
  0xc5   :  { %705 = vmatprep.mubr.bf16.mxu0 %v7669_v51 }
  0xcc   :  { %706 = vmatmul.mubr.bf16.gmra.mrb[68].mxu0 %v7671_v52 }
  0xcd   :  { %713 = vmatprep.mubr.bf16.mxu0 %v7672_v53 }
  0xd4   :  { %714 = vmatmul.mubr.bf16.gmra.mrb[72].mxu0 %v7674_v54 }
  0xd5   :  { %721 = vmatprep.mubr.bf16.mxu0 %v7675_v55 }
  0xdc   :  { %722 = vmatmul.mubr.bf16.gmra.mrb[76].mxu0 %v7677_v56 }
  0xdd   :  { %729 = vmatprep.mubr.bf16.mxu0 %v7678_v57 }
  0xe4   :  { %730 = vmatmul.mubr.bf16.gmra.mrb[80].mxu0 %v7680_v58 }
  0xe5   :  { %737 = vmatprep.mubr.bf16.mxu0 %v7681_v59 }
  0xec   :  { %738 = vmatmul.mubr.bf16.gmra.mrb[84].mxu0 %v7683_v60 }
  0xed   :  { %745 = vmatprep.mubr.bf16.mxu0 %v7684_v61 }
  0xf4   :  { %746 = vmatmul.mubr.bf16.gmra.mrb[88].mxu0 %v7686_v62 }
  0xf5   :  { %753 = vmatprep.mubr.bf16.mxu0 %v7687_v63 }
  0xfc   :  { %754 = vmatmul.mubr.bf16.gmra.mrb[92].mxu0 %v7689_v0 }
  0xfd   :  { %761 = vmatprep.mubr.bf16.mxu0 %v7690_v2 }
  0xfe   :  { %22 = vsyncpa [#allocation7], 0  ;;  %v7693_v4 = vld [vmem:[%s11083_s21 + $0x194] ss:$8 sps:$4 sm:$0xff]   ;;  %v7695_v5 = vld [vmem:[%s11083_s21 + $0x190] ss:$8 sps:$4 sm:$0xff]  }
  0xff   :  { %v7696_v6 = vld [vmem:[%s11083_s21 + $0x1a4] ss:$8 sps:$4 sm:$0xff]   ;;  %v7698_v7 = vld [vmem:[%s11083_s21 + $0x1a0] ss:$8 sps:$4 sm:$0xff]   ;;  %vm858_vm0 = vcmask 261120   ;;  %vm920_vm1 = vcmask 257024  }
 0x100   :  { %v8758_v8 = vld [vmem:[%s11065_s3] ss:$0 sm:$0xff]  ;;  %s8433_s19 = smov 64   ;;  %s8434_s1 = smov 32   ;;  %vm1094_vm2 = vcmask 261124   ;;  %vm1088_vm3 = vcmask 1043456  }
 0x101   :  { %s8435_s20 = smov 96   ;;  %vm932_vm4 = vcmask 523520   ;;  %vm946_vm5 = vcmask 785920   ;;  %vm934_vm6 = vcmask 519424   ;;  %vm948_vm7 = vcmask 781824   ;;  %s8438_s2 = smov [#allocation6]  }
 0x102   :  { %vm960_vm8 = vcmask 1048320   ;;  %vm962_vm9 = vcmask 1044224   ;;  %vm1110_vm10 = vcmask 523524   ;;  %vm1126_vm11 = vcmask 785924  }
 0x103   :  { %vm1142_vm12 = vcmask 1048324   ;;  %vm2553_vm13 = vcmask 523264   ;;  %vm2557_vm14 = vcmask 1045504   ;;  %vm2578_vm15 = vcmask 1041408  }
 0x104   :  { %762 = vmatmul.mubr.bf16.gmra.mrb[96].mxu0 %v7692_v3 }
 0x105   :  { %769 = vmatprep.mubr.bf16.mxu0 %v7693_v4 }
 0x10c   :  { %770 = vmatmul.mubr.bf16.gmra.mrb[100].mxu0 %v7695_v5 }
 0x10d   :  { %777 = vmatprep.mubr.bf16.mxu0 %v7696_v6 }
 0x114   :  { %778 = vmatmul.mubr.bf16.gmra.mrb[104].mxu0 %v7698_v7 }
 0x117   :  { %v571_v9 = vpop.f32.mrb[0].mxu0 }
 0x118   :  { %v572_v10 = vadd.f32 %v8758_v8, %v571_v9  ;;  %v573_v11 = vpop.f32.mrb[1].mxu0 }
 0x119   :  { %v574_v12 = vpop.f32.mrb[2].mxu0 }
 0x11a   :  { %v801_v13 = vmax.f32 %v572_v10, 0.0  ;;  %v575_v14 = vadd.f32 %v8758_v8, %v574_v12  ;;  %v576_v15 = vpop.f32.mrb[3].mxu0 }
 0x11c   :  { %859 = vst.msk [vmem:[#allocation2] sm:$0xff] %vm858_vm0, %v801_v13  ;;  %v802_v16 = vmax.f32 %v575_v14, 0.0 }
 0x11e   :  { %860 = vst.msk [vmem:[#allocation2 + $0x8] sm:$0xff] %vm858_vm0, %v802_v16 }
 0x11f   :  { %v579_v17 = vpop.f32.mrb[4].mxu0 }
 0x120   :  { %v580_v18 = vadd.f32 %v8758_v8, %v579_v17  ;;  %v581_v19 = vpop.f32.mrb[5].mxu0 }
 0x121   :  { %v582_v20 = vpop.f32.mrb[6].mxu0 }
 0x122   :  { %v803_v21 = vmax.f32 %v580_v18, 0.0  ;;  %v583_v22 = vadd.f32 %v8758_v8, %v582_v20  ;;  %v584_v23 = vpop.f32.mrb[7].mxu0 }
 0x123   :  { %v917_v24 = vld [vmem:[#allocation2] sm:$0xff] }
 0x124   :  { %861 = vst.msk [vmem:[#allocation2 + $0x10] sm:$0xff] %vm858_vm0, %v803_v21  ;;  %v804_v25 = vmax.f32 %v583_v22, 0.0  ;;  %919 = vst.msk [vmem:[#allocation3] sm:$0xff] %vm858_vm0, %v917_v24 }
 0x125   :  { %v937_v26 = vld [vmem:[#allocation2 + $0xa] sm:$0xf]  ;;  %v936_v27 = vld [vmem:[#allocation2 + $0x2] sm:$0xff] }
 0x126   :  { %v918_v28 = vld [vmem:[#allocation2 + $0x8] sm:$0xf]  ;;  %862 = vst.msk [vmem:[#allocation2 + $0x18] sm:$0xff] %vm858_vm0, %v804_v25  ;;  %942 = vrot.lane.b32.xlu0 %v937_v26, %s8433_s19  ;;  %940 = vrot.lane.b32.xlu1 %v936_v27, %s8433_s19 }
 0x127   :  { %921 = vst.msk [vmem:[#allocation3 + $0x20] sm:$0xf] %vm920_vm1, %v918_v28  ;;  %v587_v29 = vpop.f32.mrb[8].mxu0 }
 0x128   :  { %v588_v30 = vadd.f32 %v8758_v8, %v587_v29  ;;  %v589_v31 = vpop.f32.mrb[9].mxu0 }
 0x129   :  { %v590_v32 = vpop.f32.mrb[10].mxu0 }
 0x12a   :  { %v805_v33 = vmax.f32 %v588_v30, 0.0  ;;  %v591_v34 = vadd.f32 %v8758_v8, %v590_v32  ;;  %v592_v35 = vpop.f32.mrb[11].mxu0  ;;  %v7699_v32 = vld [vmem:[%s11066_s4 + $0x40] sm:$0xff]  }
 0x12b   :  { %v922_v36 = vld [vmem:[#allocation2 + $0x10] sm:$0xff]  ;;  %7349 = vmatprep.subr.bf16.mxu1 %v7699_v32 }
 0x12c   :  { %863 = vst.msk [vmem:[#allocation2 + $0x20] sm:$0xff] %vm858_vm0, %v805_v33  ;;  %v806_v37 = vmax.f32 %v591_v34, 0.0  ;;  %926 = vrot.lane.b32.xlu1 %v922_v36, %s8434_s1  ;;  %v7700_v36 = vld [vmem:[%s11066_s4] sm:$0xff]   ;;  %v7711_v32 = vld [vmem:[%s11066_s4 + $0x70] sm:$0xff]  }
 0x12d   :  { %v923_v38 = vld [vmem:[#allocation2 + $0x18] sm:$0xf]  ;;  %7350 = vmatpush3.bf16.msra.mxu1 %v7700_v36 }
 0x12e   :  { %864 = vst.msk [vmem:[#allocation2 + $0x28] sm:$0xff] %vm858_vm0, %v806_v37  ;;  %928 = vrot.lane.b32.xlu0 %v923_v38, %s8434_s1  ;;  %v950_v40 = vld [vmem:[#allocation2 + $0x12] sm:$0xff]  ;;  %v951_v44 = vld [vmem:[#allocation2 + $0x1a] sm:$0xf] }
 0x12f   :  { %v595_v39 = vpop.f32.mrb[12].mxu0 }
 0x130   :  { %v596_v41 = vadd.f32 %v8758_v8, %v595_v39  ;;  %v597_v42 = vpop.f32.mrb[13].mxu0  ;;  %954 = vrot.lane.b32.xlu1 %v950_v40, %s8435_s20  ;;  %v7701_v40 = vld [vmem:[%s11066_s4 + $0x48] sm:$0xff]  }
 0x131   :  { %v598_v43 = vpop.f32.mrb[14].mxu0  ;;  %7351 = vmatprep.subr.bf16.mxu1 %v7701_v40 }
 0x132   :  { %v807_v45 = vmax.f32 %v596_v41, 0.0  ;;  %v599_v46 = vadd.f32 %v8758_v8, %v598_v43  ;;  %v600_v47 = vpop.f32.mrb[15].mxu0  ;;  %956 = vrot.lane.b32.xlu0 %v951_v44, %s8435_s20 }
 0x133   :  { %v980_v48 = vld [vmem:[#allocation2 + $0x20] sm:$0xff] }
 0x134   :  { %v964_v49 = vld [vmem:[#allocation2 + $0x1e] sm:$0xff]  ;;  %865 = vst.msk [vmem:[#allocation2 + $0x30] sm:$0xff] %vm858_vm0, %v807_v45  ;;  %v808_v50 = vmax.f32 %v599_v46, 0.0  ;;  %984 = vrot.lane.b32.xlu1 %v980_v48, %s8433_s19  ;;  %v7702_v46 = vld [vmem:[%s11066_s4 + $0x8] sm:$0xff]  }
 0x135   :  { %966 = vst.msk [vmem:[#allocation3 + $0x8] sm:$0xff] %vm858_vm0, %v964_v49  ;;  %v981_v51 = vld [vmem:[#allocation2 + $0x28] sm:$0xf]  ;;  %7352 = vmatpush3.bf16.msra.mxu1 %v7702_v46 }
 0x136   :  { %v965_v52 = vld [vmem:[#allocation2 + $0x26] sm:$0xf]  ;;  %866 = vst.msk [vmem:[#allocation2 + $0x38] sm:$0xff] %vm858_vm0, %v808_v50  ;;  %986 = vrot.lane.b32.xlu0 %v981_v51, %s8433_s19  ;;  %v7703_v51 = vld [vmem:[%s11066_s4 + $0x50] sm:$0xff]  }
 0x137   :  { %967 = vst.msk [vmem:[#allocation3 + $0x28] sm:$0xf] %vm920_vm1, %v965_v52  ;;  %v603_v53 = vpop.f32.mrb[16].mxu0  ;;  %7353 = vmatprep.subr.bf16.mxu1 %v7703_v51 }
 0x138   :  { %v604_v54 = vadd.f32 %v8758_v8, %v603_v53  ;;  %v605_v55 = vpop.f32.mrb[17].mxu0 }
 0x139   :  { %v606_v56 = vpop.f32.mrb[18].mxu0 }
 0x13a   :  { %v809_v57 = vmax.f32 %v604_v54, 0.0  ;;  %v607_v58 = vadd.f32 %v8758_v8, %v606_v56  ;;  %v608_v59 = vpop.f32.mrb[19].mxu0 }
 0x13b   :  { %v968_v60 = vld [vmem:[#allocation2 + $0x2e] sm:$0xff] }
 0x13c   :  { %v992_v61 = vld [vmem:[#allocation2 + $0x30] sm:$0xff]  ;;  %867 = vst.msk [vmem:[#allocation2 + $0x40] sm:$0xff] %vm858_vm0, %v809_v57  ;;  %v810_v62 = vmax.f32 %v607_v58, 0.0  ;;  %972 = vrot.lane.b32.xlu0 %v968_v60, %s8434_s1 }
 0x13d   :  { %996 = vrot.lane.b32.xlu1 %v992_v61, %s8435_s20  ;;  %v969_v0 = vld [vmem:[#allocation2 + $0x36] sm:$0xf] }
 0x13e   :  { %868 = vst.msk [vmem:[#allocation2 + $0x48] sm:$0xff] %vm858_vm0, %v810_v62  ;;  %v993_v9 = vld [vmem:[#allocation2 + $0x38] sm:$0xf]  ;;  %v7704_v61 = vld [vmem:[%s11066_s4 + $0x10] sm:$0xff]  }
 0x13f   :  { %v611_v63 = vpop.f32.mrb[20].mxu0  ;;  %7354 = vmatpush3.bf16.msra.mxu1 %v7704_v61 }
 0x140   :  { %v612_v2 = vadd.f32 %v8758_v8, %v611_v63  ;;  %v613_v3 = vpop.f32.mrb[21].mxu0  ;;  %974 = vrot.lane.b32.xlu0 %v969_v0, %s8434_s1 }
 0x141   :  { %v614_v4 = vpop.f32.mrb[22].mxu0  ;;  %v7705_v3 = vld [vmem:[%s11066_s4 + $0x58] sm:$0xff]  }
 0x142   :  { %v811_v5 = vmax.f32 %v612_v2, 0.0  ;;  %v615_v6 = vadd.f32 %v8758_v8, %v614_v4  ;;  %v616_v7 = vpop.f32.mrb[23].mxu0  ;;  %7355 = vmatprep.subr.bf16.mxu1 %v7705_v3 }
 0x143   :  { %v1020_v10 = vld [vmem:[#allocation2 + $0x3e] sm:$0xff] }
 0x144   :  { %v1004_v11 = vld [vmem:[#allocation2 + $0x3c] sm:$0xff]  ;;  %v1005_v12 = vld [vmem:[#allocation2 + $0x44] sm:$0xf]  ;;  %869 = vst.msk [vmem:[#allocation2 + $0x50] sm:$0xff] %vm858_vm0, %v811_v5  ;;  %v812_v13 = vmax.f32 %v615_v6, 0.0  ;;  %998 = vrot.lane.b32.xlu0 %v993_v9, %s8435_s20  ;;  %1024 = vrot.lane.b32.xlu1 %v1020_v10, %s8433_s19  ;;  %v1117_v18 = vrot.slane %v1020_v10, 4 }
 0x145   :  { %1006 = vst.msk [vmem:[#allocation3 + $0x10] sm:$0xff] %vm858_vm0, %v1004_v11  ;;  %v1089_v14 = vrot.slane %v1004_v11, 4  ;;  %v1085_v15 = vld [vmem:[#allocation2 + $0x44] sm:$0xf] }
 0x146   :  { %1007 = vst.msk [vmem:[#allocation3 + $0x30] sm:$0xf] %vm920_vm1, %v1005_v12  ;;  %v1114_v16 = vld [vmem:[#allocation2 + $0x46] sm:$0xf]  ;;  %v1090_v17 = vrot.slane %v1085_v15, 4 }
 0x147   :  { %870 = vst.msk [vmem:[#allocation2 + $0x58] sm:$0xff] %vm858_vm0, %v812_v13  ;;  %v619_v19 = vpop.f32.mrb[24].mxu0  ;;  %v1021_v20 = vld [vmem:[#allocation2 + $0x46] sm:$0xf]  ;;  %v1118_v21 = vrot.slane %v1114_v16, 4 }
 0x148   :  { %1095 = vst.msk [vmem:[#allocation3 + $0x20] sm:$0xf0] %vm1094_vm2, %v1089_v14  ;;  %v1091_v22 = vsel %vm1088_vm3, %v1089_v14, %v1090_v17  ;;  %v620_v23 = vadd.f32 %v8758_v8, %v619_v19  ;;  %1026 = vrot.lane.b32.xlu0 %v1021_v20, %s8433_s19  ;;  %1120 = vrot.lane.b32.xlu1 %v1117_v18, %s8433_s19  ;;  %v621_v24 = vpop.f32.mrb[25].mxu0  ;;  %v7706_v14 = vld [vmem:[%s11066_s4 + $0x18] sm:$0xff]   ;;  %v7707_v15 = vld [vmem:[%s11066_s4 + $0x60] sm:$0xff]  }
 0x149   :  { %1096 = vst.msk [vmem:[#allocation3 + $0x40] sm:$0xff] %vm858_vm0, %v1091_v22  ;;  %v622_v25 = vpop.f32.mrb[26].mxu0  ;;  %v1119_v29 = vsel %vm1088_vm3, %v1117_v18, %v1118_v21  ;;  %7356 = vmatpush3.bf16.msra.mxu1 %v7706_v14  ;;  %v7708_v20 = vld [vmem:[%s11066_s4 + $0x20] sm:$0xff]   ;;  %v7709_v24 = vld [vmem:[%s11066_s4 + $0x68] sm:$0xff]  }
 0x14a   :  { %v813_v26 = vmax.f32 %v620_v23, 0.0  ;;  %v623_v27 = vadd.f32 %v8758_v8, %v622_v25  ;;  %v624_v28 = vpop.f32.mrb[27].mxu0  ;;  %7357 = vmatprep.subr.bf16.mxu1 %v7707_v15 }
 0x14b   :  { %v1008_v30 = vld [vmem:[#allocation2 + $0x4c] sm:$0xff]  ;;  %v1009_v34 = vld [vmem:[#allocation2 + $0x54] sm:$0xf] }
 0x14c   :  { %871 = vst.msk [vmem:[#allocation2 + $0x60] sm:$0xff] %vm858_vm0, %v813_v26  ;;  %1122 = vrot.lane.b32.xlu0 %v1119_v29, %s8433_s19  ;;  %1012 = vrot.lane.b32.xlu1 %v1008_v30, %s8434_s1  ;;  %v814_v31 = vmax.f32 %v623_v27, 0.0  ;;  %v1032_v35 = vld [vmem:[#allocation2 + $0x4e] sm:$0xff]  ;;  %v1101_v43 = vrot.slane %v1008_v30, 4 }
 0x14d   :  { %v1098_v39 = vld [vmem:[#allocation2 + $0x54] sm:$0xf]  ;;  %v1133_v55 = vrot.slane %v1032_v35, 4  ;;  %7358 = vmatpush3.bf16.msra.mxu1 %v7708_v20 }
 0x14e   :  { %872 = vst.msk [vmem:[#allocation2 + $0x68] sm:$0xff] %vm858_vm0, %v814_v31  ;;  %v1033_v47 = vld [vmem:[#allocation2 + $0x56] sm:$0xf]  ;;  %v1102_v48 = vrot.slane %v1098_v39, 4  ;;  %7359 = vmatprep.subr.bf16.mxu1 %v7709_v24  ;;  %v7710_v31 = vld [vmem:[%s11066_s4 + $0x28] sm:$0xff]  }
 0x14f   :  { %v627_v33 = vpop.f32.mrb[28].mxu0  ;;  %v1130_v50 = vld [vmem:[#allocation2 + $0x56] sm:$0xf] }
 0x150   :  { %v628_v37 = vadd.f32 %v8758_v8, %v627_v33  ;;  %1014 = vrot.lane.b32.xlu0 %v1009_v34, %s8434_s1  ;;  %1036 = vrot.lane.b32.xlu1 %v1032_v35, %s8435_s20  ;;  %v629_v38 = vpop.f32.mrb[29].mxu0  ;;  %v1103_v59 = vsel %vm1088_vm3, %v1101_v43, %v1102_v48  ;;  %v1134_v60 = vrot.slane %v1130_v50, 4  ;;  %v7712_v39 = vld [vmem:[%s11066_s4 + $0x30] sm:$0xff]   ;;  %v7714_v50 = vld [vmem:[%s11066_s4 + $0x38] sm:$0xff]  }
 0x151   :  { %v630_v41 = vpop.f32.mrb[30].mxu0  ;;  %7360 = vmatpush3.bf16.msra.mxu1 %v7710_v31 }
 0x152   :  { %v815_v42 = vmax.f32 %v628_v37, 0.0  ;;  %v631_v44 = vadd.f32 %v8758_v8, %v630_v41  ;;  %v632_v45 = vpop.f32.mrb[31].mxu0  ;;  %v1135_v10 = vsel %vm1088_vm3, %v1133_v55, %v1134_v60  ;;  %7361 = vmatprep.subr.bf16.mxu1 %v7711_v32 }
 0x153   :  { %v1045_v52 = vld [vmem:[#allocation2 + $0x62] sm:$0xf]  ;;  %v1044_v53 = vld [vmem:[#allocation2 + $0x5a] sm:$0xff] }
 0x154   :  { %873 = vst.msk [vmem:[#allocation2 + $0x70] sm:$0xff] %vm858_vm0, %v815_v42  ;;  %1038 = vrot.lane.b32.xlu0 %v1033_v47, %s8435_s20  ;;  %1104 = vrot.lane.b32.xlu1 %v1101_v43, %s8434_s1  ;;  %v816_v49 = vmax.f32 %v631_v44, 0.0  ;;  %v1146_v54 = vld [vmem:[#allocation2 + $0x62] sm:$0xf]  ;;  %1046 = vst.msk [vmem:[#allocation3 + $0x18] sm:$0xff] %vm858_vm0, %v1044_v53  ;;  %v1149_v56 = vrot.slane %v1044_v53, 4 }
 0x155   :  { %1047 = vst.msk [vmem:[#allocation3 + $0x38] sm:$0xf] %vm920_vm1, %v1045_v52  ;;  %v1150_v57 = vrot.slane %v1146_v54, 4  ;;  %v1060_v63 = vld [vmem:[#allocation2 + $0x5c] sm:$0xff]  ;;  %v1172_v0 = vld [vmem:[#allocation2 + $0x64] sm:$0xf]  ;;  %7362 = vmatpush3.bf16.msra.mxu1 %v7712_v39 }
 0x156   :  { %874 = vst.msk [vmem:[#allocation2 + $0x78] sm:$0xff] %vm858_vm0, %v816_v49  ;;  %v1175_v11 = vrot.slane %v1060_v63, 4  ;;  %v1176_v12 = vrot.slane %v1172_v0, 4  ;;  %v1061_v17 = vld [vmem:[#allocation2 + $0x64] sm:$0xf]  ;;  %v7713_v45 = vld [vmem:[%s11066_s4 + $0x78] sm:$0xff]  }
 0x157   :  { %v635_v58 = vpop.f32.mrb[32].mxu0  ;;  %1154 = vst.msk [vmem:[#allocation3 + $0x28] sm:$0xf0] %vm1094_vm2, %v1149_v56  ;;  %v1151_v4 = vsel %vm1088_vm3, %v1149_v56, %v1150_v57  ;;  %7363 = vmatprep.subr.bf16.mxu1 %v7713_v45 }
 0x158   :  { %v636_v62 = vadd.f32 %v8758_v8, %v635_v58  ;;  %1106 = vrot.lane.b32.xlu0 %v1103_v59, %s8434_s1  ;;  %1136 = vrot.lane.b32.xlu1 %v1133_v55, %s8435_s20  ;;  %v637_v2 = vpop.f32.mrb[33].mxu0  ;;  %1155 = vst.msk [vmem:[#allocation3 + $0x48] sm:$0xff] %vm858_vm0, %v1151_v4  ;;  %v1177_v18 = vsel %vm1088_vm3, %v1175_v11, %v1176_v12 }
 0x159   :  { %v638_v5 = vpop.f32.mrb[34].mxu0  ;;  %7364 = vmatpush3.bf16.msra.mxu1 %v7714_v50 }
 0x15a   :  { %v817_v6 = vmax.f32 %v636_v62, 0.0  ;;  %v639_v7 = vadd.f32 %v8758_v8, %v638_v5  ;;  %v640_v9 = vpop.f32.mrb[35].mxu0 }
 0x15b   :  { %v1049_v25 = vld [vmem:[#allocation2 + $0x72] sm:$0xf]  ;;  %v1048_v36 = vld [vmem:[#allocation2 + $0x6a] sm:$0xff] }
 0x15c   :  { %875 = vst.msk [vmem:[#allocation2 + $0x80] sm:$0xff] %vm858_vm0, %v817_v6  ;;  %1138 = vrot.lane.b32.xlu0 %v1135_v10, %s8435_s20  ;;  %1064 = vrot.lane.b32.xlu1 %v1060_v63, %s8433_s19  ;;  %v818_v13 = vmax.f32 %v639_v7, 0.0  ;;  %v1072_v37 = vld [vmem:[#allocation2 + $0x6c] sm:$0xff]  ;;  %v1187_v40 = vld [vmem:[#allocation2 + $0x74] sm:$0xf]  ;;  %v1160_v46 = vrot.slane %v1048_v36, 4 }
 0x15d   :  { %v1313_v16 = vld [vmem:[#allocation2 + $0x78] sm:$0xff]  ;;  %v1073_v51 = vld [vmem:[#allocation2 + $0x74] sm:$0xf]  ;;  %v1190_v52 = vrot.slane %v1072_v37, 4  ;;  %v1191_v53 = vrot.slane %v1187_v40, 4 }
 0x15e   :  { %876 = vst.msk [vmem:[#allocation2 + $0x88] sm:$0xff] %vm858_vm0, %v818_v13  ;;  %1315 = vst.msk [vmem:[#allocation3 + $0x60] sm:$0xff] %vm858_vm0, %v1313_v16  ;;  %v1205_v21 = vrot.slane %v1313_v16, 4  ;;  %v1157_v54 = vld [vmem:[#allocation2 + $0x72] sm:$0xf] }
 0x15f   :  { %v643_v19 = vpop.f32.mrb[36].mxu0  ;;  %v1192_v58 = vsel %vm1088_vm3, %v1190_v52, %v1191_v53  ;;  %v1161_v59 = vrot.slane %v1157_v54, 4 }
 0x160   :  { %1066 = vrot.lane.b32.xlu0 %v1061_v17, %s8433_s19  ;;  %1180 = vrot.lane.b32.xlu1 %v1177_v18, %s8433_s19  ;;  %v644_v22 = vadd.f32 %v8758_v8, %v643_v19  ;;  %v645_v23 = vpop.f32.mrb[37].mxu0  ;;  %1210 = vst.msk [vmem:[#allocation3 + $0x30] sm:$0xf0] %vm1094_vm2, %v1205_v21 }
 0x161   :  { %v646_v26 = vpop.f32.mrb[38].mxu0  ;;  %v1162_v5 = vsel %vm1088_vm3, %v1160_v46, %v1161_v59 }
 0x162   :  { %v819_v27 = vmax.f32 %v644_v22, 0.0  ;;  %v647_v28 = vadd.f32 %v8758_v8, %v646_v26  ;;  %v648_v29 = vpop.f32.mrb[39].mxu0 }
 0x163   :  { %v1202_v33 = vld [vmem:[#allocation2 + $0x80] sm:$0xf] }
 0x164   :  { %1178 = vrot.lane.b32.xlu0 %v1175_v11, %s8433_s19  ;;  %1054 = vrot.lane.b32.xlu1 %v1049_v25, %s8434_s1  ;;  %877 = vst.msk [vmem:[#allocation2 + $0x90] sm:$0xff] %vm858_vm0, %v819_v27  ;;  %v820_v30 = vmax.f32 %v647_v28, 0.0  ;;  %v1314_v34 = vld [vmem:[#allocation2 + $0x80] sm:$0xf]  ;;  %v1206_v35 = vrot.slane %v1202_v33, 4 }
 0x165   :  { %1316 = vst.msk [vmem:[#allocation3 + $0x80] sm:$0xf] %vm920_vm1, %v1314_v34  ;;  %v1330_v63 = vld [vmem:[#allocation2 + $0x82] sm:$0xf]  ;;  %v1329_v6 = vld [vmem:[#allocation2 + $0x7a] sm:$0xff]  ;;  %v1317_v13 = vld [vmem:[#allocation2 + $0x88] sm:$0xff] }
 0x166   :  { %878 = vst.msk [vmem:[#allocation2 + $0x98] sm:$0xff] %vm858_vm0, %v820_v30  ;;  %v1207_v43 = vsel %vm1088_vm3, %v1205_v21, %v1206_v35  ;;  %v1231_v12 = vrot.slane %v1329_v6, 4  ;;  %v1228_v16 = vld [vmem:[#allocation2 + $0x82] sm:$0xf]  ;;  %v1216_v20 = vrot.slane %v1317_v13, 4 }
 0x167   :  { %v651_v38 = vpop.f32.mrb[40].mxu0  ;;  %1211 = vst.msk [vmem:[#allocation3 + $0x50] sm:$0xff] %vm858_vm0, %v1207_v43  ;;  %v1232_v24 = vrot.slane %v1228_v16, 4 }
 0x168   :  { %1052 = vrot.lane.b32.xlu0 %v1048_v36, %s8434_s1  ;;  %1076 = vrot.lane.b32.xlu1 %v1072_v37, %s8435_s20  ;;  %v652_v41 = vadd.f32 %v8758_v8, %v651_v38  ;;  %v653_v42 = vpop.f32.mrb[41].mxu0 }
 0x169   :  { %v654_v44 = vpop.f32.mrb[42].mxu0  ;;  %v1233_v31 = vsel %vm1088_vm3, %v1231_v12, %v1232_v24 }
 0x16a   :  { %v821_v47 = vmax.f32 %v652_v41, 0.0  ;;  %v655_v48 = vadd.f32 %v8758_v8, %v654_v44  ;;  %v656_v49 = vpop.f32.mrb[43].mxu0 }
 0x16b   :  { %v1213_v25 = vld [vmem:[#allocation2 + $0x90] sm:$0xf] }
 0x16c   :  { %1078 = vrot.lane.b32.xlu0 %v1073_v51, %s8435_s20  ;;  %1163 = vrot.lane.b32.xlu1 %v1160_v46, %s8434_s1  ;;  %879 = vst.msk [vmem:[#allocation2 + $0xa0] sm:$0xff] %vm858_vm0, %v821_v47  ;;  %v822_v55 = vmax.f32 %v655_v48, 0.0  ;;  %v1341_v32 = vld [vmem:[#allocation2 + $0x8a] sm:$0xff]  ;;  %v1217_v33 = vrot.slane %v1213_v25, 4  ;;  %v1243_v36 = vld [vmem:[#allocation2 + $0x92] sm:$0xf] }
 0x16d   :  { %v1257_v56 = vld [vmem:[#allocation2 + $0x96] sm:$0xff]  ;;  %v1318_v45 = vld [vmem:[#allocation2 + $0x90] sm:$0xf]  ;;  %v1246_v46 = vrot.slane %v1341_v32, 4  ;;  %v1247_v47 = vrot.slane %v1243_v36, 4 }
 0x16e   :  { %880 = vst.msk [vmem:[#allocation2 + $0xa8] sm:$0xff] %vm858_vm0, %v822_v55  ;;  %v1261_v57 = vrot.slane %v1257_v56, 4  ;;  %1355 = vst.msk [vmem:[#allocation3 + $0x68] sm:$0xff] %vm858_vm0, %v1257_v56  ;;  %v1218_v44 = vsel %vm1088_vm3, %v1216_v20, %v1217_v33  ;;  %v1342_v50 = vld [vmem:[#allocation2 + $0x92] sm:$0xf]  ;;  %v1283_v51 = vld [vmem:[#allocation2 + $0x98] sm:$0xff] }
 0x16f   :  { %v659_v60 = vpop.f32.mrb[44].mxu0  ;;  %v1248_v49 = vsel %vm1088_vm3, %v1246_v46, %v1247_v47  ;;  %v1287_v56 = vrot.slane %v1283_v51, 4 }
 0x170   :  { %1193 = vrot.lane.b32.xlu0 %v1190_v52, %s8435_s20  ;;  %1195 = vrot.lane.b32.xlu1 %v1192_v58, %s8435_s20  ;;  %v660_v61 = vadd.f32 %v8758_v8, %v659_v60  ;;  %v661_v62 = vpop.f32.mrb[45].mxu0  ;;  %1266 = vst.msk [vmem:[#allocation3 + $0x38] sm:$0xf0] %vm1094_vm2, %v1261_v57 }
 0x171   :  { %v662_v0 = vpop.f32.mrb[46].mxu0 }
 0x172   :  { %v823_v2 = vmax.f32 %v660_v61, 0.0  ;;  %v663_v3 = vadd.f32 %v8758_v8, %v662_v0  ;;  %v664_v4 = vpop.f32.mrb[47].mxu0 }
 0x173   :  { %v1354_v7 = vld [vmem:[#allocation2 + $0x9e] sm:$0xf] }
 0x174   :  { %1165 = vrot.lane.b32.xlu0 %v1162_v5, %s8434_s1  ;;  %1335 = vrot.lane.b32.xlu1 %v1330_v63, %s8433_s19  ;;  %881 = vst.msk [vmem:[#allocation2 + $0xb0] sm:$0xff] %vm858_vm0, %v823_v2  ;;  %v824_v9 = vmax.f32 %v663_v3, 0.0  ;;  %v1258_v10 = vld [vmem:[#allocation2 + $0x9e] sm:$0xf] }
 0x175   :  { %1356 = vst.msk [vmem:[#allocation3 + $0x88] sm:$0xf] %vm920_vm1, %v1354_v7  ;;  %v1262_v11 = vrot.slane %v1258_v10, 4  ;;  %v1370_v61 = vld [vmem:[#allocation2 + $0xa0] sm:$0xf]  ;;  %v8954_v62 = vld [vmem:[#allocation2 + $0xa6] sm:$0xff] }
 0x176   :  { %882 = vst.msk [vmem:[#allocation2 + $0xb8] sm:$0xff] %vm858_vm0, %v824_v9  ;;  %v1272_v5 = vrot.slane %v8954_v62, 4  ;;  %v1284_v16 = vld [vmem:[#allocation2 + $0xa0] sm:$0xf] }
 0x177   :  { %v667_v14 = vpop.f32.mrb[48].mxu0  ;;  %v1263_v15 = vsel %vm1088_vm3, %v1261_v57, %v1262_v11 }
 0x178   :  { %1333 = vrot.lane.b32.xlu0 %v1329_v6, %s8433_s19  ;;  %1234 = vrot.lane.b32.xlu1 %v1231_v12, %s8433_s19  ;;  %v668_v17 = vadd.f32 %v8758_v8, %v667_v14  ;;  %v669_v18 = vpop.f32.mrb[49].mxu0  ;;  %1267 = vst.msk [vmem:[#allocation3 + $0x58] sm:$0xff] %vm858_vm0, %v1263_v15  ;;  %v1298_v15 = vld [vmem:[#allocation2 + $0xa8] sm:$0xff] }
 0x179   :  { %v670_v19 = vpop.f32.mrb[50].mxu0  ;;  %v1302_v18 = vrot.slane %v1298_v15, 4 }
 0x17a   :  { %v825_v21 = vmax.f32 %v668_v17, 0.0  ;;  %v671_v22 = vadd.f32 %v8758_v8, %v670_v19  ;;  %v672_v23 = vpop.f32.mrb[51].mxu0  ;;  %v1288_v19 = vrot.slane %v1284_v16, 4 }
 0x17c   :  { %1321 = vrot.lane.b32.xlu0 %v1317_v13, %s8434_s1  ;;  %1219 = vrot.lane.b32.xlu1 %v1216_v20, %s8434_s1  ;;  %883 = vst.msk [vmem:[#allocation2 + $0xc0] sm:$0xff] %vm858_vm0, %v825_v21  ;;  %v826_v26 = vmax.f32 %v671_v22, 0.0  ;;  %v1299_v21 = vld [vmem:[#allocation2 + $0xb0] sm:$0xf] }
 0x17d   :  { %v1393_v27 = vld [vmem:[#allocation2 + $0xb4] sm:$0xff]  ;;  %v1394_v28 = vld [vmem:[#allocation2 + $0xbc] sm:$0xf] }
 0x17e   :  { %884 = vst.msk [vmem:[#allocation2 + $0xc8] sm:$0xff] %vm858_vm0, %v826_v26  ;;  %1395 = vst.msk [vmem:[#allocation3 + $0x70] sm:$0xff] %vm858_vm0, %v1393_v27  ;;  %v1477_v29 = vrot.slane %v1393_v27, 4  ;;  %v1474_v30 = vld [vmem:[#allocation2 + $0xbc] sm:$0xf] }
 0x17f   :  { %1396 = vst.msk [vmem:[#allocation3 + $0x90] sm:$0xf] %vm920_vm1, %v1394_v28  ;;  %v675_v34 = vpop.f32.mrb[52].mxu0  ;;  %v1478_v35 = vrot.slane %v1474_v30, 4  ;;  %v1358_v27 = vld [vmem:[#allocation2 + $0xae] sm:$0xf]  ;;  %v1289_v28 = vsel %vm1088_vm3, %v1287_v56, %v1288_v19 }
 0x180   :  { %1236 = vrot.lane.b32.xlu0 %v1233_v31, %s8433_s19  ;;  %1345 = vrot.lane.b32.xlu1 %v1341_v32, %s8435_s20  ;;  %v676_v37 = vadd.f32 %v8758_v8, %v675_v34  ;;  %v677_v38 = vpop.f32.mrb[53].mxu0  ;;  %1482 = vst.msk [vmem:[#allocation3 + $0x80] sm:$0xf0] %vm1094_vm2, %v1477_v29 }
 0x181   :  { %v678_v39 = vpop.f32.mrb[54].mxu0  ;;  %v1479_v40 = vsel %vm1088_vm3, %v1477_v29, %v1478_v35  ;;  %v1303_v29 = vrot.slane %v1299_v21, 4 }
 0x182   :  { %v827_v41 = vmax.f32 %v676_v37, 0.0  ;;  %v679_v42 = vadd.f32 %v8758_v8, %v678_v39  ;;  %v680_v43 = vpop.f32.mrb[55].mxu0  ;;  %1483 = vst.msk [vmem:[#allocation3 + $0xa0] sm:$0xff] %vm858_vm0, %v1479_v40  ;;  %v1382_v39 = vld [vmem:[#allocation2 + $0xb0] sm:$0xf] }
 0x183   :  { %v1304_v40 = vsel %vm1088_vm3, %v1302_v18, %v1303_v29 }
 0x184   :  { %1221 = vrot.lane.b32.xlu0 %v1218_v44, %s8434_s1  ;;  %1323 = vrot.lane.b32.xlu1 %v1318_v45, %s8434_s1  ;;  %885 = vst.msk [vmem:[#allocation2 + $0xd0] sm:$0xff] %vm858_vm0, %v827_v41  ;;  %v828_v48 = vmax.f32 %v679_v42, 0.0  ;;  %v8986_v41 = vld [vmem:[#allocation2 + $0xb6] sm:$0xff]  ;;  %v1269_v45 = vld [vmem:[#allocation2 + $0xae] sm:$0xf] }
 0x186   :  { %886 = vst.msk [vmem:[#allocation2 + $0xd8] sm:$0xff] %vm858_vm0, %v828_v48 }
 0x187   :  { %v683_v52 = vpop.f32.mrb[56].mxu0 }
 0x188   :  { %1251 = vrot.lane.b32.xlu0 %v1248_v49, %s8435_s20  ;;  %1347 = vrot.lane.b32.xlu1 %v1342_v50, %s8435_s20  ;;  %v684_v53 = vadd.f32 %v8758_v8, %v683_v52  ;;  %v685_v54 = vpop.f32.mrb[57].mxu0 }
 0x189   :  { %v686_v55 = vpop.f32.mrb[58].mxu0 }
 0x18a   :  { %v829_v57 = vmax.f32 %v684_v53, 0.0  ;;  %v687_v58 = vadd.f32 %v8758_v8, %v686_v55  ;;  %v688_v59 = vpop.f32.mrb[59].mxu0  ;;  %v1273_v55 = vrot.slane %v1269_v45, 4 }
 0x18b   :  { %v1410_v59 = vld [vmem:[#allocation2 + $0xbe] sm:$0xf] }
 0x18c   :  { %1290 = vrot.lane.b32.xlu0 %v1287_v56, %s8433_s19  ;;  %1373 = vrot.lane.b32.xlu1 %v1283_v51, %s8433_s19  ;;  %887 = vst.msk [vmem:[#allocation2 + $0xe0] sm:$0xff] %vm858_vm0, %v829_v57  ;;  %v830_v60 = vmax.f32 %v687_v58, 0.0  ;;  %v1503_v51 = vrot.slane %v8986_v41, 4  ;;  %v1274_v58 = vsel %vm1088_vm3, %v1272_v5, %v1273_v55 }
 0x18d   :  { %v1434_v63 = vld [vmem:[#allocation2 + $0xda] sm:$0xf]  ;;  %v1433_v0 = vld [vmem:[#allocation2 + $0xd2] sm:$0xff] }
 0x18e   :  { %888 = vst.msk [vmem:[#allocation2 + $0xe8] sm:$0xff] %vm858_vm0, %v830_v60  ;;  %1435 = vst.msk [vmem:[#allocation3 + $0x78] sm:$0xff] %vm858_vm0, %v1433_v0  ;;  %v1530_v3 = vld [vmem:[#allocation2 + $0xda] sm:$0xf]  ;;  %v1533_v4 = vrot.slane %v1433_v0, 4 }
 0x18f   :  { %v691_v2 = vpop.f32.mrb[60].mxu0  ;;  %1436 = vst.msk [vmem:[#allocation3 + $0x98] sm:$0xf] %vm920_vm1, %v1434_v63  ;;  %v1534_v9 = vrot.slane %v1530_v3, 4 }
 0x190   :  { %1375 = vrot.lane.b32.xlu0 %v1370_v61, %s8433_s19  ;;  %1249 = vrot.lane.b32.xlu1 %v1246_v46, %s8435_s20  ;;  %v692_v6 = vadd.f32 %v8758_v8, %v691_v2  ;;  %v693_v7 = vpop.f32.mrb[61].mxu0  ;;  %1538 = vst.msk [vmem:[#allocation3 + $0x88] sm:$0xf0] %vm1094_vm2, %v1533_v4  ;;  %v1500_v61 = vld [vmem:[#allocation2 + $0xbe] sm:$0xf] }
 0x191   :  { %v694_v10 = vpop.f32.mrb[62].mxu0  ;;  %v1535_v14 = vsel %vm1088_vm3, %v1533_v4, %v1534_v9  ;;  %v1397_v9 = vld [vmem:[#allocation2 + $0xc4] sm:$0xff] }
 0x192   :  { %v831_v11 = vmax.f32 %v692_v6, 0.0  ;;  %v695_v12 = vadd.f32 %v8758_v8, %v694_v10  ;;  %v696_v13 = vpop.f32.mrb[63].mxu0  ;;  %1539 = vst.msk [vmem:[#allocation3 + $0xa8] sm:$0xff] %vm858_vm0, %v1535_v14  ;;  %v1488_v29 = vrot.slane %v1397_v9, 4 }
 0x194   :  { %1275 = vrot.lane.b32.xlu0 %v1272_v5, %s8434_s1  ;;  %1361 = vrot.lane.b32.xlu1 %v8954_v62, %s8434_s1  ;;  %889 = vst.msk [vmem:[#allocation2 + $0xf0] sm:$0xff] %vm858_vm0, %v831_v11  ;;  %v832_v17 = vmax.f32 %v695_v12, 0.0  ;;  %v9014_v62 = vld [vmem:[#allocation2 + $0xc6] sm:$0xff]  ;;  %v1504_v5 = vrot.slane %v1500_v61, 4 }
 0x196   :  { %890 = vst.msk [vmem:[#allocation2 + $0xf8] sm:$0xff] %vm858_vm0, %v832_v17  ;;  %v1505_v17 = vsel %vm1088_vm3, %v1503_v51, %v1504_v5 }
 0x197   :  { %v699_v20 = vpop.f32.mrb[64].mxu0 }
 0x198   :  { %1305 = vrot.lane.b32.xlu0 %v1302_v18, %s8435_s20  ;;  %1385 = vrot.lane.b32.xlu1 %v1298_v15, %s8435_s20  ;;  %v700_v22 = vadd.f32 %v8758_v8, %v699_v20  ;;  %v701_v23 = vpop.f32.mrb[65].mxu0  ;;  %v941_v24 = vpop.permute.xlu1 %940  ;;  %v1398_v18 = vld [vmem:[#allocation2 + $0xcc] sm:$0xf] }
 0x199   :  { %v702_v26 = vpop.f32.mrb[66].mxu0  ;;  %v943_v33 = vpop.permute.xlu0 %942 }
 0x19a   :  { %v833_v25 = vmax.f32 %v700_v22, 0.0  ;;  %v703_v30 = vadd.f32 %v8758_v8, %v702_v26  ;;  %v704_v31 = vpop.f32.mrb[67].mxu0  ;;  %v1485_v22 = vld [vmem:[#allocation2 + $0xcc] sm:$0xf] }
 0x19b   :  { %v1697_v32 = vld [vmem:[#allocation2 + $0xf0] sm:$0xff] }
 0x19c   :  { %1363 = vrot.lane.b32.xlu0 %v1358_v27, %s8434_s1  ;;  %1292 = vrot.lane.b32.xlu1 %v1289_v28, %s8433_s19  ;;  %891 = vst.msk [vmem:[#allocation2 + $0x100] sm:$0xff] %vm858_vm0, %v833_v25  ;;  %1699 = vst.msk [vmem:[#allocation3 + $0xc0] sm:$0xff] %vm858_vm0, %v1697_v32  ;;  %v1589_v34 = vrot.slane %v1697_v32, 4  ;;  %v834_v35 = vmax.f32 %v703_v30, 0.0  ;;  %v1518_v28 = vrot.slane %v9014_v62, 4 }
 0x19d   :  { %v1698_v37 = vld [vmem:[#allocation2 + $0xf8] sm:$0xf] }
 0x19e   :  { %v927_v36 = vpop.permute.xlu1 %926  ;;  %v1586_v38 = vld [vmem:[#allocation2 + $0xf8] sm:$0xf]  ;;  %1594 = vst.msk [vmem:[#allocation3 + $0x90] sm:$0xf0] %vm1094_vm2, %v1589_v34 }
 0x19f   :  { %933 = vst.msk [vmem:[#allocation3] sm:$0xff] %vm932_vm4, %v927_v36  ;;  %v707_v42 = vpop.f32.mrb[68].mxu0  ;;  %v1590_v43 = vrot.slane %v1586_v38, 4  ;;  %v1449_v38 = vld [vmem:[#allocation2 + $0xd4] sm:$0xff] }
 0x1a0   :  { %892 = vst.msk [vmem:[#allocation2 + $0x108] sm:$0xff] %vm858_vm0, %v834_v35  ;;  %1387 = vrot.lane.b32.xlu0 %v1382_v39, %s8435_s20  ;;  %v929_v44 = vpop.permute.xlu0 %928  ;;  %1307 = vrot.lane.b32.xlu1 %v1304_v40, %s8435_s20  ;;  %v708_v46 = vadd.f32 %v8758_v8, %v707_v42  ;;  %v709_v47 = vpop.f32.mrb[69].mxu0  ;;  %v9048_v42 = vld [vmem:[%s11065_s3] ss:$0 sm:$0xff] }
 0x1a1   :  { %1700 = vst.msk [vmem:[#allocation3 + $0xe0] sm:$0xf] %vm920_vm1, %v1698_v37  ;;  %v710_v48 = vpop.f32.mrb[70].mxu0  ;;  %v1591_v49 = vsel %vm1088_vm3, %v1589_v34, %v1590_v43  ;;  %v1515_v34 = vld [vmem:[#allocation2 + $0xce] sm:$0xf] }
 0x1a2   :  { %947 = vst.msk [vmem:[#allocation3] sm:$0xff] %vm946_vm5, %v941_v24  ;;  %v955_v50 = vpop.permute.xlu1 %954  ;;  %v835_v52 = vmax.f32 %v708_v46, 0.0  ;;  %v711_v53 = vadd.f32 %v8758_v8, %v710_v48  ;;  %v712_v54 = vpop.f32.mrb[71].mxu0  ;;  %v1519_v39 = vrot.slane %v1515_v34, 4  ;;  %v1450_v48 = vld [vmem:[#allocation2 + $0xdc] sm:$0xf] }
 0x1a3   :  { %935 = vst.msk [vmem:[#allocation3 + $0x20] sm:$0xf] %vm934_vm6, %v929_v44 }
 0x1a4   :  { %949 = vst.msk [vmem:[#allocation3 + $0x20] sm:$0xf] %vm948_vm7, %v943_v33  ;;  %1413 = vrot.lane.b32.xlu0 %v8986_v41, %s8433_s19  ;;  %v957_v56 = vpop.permute.xlu0 %956  ;;  %1506 = vrot.lane.b32.xlu1 %v1503_v51, %s8433_s19  ;;  %v836_v57 = vmax.f32 %v711_v53, 0.0  ;;  %v1489_v33 = vrot.slane %v1485_v22, 4  ;;  %v1556_v41 = vld [vmem:[#allocation2 + $0xdc] sm:$0xf]  ;;  %v1520_v51 = vsel %vm1088_vm3, %v1518_v28, %v1519_v39 }
 0x1a5   :  { %1595 = vst.msk [vmem:[#allocation3 + $0xb0] sm:$0xff] %vm858_vm0, %v1591_v49  ;;  %893 = vst.msk [vmem:[#allocation2 + $0x110] sm:$0xff] %vm858_vm0, %v835_v52  ;;  %v1559_v52 = vrot.slane %v1449_v38, 4  ;;  %v1560_v53 = vrot.slane %v1556_v41, 4 }
 0x1a6   :  { %961 = vst.msk [vmem:[#allocation3] sm:$0xff] %vm960_vm8, %v955_v50  ;;  %v985_v11 = vpop.permute.xlu1 %984 }
 0x1a7   :  { %963 = vst.msk [vmem:[#allocation3 + $0x20] sm:$0xf] %vm962_vm9, %v957_v56  ;;  %v715_v60 = vpop.f32.mrb[72].mxu0 }
 0x1a8   :  { %894 = vst.msk [vmem:[#allocation2 + $0x118] sm:$0xff] %vm858_vm0, %v836_v57  ;;  %1277 = vrot.lane.b32.xlu0 %v1274_v58, %s8434_s1  ;;  %1415 = vrot.lane.b32.xlu1 %v1410_v59, %s8433_s19  ;;  %v716_v63 = vadd.f32 %v8758_v8, %v715_v60  ;;  %v717_v0 = vpop.f32.mrb[73].mxu0  ;;  %v987_v3 = vpop.permute.xlu0 %986 }
 0x1a9   :  { %v718_v2 = vpop.f32.mrb[74].mxu0 }
 0x1aa   :  { %v837_v4 = vmax.f32 %v716_v63, 0.0  ;;  %v719_v6 = vadd.f32 %v8758_v8, %v718_v2  ;;  %v720_v7 = vpop.f32.mrb[75].mxu0  ;;  %v1561_v2 = vsel %vm1088_vm3, %v1559_v52, %v1560_v53 }
 0x1ac   :  { %v1737_v10 = vld [vmem:[#allocation2 + $0x10e] sm:$0xff]  ;;  %1401 = vrot.lane.b32.xlu0 %v1397_v9, %s8434_s1  ;;  %1425 = vrot.lane.b32.xlu1 %v9014_v62, %s8435_s20  ;;  %895 = vst.msk [vmem:[#allocation2 + $0x120] sm:$0xff] %vm858_vm0, %v837_v4  ;;  %v838_v12 = vmax.f32 %v719_v6, 0.0 }
 0x1ad   :  { %1739 = vst.msk [vmem:[#allocation3 + $0xc8] sm:$0xff] %vm858_vm0, %v1737_v10  ;;  %v1645_v13 = vrot.slane %v1737_v10, 4 }
 0x1ae   :  { %v973_v15 = vpop.permute.xlu0 %972  ;;  %896 = vst.msk [vmem:[#allocation2 + $0x128] sm:$0xff] %vm858_vm0, %v838_v12  ;;  %v1437_v12 = vld [vmem:[#allocation2 + $0xe2] sm:$0xff] }
 0x1af   :  { %v1738_v14 = vld [vmem:[#allocation2 + $0x116] sm:$0xf]  ;;  %1650 = vst.msk [vmem:[#allocation3 + $0x98] sm:$0xf0] %vm1094_vm2, %v1645_v13  ;;  %v723_v19 = vpop.f32.mrb[76].mxu0  ;;  %v997_v21 = vpop.permute.xlu1 %996 }
 0x1b0   :  { %1740 = vst.msk [vmem:[#allocation3 + $0xe8] sm:$0xf] %vm920_vm1, %v1738_v14  ;;  %v1642_v16 = vld [vmem:[#allocation2 + $0x116] sm:$0xf]  ;;  %1508 = vrot.lane.b32.xlu0 %v1505_v17, %s8433_s19  ;;  %1403 = vrot.lane.b32.xlu1 %v1398_v18, %s8434_s1  ;;  %v724_v23 = vadd.f32 %v8758_v8, %v723_v19  ;;  %v725_v24 = vpop.f32.mrb[77].mxu0  ;;  %v1461_v19 = vld [vmem:[#allocation2 + $0xe4] sm:$0xff] }
 0x1b1   :  { %978 = vst.msk [vmem:[#allocation3 + $0x8] sm:$0xff] %vm932_vm4, %v973_v15  ;;  %v1646_v20 = vrot.slane %v1642_v16, 4  ;;  %v726_v25 = vpop.f32.mrb[78].mxu0  ;;  %v1541_v14 = vld [vmem:[#allocation2 + $0xea] sm:$0xf] }
 0x1b2   :  { %990 = vst.msk [vmem:[#allocation3 + $0x8] sm:$0xff] %vm946_vm5, %v985_v11  ;;  %v975_v27 = vpop.permute.xlu0 %974  ;;  %v839_v30 = vmax.f32 %v724_v23, 0.0  ;;  %v727_v31 = vadd.f32 %v8758_v8, %v726_v25  ;;  %v728_v32 = vpop.f32.mrb[79].mxu0  ;;  %v1490_v8 = vsel %vm1088_vm3, %v1488_v29, %v1489_v33  ;;  %v1438_v11 = vld [vmem:[#allocation2 + $0xea] sm:$0xf] }
 0x1b3   :  { %1002 = vst.msk [vmem:[#allocation3 + $0x8] sm:$0xff] %vm960_vm8, %v997_v21  ;;  %v1647_v26 = vsel %vm1088_vm3, %v1645_v13, %v1646_v20  ;;  %v1462_v18 = vld [vmem:[#allocation2 + $0xec] sm:$0xf]  ;;  %v1544_v20 = vrot.slane %v1437_v12, 4  ;;  %v1545_v21 = vrot.slane %v1541_v14, 4  ;;  %v1574_v32 = vrot.slane %v1461_v19, 4 }
 0x1b4   :  { %1651 = vst.msk [vmem:[#allocation3 + $0xb8] sm:$0xff] %vm858_vm0, %v1647_v26  ;;  %1521 = vrot.lane.b32.xlu0 %v1518_v28, %s8435_s20  ;;  %1491 = vrot.lane.b32.xlu1 %v1488_v29, %s8434_s1  ;;  %897 = vst.msk [vmem:[#allocation2 + $0x130] sm:$0xff] %vm858_vm0, %v839_v30  ;;  %v840_v35 = vmax.f32 %v727_v31, 0.0  ;;  %v1571_v23 = vld [vmem:[#allocation2 + $0xec] sm:$0xf] }
 0x1b5   :  { %979 = vst.msk [vmem:[#allocation3 + $0x28] sm:$0xf] %vm934_vm6, %v975_v27  ;;  %v1546_v31 = vsel %vm1088_vm3, %v1544_v20, %v1545_v21  ;;  %v1575_v33 = vrot.slane %v1571_v23, 4  ;;  %v1726_v21 = vld [vmem:[#allocation2 + $0x10a] sm:$0xf] }
 0x1b6   :  { %991 = vst.msk [vmem:[#allocation3 + $0x28] sm:$0xf] %vm948_vm7, %v987_v3  ;;  %v999_v36 = vpop.permute.xlu0 %998  ;;  %v1025_v37 = vpop.permute.xlu1 %1024 }
 0x1b7   :  { %898 = vst.msk [vmem:[#allocation2 + $0x138] sm:$0xff] %vm858_vm0, %v840_v35  ;;  %v731_v40 = vpop.f32.mrb[80].mxu0 }
 0x1b8   :  { %1003 = vst.msk [vmem:[#allocation3 + $0x28] sm:$0xf] %vm962_vm9, %v999_v36  ;;  %1493 = vrot.lane.b32.xlu0 %v1490_v8, %s8434_s1  ;;  %1453 = vrot.lane.b32.xlu1 %v1449_v38, %s8433_s19  ;;  %v732_v43 = vadd.f32 %v9048_v42, %v731_v40  ;;  %v733_v44 = vpop.f32.mrb[81].mxu0 }
 0x1b9   :  { %v734_v45 = vpop.f32.mrb[82].mxu0 }
 0x1ba   :  { %v1027_v46 = vpop.permute.xlu0 %1026  ;;  %v9051_v47 = vpop.permute.xlu1 %1120  ;;  %v841_v49 = vmax.f32 %v732_v43, 0.0  ;;  %v735_v50 = vadd.f32 %v9048_v42, %v734_v45  ;;  %v1576_v43 = vsel %vm1088_vm3, %v1574_v32, %v1575_v33 }
 0x1bb   :  { %v736_v54 = vpop.f32.mrb[83].mxu0  ;;  %v1857_v55 = vld [vmem:[#allocation2 + $0x12c] sm:$0xff]  ;;  %v1858_v56 = vld [vmem:[#allocation2 + $0x134] sm:$0xf] }
 0x1bc   :  { %1455 = vrot.lane.b32.xlu0 %v1450_v48, %s8433_s19  ;;  %1523 = vrot.lane.b32.xlu1 %v1520_v51, %s8435_s20  ;;  %899 = vst.msk [vmem:[#allocation2 + $0x140] sm:$0xff] %vm858_vm0, %v841_v49  ;;  %v842_v57 = vmax.f32 %v735_v50, 0.0  ;;  %v1861_v58 = vrot.slane %v1857_v55, 4  ;;  %v1862_v59 = vrot.slane %v1858_v56, 4  ;;  %v1778_v60 = vld [vmem:[#allocation2 + $0x134] sm:$0xf] }
 0x1bd   :  { %1779 = vst.msk [vmem:[#allocation3 + $0xd0] sm:$0xff] %vm858_vm0, %v1857_v55  ;;  %v1714_v55 = vld [vmem:[#allocation2 + $0xfa] sm:$0xf] }
 0x1be   :  { %1780 = vst.msk [vmem:[#allocation3 + $0xf0] sm:$0xf] %vm920_vm1, %v1778_v60  ;;  %v1123_v61 = vpop.permute.xlu0 %1122  ;;  %v1013_v63 = vpop.permute.xlu1 %1012  ;;  %v1863_v0 = vsel %vm1088_vm3, %v1861_v58, %v1862_v59 }
 0x1bf   :  { %900 = vst.msk [vmem:[#allocation2 + $0x148] sm:$0xff] %vm858_vm0, %v842_v57  ;;  %v739_v3 = vpop.f32.mrb[84].mxu0  ;;  %1867 = vst.msk [vmem:[#allocation3 + $0x100] sm:$0xff] %vm858_vm0, %v1863_v0 }
 0x1c0   :  { %1866 = vst.msk [vmem:[#allocation3 + $0xe0] sm:$0xf0] %vm1094_vm2, %v1861_v58  ;;  %1564 = vrot.lane.b32.xlu0 %v1561_v2, %s8433_s19  ;;  %1562 = vrot.lane.b32.xlu1 %v1559_v52, %s8433_s19  ;;  %v740_v4 = vadd.f32 %v9048_v42, %v739_v3  ;;  %v741_v6 = vpop.f32.mrb[85].mxu0 }
 0x1c1   :  { %1018 = vst.msk [vmem:[#allocation3 + $0x10] sm:$0xff] %vm932_vm4, %v1013_v63  ;;  %v742_v7 = vpop.f32.mrb[86].mxu0 }
 0x1c2   :  { %1030 = vst.msk [vmem:[#allocation3 + $0x10] sm:$0xff] %vm946_vm5, %v1025_v37  ;;  %v1015_v9 = vpop.permute.xlu0 %1014  ;;  %v1037_v62 = vpop.permute.xlu1 %1036  ;;  %v843_v5 = vmax.f32 %v740_v4, 0.0  ;;  %v743_v10 = vadd.f32 %v9048_v42, %v742_v7 }
 0x1c3   :  { %1019 = vst.msk [vmem:[#allocation3 + $0x30] sm:$0xf] %vm934_vm6, %v1015_v9  ;;  %v744_v13 = vpop.f32.mrb[87].mxu0 }
 0x1c4   :  { %1042 = vst.msk [vmem:[#allocation3 + $0x10] sm:$0xff] %vm960_vm8, %v1037_v62  ;;  %1443 = vrot.lane.b32.xlu0 %v1438_v11, %s8434_s1  ;;  %1441 = vrot.lane.b32.xlu1 %v1437_v12, %s8434_s1  ;;  %v844_v15 = vmax.f32 %v743_v10, 0.0  ;;  %v1702_v11 = vld [vmem:[#allocation2 + $0x108] sm:$0xf]  ;;  %v1701_v12 = vld [vmem:[#allocation2 + $0x100] sm:$0xff] }
 0x1c5   :  { %1031 = vst.msk [vmem:[#allocation3 + $0x30] sm:$0xf] %vm948_vm7, %v1027_v46  ;;  %v1713_v46 = vld [vmem:[#allocation2 + $0xf2] sm:$0xff]  ;;  %v1600_v23 = vrot.slane %v1701_v12, 4 }
 0x1c6   :  { %901 = vst.msk [vmem:[#allocation2 + $0x150] sm:$0xff] %vm858_vm0, %v843_v5  ;;  %v1039_v16 = vpop.permute.xlu0 %1038  ;;  %v1105_v17 = vpop.permute.xlu1 %1104  ;;  %902 = vst.msk [vmem:[#allocation2 + $0x158] sm:$0xff] %vm858_vm0, %v844_v15  ;;  %v1615_v56 = vrot.slane %v1713_v46, 4  ;;  %v1597_v15 = vld [vmem:[#allocation2 + $0x108] sm:$0xf] }
 0x1c7   :  { %1043 = vst.msk [vmem:[#allocation3 + $0x30] sm:$0xf] %vm962_vm9, %v1039_v16  ;;  %v747_v22 = vpop.f32.mrb[88].mxu0 }
 0x1c8   :  { %1111 = vst.msk [vmem:[#allocation3 + $0x20] sm:$0xf0] %vm1110_vm10, %v1105_v17  ;;  %1467 = vrot.lane.b32.xlu0 %v1462_v18, %s8435_s20  ;;  %1465 = vrot.lane.b32.xlu1 %v1461_v19, %s8435_s20  ;;  %v748_v24 = vadd.f32 %v9048_v42, %v747_v22  ;;  %v749_v25 = vpop.f32.mrb[89].mxu0  ;;  %v9129_v22 = vld [vmem:[#allocation2 + $0x102] sm:$0xff] }
 0x1c9   :  { %1127 = vst.msk [vmem:[#allocation3 + $0x20] sm:$0xf0] %vm1126_vm11, %v9051_v47  ;;  %v750_v26 = vpop.f32.mrb[90].mxu0  ;;  %v1612_v47 = vld [vmem:[#allocation2 + $0xfa] sm:$0xf] }
 0x1ca   :  { %v1107_v27 = vpop.permute.xlu0 %1106  ;;  %v1137_v28 = vpop.permute.xlu1 %1136  ;;  %v845_v29 = vmax.f32 %v748_v24, 0.0  ;;  %v751_v30 = vadd.f32 %v9048_v42, %v750_v26  ;;  %v1616_v57 = vrot.slane %v1612_v47, 4  ;;  %v1601_v24 = vrot.slane %v1597_v15, 4 }
 0x1cb   :  { %1112 = vst.msk [vmem:[#allocation3 + $0x40] sm:$0xff] %vm932_vm4, %v1107_v27  ;;  %v752_v34 = vpop.f32.mrb[91].mxu0 }
 0x1cc   :  { %1143 = vst.msk [vmem:[#allocation3 + $0x20] sm:$0xf0] %vm1142_vm12, %v1137_v28  ;;  %1549 = vrot.lane.b32.xlu0 %v1546_v31, %s8434_s1  ;;  %1547 = vrot.lane.b32.xlu1 %v1544_v20, %s8434_s1  ;;  %v846_v35 = vmax.f32 %v751_v30, 0.0  ;;  %v1617_v2 = vsel %vm1088_vm3, %v1615_v56, %v1616_v57  ;;  %v1602_v33 = vsel %vm1088_vm3, %v1600_v23, %v1601_v24  ;;  %v2081_v57 = vld [vmem:[#allocation3] sm:$0xff] }
 0x1cd   :  { %1128 = vst.msk [vmem:[#allocation3 + $0x40] sm:$0xff] %vm946_vm5, %v1123_v61  ;;  %v1913_v36 = vld [vmem:[#allocation2 + $0x14a] sm:$0xff]  ;;  %v1914_v37 = vld [vmem:[#allocation2 + $0x152] sm:$0xf] }
 0x1ce   :  { %903 = vst.msk [vmem:[#allocation2 + $0x160] sm:$0xff] %vm858_vm0, %v845_v29  ;;  %v1917_v8 = vrot.slane %v1913_v36, 4  ;;  %v1918_v38 = vrot.slane %v1914_v37, 4  ;;  %1819 = vst.msk [vmem:[#allocation3 + $0xd8] sm:$0xff] %vm858_vm0, %v1913_v36  ;;  %v1818_v39 = vld [vmem:[#allocation2 + $0x152] sm:$0xf]  ;;  %v1139_v40 = vpop.permute.xlu0 %1138  ;;  %v1065_v41 = vpop.permute.xlu1 %1064 }
 0x1cf   :  { %904 = vst.msk [vmem:[#allocation2 + $0x168] sm:$0xff] %vm858_vm0, %v846_v35  ;;  %v755_v44 = vpop.f32.mrb[92].mxu0  ;;  %v1753_v35 = vld [vmem:[#allocation2 + $0x110] sm:$0xff]  ;;  %v1668_v36 = vld [vmem:[#allocation2 + $0x118] sm:$0xf] }
 0x1d0   :  { %1820 = vst.msk [vmem:[#allocation3 + $0xf8] sm:$0xf] %vm920_vm1, %v1818_v39  ;;  %v1919_v45 = vsel %vm1088_vm3, %v1917_v8, %v1918_v38  ;;  %1579 = vrot.lane.b32.xlu0 %v1576_v43, %s8435_s20  ;;  %1577 = vrot.lane.b32.xlu1 %v1574_v32, %s8435_s20  ;;  %v756_v48 = vadd.f32 %v9048_v42, %v755_v44  ;;  %v757_v49 = vpop.f32.mrb[93].mxu0  ;;  %v1671_v43 = vrot.slane %v1753_v35, 4  ;;  %v1672_v44 = vrot.slane %v1668_v36, 4  ;;  %v7721_v36 = vld [vmem:[%s11066_s4 + $0xd8] sm:$0xff]  }
 0x1d1   :  { %1144 = vst.msk [vmem:[#allocation3 + $0x40] sm:$0xff] %vm960_vm8, %v1139_v40  ;;  %v758_v50 = vpop.f32.mrb[94].mxu0  ;;  %vm3169_vm1 = vcmask 517120  }
 0x1d2   :  { %1922 = vst.msk [vmem:[#allocation3 + $0xe8] sm:$0xf0] %vm1094_vm2, %v1917_v8  ;;  %v1067_v51 = vpop.permute.xlu0 %1066  ;;  %v9104_v52 = vpop.permute.xlu1 %1180  ;;  %v847_v53 = vmax.f32 %v756_v48, 0.0  ;;  %v759_v54 = vadd.f32 %v9048_v42, %v758_v50 }
 0x1d3   :  { %1923 = vst.msk [vmem:[#allocation3 + $0x108] sm:$0xff] %vm858_vm0, %v1919_v45  ;;  %v760_v58 = vpop.f32.mrb[95].mxu0  ;;  %v2085_v48 = vld [vmem:[#allocation3 + $0x20] sm:$0xff] }
 0x1d4   :  { %1719 = vrot.lane.b32.xlu0 %v1714_v55, %s8433_s19  ;;  %1717 = vrot.lane.b32.xlu1 %v1713_v46, %s8433_s19  ;;  %905 = vst.msk [vmem:[#allocation2 + $0x170] sm:$0xff] %vm858_vm0, %v847_v53  ;;  %v848_v59 = vmax.f32 %v759_v54, 0.0  ;;  %v2082_v53 = vld [vmem:[#allocation3 + $0x8] sm:$0xff] }
 0x1d6   :  { %v1969_v60 = vld [vmem:[#allocation2 + $0x168] sm:$0xff]  ;;  %v1179_v61 = vpop.permute.xlu0 %1178  ;;  %v1055_v63 = vpop.permute.xlu1 %1054  ;;  %906 = vst.msk [vmem:[#allocation2 + $0x178] sm:$0xff] %vm858_vm0, %v848_v59 }
 0x1d7   :  { %v1973_v0 = vrot.slane %v1969_v60, 4  ;;  %1059 = vst.msk [vmem:[#allocation3 + $0x38] sm:$0xf] %vm934_vm6, %v1055_v63  ;;  %v763_v3 = vpop.f32.mrb[96].mxu0 }
 0x1d8   :  { %1071 = vst.msk [vmem:[#allocation3 + $0x38] sm:$0xf] %vm948_vm7, %v1067_v51  ;;  %1620 = vrot.lane.b32.xlu0 %v1617_v2, %s8433_s19  ;;  %1618 = vrot.lane.b32.xlu1 %v1615_v56, %s8433_s19  ;;  %v764_v4 = vadd.f32 %v9048_v42, %v763_v3  ;;  %v765_v6 = vpop.f32.mrb[97].mxu0  ;;  %v1741_v2 = vld [vmem:[#allocation2 + $0x11e] sm:$0xff] }
 0x1d9   :  { %1978 = vst.msk [vmem:[#allocation3 + $0xf0] sm:$0xf0] %vm1094_vm2, %v1973_v0  ;;  %v766_v7 = vpop.f32.mrb[98].mxu0  ;;  %v9161_v3 = vld [vmem:[#allocation2 + $0x120] sm:$0xff] }
 0x1da   :  { %v1053_v9 = vpop.permute.xlu0 %1052  ;;  %v1077_v62 = vpop.permute.xlu1 %1076  ;;  %v849_v5 = vmax.f32 %v764_v4, 0.0  ;;  %v767_v10 = vadd.f32 %v9048_v42, %v766_v7  ;;  %v7715_v4 = vld [vmem:[%s11066_s4 + $0xc0] sm:$0xff]   ;;  %v1686_v24 = vrot.slane %v9161_v3, 4 }
 0x1db   :  { %1058 = vst.msk [vmem:[#allocation3 + $0x18] sm:$0xff] %vm932_vm4, %v1053_v9  ;;  %v768_v13 = vpop.f32.mrb[99].mxu0  ;;  %v1970_v14 = vld [vmem:[#allocation2 + $0x170] sm:$0xf]  ;;  %v1653_v6 = vld [vmem:[#allocation2 + $0x126] sm:$0xf]  ;;  %7395 = vmatprep.subr.bf16.mxu1 %v7715_v4 }
 0x1dc   :  { %1070 = vst.msk [vmem:[#allocation3 + $0x18] sm:$0xff] %vm946_vm5, %v1065_v41  ;;  %1707 = vrot.lane.b32.xlu0 %v1702_v11, %s8434_s1  ;;  %1705 = vrot.lane.b32.xlu1 %v1701_v12, %s8434_s1  ;;  %v850_v16 = vmax.f32 %v767_v10, 0.0  ;;  %v1974_v17 = vrot.slane %v1970_v14, 4  ;;  %v1754_v41 = vld [vmem:[#allocation2 + $0x118] sm:$0xf]  ;;  %v1656_v11 = vrot.slane %v1741_v2, 4 }
 0x1dd   :  { %907 = vst.msk [vmem:[#allocation2 + $0x180] sm:$0xff] %vm858_vm0, %v849_v5  ;;  %v1766_v5 = vld [vmem:[#allocation2 + $0x128] sm:$0xf]  ;;  %v1657_v12 = vrot.slane %v1653_v6, 4 }
 0x1de   :  { %1082 = vst.msk [vmem:[#allocation3 + $0x18] sm:$0xff] %vm960_vm8, %v1077_v62  ;;  %v1079_v18 = vpop.permute.xlu0 %1078  ;;  %v1164_v19 = vpop.permute.xlu1 %1163  ;;  %v1975_v20 = vsel %vm1088_vm3, %v1973_v0, %v1974_v17  ;;  %v7716_v62 = vld [vmem:[%s11066_s4 + $0x80] sm:$0xff]   ;;  %v1940_v17 = vld [vmem:[#allocation2 + $0x154] sm:$0xf] }
 0x1df   :  { %908 = vst.msk [vmem:[#allocation2 + $0x188] sm:$0xff] %vm858_vm0, %v850_v16  ;;  %v771_v25 = vpop.f32.mrb[100].mxu0  ;;  %1979 = vst.msk [vmem:[#allocation3 + $0x110] sm:$0xff] %vm858_vm0, %v1975_v20  ;;  %v1742_v10 = vld [vmem:[#allocation2 + $0x126] sm:$0xf]  ;;  %v1658_v15 = vsel %vm1088_vm3, %v1656_v11, %v1657_v12  ;;  %v9181_v16 = vld [vmem:[#allocation2 + $0x14c] sm:$0xff] }
 0x1e0   :  { %1083 = vst.msk [vmem:[#allocation3 + $0x38] sm:$0xf] %vm962_vm9, %v1079_v18  ;;  %1731 = vrot.lane.b32.xlu0 %v1726_v21, %s8435_s20  ;;  %1729 = vrot.lane.b32.xlu1 %v9129_v22, %s8435_s20  ;;  %v772_v26 = vadd.f32 %v9048_v42, %v771_v25  ;;  %v773_v27 = vpop.f32.mrb[101].mxu0  ;;  %v7717_v18 = vld [vmem:[%s11066_s4 + $0xc8] sm:$0xff]   ;;  %v1944_v25 = vrot.slane %v1940_v17, 4 }
 0x1e1   :  { %1169 = vst.msk [vmem:[#allocation3 + $0x28] sm:$0xf0] %vm1110_vm10, %v1164_v19  ;;  %v774_v28 = vpop.f32.mrb[102].mxu0  ;;  %v7718_v19 = vld [vmem:[%s11066_s4 + $0x88] sm:$0xff]   ;;  %v1884_v27 = vld [vmem:[#allocation2 + $0x136] sm:$0xf] }
 0x1e2   :  { %1184 = vst.msk [vmem:[#allocation3 + $0x28] sm:$0xf0] %vm1126_vm11, %v1179_v61  ;;  %v1194_v29 = vpop.permute.xlu0 %1193  ;;  %v1196_v30 = vpop.permute.xlu1 %1195  ;;  %v851_v31 = vmax.f32 %v772_v26, 0.0  ;;  %v775_v32 = vadd.f32 %v9048_v42, %v774_v28  ;;  %v9198_v26 = vld [vmem:[#allocation2 + $0x12e] sm:$0xff] }
 0x1e3   :  { %1199 = vst.msk [vmem:[#allocation3 + $0x28] sm:$0xf0] %vm1142_vm12, %v1194_v29  ;;  %v776_v34 = vpop.f32.mrb[103].mxu0  ;;  %v7719_v28 = vld [vmem:[%s11066_s4 + $0xd0] sm:$0xff]  }
 0x1e4   :  { %1605 = vrot.lane.b32.xlu0 %v1602_v33, %s8434_s1  ;;  %1603 = vrot.lane.b32.xlu1 %v1600_v23, %s8434_s1  ;;  %909 = vst.msk [vmem:[#allocation2 + $0x190] sm:$0xff] %vm858_vm0, %v851_v31  ;;  %v852_v37 = vmax.f32 %v775_v32, 0.0  ;;  %v1943_v23 = vrot.slane %v9181_v16, 4  ;;  %v7720_v29 = vld [vmem:[%s11066_s4 + $0x90] sm:$0xff]   ;;  %v1887_v32 = vrot.slane %v9198_v26, 4  ;;  %v9212_v34 = vld [vmem:[#allocation2 + $0x15a] sm:$0xff] }
 0x1e6   :  { %v2025_v8 = vld [vmem:[#allocation2 + $0x186] sm:$0xff]  ;;  %v1166_v38 = vpop.permute.xlu0 %1165  ;;  %v9143_v39 = vpop.permute.xlu1 %1335  ;;  %910 = vst.msk [vmem:[#allocation2 + $0x198] sm:$0xff] %vm858_vm0, %v852_v37  ;;  %v1945_v33 = vsel %vm1088_vm3, %v1943_v23, %v1944_v25 }
 0x1e7   :  { %v2029_v40 = vrot.slane %v2025_v8, 4  ;;  %1170 = vst.msk [vmem:[#allocation3 + $0x48] sm:$0xff] %vm932_vm4, %v1166_v38  ;;  %v779_v45 = vpop.f32.mrb[104].mxu0  ;;  %v1928_v38 = vrot.slane %v9212_v34, 4  ;;  %v1627_v25 = vld [vmem:[#allocation2 + $0x10a] sm:$0xf] }
 0x1e8   :  { %1185 = vst.msk [vmem:[#allocation3 + $0x48] sm:$0xff] %vm946_vm5, %v9104_v52  ;;  %1759 = vrot.lane.b32.xlu0 %v1754_v41, %s8433_s19  ;;  %1757 = vrot.lane.b32.xlu1 %v1753_v35, %s8433_s19  ;;  %v780_v46 = vadd.f32 %v9048_v42, %v779_v45  ;;  %v781_v47 = vpop.f32.mrb[105].mxu0  ;;  %v1673_v52 = vsel %vm1088_vm3, %v1671_v43, %v1672_v44  ;;  %v1888_v35 = vrot.slane %v1884_v27, 4  ;;  %v9224_v41 = vld [vmem:[#allocation2 + $0x13c] sm:$0xff] }
 0x1e9   :  { %2034 = vst.msk [vmem:[#allocation3 + $0xf8] sm:$0xf0] %vm1094_vm2, %v2029_v40  ;;  %v782_v49 = vpop.f32.mrb[106].mxu0  ;;  %v2117_v42 = vpack.c.bf16 %v2085_v48, %v2081_v57  ;;  %v7722_v44 = vld [vmem:[%s11066_s4 + $0x98] sm:$0xff]   ;;  %v1872_v48 = vrot.slane %v9224_v41, 4  ;;  %vm3183_vm2 = vcmask 1041920  }
 0x1ea   :  { %1200 = vst.msk [vmem:[#allocation3 + $0x48] sm:$0xff] %vm960_vm8, %v1196_v30  ;;  %v1334_v50 = vpop.permute.xlu0 %1333  ;;  %v1235_v51 = vpop.permute.xlu1 %1234  ;;  %v2086_v54 = vld [vmem:[#allocation3 + $0x28] sm:$0xff]  ;;  %v853_v55 = vmax.f32 %v780_v46, 0.0 }
 0x1eb   :  { %v2118_v56 = vpack.c.bf16 %v2086_v54, %v2082_v53  ;;  %v784_v58 = vpop.f32.mrb[107].mxu0  ;;  %v2026_v59 = vld [vmem:[#allocation2 + $0x18e] sm:$0xf]  ;;  %v7724_v53 = vld [vmem:[%s11066_s4 + $0xa0] sm:$0xff]  }
 0x1ec   :  { %1676 = vrot.lane.b32.xlu0 %v1673_v52, %s8433_s19  ;;  %1674 = vrot.lane.b32.xlu1 %v1671_v43, %s8433_s19  ;;  %911 = vst.msk [vmem:[#allocation2 + $0x1a0] sm:$0xff] %vm858_vm0, %v853_v55  ;;  %v2030_v60 = vrot.slane %v2026_v59, 4  ;;  %v1925_v43 = vld [vmem:[#allocation2 + $0x162] sm:$0xf] }
 0x1ed   :  { %2432 = vmatprep.mubr.bf16.mxu1 %v2118_v56  ;;  %v1929_v49 = vrot.slane %v1925_v43, 4  ;;  %v1955_v54 = vld [vmem:[#allocation2 + $0x164] sm:$0xf] }
 0x1ee   :  { %v1322_v61 = vpop.permute.xlu0 %1321  ;;  %v1220_v63 = vpop.permute.xlu1 %1219  ;;  %2433 = vmatmul.mubr.bf16.vlgmr.msra.gmra.mrb[0].mxu1 %v2117_v42  ;;  %v2031_v0 = vsel %vm1088_vm3, %v2029_v40, %v2030_v60  ;;  %v9222_v40 = vld [vmem:[#allocation2 + $0x15c] sm:$0xff]  ;;  %v1869_v55 = vld [vmem:[#allocation2 + $0x144] sm:$0xf]  ;;  %v1959_v59 = vrot.slane %v1955_v54, 4  ;;  %v7725_v60 = vld [vmem:[%s11066_s4 + $0xe8] sm:$0xff]  }
 0x1ef   :  { %1327 = vst.msk [vmem:[#allocation3 + $0x60] sm:$0xff] %vm932_vm4, %v1322_v61  ;;  %7396 = vmatpush3.bf16.msra.mxu1 %v7716_v62  ;;  %v1958_v47 = vrot.slane %v9222_v40, 4  ;;  %v1930_v58 = vsel %vm1088_vm3, %v1928_v38, %v1929_v49  ;;  %v1873_v42 = vrot.slane %v1869_v55, 4  ;;  %v7726_v61 = vld [vmem:[%s11066_s4 + $0xa8] sm:$0xff]  }
 0x1f0   :  { %1225 = vst.msk [vmem:[#allocation3 + $0x30] sm:$0xf0] %vm1110_vm10, %v1220_v63  ;;  %1745 = vrot.lane.b32.xlu0 %v1741_v2, %s8434_s1  ;;  %1769 = vrot.lane.b32.xlu1 %v9161_v3, %s8435_s20  ;;  %v1683_v63 = vld [vmem:[#allocation2 + $0x128] sm:$0xf] }
 0x1f1   :  { %2035 = vst.msk [vmem:[#allocation3 + $0x118] sm:$0xff] %vm858_vm0, %v2031_v0  ;;  %7397 = vmatprep.subr.bf16.mxu1 %v7717_v18  ;;  %v1899_v0 = vld [vmem:[#allocation2 + $0x146] sm:$0xf]  ;;  %v1960_v6 = vsel %vm1088_vm3, %v1958_v47, %v1959_v59  ;;  %vm2564_vm0 = vcmask 1048064  }
 0x1f2   :  { %1339 = vst.msk [vmem:[#allocation3 + $0x60] sm:$0xff] %vm946_vm5, %v1334_v50  ;;  %v1237_v7 = vpop.permute.xlu0 %1236  ;;  %v1346_v9 = vpop.permute.xlu1 %1345  ;;  %v9235_v50 = vld [vmem:[#allocation2 + $0x13e] sm:$0xff]  ;;  %v1903_v62 = vrot.slane %v1899_v0, 4 }
 0x1f3   :  { %1240 = vst.msk [vmem:[#allocation3 + $0x30] sm:$0xf0] %vm1126_vm11, %v1235_v51  ;;  %7398 = vmatpush3.bf16.msra.mxu1 %v7718_v19  ;;  %v7723_v51 = vld [vmem:[%s11066_s4 + $0xe0] sm:$0xff]   ;;  %v1902_v57 = vrot.slane %v9235_v50, 4 }
 0x1f4   :  { %1351 = vst.msk [vmem:[#allocation3 + $0x60] sm:$0xff] %vm960_vm8, %v1346_v9  ;;  %1771 = vrot.lane.b32.xlu0 %v1766_v5, %s8435_s20  ;;  %1747 = vrot.lane.b32.xlu1 %v1742_v10, %s8434_s1  ;;  %v1687_v9 = vrot.slane %v1683_v63, 4  ;;  %v7727_v5 = vld [vmem:[%s11066_s4 + $0xf0] sm:$0xff]   ;;  %v1806_v63 = vld [vmem:[#allocation2 + $0x146] sm:$0xf] }
 0x1f5   :  { %7399 = vmatprep.subr.bf16.mxu1 %v7719_v28  ;;  %v1904_v18 = vsel %vm1088_vm3, %v1902_v57, %v1903_v62  ;;  %v7730_v28 = vld [vmem:[%s11066_s4 + $0xb8] sm:$0xff]  }
 0x1f6   :  { %v1222_v13 = vpop.permute.xlu0 %1221  ;;  %v1324_v14 = vpop.permute.xlu1 %1323  ;;  %v1688_v17 = vsel %vm1088_vm3, %v1686_v24, %v1687_v9 }
 0x1f7   :  { %1226 = vst.msk [vmem:[#allocation3 + $0x50] sm:$0xff] %vm932_vm4, %v1222_v13  ;;  %7400 = vmatpush3.bf16.msra.mxu1 %v7720_v29  ;;  %v1422_v29 = vld [vmem:[#allocation2 + $0xce] sm:$0xf] }
 0x1f8   :  { %1328 = vst.msk [vmem:[#allocation3 + $0x80] sm:$0xf] %vm934_vm6, %v1324_v14  ;;  %1661 = vrot.lane.b32.xlu0 %v1658_v15, %s8434_s1  ;;  %1659 = vrot.lane.b32.xlu1 %v1656_v11, %s8434_s1  ;;  %v7728_v11 = vld [vmem:[%s11066_s4 + $0xb0] sm:$0xff]  }
 0x1f9   :  { %1241 = vst.msk [vmem:[#allocation3 + $0x50] sm:$0xff] %vm946_vm5, %v1237_v7  ;;  %7401 = vmatprep.subr.bf16.mxu1 %v7721_v36  ;;  %v1874_v7 = vsel %vm1088_vm3, %v1872_v48, %v1873_v42  ;;  %v2090_v14 = vld [vmem:[#allocation3 + $0x48] sm:$0xff]  ;;  %v1782_v36 = vld [vmem:[#allocation2 + $0x144] sm:$0xf]  ;;  %v1980_v42 = vld [vmem:[#allocation2 + $0x178] sm:$0xff] }
 0x1fa   :  { %1340 = vst.msk [vmem:[#allocation3 + $0x80] sm:$0xf] %vm948_vm7, %v9143_v39  ;;  %v1252_v20 = vpop.permute.xlu0 %1251  ;;  %v1348_v21 = vpop.permute.xlu1 %1347  ;;  %v1889_v39 = vsel %vm1088_vm3, %v1887_v32, %v1888_v35 }
 0x1fb   :  { %1256 = vst.msk [vmem:[#allocation3 + $0x50] sm:$0xff] %vm960_vm8, %v1252_v20  ;;  %7402 = vmatpush3.bf16.msra.mxu1 %v7722_v44  ;;  %v2093_v10 = vld [vmem:[#allocation3 + $0x60] sm:$0xff]  ;;  %v1794_v44 = vld [vmem:[#allocation2 + $0x136] sm:$0xf] }
 0x1fc   :  { %1352 = vst.msk [vmem:[#allocation3 + $0x80] sm:$0xf] %vm962_vm9, %v1348_v21  ;;  %1946 = vrot.lane.b32.xlu0 %v1943_v23, %s8433_s19  ;;  %1689 = vrot.lane.b32.xlu1 %v1686_v24, %s8435_s20  ;;  %v2089_v20 = vld [vmem:[#allocation3 + $0x40] sm:$0xff]  ;;  %v7729_v21 = vld [vmem:[%s11066_s4 + $0xf8] sm:$0xff]   ;;  %v1630_v24 = vrot.slane %v9129_v22, 4 }
 0x1fd   :  { %7403 = vmatprep.subr.bf16.mxu1 %v7723_v51  ;;  %v2121_v23 = vpack.c.bf16 %v2093_v10, %v2089_v20 }
 0x1fe   :  { %v1291_v30 = vpop.permute.xlu0 %1290  ;;  %v1374_v31 = vpop.permute.xlu1 %1373 }
 0x1ff   :  { %7404 = vmatpush3.bf16.msra.mxu1 %v7724_v53 }
 0x200   :  { %1948 = vrot.lane.b32.xlu0 %v1945_v33, %s8433_s19  ;;  %1890 = vrot.lane.b32.xlu1 %v1887_v32, %s8433_s19 }
 0x201   :  { %7405 = vmatprep.subr.bf16.mxu1 %v7725_v60 }
 0x202   :  { %v1376_v37 = vpop.permute.xlu0 %1375  ;;  %v1250_v8 = vpop.permute.xlu1 %1249 }
 0x203   :  { %1255 = vst.msk [vmem:[#allocation3 + $0x30] sm:$0xf0] %vm1142_vm12, %v1250_v8  ;;  %7406 = vmatpush3.bf16.msra.mxu1 %v7726_v61  ;;  %v1984_v61 = vrot.slane %v1980_v42, 4 }
 0x204   :  { %1931 = vrot.lane.b32.xlu0 %v1928_v38, %s8434_s1  ;;  %1892 = vrot.lane.b32.xlu1 %v1889_v39, %s8433_s19  ;;  %v1834_v38 = vld [vmem:[#allocation2 + $0x154] sm:$0xf] }
 0x205   :  { %7407 = vmatprep.subr.bf16.mxu1 %v7727_v5 }
 0x206   :  { %v1276_v45 = vpop.permute.xlu0 %1275  ;;  %v1362_v46 = vpop.permute.xlu1 %1361 }
 0x207   :  { %1281 = vst.msk [vmem:[#allocation3 + $0x38] sm:$0xf0] %vm1110_vm10, %v1276_v45  ;;  %7408 = vmatpush3.bf16.msra.mxu1 %v7728_v11 }
 0x208   :  { %1367 = vst.msk [vmem:[#allocation3 + $0x68] sm:$0xff] %vm932_vm4, %v1362_v46  ;;  %1961 = vrot.lane.b32.xlu0 %v1958_v47, %s8435_s20  ;;  %1875 = vrot.lane.b32.xlu1 %v1872_v48, %s8434_s1  ;;  %v1846_v47 = vld [vmem:[#allocation2 + $0x164] sm:$0xf]  ;;  %v2036_v48 = vld [vmem:[#allocation2 + $0x196] sm:$0xff] }
 0x209   :  { %1296 = vst.msk [vmem:[#allocation3 + $0x38] sm:$0xf0] %vm1126_vm11, %v1291_v30  ;;  %7409 = vmatprep.subr.bf16.mxu1 %v7729_v21  ;;  %v1631_v30 = vrot.slane %v1627_v25, 4  ;;  %v2011_v21 = vld [vmem:[#allocation2 + $0x182] sm:$0xf] }
 0x20a   :  { %1379 = vst.msk [vmem:[#allocation3 + $0x68] sm:$0xff] %vm946_vm5, %v1374_v31  ;;  %v1306_v52 = vpop.permute.xlu0 %1305  ;;  %v1386_v56 = vpop.permute.xlu1 %1385 }
 0x20b   :  { %1311 = vst.msk [vmem:[#allocation3 + $0x38] sm:$0xf0] %vm1142_vm12, %v1306_v52  ;;  %7410 = vmatpush3.bf16.msra.mxu1 %v7730_v28  ;;  %v1632_v33 = vsel %vm1088_vm3, %v1630_v24, %v1631_v30  ;;  %v2066_v52 = vld [vmem:[#allocation2 + $0x198] sm:$0xff] }
 0x20c   :  { %1391 = vst.msk [vmem:[#allocation3 + $0x68] sm:$0xff] %vm960_vm8, %v1386_v56  ;;  %1933 = vrot.lane.b32.xlu0 %v1930_v58, %s8434_s1  ;;  %1905 = vrot.lane.b32.xlu1 %v1902_v57, %s8435_s20  ;;  %v1995_v56 = vld [vmem:[#allocation2 + $0x16a] sm:$0xff]  ;;  %v2070_v58 = vrot.slane %v2066_v52, 4 }
 0x20d   :  { %v1999_v59 = vrot.slane %v1995_v56, 4 }
 0x20e   :  { %v1364_v2 = vpop.permute.xlu0 %1363  ;;  %v1293_v4 = vpop.permute.xlu1 %1292 }
 0x20f   :  { %1368 = vst.msk [vmem:[#allocation3 + $0x88] sm:$0xf] %vm934_vm6, %v1364_v2  ;;  %v2010_v2 = vld [vmem:[#allocation2 + $0x17a] sm:$0xff] }
 0x210   :  { %1380 = vst.msk [vmem:[#allocation3 + $0x88] sm:$0xf] %vm948_vm7, %v1376_v37  ;;  %1963 = vrot.lane.b32.xlu0 %v1960_v6, %s8435_s20  ;;  %1877 = vrot.lane.b32.xlu1 %v1874_v7, %s8434_s1  ;;  %v1822_v37 = vld [vmem:[#allocation2 + $0x162] sm:$0xf]  ;;  %v2014_v62 = vrot.slane %v2010_v2, 4 }
 0x211   :  { %v1981_v6 = vld [vmem:[#allocation2 + $0x180] sm:$0xf] }
 0x212   :  { %v1388_v12 = vpop.permute.xlu0 %1387  ;;  %v1308_v13 = vpop.permute.xlu1 %1307  ;;  %v1985_v11 = vrot.slane %v1981_v6, 4 }
 0x213   :  { %v2094_v15 = vld [vmem:[#allocation3 + $0x68] sm:$0xff]  ;;  %1392 = vst.msk [vmem:[#allocation3 + $0x88] sm:$0xf] %vm962_vm9, %v1388_v12  ;;  %v2067_v12 = vld [vmem:[#allocation2 + $0x1a0] sm:$0xf] }
 0x214   :  { %v2122_v19 = vpack.c.bf16 %v2094_v15, %v2090_v14  ;;  %1691 = vrot.lane.b32.xlu0 %v1688_v17, %s8435_s20  ;;  %1907 = vrot.lane.b32.xlu1 %v1904_v18, %s8435_s20  ;;  %v1986_v18 = vsel %vm1088_vm3, %v1984_v61, %v1985_v11 }
 0x216   :  { %2440 = vmatprep.mubr.bf16.mxu1 %v2122_v19  ;;  %v1414_v3 = vpop.permute.xlu0 %1413  ;;  %v1507_v27 = vpop.permute.xlu1 %1506  ;;  %v2071_v19 = vrot.slane %v2067_v12, 4  ;;  %v2088_v12 = vld [vmem:[#allocation3 + $0x38] sm:$0xff] }
 0x217   :  { %2441 = vmatmul.mubr.bf16.gmra.mrb[4].mxu1 %v2121_v23 }
 0x218   :  { %1633 = vrot.lane.b32.xlu0 %v1630_v24, %s8435_s20  ;;  %1427 = vrot.lane.b32.xlu1 %v1422_v29, %s8435_s20  ;;  %v2015_v24 = vrot.slane %v2011_v21, 4 }
 0x21a   :  { %v1278_v31 = vpop.permute.xlu0 %1277  ;;  %v1416_v32 = vpop.permute.xlu1 %1415 }
 0x21b   :  { %1282 = vst.msk [vmem:[#allocation3 + $0x58] sm:$0xff] %vm932_vm4, %v1278_v31 }
 0x21c   :  { %1297 = vst.msk [vmem:[#allocation3 + $0x58] sm:$0xff] %vm946_vm5, %v1293_v4  ;;  %1825 = vrot.lane.b32.xlu0 %v9212_v34, %s8434_s1  ;;  %1635 = vrot.lane.b32.xlu1 %v1632_v33, %s8435_s20  ;;  %v2037_v4 = vld [vmem:[#allocation2 + $0x19e] sm:$0xf]  ;;  %v2016_v33 = vsel %vm1088_vm3, %v2014_v62, %v2015_v24 }
 0x21d   :  { %1312 = vst.msk [vmem:[#allocation3 + $0x58] sm:$0xff] %vm960_vm8, %v1308_v13  ;;  %v2041_v10 = vrot.slane %v2037_v4, 4  ;;  %v1996_v13 = vld [vmem:[#allocation2 + $0x172] sm:$0xf]  ;;  %v2083_v24 = vld [vmem:[#allocation3 + $0x10] sm:$0xff] }
 0x21e   :  { %v1402_v22 = vpop.permute.xlu0 %1401  ;;  %v1426_v35 = vpop.permute.xlu1 %1425  ;;  %v2000_v20 = vrot.slane %v1996_v13, 4 }
 0x21f   :  { %1407 = vst.msk [vmem:[#allocation3 + $0x70] sm:$0xff] %vm932_vm4, %v1402_v22 }
 0x220   :  { %1419 = vst.msk [vmem:[#allocation3 + $0x70] sm:$0xff] %vm946_vm5, %v1414_v3  ;;  %1787 = vrot.lane.b32.xlu0 %v1782_v36, %s8434_s1  ;;  %1827 = vrot.lane.b32.xlu1 %v1822_v37, %s8434_s1  ;;  %v2072_v3 = vsel %vm1088_vm3, %v2070_v58, %v2071_v19 }
 0x221   :  { %1431 = vst.msk [vmem:[#allocation3 + $0x70] sm:$0xff] %vm960_vm8, %v1426_v35 }
 0x222   :  { %v1509_v8 = vpop.permute.xlu0 %1508  ;;  %v1404_v34 = vpop.permute.xlu1 %1403 }
 0x223   :  { %1408 = vst.msk [vmem:[#allocation3 + $0x90] sm:$0xf] %vm934_vm6, %v1404_v34 }
 0x224   :  { %1420 = vst.msk [vmem:[#allocation3 + $0x90] sm:$0xf] %vm948_vm7, %v1416_v32  ;;  %1839 = vrot.lane.b32.xlu0 %v1834_v38, %s8433_s19  ;;  %1785 = vrot.lane.b32.xlu1 %v9224_v41, %s8434_s1  ;;  %v2051_v41 = vld [vmem:[#allocation2 + $0x188] sm:$0xff] }
 0x225   :  { %v2055_v53 = vrot.slane %v2051_v41, 4 }
 0x226   :  { %v1522_v39 = vpop.permute.xlu0 %1521  ;;  %v1492_v43 = vpop.permute.xlu1 %1491 }
 0x227   :  { %1497 = vst.msk [vmem:[#allocation3 + $0x80] sm:$0xf0] %vm1110_vm10, %v1492_v43 }
 0x228   :  { %1512 = vst.msk [vmem:[#allocation3 + $0x80] sm:$0xf0] %vm1126_vm11, %v1507_v27  ;;  %1799 = vrot.lane.b32.xlu0 %v1794_v44, %s8433_s19  ;;  %1837 = vrot.lane.b32.xlu1 %v9181_v16, %s8433_s19  ;;  %v2040_v16 = vrot.slane %v2036_v48, 4  ;;  %v2001_v27 = vsel %vm1088_vm3, %v1999_v59, %v2000_v20 }
 0x229   :  { %1527 = vst.msk [vmem:[#allocation3 + $0x80] sm:$0xf0] %vm1142_vm12, %v1522_v39 }
 0x22a   :  { %v1494_v45 = vpop.permute.xlu0 %1493  ;;  %v1454_v46 = vpop.permute.xlu1 %1453  ;;  %v2042_v17 = vsel %vm1088_vm3, %v2040_v16, %v2041_v10 }
 0x22b   :  { %1498 = vst.msk [vmem:[#allocation3 + $0xa0] sm:$0xff] %vm932_vm4, %v1494_v45 }
 0x22c   :  { %1513 = vst.msk [vmem:[#allocation3 + $0xa0] sm:$0xff] %vm946_vm5, %v1509_v8  ;;  %1851 = vrot.lane.b32.xlu0 %v1846_v47, %s8435_s20  ;;  %1797 = vrot.lane.b32.xlu1 %v9198_v26, %s8433_s19 }
 0x22e   :  { %v1456_v49 = vpop.permute.xlu0 %1455  ;;  %v1524_v51 = vpop.permute.xlu1 %1523 }
 0x22f   :  { %1528 = vst.msk [vmem:[#allocation3 + $0xa0] sm:$0xff] %vm960_vm8, %v1524_v51 }
 0x230   :  { %2058 = vrot.lane.b32.xlu0 %v2055_v53, %s8433_s19  ;;  %1849 = vrot.lane.b32.xlu1 %v9222_v40, %s8435_s20  ;;  %v2052_v40 = vld [vmem:[#allocation2 + $0x190] sm:$0xf]  ;;  %v2097_v35 = vld [vmem:[#allocation3 + $0x80] sm:$0xff] }
 0x231   :  { %v2056_v0 = vrot.slane %v2052_v40, 4 }
 0x232   :  { %v1565_v54 = vpop.permute.xlu0 %1564  ;;  %v1563_v55 = vpop.permute.xlu1 %1562 }
 0x233   :  { %v2057_v5 = vsel %vm1088_vm3, %v2055_v53, %v2056_v0 }
 0x234   :  { %2043 = vrot.lane.b32.xlu0 %v2040_v16, %s8434_s1  ;;  %1809 = vrot.lane.b32.xlu1 %v9235_v50, %s8435_s20 }
 0x236   :  { %v1444_v26 = vpop.permute.xlu0 %1443  ;;  %v1442_v57 = vpop.permute.xlu1 %1441  ;;  %v2101_v28 = vld [vmem:[#allocation3 + $0xa0] sm:$0xff] }
 0x237   :  { %1448 = vst.msk [vmem:[#allocation3 + $0x98] sm:$0xf] %vm934_vm6, %v1444_v26  ;;  %v2125_v36 = vpack.c.bf16 %v2101_v28, %v2097_v35 }
 0x238   :  { %1447 = vst.msk [vmem:[#allocation3 + $0x78] sm:$0xff] %vm932_vm4, %v1442_v57  ;;  %2073 = vrot.lane.b32.xlu0 %v2070_v58, %s8435_s20  ;;  %2002 = vrot.lane.b32.xlu1 %v1999_v59, %s8433_s19 }
 0x239   :  { %1460 = vst.msk [vmem:[#allocation3 + $0x98] sm:$0xf] %vm948_vm7, %v1456_v49 }
 0x23a   :  { %1459 = vst.msk [vmem:[#allocation3 + $0x78] sm:$0xff] %vm946_vm5, %v1454_v46  ;;  %v1468_v60 = vpop.permute.xlu0 %1467  ;;  %v1466_v50 = vpop.permute.xlu1 %1465 }
 0x23b   :  { %1472 = vst.msk [vmem:[#allocation3 + $0x98] sm:$0xf] %vm962_vm9, %v1468_v60 }
 0x23c   :  { %1471 = vst.msk [vmem:[#allocation3 + $0x78] sm:$0xff] %vm960_vm8, %v1466_v50  ;;  %1811 = vrot.lane.b32.xlu0 %v1806_v63, %s8435_s20  ;;  %1987 = vrot.lane.b32.xlu1 %v1984_v61, %s8434_s1 }
 0x23e   :  { %v1550_v7 = vpop.permute.xlu0 %1549  ;;  %v1548_v9 = vpop.permute.xlu1 %1547 }
 0x23f   :  { %1554 = vst.msk [vmem:[#allocation3 + $0xa8] sm:$0xff] %vm932_vm4, %v1550_v7 }
 0x240   :  { %1553 = vst.msk [vmem:[#allocation3 + $0x88] sm:$0xf0] %vm1110_vm10, %v1548_v9  ;;  %2060 = vrot.lane.b32.xlu0 %v2057_v5, %s8433_s19  ;;  %2017 = vrot.lane.b32.xlu1 %v2014_v62, %s8435_s20 }
 0x241   :  { %1569 = vst.msk [vmem:[#allocation3 + $0xa8] sm:$0xff] %vm946_vm5, %v1565_v54 }
 0x242   :  { %1568 = vst.msk [vmem:[#allocation3 + $0x88] sm:$0xf0] %vm1126_vm11, %v1563_v55  ;;  %v1580_v14 = vpop.permute.xlu0 %1579  ;;  %v1578_v15 = vpop.permute.xlu1 %1577 }
 0x243   :  { %1584 = vst.msk [vmem:[#allocation3 + $0xa8] sm:$0xff] %vm960_vm8, %v1580_v14 }
 0x244   :  { %1583 = vst.msk [vmem:[#allocation3 + $0x88] sm:$0xf0] %vm1142_vm12, %v1578_v15  ;;  %2045 = vrot.lane.b32.xlu0 %v2042_v17, %s8434_s1  ;;  %1989 = vrot.lane.b32.xlu1 %v1986_v18, %s8434_s1  ;;  %v2084_v18 = vld [vmem:[#allocation3 + $0x18] sm:$0xff] }
 0x245   :  { %v2120_v19 = vpack.c.bf16 %v2088_v12, %v2084_v18 }
 0x246   :  { %v1720_v23 = vpop.permute.xlu0 %1719  ;;  %v1718_v25 = vpop.permute.xlu1 %1717 }
 0x248   :  { %2075 = vrot.lane.b32.xlu0 %v2072_v3, %s8435_s20  ;;  %2004 = vrot.lane.b32.xlu1 %v2001_v27, %s8433_s19 }
 0x24a   :  { %v1621_v29 = vpop.permute.xlu0 %1620  ;;  %v1619_v30 = vpop.permute.xlu1 %1618  ;;  %v2102_v32 = vld [vmem:[#allocation3 + $0xa8] sm:$0xff] }
 0x24b   :  { %v2098_v31 = vld [vmem:[#allocation3 + $0x88] sm:$0xff] }
 0x24c   :  { %v2126_v22 = vpack.c.bf16 %v2102_v32, %v2098_v31  ;;  %2019 = vrot.lane.b32.xlu1 %v2016_v33, %s8435_s20  ;;  %v2095_v33 = vld [vmem:[#allocation3 + $0x70] sm:$0xff] }
 0x24e   :  { %2448 = vmatprep.mubr.bf16.mxu1 %v2126_v22  ;;  %v1708_v37 = vpop.permute.xlu0 %1707  ;;  %v1706_v8 = vpop.permute.xlu1 %1705 }
 0x24f   :  { %2449 = vmatmul.mubr.bf16.gmra.mrb[8].mxu1 %v2125_v36  ;;  %1712 = vst.msk [vmem:[#allocation3 + $0xe0] sm:$0xf] %vm934_vm6, %v1708_v37  ;;  %v2091_v37 = vld [vmem:[#allocation3 + $0x50] sm:$0xff] }
 0x250   :  { %1711 = vst.msk [vmem:[#allocation3 + $0xc0] sm:$0xff] %vm932_vm4, %v1706_v8  ;;  %v2123_v8 = vpack.c.bf16 %v2095_v33, %v2091_v37  ;;  %v7740_v33 = vld [vmem:[%s11068_s6 + $0x20] sm:$0xff]  }
 0x251   :  { %1724 = vst.msk [vmem:[#allocation3 + $0xe0] sm:$0xf] %vm948_vm7, %v1720_v23  ;;  %v2087_v23 = vld [vmem:[#allocation3 + $0x30] sm:$0xff] }
 0x252   :  { %1723 = vst.msk [vmem:[#allocation3 + $0xc0] sm:$0xff] %vm946_vm5, %v1718_v25  ;;  %v1732_v34 = vpop.permute.xlu0 %1731  ;;  %v1730_v38 = vpop.permute.xlu1 %1729  ;;  %v2096_v25 = vld [vmem:[#allocation3 + $0x78] sm:$0xff]  ;;  %v2119_v28 = vpack.c.bf16 %v2087_v23, %v2083_v24  ;;  %v7734_v24 = vld [vmem:[%s11068_s6 + $0x8] sm:$0xff]  }
 0x253   :  { %1736 = vst.msk [vmem:[#allocation3 + $0xe0] sm:$0xf] %vm962_vm9, %v1732_v34 }
 0x254   :  { %1735 = vst.msk [vmem:[#allocation3 + $0xc0] sm:$0xff] %vm960_vm8, %v1730_v38 }
 0x256   :  { %v1606_v39 = vpop.permute.xlu0 %1605  ;;  %v1604_v43 = vpop.permute.xlu1 %1603 }
 0x257   :  { %1610 = vst.msk [vmem:[#allocation3 + $0xb0] sm:$0xff] %vm932_vm4, %v1606_v39 }
 0x258   :  { %1609 = vst.msk [vmem:[#allocation3 + $0x90] sm:$0xf0] %vm1110_vm10, %v1604_v43 }
 0x259   :  { %1625 = vst.msk [vmem:[#allocation3 + $0xb0] sm:$0xff] %vm946_vm5, %v1621_v29  ;;  %v2092_v29 = vld [vmem:[#allocation3 + $0x58] sm:$0xff] }
 0x25a   :  { %1624 = vst.msk [vmem:[#allocation3 + $0x90] sm:$0xf0] %vm1126_vm11, %v1619_v30  ;;  %v1760_v44 = vpop.permute.xlu0 %1759  ;;  %v1758_v45 = vpop.permute.xlu1 %1757  ;;  %v2124_v30 = vpack.c.bf16 %v2096_v25, %v2092_v29  ;;  %v7731_v25 = vld [vmem:[%s11068_s6 + $0x40] sm:$0xff]   ;;  %v7736_v29 = vld [vmem:[%s11068_s6 + $0x10] sm:$0xff]  }
 0x25b   :  { %v2105_v6 = vld [vmem:[#allocation3 + $0xc0] sm:$0xff]  ;;  %7441 = vmatprep.subr.bf16.mxu1 %v7731_v25  ;;  %v7746_v25 = vld [vmem:[%s11068_s6 + $0x38] sm:$0xff]  }
 0x25e   :  { %v1677_v46 = vpop.permute.xlu0 %1676  ;;  %v1675_v47 = vpop.permute.xlu1 %1674 }
 0x262   :  { %v1746_v41 = vpop.permute.xlu0 %1745  ;;  %v1770_v48 = vpop.permute.xlu1 %1769 }
 0x263   :  { %1751 = vst.msk [vmem:[#allocation3 + $0xc8] sm:$0xff] %vm932_vm4, %v1746_v41 }
 0x264   :  { %1763 = vst.msk [vmem:[#allocation3 + $0xc8] sm:$0xff] %vm946_vm5, %v1758_v45 }
 0x265   :  { %1775 = vst.msk [vmem:[#allocation3 + $0xc8] sm:$0xff] %vm960_vm8, %v1770_v48 }
 0x266   :  { %v1772_v49 = vpop.permute.xlu0 %1771  ;;  %v1748_v51 = vpop.permute.xlu1 %1747 }
 0x267   :  { %1752 = vst.msk [vmem:[#allocation3 + $0xe8] sm:$0xf] %vm934_vm6, %v1748_v51 }
 0x268   :  { %1764 = vst.msk [vmem:[#allocation3 + $0xe8] sm:$0xf] %vm948_vm7, %v1760_v44 }
 0x269   :  { %1776 = vst.msk [vmem:[#allocation3 + $0xe8] sm:$0xf] %vm962_vm9, %v1772_v49 }
 0x26a   :  { %v1662_v53 = vpop.permute.xlu0 %1661  ;;  %v1660_v16 = vpop.permute.xlu1 %1659 }
 0x26b   :  { %1666 = vst.msk [vmem:[#allocation3 + $0xb8] sm:$0xff] %vm932_vm4, %v1662_v53 }
 0x26c   :  { %1665 = vst.msk [vmem:[#allocation3 + $0x98] sm:$0xf0] %vm1110_vm10, %v1660_v16  ;;  %v2106_v61 = vld [vmem:[#allocation3 + $0xc8] sm:$0xff] }
 0x26d   :  { %1681 = vst.msk [vmem:[#allocation3 + $0xb8] sm:$0xff] %vm946_vm5, %v1677_v46 }
 0x26e   :  { %1680 = vst.msk [vmem:[#allocation3 + $0x98] sm:$0xf0] %vm1126_vm11, %v1675_v47  ;;  %v1947_v54 = vpop.permute.xlu0 %1946  ;;  %v1690_v55 = vpop.permute.xlu1 %1689 }
 0x26f   :  { %1695 = vst.msk [vmem:[#allocation3 + $0x98] sm:$0xf0] %vm1142_vm12, %v1690_v55 }
 0x272   :  { %v1949_v52 = vpop.permute.xlu0 %1948  ;;  %v1891_v56 = vpop.permute.xlu1 %1890 }
 0x276   :  { %v1932_v26 = vpop.permute.xlu0 %1931  ;;  %v1893_v57 = vpop.permute.xlu1 %1892  ;;  %v2100_v34 = vld [vmem:[#allocation3 + $0x98] sm:$0xff] }
 0x277   :  { %1937 = vst.msk [vmem:[#allocation3 + $0xe8] sm:$0xf0] %vm1110_vm10, %v1932_v26 }
 0x278   :  { %1952 = vst.msk [vmem:[#allocation3 + $0xe8] sm:$0xf0] %vm1126_vm11, %v1947_v54 }
 0x27a   :  { %v1962_v58 = vpop.permute.xlu0 %1961  ;;  %v1876_v59 = vpop.permute.xlu1 %1875 }
 0x27b   :  { %1967 = vst.msk [vmem:[#allocation3 + $0xe8] sm:$0xf0] %vm1142_vm12, %v1962_v58 }
 0x27c   :  { %1881 = vst.msk [vmem:[#allocation3 + $0xe0] sm:$0xf0] %vm1110_vm10, %v1876_v59 }
 0x27d   :  { %1896 = vst.msk [vmem:[#allocation3 + $0xe0] sm:$0xf0] %vm1126_vm11, %v1891_v56 }
 0x27e   :  { %v1934_v42 = vpop.permute.xlu0 %1933  ;;  %v1906_v40 = vpop.permute.xlu1 %1905 }
 0x27f   :  { %1938 = vst.msk [vmem:[#allocation3 + $0x108] sm:$0xff] %vm932_vm4, %v1934_v42 }
 0x280   :  { %1911 = vst.msk [vmem:[#allocation3 + $0xe0] sm:$0xf0] %vm1142_vm12, %v1906_v40 }
 0x281   :  { %1953 = vst.msk [vmem:[#allocation3 + $0x108] sm:$0xff] %vm946_vm5, %v1949_v52 }
 0x282   :  { %v1964_v60 = vpop.permute.xlu0 %1963  ;;  %v1878_v50 = vpop.permute.xlu1 %1877  ;;  %v2110_v63 = vld [vmem:[#allocation3 + $0xe8] sm:$0xff] }
 0x283   :  { %1968 = vst.msk [vmem:[#allocation3 + $0x108] sm:$0xff] %vm960_vm8, %v1964_v60  ;;  %v2130_v0 = vpack.c.bf16 %v2110_v63, %v2106_v61 }
 0x284   :  { %1882 = vst.msk [vmem:[#allocation3 + $0x100] sm:$0xff] %vm932_vm4, %v1878_v50 }
 0x285   :  { %1897 = vst.msk [vmem:[#allocation3 + $0x100] sm:$0xff] %vm946_vm5, %v1893_v57  ;;  %2456 = vmatprep.mubr.bf16.mxu1 %v2130_v0 }
 0x286   :  { %v1692_v2 = vpop.permute.xlu0 %1691  ;;  %v1908_v4 = vpop.permute.xlu1 %1907 }
 0x287   :  { %v2109_v7 = vld [vmem:[#allocation3 + $0xe0] sm:$0xff]  ;;  %1696 = vst.msk [vmem:[#allocation3 + $0xb8] sm:$0xff] %vm960_vm8, %v1692_v2  ;;  %1912 = vst.msk [vmem:[#allocation3 + $0x100] sm:$0xff] %vm960_vm8, %v1908_v4 }
 0x288   :  { %v2129_v9 = vpack.c.bf16 %v2109_v7, %v2105_v6 }
 0x28a   :  { %2457 = vmatmul.mubr.bf16.gmra.mrb[12].mxu1 %v2129_v9  ;;  %v1634_v62 = vpop.permute.xlu0 %1633  ;;  %v1428_v5 = vpop.permute.xlu1 %1427  ;;  %v2114_v10 = vld [vmem:[#allocation3 + $0x108] sm:$0xff] }
 0x28b   :  { %1639 = vst.msk [vmem:[#allocation3 + $0x90] sm:$0xf0] %vm1142_vm12, %v1634_v62  ;;  %v2134_v11 = vpack.c.bf16 %v2114_v10, %v2114_v10 }
 0x28c   :  { %1432 = vst.msk [vmem:[#allocation3 + $0x90] sm:$0xf] %vm962_vm9, %v1428_v5 }
 0x28d   :  { %2464 = vmatprep.mubr.bf16.mxu1 %v2134_v11 }
 0x28e   :  { %v1826_v13 = vpop.permute.xlu0 %1825  ;;  %v1636_v14 = vpop.permute.xlu1 %1635  ;;  %v2113_v15 = vld [vmem:[#allocation3 + $0x100] sm:$0xff]  ;;  %v2104_v22 = vld [vmem:[#allocation3 + $0xb8] sm:$0xff] }
 0x28f   :  { %1831 = vst.msk [vmem:[#allocation3 + $0xd8] sm:$0xff] %vm932_vm4, %v1826_v13  ;;  %v2133_v17 = vpack.c.bf16 %v2113_v15, %v2113_v15  ;;  %v2128_v38 = vpack.c.bf16 %v2104_v22, %v2100_v34 }
 0x290   :  { %1640 = vst.msk [vmem:[#allocation3 + $0xb0] sm:$0xff] %vm960_vm8, %v1636_v14 }
 0x292   :  { %2465 = vmatmul.mubr.bf16.gmra.mrb[16].mxu1 %v2133_v17  ;;  %v1788_v20 = vpop.permute.xlu0 %1787  ;;  %v1828_v21 = vpop.permute.xlu1 %1827 }
 0x293   :  { %2504 = vmatprep.mubr.bf16.mxu1 %v2120_v19  ;;  %1792 = vst.msk [vmem:[#allocation3 + $0xf0] sm:$0xf] %vm934_vm6, %v1788_v20  ;;  %1832 = vst.msk [vmem:[#allocation3 + $0xf8] sm:$0xf] %vm934_vm6, %v1828_v21  ;;  %v2099_v47 = vld [vmem:[#allocation3 + $0x90] sm:$0xff] }
 0x296   :  { %v1840_v3 = vpop.permute.xlu0 %1839  ;;  %v1786_v27 = vpop.permute.xlu1 %1785 }
 0x297   :  { %1844 = vst.msk [vmem:[#allocation3 + $0xf8] sm:$0xf] %vm948_vm7, %v1840_v3  ;;  %v2103_v44 = vld [vmem:[#allocation3 + $0xb0] sm:$0xff]  ;;  %v7732_v3 = vld [vmem:[%s11068_s6] sm:$0xff]  }
 0x298   :  { %1791 = vst.msk [vmem:[#allocation3 + $0xd0] sm:$0xff] %vm932_vm4, %v1786_v27  ;;  %v2127_v41 = vpack.c.bf16 %v2103_v44, %v2099_v47  ;;  %v7733_v27 = vld [vmem:[%s11068_s6 + $0x48] sm:$0xff]  }
 0x29a   :  { %2505 = vmatmul.mubr.bf16.vlgmr.msra.gmra.mrb[20].mxu1 %v2119_v28  ;;  %v1800_v31 = vpop.permute.xlu0 %1799  ;;  %v1838_v32 = vpop.permute.xlu1 %1837  ;;  %v7735_v28 = vld [vmem:[%s11068_s6 + $0x50] sm:$0xff]  }
 0x29b   :  { %2512 = vmatprep.mubr.bf16.mxu1 %v2124_v30  ;;  %1804 = vst.msk [vmem:[#allocation3 + $0xf0] sm:$0xf] %vm948_vm7, %v1800_v31  ;;  %7442 = vmatpush3.bf16.msra.mxu1 %v7732_v3  ;;  %v7737_v30 = vld [vmem:[%s11068_s6 + $0x58] sm:$0xff]  }
 0x29c   :  { %1843 = vst.msk [vmem:[#allocation3 + $0xd8] sm:$0xff] %vm946_vm5, %v1838_v32  ;;  %7443 = vmatprep.subr.bf16.mxu1 %v7733_v27  ;;  %v7738_v31 = vld [vmem:[%s11068_s6 + $0x18] sm:$0xff]   ;;  %v7739_v32 = vld [vmem:[%s11068_s6 + $0x60] sm:$0xff]  }
 0x29e   :  { %v1852_v35 = vpop.permute.xlu0 %1851  ;;  %v1798_v36 = vpop.permute.xlu1 %1797 }
 0x29f   :  { %1856 = vst.msk [vmem:[#allocation3 + $0xf8] sm:$0xf] %vm962_vm9, %v1852_v35  ;;  %7444 = vmatpush3.bf16.msra.mxu1 %v7734_v24 }
 0x2a0   :  { %1803 = vst.msk [vmem:[#allocation3 + $0xd0] sm:$0xff] %vm946_vm5, %v1798_v36  ;;  %7445 = vmatprep.subr.bf16.mxu1 %v7735_v28 }
 0x2a2   :  { %2513 = vmatmul.mubr.bf16.gmra.mrb[24].mxu1 %v2123_v8  ;;  %v2059_v39 = vpop.permute.xlu0 %2058  ;;  %v1850_v43 = vpop.permute.xlu1 %1849 }
 0x2a3   :  { %2520 = vmatprep.mubr.bf16.mxu1 %v2128_v38  ;;  %1855 = vst.msk [vmem:[#allocation3 + $0xd8] sm:$0xff] %vm960_vm8, %v1850_v43  ;;  %7446 = vmatpush3.bf16.msra.mxu1 %v7736_v29 }
 0x2a4   :  { %7447 = vmatprep.subr.bf16.mxu1 %v7737_v30 }
 0x2a6   :  { %v2044_v45 = vpop.permute.xlu0 %2043  ;;  %v1810_v46 = vpop.permute.xlu1 %1809 }
 0x2a7   :  { %2049 = vst.msk [vmem:[#allocation3 + $0xf8] sm:$0xf0] %vm1110_vm10, %v2044_v45  ;;  %7448 = vmatpush3.bf16.msra.mxu1 %v7738_v31 }
 0x2a8   :  { %1815 = vst.msk [vmem:[#allocation3 + $0xd0] sm:$0xff] %vm960_vm8, %v1810_v46  ;;  %7449 = vmatprep.subr.bf16.mxu1 %v7739_v32  ;;  %v9457_v46 = vld [vmem:[%s11067_s5] ss:$0 sm:$0xff] }
 0x2a9   :  { %2064 = vst.msk [vmem:[#allocation3 + $0xf8] sm:$0xf0] %vm1126_vm11, %v2059_v39 }
 0x2aa   :  { %2521 = vmatmul.mubr.bf16.gmra.mrb[28].mxu1 %v2127_v41  ;;  %v2074_v48 = vpop.permute.xlu0 %2073  ;;  %v2003_v49 = vpop.permute.xlu1 %2002  ;;  %v2108_v55 = vld [vmem:[#allocation3 + $0xd8] sm:$0xff] }
 0x2ab   :  { %2079 = vst.msk [vmem:[#allocation3 + $0xf8] sm:$0xf0] %vm1142_vm12, %v2074_v48  ;;  %7450 = vmatpush3.bf16.msra.mxu1 %v7740_v33 }
 0x2ae   :  { %v1812_v51 = vpop.permute.xlu0 %1811  ;;  %v1988_v53 = vpop.permute.xlu1 %1987 }
 0x2af   :  { %1816 = vst.msk [vmem:[#allocation3 + $0xf0] sm:$0xf] %vm962_vm9, %v1812_v51  ;;  %v2107_v42 = vld [vmem:[#allocation3 + $0xd0] sm:$0xff] }
 0x2b0   :  { %1993 = vst.msk [vmem:[#allocation3 + $0xf0] sm:$0xf0] %vm1110_vm10, %v1988_v53 }
 0x2b1   :  { %2008 = vst.msk [vmem:[#allocation3 + $0xf0] sm:$0xf0] %vm1126_vm11, %v2003_v49 }
 0x2b2   :  { %v2061_v16 = vpop.permute.xlu0 %2060  ;;  %v2018_v54 = vpop.permute.xlu1 %2017  ;;  %v2112_v52 = vld [vmem:[#allocation3 + $0xf8] sm:$0xff] }
 0x2b3   :  { %2023 = vst.msk [vmem:[#allocation3 + $0xf0] sm:$0xf0] %vm1142_vm12, %v2018_v54  ;;  %v2132_v56 = vpack.c.bf16 %v2112_v52, %v2108_v55 }
 0x2b5   :  { %2528 = vmatprep.mubr.bf16.mxu1 %v2132_v56 }
 0x2b6   :  { %v2046_v26 = vpop.permute.xlu0 %2045  ;;  %v1990_v57 = vpop.permute.xlu1 %1989 }
 0x2b7   :  { %2050 = vst.msk [vmem:[#allocation3 + $0x118] sm:$0xff] %vm932_vm4, %v2046_v26  ;;  %1994 = vst.msk [vmem:[#allocation3 + $0x110] sm:$0xff] %vm932_vm4, %v1990_v57  ;;  %v7741_v26 = vld [vmem:[%s11068_s6 + $0x68] sm:$0xff]  }
 0x2b8   :  { %2065 = vst.msk [vmem:[#allocation3 + $0x118] sm:$0xff] %vm946_vm5, %v2061_v16  ;;  %v7742_v57 = vld [vmem:[%s11068_s6 + $0x28] sm:$0xff]   ;;  %7451 = vmatprep.subr.bf16.mxu1 %v7741_v26 }
 0x2b9   :  { %7452 = vmatpush3.bf16.msra.mxu1 %v7742_v57 }
 0x2ba   :  { %v2076_v58 = vpop.permute.xlu0 %2075  ;;  %v2005_v59 = vpop.permute.xlu1 %2004  ;;  %v2111_v40 = vld [vmem:[#allocation3 + $0xf0] sm:$0xff] }
 0x2bb   :  { %2080 = vst.msk [vmem:[#allocation3 + $0x118] sm:$0xff] %vm960_vm8, %v2076_v58  ;;  %v2131_v60 = vpack.c.bf16 %v2111_v40, %v2107_v42 }
 0x2bc   :  { %2009 = vst.msk [vmem:[#allocation3 + $0x110] sm:$0xff] %vm946_vm5, %v2005_v59 }
 0x2bd   :  { %2529 = vmatmul.mubr.bf16.gmra.mrb[32].mxu1 %v2131_v60 }
 0x2be   :  { %v2020_v50 = vpop.permute.xlu1 %2019 }
 0x2bf   :  { %2024 = vst.msk [vmem:[#allocation3 + $0x110] sm:$0xff] %vm960_vm8, %v2020_v50 }
 0x2c1   :  { %v7365_v61 = vpop.f32.mrb[0].mxu1 }
 0x2c2   :  { %v7366_v63 = vpop.f32.mrb[1].mxu1  ;;  %v2116_v0 = vld [vmem:[#allocation3 + $0x118] sm:$0xff] }
 0x2c3   :  { %v7367_v2 = vadd.f32 %v7366_v63, %v7365_v61  ;;  %v7368_v4 = vpop.f32.mrb[2].mxu1  ;;  %v2136_v6 = vpack.c.bf16 %v2116_v0, %v2116_v0 }
 0x2c4   :  { %v7369_v7 = vpop.f32.mrb[3].mxu1 }
 0x2c5   :  { %v7370_v9 = vadd.f32 %v7369_v7, %v7368_v4  ;;  %2536 = vmatprep.mubr.bf16.mxu1 %v2136_v6  ;;  %v2435_v48 = vadd.f32 %v7367_v2, %v9457_v46  ;;  %v7743_v4 = vld [vmem:[%s11068_s6 + $0x70] sm:$0xff]  }
 0x2c6   :  { %v2115_v62 = vld [vmem:[#allocation3 + $0x110] sm:$0xff]  ;;  %v7744_v6 = vld [vmem:[%s11068_s6 + $0x30] sm:$0xff]   ;;  %7453 = vmatprep.subr.bf16.mxu1 %v7743_v4 }
 0x2c7   :  { %v2135_v5 = vpack.c.bf16 %v2115_v62, %v2115_v62  ;;  %v2438_v16 = vadd.f32 %v7370_v9, %v9457_v46  ;;  %7454 = vmatpush3.bf16.msra.mxu1 %v7744_v6 }
 0x2c9   :  { %2537 = vmatmul.mubr.bf16.gmra.mrb[36].mxu1 %v2135_v5 }
 0x2ea   :  { %v7371_v10 = vpop.f32.mrb[4].mxu1 }
 0x2eb   :  { %v7372_v11 = vpop.f32.mrb[5].mxu1 }
 0x2ec   :  { %v7373_v12 = vadd.f32 %v7372_v11, %v7371_v10  ;;  %v7374_v13 = vpop.f32.mrb[6].mxu1 }
 0x2ed   :  { %v7375_v14 = vpop.f32.mrb[7].mxu1 }
 0x2ee   :  { %v9412_v15 = vadd.f32 %v7375_v14, %v7374_v13  ;;  %v2443_v42 = vadd.f32 %v7373_v12, %v9457_v46 }
 0x2f0   :  { %v2446_v7 = vadd.f32 %v9412_v15, %v9457_v46 }
 0x322   :  { %v7377_v17 = vpop.f32.mrb[8].mxu1 }
 0x323   :  { %v7378_v18 = vpop.f32.mrb[9].mxu1 }
 0x324   :  { %v9414_v19 = vadd.f32 %v7378_v18, %v7377_v17  ;;  %v7380_v20 = vpop.f32.mrb[10].mxu1 }
 0x325   :  { %v7381_v21 = vpop.f32.mrb[11].mxu1 }
 0x326   :  { %v9416_v23 = vadd.f32 %v7381_v21, %v7380_v20  ;;  %v7745_v21 = vld [vmem:[%s11068_s6 + $0x78] sm:$0xff]   ;;  %v2451_v3 = vadd.f32 %v9414_v19, %v9457_v46 }
 0x327   :  { %7455 = vmatprep.subr.bf16.mxu1 %v7745_v21 }
 0x328   :  { %7456 = vmatpush3.bf16.msra.mxu1 %v7746_v25  ;;  %v2454_v19 = vadd.f32 %v9416_v23, %v9457_v46 }
 0x35d   :  { %v7383_v22 = vpop.f32.mrb[12].mxu1 }
 0x35e   :  { %v7384_v35 = vpop.f32.mrb[13].mxu1 }
 0x35f   :  { %v9448_v36 = vadd.f32 %v7384_v35, %v7383_v22  ;;  %v7386_v37 = vpop.f32.mrb[14].mxu1  ;;  %v7747_v22 = vld [vmem:[%s11068_s6 + $0xc0] sm:$0xff]  }
 0x360   :  { %v7387_v8 = vpop.f32.mrb[15].mxu1  ;;  %7469 = vmatprep.subr.bf16.mxu1 %v7747_v22  ;;  %v7752_v22 = vld [vmem:[%s11068_s6 + $0x90] sm:$0xff]  }
 0x361   :  { %v9450_v34 = vadd.f32 %v7387_v8, %v7386_v37 }
 0x363   :  { %v2462_v57 = vadd.f32 %v9450_v34, %v9457_v46 }
 0x365   :  { %v7389_v38 = vpop.f32.mrb[16].mxu1 }
 0x366   :  { %v7390_v39 = vpop.f32.mrb[17].mxu1 }
 0x367   :  { %v9452_v43 = vadd.f32 %v7390_v39, %v7389_v38  ;;  %v7392_v44 = vpop.f32.mrb[18].mxu1 }
 0x368   :  { %v7393_v45 = vpop.f32.mrb[19].mxu1 }
 0x369   :  { %v2467_v6 = vadd.f32 %v9452_v43, %v9457_v46 }
 0x36d   :  { %v7411_v47 = vpop.f32.mrb[20].mxu1 }
 0x36e   :  { %v7412_v41 = vpop.f32.mrb[21].mxu1 }
 0x36f   :  { %v7413_v49 = vadd.f32 %v7412_v41, %v7411_v47  ;;  %v7414_v51 = vpop.f32.mrb[22].mxu1 }
 0x370   :  { %v7415_v53 = vpop.f32.mrb[23].mxu1 }
 0x371   :  { %v2507_v54 = vadd.f32 %v7413_v49, %v2435_v48  ;;  %v7416_v55 = vadd.f32 %v7415_v53, %v7414_v51 }
 0x373   :  { %v2544_v52 = vmax.f32 %v2507_v54, 0.0  ;;  %v2510_v56 = vadd.f32 %v7416_v55, %v2438_v16  ;;  %v2459_v55 = vadd.f32 %v9448_v36, %v9457_v46 }
 0x375   :  { %v2545_v58 = vmax.f32 %v2510_v56, 0.0  ;;  %v7417_v59 = vpop.f32.mrb[24].mxu1  ;;  %2554 = vst.msk [vmem:[#allocation4] sm:$0xff] %vm2553_vm13, %v2544_v52  ;;  %v2558_v40 = vrot.slane %v2544_v52, 2  ;;  %v2566_v50 = vrot.slane %v2544_v52, 4 }
 0x376   :  { %v7418_v60 = vpop.f32.mrb[25].mxu1 }
 0x377   :  { %v2559_v61 = vrot.slane %v2545_v58, 2  ;;  %v2567_v63 = vrot.slane %v2545_v58, 4  ;;  %v7419_v0 = vadd.f32 %v7418_v60, %v7417_v59  ;;  %v7420_v2 = vpop.f32.mrb[26].mxu1  ;;  %v2579_v14 = vrot.slane %v2545_v58, 6 }
 0x378   :  { %v7421_v9 = vpop.f32.mrb[27].mxu1 }
 0x379   :  { %v2515_v62 = vadd.f32 %v7419_v0, %v2443_v42  ;;  %v7422_v5 = vadd.f32 %v7421_v9, %v7420_v2  ;;  %v2560_v10 = vsel %vm2557_vm14, %v2558_v40, %v2559_v61  ;;  %v2568_v11 = vsel %vm1088_vm3, %v2566_v50, %v2567_v63 }
 0x37a   :  { %2570 = vst.msk [vmem:[#allocation4 + $0x8] sm:$0xff] %vm2553_vm13, %v2568_v11 }
 0x37b   :  { %v2546_v12 = vmax.f32 %v2515_v62, 0.0  ;;  %v2518_v13 = vadd.f32 %v7422_v5, %v2446_v7 }
 0x37d   :  { %v2547_v17 = vmax.f32 %v2518_v13, 0.0  ;;  %v7423_v18 = vpop.f32.mrb[28].mxu1  ;;  %2609 = vst.msk [vmem:[#allocation4 + $0x30] sm:$0xff] %vm2553_vm13, %v2546_v12  ;;  %v2572_v15 = vrot.slane %v2546_v12, 4  ;;  %v2580_v20 = vrot.slane %v2546_v12, 6 }
 0x37e   :  { %v7424_v27 = vpop.f32.mrb[29].mxu1 }
 0x37f   :  { %v7425_v24 = vadd.f32 %v7424_v27, %v7423_v18  ;;  %v7426_v28 = vpop.f32.mrb[30].mxu1  ;;  %2610 = vrot.lane.b32.xlu1 %v2547_v17, %s8433_s19  ;;  %2588 = vst.msk [vmem:[#allocation4 + $0x18] sm:$0xff] %vm2553_vm13, %v2547_v17  ;;  %2633 = vst.msk [vmem:[#allocation4 + $0x50] sm:$0xff] %vm2553_vm13, %v2547_v17  ;;  %v2573_v29 = vsel %vm1088_vm3, %v2567_v63, %v2572_v15  ;;  %v2581_v30 = vsel %vm2578_vm15, %v2579_v14, %v2580_v20 }
 0x380   :  { %v7427_v31 = vpop.f32.mrb[31].mxu1  ;;  %2574 = vrot.lane.b32.xlu0 %v2573_v29, %s8433_s19  ;;  %2604 = vst.msk [vmem:[#allocation4 + $0x28] sm:$0xff] %vm2553_vm13, %v2573_v29  ;;  %2583 = vst.msk [vmem:[#allocation4 + $0x10] sm:$0xff] %vm2553_vm13, %v2581_v30  ;;  %v2591_v8 = vrot.slane %v2547_v17, 2  ;;  %v2598_v45 = vrot.slane %v2547_v17, 4 }
 0x381   :  { %v2523_v32 = vadd.f32 %v7425_v24, %v2451_v3  ;;  %v7428_v33 = vadd.f32 %v7427_v31, %v7426_v28  ;;  %v7748_v28 = vld [vmem:[%s11068_s6 + $0x80] sm:$0xff]  }
 0x383   :  { %v2548_v35 = vmax.f32 %v2523_v32, 0.0  ;;  %v2526_v37 = vadd.f32 %v7428_v33, %v2454_v19  ;;  %2605 = vrot.lane.b32.xlu1 %v2581_v30, %s8433_s19  ;;  %v7749_v30 = vld [vmem:[%s11068_s6 + $0xc8] sm:$0xff]   ;;  %v7751_v32 = vld [vmem:[%s11068_s6 + $0xd0] sm:$0xff]  }
 0x384   :  { %2561 = vrot.lane.b32.xlu0 %v2560_v10, %s8433_s19  ;;  %v7750_v19 = vld [vmem:[%s11068_s6 + $0x88] sm:$0xff]  }
 0x385   :  { %v2592_v38 = vrot.slane %v2548_v35, 2  ;;  %v2599_v39 = vrot.slane %v2548_v35, 4  ;;  %v2549_v44 = vmax.f32 %v2526_v37, 0.0  ;;  %v2625_v47 = vrot.slane %v2548_v35, 6  ;;  %v7753_v35 = vld [vmem:[%s11068_s6 + $0xd8] sm:$0xff]  }
 0x386   :  { %v7754_v37 = vld [vmem:[%s11068_s6 + $0x98] sm:$0xff]  }
 0x387   :  { %2632 = vst.msk [vmem:[#allocation4 + $0x48] sm:$0xff] %vm2553_vm13, %v2549_v44  ;;  %2663 = vst.msk [vmem:[#allocation4 + $0x80] sm:$0xff] %vm2553_vm13, %v2549_v44  ;;  %v2621_v23 = vrot.slane %v2549_v44, 4  ;;  %v2593_v41 = vsel %vm2557_vm14, %v2591_v8, %v2592_v38  ;;  %v2626_v48 = vrot.slane %v2549_v44, 6  ;;  %v2600_v49 = vsel %vm1088_vm3, %v2598_v45, %v2599_v39  ;;  %v7755_v38 = vld [vmem:[%s11068_s6 + $0xe0] sm:$0xff]   ;;  %v7757_v45 = vld [vmem:[%s11068_s6 + $0xe8] sm:$0xff]  }
 0x388   :  { %2615 = vst.msk [vmem:[#allocation4 + $0x38] sm:$0xff] %vm2553_vm13, %v2593_v41  ;;  %2602 = vst.msk [vmem:[#allocation4 + $0x20] sm:$0xff] %vm2553_vm13, %v2600_v49 }
 0x389   :  { %2635 = vst.msk [vmem:[#allocation4 + $0x58] sm:$0xff] %vm2553_vm13, %v2600_v49  ;;  %v2622_v51 = vsel %vm1088_vm3, %v2599_v39, %v2621_v23  ;;  %v2627_v53 = vsel %vm2578_vm15, %v2625_v47, %v2626_v48  ;;  %v7756_v39 = vld [vmem:[%s11068_s6 + $0xa0] sm:$0xff]   ;;  %v7758_v23 = vld [vmem:[%s11068_s6 + $0xa8] sm:$0xff]  }
 0x38a   :  { %2636 = vrot.lane.b32.xlu0 %v2622_v51, %s8433_s19  ;;  %2624 = vst.msk [vmem:[#allocation4 + $0x40] sm:$0xff] %vm2553_vm13, %v2622_v51  ;;  %2661 = vst.msk [vmem:[#allocation4 + $0x78] sm:$0xff] %vm2553_vm13, %v2622_v51  ;;  %v7759_v51 = vld [vmem:[%s11068_s6 + $0xf0] sm:$0xff]  }
 0x38b   :  { %2641 = vst.msk [vmem:[#allocation4 + $0x60] sm:$0xff] %vm2553_vm13, %v2627_v53 }
 0x38e   :  { %2594 = vrot.lane.b32.xlu0 %v2593_v41, %s8433_s19 }
 0x390   :  { %v7429_v16 = vpop.f32.mrb[32].mxu1 }
 0x391   :  { %v7430_v54 = vpop.f32.mrb[33].mxu1 }
 0x392   :  { %2584 = vrot.lane.b32.xlu0 %v2546_v12, %s8433_s19  ;;  %v7431_v52 = vadd.f32 %v7430_v54, %v7429_v16  ;;  %v7432_v56 = vpop.f32.mrb[34].mxu1 }
 0x393   :  { %v7433_v26 = vpop.f32.mrb[35].mxu1 }
 0x394   :  { %v2531_v58 = vadd.f32 %v7431_v52, %v2459_v55  ;;  %v7434_v59 = vadd.f32 %v7433_v26, %v7432_v56  ;;  %v7760_v55 = vld [vmem:[%s11068_s6 + $0xb0] sm:$0xff]  }
 0x396   :  { %v2550_v42 = vmax.f32 %v2531_v58, 0.0  ;;  %v2534_v40 = vadd.f32 %v7434_v59, %v2462_v57  ;;  %v7761_v59 = vld [vmem:[%s11068_s6 + $0xf8] sm:$0xff]  }
 0x398   :  { %2646 = vst.msk [vmem:[#allocation4 + $0x68] sm:$0xff] %vm2553_vm13, %v2550_v42  ;;  %v2551_v60 = vmax.f32 %v2534_v40, 0.0  ;;  %2664 = vrot.lane.b32.xlu1 %v2550_v42, %s8433_s19  ;;  %v2649_v63 = vrot.slane %v2550_v42, 2  ;;  %v2656_v0 = vrot.slane %v2550_v42, 4  ;;  %v7762_v40 = vld [vmem:[%s11068_s6 + $0xb8] sm:$0xff]  }
 0x39a   :  { %v2650_v50 = vrot.slane %v2551_v60, 2  ;;  %v2657_v61 = vrot.slane %v2551_v60, 4  ;;  %v2679_v11 = vrot.slane %v2551_v60, 6  ;;  %v7763_v60 = vld [vmem:[%s11068_s6 + $0x100] sm:$0xff]  }
 0x39c   :  { %v7435_v36 = vpop.f32.mrb[36].mxu1  ;;  %2628 = vrot.lane.b32.xlu1 %v2627_v53, %s8433_s19  ;;  %v2651_v2 = vsel %vm2557_vm14, %v2649_v63, %v2650_v50  ;;  %v2658_v34 = vsel %vm1088_vm3, %v2656_v0, %v2657_v61 }
 0x39d   :  { %v7436_v4 = vpop.f32.mrb[37].mxu1  ;;  %2652 = vrot.lane.b32.xlu0 %v2651_v2, %s8433_s19  ;;  %2669 = vst.msk [vmem:[#allocation4 + $0x88] sm:$0xff] %vm2553_vm13, %v2651_v2  ;;  %2660 = vst.msk [vmem:[#allocation4 + $0x70] sm:$0xff] %vm2553_vm13, %v2658_v34 }
 0x39e   :  { %v7437_v7 = vadd.f32 %v7436_v4, %v7435_v36  ;;  %v7438_v9 = vpop.f32.mrb[38].mxu1  ;;  %v7764_v36 = vld [vmem:[%s11068_s6 + $0x108] sm:$0xff]  }
 0x39f   :  { %v7439_v62 = vpop.f32.mrb[39].mxu1 }
 0x3a0   :  { %v2539_v5 = vadd.f32 %v7437_v7, %v2467_v6  ;;  %2616 = vrot.lane.b32.xlu1 %v2600_v49, %s8433_s19  ;;  %v7765_v6 = vld [vmem:[%s11068_s6 + $0x110] sm:$0xff]  }
 0x3a1   :  { %2642 = vrot.lane.b32.xlu0 %v2549_v44, %s8433_s19  ;;  %v2696_v7 = vld [vmem:[#allocation4 + $0x48] sm:$0xff] }
 0x3a2   :  { %v2552_v10 = vmax.f32 %v2539_v5, 0.0  ;;  %v2691_v5 = vld [vmem:[#allocation4 + $0x20] sm:$0xff] }
 0x3a4   :  { %v2675_v12 = vrot.slane %v2552_v10, 4  ;;  %v2680_v13 = vrot.slane %v2552_v10, 6  ;;  %2686 = vst.msk [vmem:[#allocation4 + $0x98] sm:$0xff] %vm2553_vm13, %v2552_v10 }
 0x3a6   :  { %v2681_v14 = vsel %vm2578_vm15, %v2679_v11, %v2680_v13  ;;  %v2676_v17 = vsel %vm1088_vm3, %v2657_v61, %v2675_v12  ;;  %v7766_v11 = vld [vmem:[%s11068_s6 + $0x118] sm:$0xff]   ;;  %v2711_v12 = vpack.c.bf16 %v2696_v7, %v2691_v5  ;;  %v6875_v5 = vld [vmem:[%s11069_s7] ss:$0 sm:$0xff]  ;;  %vm6740_vm3 = vcmask 41984  }
 0x3a7   :  { %2682 = vrot.lane.b32.xlu1 %v2681_v14, %s8433_s19  ;;  %2678 = vst.msk [vmem:[#allocation4 + $0x90] sm:$0xff] %vm2553_vm13, %v2676_v17  ;;  %v2701_v14 = vld [vmem:[#allocation4 + $0x70] sm:$0xff] }
 0x3ab   :  { %2670 = vrot.lane.b32.xlu1 %v2658_v34, %s8433_s19  ;;  %v2706_v13 = vld [vmem:[#allocation4 + $0x98] sm:$0xff] }
 0x3ac   :  { %v2716_v17 = vpack.c.bf16 %v2706_v13, %v2701_v14 }
 0x3f1   :  { %v2611_v43 = vpop.permute.xlu1 %2610 }
 0x3f2   :  { %2613 = vst.msk [vmem:[#allocation4 + $0x30] sm:$0xff] %vm2564_vm0, %v2611_v43  ;;  %v2575_v46 = vpop.permute.xlu0 %2574  ;;  %v7767_v43 = vld [vmem:[%s11070_s8 + $0x8] ss:$16 sps:$4 sm:$0xff]  }
 0x3f3   :  { %2577 = vst.msk [vmem:[#allocation4 + $0x8] sm:$0xff] %vm2564_vm0, %v2575_v46  ;;  %v7769_v46 = vld [vmem:[%s11070_s8 + $0xc] ss:$16 sps:$4 sm:$0xff]  }
 0x3f4   :  { %5063 = vmatprep.subr.bf16.mxu0 %v7769_v46 }
 0x3f5   :  { %v2606_v18 = vpop.permute.xlu1 %2605  ;;  %5064 = vmatpush1.bf16.msra.mxu0 %v7767_v43 }
 0x3f6   :  { %2608 = vst.msk [vmem:[#allocation4 + $0x28] sm:$0xff] %vm2564_vm0, %v2606_v18  ;;  %v2562_v15 = vpop.permute.xlu0 %2561  ;;  %v7770_v18 = vld [vmem:[%s11070_s8 + $0x28] ss:$16 sps:$4 sm:$0xff]  }
 0x3f7   :  { %2565 = vst.msk [vmem:[#allocation4] sm:$0xff] %vm2564_vm0, %v2562_v15  ;;  %v7772_v15 = vld [vmem:[%s11070_s8 + $0x2c] ss:$16 sps:$4 sm:$0xff]  }
 0x3f8   :  { %5065 = vmatprep.subr.bf16.mxu0 %v7772_v15 }
 0x3f9   :  { %v2693_v20 = vld [vmem:[#allocation4 + $0x30] sm:$0xff]  ;;  %5066 = vmatpush1.bf16.msra.mxu0 %v7770_v18 }
 0x3fa   :  { %v2688_v21 = vld [vmem:[#allocation4 + $0x8] sm:$0xff] }
 0x3fb   :  { %v2708_v25 = vpack.c.bf16 %v2693_v20, %v2688_v21  ;;  %v7773_v20 = vld [vmem:[%s11070_s8 + $0x48] ss:$16 sps:$4 sm:$0xff]   ;;  %v7775_v21 = vld [vmem:[%s11070_s8 + $0x4c] ss:$16 sps:$4 sm:$0xff]  }
 0x3fc   :  { %v2637_v3 = vpop.permute.xlu0 %2636  ;;  %5067 = vmatprep.subr.bf16.mxu0 %v7775_v21 }
 0x3fd   :  { %2639 = vst.msk [vmem:[#allocation4 + $0x58] sm:$0xff] %vm2564_vm0, %v2637_v3  ;;  %3050 = vmatprep.mubr.bf16.mxu1 %v2708_v25  ;;  %v2692_v27 = vld [vmem:[#allocation4 + $0x28] sm:$0xff]  ;;  %5068 = vmatpush1.bf16.msra.mxu0 %v7773_v20  ;;  %v7776_v25 = vld [vmem:[%s11070_s8 + $0x68] ss:$16 sps:$4 sm:$0xff]   ;;  %v7778_v3 = vld [vmem:[%s11070_s8 + $0x6c] ss:$16 sps:$4 sm:$0xff]  }
 0x3fe   :  { %v2687_v24 = vld [vmem:[#allocation4] sm:$0xff]  ;;  %5069 = vmatprep.subr.bf16.mxu0 %v7778_v3 }
 0x3ff   :  { %v2707_v29 = vpack.c.bf16 %v2692_v27, %v2687_v24  ;;  %v7779_v27 = vld [vmem:[%s11070_s8 + $0x88] ss:$16 sps:$4 sm:$0xff]   ;;  %v7781_v24 = vld [vmem:[%s11070_s8 + $0x8c] ss:$16 sps:$4 sm:$0xff]  }
 0x400   :  { %v2595_v31 = vpop.permute.xlu0 %2594 }
 0x401   :  { %2597 = vst.msk [vmem:[#allocation4 + $0x18] sm:$0xff] %vm2564_vm0, %v2595_v31  ;;  %2634 = vst.msk [vmem:[#allocation4 + $0x50] sm:$0xff] %vm2564_vm0, %v2595_v31  ;;  %3051 = vmatmul.mubr.bf16.vlgmr.msra.gmra.mrb[40].mxu1 %v2707_v29  ;;  %5070 = vmatpush1.bf16.msra.mxu0 %v7776_v25  ;;  %v7791_v29 = vld [vmem:[%s11070_s8] ss:$16 sps:$4 sm:$0xff]   ;;  %v7793_v31 = vld [vmem:[%s11070_s8 + $0x4] ss:$16 sps:$4 sm:$0xff]  }
 0x402   :  { %7470 = vmatpush3.bf16.msra.mxu1 %v7748_v28  ;;  %v7784_v28 = vld [vmem:[%s11070_s8 + $0xac] ss:$16 sps:$4 sm:$0xff]   ;;  %5071 = vmatprep.subr.bf16.mxu0 %v7781_v24  ;;  %v8436_v24 = vmov 1983009808  }
 0x403   :  { %7471 = vmatprep.subr.bf16.mxu1 %v7749_v30  ;;  %v7782_v30 = vld [vmem:[%s11070_s8 + $0xa8] ss:$16 sps:$4 sm:$0xff]  }
 0x404   :  { %v2585_v33 = vpop.permute.xlu0 %2584  ;;  %v2698_v48 = vld [vmem:[#allocation4 + $0x58] sm:$0xff] }
 0x405   :  { %2587 = vst.msk [vmem:[#allocation4 + $0x10] sm:$0xff] %vm2564_vm0, %v2585_v33  ;;  %5072 = vmatpush1.bf16.msra.mxu0 %v7779_v27  ;;  %v7794_v33 = vld [vmem:[%s11070_s8 + $0x20] ss:$16 sps:$4 sm:$0xff]  }
 0x406   :  { %7472 = vmatpush3.bf16.msra.mxu1 %v7750_v19  ;;  %v7796_v19 = vld [vmem:[%s11070_s8 + $0x24] ss:$16 sps:$4 sm:$0xff]   ;;  %5073 = vmatprep.subr.bf16.mxu0 %v7784_v28  ;;  %v3173_v28 = vunpack.c.l.s4 %v8436_v24 }
 0x407   :  { %7473 = vmatprep.subr.bf16.mxu1 %v7751_v32  ;;  %v7787_v32 = vld [vmem:[%s11070_s8 + $0xcc] ss:$16 sps:$4 sm:$0xff]  }
 0x408   :  { %v2697_v54 = vld [vmem:[#allocation4 + $0x50] sm:$0xff]  ;;  %v2690_v56 = vld [vmem:[#allocation4 + $0x18] sm:$0xff] }
 0x409   :  { %5074 = vmatpush1.bf16.msra.mxu0 %v7782_v30 }
 0x40a   :  { %7474 = vmatpush3.bf16.msra.mxu1 %v7752_v22  ;;  %v2665_v8 = vpop.permute.xlu1 %2664  ;;  %v7785_v22 = vld [vmem:[%s11070_s8 + $0xc8] ss:$16 sps:$4 sm:$0xff]   ;;  %5075 = vmatprep.subr.bf16.mxu0 %v7787_v32 }
 0x40b   :  { %7475 = vmatprep.subr.bf16.mxu1 %v7753_v35  ;;  %2667 = vst.msk [vmem:[#allocation4 + $0x80] sm:$0xff] %vm2564_vm0, %v2665_v8  ;;  %v7799_v35 = vld [vmem:[%s11070_s8 + $0x44] ss:$16 sps:$4 sm:$0xff]   ;;  %v7797_v8 = vld [vmem:[%s11070_s8 + $0x40] ss:$16 sps:$4 sm:$0xff]  }
 0x40c   :  { %v2689_v63 = vld [vmem:[#allocation4 + $0x10] sm:$0xff] }
 0x40d   :  { %5076 = vmatpush1.bf16.msra.mxu0 %v7785_v22  ;;  %v7835_v22 = vld [vmem:[%s11070_s8 + $0x164] ss:$16 sps:$4 sm:$0xff]  }
 0x40e   :  { %7476 = vmatpush3.bf16.msra.mxu1 %v7754_v37  ;;  %v2629_v44 = vpop.permute.xlu1 %2628  ;;  %v7790_v37 = vld [vmem:[%s11070_s8 + $0xec] ss:$16 sps:$4 sm:$0xff]  }
 0x40f   :  { %7477 = vmatprep.subr.bf16.mxu1 %v7755_v38  ;;  %2631 = vst.msk [vmem:[#allocation4 + $0x40] sm:$0xff] %vm2564_vm0, %v2629_v44  ;;  %2662 = vst.msk [vmem:[#allocation4 + $0x78] sm:$0xff] %vm2564_vm0, %v2629_v44  ;;  %v2653_v47 = vpop.permute.xlu0 %2652  ;;  %v7788_v38 = vld [vmem:[%s11070_s8 + $0xe8] ss:$16 sps:$4 sm:$0xff]   ;;  %5077 = vmatprep.subr.bf16.mxu0 %v7790_v37  ;;  %v7802_v44 = vld [vmem:[%s11070_s8 + $0x10c] ss:$16 sps:$4 sm:$0xff]   ;;  %v3174_v37 = vunpack.c.0.s8 %v3173_v28 }
 0x410   :  { %2655 = vst.msk [vmem:[#allocation4 + $0x68] sm:$0xff] %vm2564_vm0, %v2653_v47  ;;  %v7800_v47 = vld [vmem:[%s11070_s8 + $0x108] ss:$16 sps:$4 sm:$0xff]  }
 0x411   :  { %5078 = vmatpush1.bf16.msra.mxu0 %v7788_v38 }
 0x412   :  { %7478 = vmatpush3.bf16.msra.mxu1 %v7756_v39  ;;  %v2617_v41 = vpop.permute.xlu1 %2616  ;;  %v2703_v49 = vld [vmem:[#allocation4 + $0x80] sm:$0xff]  ;;  %v7805_v39 = vld [vmem:[%s11070_s8 + $0x64] ss:$16 sps:$4 sm:$0xff]   ;;  %5079 = vmatprep.subr.bf16.mxu0 %v7802_v44 }
 0x413   :  { %7479 = vmatprep.subr.bf16.mxu1 %v7757_v45  ;;  %2619 = vst.msk [vmem:[#allocation4 + $0x38] sm:$0xff] %vm2564_vm0, %v2617_v41  ;;  %v2643_v53 = vpop.permute.xlu0 %2642  ;;  %v2713_v16 = vpack.c.bf16 %v2703_v49, %v2698_v48  ;;  %v7803_v45 = vld [vmem:[%s11070_s8 + $0x60] ss:$16 sps:$4 sm:$0xff]   ;;  %v7817_v41 = vld [vmem:[%s11070_s8 + $0x12c] ss:$16 sps:$4 sm:$0xff]  }
 0x414   :  { %2645 = vst.msk [vmem:[#allocation4 + $0x60] sm:$0xff] %vm2564_vm0, %v2643_v53  ;;  %v7806_v48 = vld [vmem:[%s11070_s8 + $0x80] ss:$16 sps:$4 sm:$0xff]   ;;  %v7811_v49 = vld [vmem:[%s11070_s8 + $0xa4] ss:$16 sps:$4 sm:$0xff]  }
 0x415   :  { %3058 = vmatprep.mubr.bf16.mxu1 %v2713_v16  ;;  %5080 = vmatpush1.bf16.msra.mxu0 %v7800_v47  ;;  %v7832_v53 = vld [vmem:[%s11070_s8 + $0x14c] ss:$16 sps:$4 sm:$0xff]   ;;  %v7809_v16 = vld [vmem:[%s11070_s8 + $0xa0] ss:$16 sps:$4 sm:$0xff]  }
 0x416   :  { %7480 = vmatpush3.bf16.msra.mxu1 %v7758_v23  ;;  %v2702_v52 = vld [vmem:[#allocation4 + $0x78] sm:$0xff]  ;;  %v2695_v26 = vld [vmem:[#allocation4 + $0x40] sm:$0xff]  ;;  %5081 = vmatprep.subr.bf16.mxu0 %v7817_v41 }
 0x417   :  { %7481 = vmatprep.subr.bf16.mxu1 %v7759_v51  ;;  %v2712_v57 = vpack.c.bf16 %v2702_v52, %v2697_v54  ;;  %v2710_v58 = vpack.c.bf16 %v2695_v26, %v2690_v56  ;;  %v2700_v2 = vld [vmem:[#allocation4 + $0x68] sm:$0xff]  ;;  %v7815_v51 = vld [vmem:[%s11070_s8 + $0x128] ss:$16 sps:$4 sm:$0xff]  }
 0x418   :  { %v7808_v23 = vld [vmem:[%s11070_s8 + $0x84] ss:$16 sps:$4 sm:$0xff]   ;;  %v7812_v52 = vld [vmem:[%s11070_s8 + $0xc0] ss:$16 sps:$4 sm:$0xff]  }
 0x419   :  { %v2683_v42 = vpop.permute.xlu1 %2682  ;;  %3059 = vmatmul.mubr.bf16.gmra.mrb[44].mxu1 %v2712_v57  ;;  %v7814_v54 = vld [vmem:[%s11070_s8 + $0xc4] ss:$16 sps:$4 sm:$0xff]   ;;  %5082 = vmatpush1.bf16.msra.mxu0 %v7815_v51  ;;  %v7818_v26 = vld [vmem:[%s11070_s8 + $0xe0] ss:$16 sps:$4 sm:$0xff]  }
 0x41a   :  { %2685 = vst.msk [vmem:[#allocation4 + $0x90] sm:$0xff] %vm2564_vm0, %v2683_v42  ;;  %7482 = vmatpush3.bf16.msra.mxu1 %v7760_v55  ;;  %3099 = vmatprep.mubr.bf16.mxu1 %v2710_v58  ;;  %v2694_v50 = vld [vmem:[#allocation4 + $0x38] sm:$0xff]  ;;  %v7830_v55 = vld [vmem:[%s11070_s8 + $0x148] ss:$16 sps:$4 sm:$0xff]  }
 0x41b   :  { %7483 = vmatprep.subr.bf16.mxu1 %v7761_v59  ;;  %v2709_v0 = vpack.c.bf16 %v2694_v50, %v2689_v63  ;;  %v2699_v9 = vld [vmem:[#allocation4 + $0x60] sm:$0xff]  ;;  %5083 = vmatprep.subr.bf16.mxu0 %v7832_v53  ;;  %v7820_v56 = vld [vmem:[%s11070_s8 + $0xe4] ss:$16 sps:$4 sm:$0xff]   ;;  %v7821_v58 = vld [vmem:[%s11070_s8 + $0x100] ss:$16 sps:$4 sm:$0xff]  }
 0x41c   :  { %v7823_v57 = vld [vmem:[%s11070_s8 + $0x104] ss:$16 sps:$4 sm:$0xff]   ;;  %v7824_v42 = vld [vmem:[%s11070_s8 + $0x120] ss:$16 sps:$4 sm:$0xff]  }
 0x41d   :  { %v2671_v61 = vpop.permute.xlu1 %2670  ;;  %5084 = vmatpush1.bf16.msra.mxu0 %v7830_v55  ;;  %v7826_v59 = vld [vmem:[%s11070_s8 + $0x124] ss:$16 sps:$4 sm:$0xff]   ;;  %v7841_v41 = vld [vmem:[%s11070_s8 + $0x180] ss:$16 sps:$4 sm:$0xff]  }
 0x41e   :  { %2673 = vst.msk [vmem:[#allocation4 + $0x88] sm:$0xff] %vm2564_vm0, %v2671_v61  ;;  %7484 = vmatpush3.bf16.msra.mxu1 %v7762_v40  ;;  %v7829_v40 = vld [vmem:[%s11070_s8 + $0x144] ss:$16 sps:$4 sm:$0xff]  }
 0x41f   :  { %7547 = vmatprep.subr.bf16.mxu1 %v7763_v60  ;;  %v7843_v53 = vld [vmem:[%s11070_s8 + $0x184] ss:$16 sps:$4 sm:$0xff]  }
 0x421   :  { %3100 = vmatmul.mubr.bf16.vlgmr.msra.gmra.mrb[48].mxu1 %v2709_v0  ;;  %v2705_v34 = vld [vmem:[#allocation4 + $0x90] sm:$0xff] }
 0x422   :  { %7548 = vmatpush3.bf16.msra.mxu1 %v7763_v60  ;;  %v2715_v4 = vpack.c.bf16 %v2705_v34, %v2700_v2  ;;  %v7827_v60 = vld [vmem:[%s11070_s8 + $0x140] ss:$16 sps:$4 sm:$0xff]  }
 0x423   :  { %7549 = vmatprep.subr.bf16.mxu1 %v7764_v36 }
 0x424   :  { %3107 = vmatprep.mubr.bf16.mxu1 %v2715_v4 }
 0x425   :  { %v2704_v62 = vld [vmem:[#allocation4 + $0x88] sm:$0xff] }
 0x426   :  { %7550 = vmatpush3.bf16.msra.mxu1 %v7764_v36  ;;  %v2714_v10 = vpack.c.bf16 %v2704_v62, %v2699_v9 }
 0x427   :  { %7551 = vmatprep.subr.bf16.mxu1 %v7765_v6 }
 0x429   :  { %3108 = vmatmul.mubr.bf16.gmra.mrb[52].mxu1 %v2714_v10 }
 0x42a   :  { %7552 = vmatpush3.bf16.msra.mxu1 %v7765_v6  ;;  %7555 = vmatprep.mubr.msk.bf16.mxu1 %vm2553_vm13, %v2711_v12 }
 0x42b   :  { %7553 = vmatprep.subr.bf16.mxu1 %v7766_v11 }
 0x42e   :  { %7554 = vmatpush3.bf16.msra.mxu1 %v7766_v11 }
 0x42f   :  { %4899 = vmatprep.subr.bf16.mxu1 %v7793_v31 }
 0x431   :  { %7556 = vmatmul.mubr.msk.bf16.vlgmr.msra.gmra.mrb[56].mxu1 %vm2553_vm13, %v2716_v17 }
 0x432   :  { %4900 = vmatpush1.bf16.msra.mxu1 %v7791_v29  ;;  %v3175_v29 = vlaneseq }
 0x433   :  { %4901 = vmatprep.subr.bf16.mxu1 %v7796_v19 }
 0x436   :  { %4902 = vmatpush1.bf16.msra.mxu1 %v7794_v33  ;;  %v7833_v33 = vld [vmem:[%s11070_s8 + $0x160] ss:$16 sps:$4 sm:$0xff]  }
 0x437   :  { %4903 = vmatprep.subr.bf16.mxu1 %v7799_v35  ;;  %v7836_v35 = vld [vmem:[%s11070_s8 + $0x168] ss:$16 sps:$4 sm:$0xff]  }
 0x43a   :  { %4904 = vmatpush1.bf16.msra.mxu1 %v7797_v8  ;;  %v9760_v8 = vshrl.u32 %v3175_v29, 7  ;;  %v7870_v29 = vld [vmem:[%s11070_s8 + $0x204] ss:$16 sps:$4 sm:$0xff]  }
 0x43b   :  { %4905 = vmatprep.subr.bf16.mxu1 %v7805_v39  ;;  %v7838_v39 = vld [vmem:[%s11070_s8 + $0x16c] ss:$16 sps:$4 sm:$0xff]  }
 0x43c   :  { %5085 = vmatprep.subr.bf16.mxu0 %v7838_v39 }
 0x43d   :  { %5086 = vmatpush1.bf16.msra.mxu0 %v7836_v35 }
 0x43e   :  { %4906 = vmatpush1.bf16.msra.mxu1 %v7803_v45 }
 0x43f   :  { %4907 = vmatprep.subr.bf16.mxu1 %v7808_v23  ;;  %v7839_v23 = vld [vmem:[%s11083_s21 + $0x1b4] ss:$8 sps:$4 sm:$0xff]  }
 0x440   :  { %785 = vmatprep.mubr.bf16.mxu0 %v7839_v23 }
 0x442   :  { %4908 = vmatpush1.bf16.msra.mxu1 %v7806_v48  ;;  %v9772_v48 = vsub.s32 %v3174_v37, %v9760_v8 }
 0x443   :  { %4909 = vmatprep.subr.bf16.mxu1 %v7811_v49 }
 0x446   :  { %4910 = vmatpush1.bf16.msra.mxu1 %v7809_v16  ;;  %v7844_v16 = vld [vmem:[%s11070_s8 + $0x188] ss:$16 sps:$4 sm:$0xff]  }
 0x447   :  { %4911 = vmatprep.subr.bf16.mxu1 %v7814_v54 }
 0x44a   :  { %4912 = vmatpush1.bf16.msra.mxu1 %v7812_v52 }
 0x44b   :  { %4913 = vmatprep.subr.bf16.mxu1 %v7820_v56  ;;  %v7846_v56 = vld [vmem:[%s11070_s8 + $0x18c] ss:$16 sps:$4 sm:$0xff]  }
 0x44c   :  { %5087 = vmatprep.subr.bf16.mxu0 %v7846_v56 }
 0x44d   :  { %5088 = vmatpush1.bf16.msra.mxu0 %v7844_v16  ;;  %v7868_v16 = vld [vmem:[%s11070_s8 + $0x200] ss:$16 sps:$4 sm:$0xff]  }
 0x44e   :  { %4914 = vmatpush1.bf16.msra.mxu1 %v7818_v26  ;;  %v7847_v26 = vld [vmem:[%s11083_s21 + $0x1b0] ss:$8 sps:$4 sm:$0xff]  }
 0x44f   :  { %4915 = vmatprep.subr.bf16.mxu1 %v7823_v57  ;;  %786 = vmatmul.mubr.bf16.gmra.mrb[108].mxu0 %v7847_v26  ;;  %v7877_v26 = vld [vmem:[%s11070_s8 + $0x224] ss:$16 sps:$4 sm:$0xff]  }
 0x452   :  { %4916 = vmatpush1.bf16.msra.mxu1 %v7821_v58 }
 0x453   :  { %4917 = vmatprep.subr.bf16.mxu1 %v7826_v59 }
 0x456   :  { %4918 = vmatpush1.bf16.msra.mxu1 %v7824_v42 }
 0x457   :  { %4919 = vmatprep.subr.bf16.mxu1 %v7829_v40  ;;  %v7850_v40 = vld [vmem:[%s11070_s8 + $0x1a4] ss:$16 sps:$4 sm:$0xff]  }
 0x45a   :  { %4920 = vmatpush1.bf16.msra.mxu1 %v7827_v60 }
 0x45b   :  { %4921 = vmatprep.subr.bf16.mxu1 %v7835_v22 }
 0x45e   :  { %4922 = vmatpush1.bf16.msra.mxu1 %v7833_v33 }
 0x45f   :  { %4923 = vmatprep.subr.bf16.mxu1 %v7843_v53 }
 0x462   :  { %4924 = vmatpush1.bf16.msra.mxu1 %v7841_v41 }
 0x463   :  { %4925 = vmatprep.subr.bf16.mxu1 %v7850_v40  ;;  %v7886_v40 = vld [vmem:[%s11070_s8 + $0x24c] ss:$16 sps:$4 sm:$0xff]  }
 0x4d4   :  { %v7457_v50 = vpop.f32.mrb[40].mxu1 }
 0x4d5   :  { %v7458_v61 = vpop.f32.mrb[41].mxu1 }
 0x4d6   :  { %v7459_v63 = vadd.f32 %v7458_v61, %v7457_v50  ;;  %v7460_v0 = vpop.f32.mrb[42].mxu1 }
 0x4d7   :  { %v7461_v36 = vpop.f32.mrb[43].mxu1 }
 0x4d8   :  { %v7462_v2 = vadd.f32 %v7461_v36, %v7460_v0  ;;  %v3053_v12 = vadd.f32 %v7459_v63, %v6875_v5  ;;  %v7848_v63 = vld [vmem:[%s11070_s8 + $0x1a0] ss:$16 sps:$4 sm:$0xff]   ;;  %v7853_v0 = vld [vmem:[%s11070_s8 + $0x1ac] ss:$16 sps:$4 sm:$0xff]  }
 0x4d9   :  { %5089 = vmatprep.subr.bf16.mxu0 %v7853_v0  ;;  %4926 = vmatpush1.bf16.msra.mxu1 %v7848_v63  ;;  %v7892_v63 = vld [vmem:[%s11070_s8 + $0x26c] ss:$16 sps:$4 sm:$0xff]   ;;  %v7887_v0 = vld [vmem:[%s11070_s8 + $0x260] ss:$16 sps:$4 sm:$0xff]  }
 0x4da   :  { %v3056_v43 = vadd.f32 %v7462_v2, %v6875_v5 }
 0x4ec   :  { %v7463_v34 = vpop.f32.mrb[44].mxu1 }
 0x4ed   :  { %v7464_v4 = vpop.f32.mrb[45].mxu1 }
 0x4ee   :  { %v7465_v6 = vadd.f32 %v7464_v4, %v7463_v34  ;;  %v7466_v7 = vpop.f32.mrb[46].mxu1  ;;  %v7851_v34 = vld [vmem:[%s11070_s8 + $0x1a8] ss:$16 sps:$4 sm:$0xff]  }
 0x4ef   :  { %v7467_v9 = vpop.f32.mrb[47].mxu1  ;;  %5090 = vmatpush1.bf16.msra.mxu0 %v7851_v34  ;;  %v7898_v34 = vld [vmem:[%s11070_s8 + $0x28c] ss:$16 sps:$4 sm:$0xff]  }
 0x4f0   :  { %v7468_v62 = vadd.f32 %v7467_v9, %v7466_v7  ;;  %v3061_v25 = vadd.f32 %v7465_v6, %v6875_v5 }
 0x4f2   :  { %v3064_v31 = vadd.f32 %v7468_v62, %v6875_v5  ;;  %v114_v62 = vld [vmem:[%s11083_s21 + $0x1c0] sm:$0x11] }
 0x4f4   :  { %v7485_v10 = vpop.f32.mrb[48].mxu1 }
 0x4f5   :  { %v7486_v11 = vpop.f32.mrb[49].mxu1 }
 0x4f6   :  { %v7487_v13 = vadd.f32 %v7486_v11, %v7485_v10  ;;  %v7488_v14 = vpop.f32.mrb[50].mxu1  ;;  %v6825_v10 = vcombine.high %v114_v62, %v114_v62  ;;  %v7857_v11 = vld [vmem:[%s11070_s8 + $0x1c4] ss:$16 sps:$4 sm:$0xff]  }
 0x4f7   :  { %v7489_v17 = vpop.f32.mrb[51].mxu1  ;;  %4927 = vmatprep.subr.bf16.mxu1 %v7857_v11  ;;  %v7910_v11 = vld [vmem:[%s11070_s8 + $0x2cc] ss:$16 sps:$4 sm:$0xff]  }
 0x4f8   :  { %v7490_v46 = vadd.f32 %v7489_v17, %v7488_v14  ;;  %v3102_v18 = vadd.f32 %v7487_v13, %v3053_v12  ;;  %v7855_v14 = vld [vmem:[%s11070_s8 + $0x1c0] ss:$16 sps:$4 sm:$0xff]   ;;  %v7860_v17 = vld [vmem:[%s11070_s8 + $0x1cc] ss:$16 sps:$4 sm:$0xff]   ;;  %793 = vmatprep.mubr.bf16.mxu0 %v6825_v10  ;;  %v7907_v10 = vld [vmem:[%s11070_s8 + $0x2c4] ss:$16 sps:$4 sm:$0xff]  }
 0x4f9   :  { %5091 = vmatprep.subr.bf16.mxu0 %v7860_v17  ;;  %4928 = vmatpush1.bf16.msra.mxu1 %v7855_v14  ;;  %v7913_v14 = vld [vmem:[%s11070_s8 + $0x2e4] ss:$16 sps:$4 sm:$0xff]   ;;  %v7916_v17 = vld [vmem:[%s11070_s8 + $0x2ec] ss:$16 sps:$4 sm:$0xff]  }
 0x4fa   :  { %v3105_v15 = vadd.f32 %v7490_v46, %v3056_v43  ;;  %v7858_v43 = vld [vmem:[%s11070_s8 + $0x1c8] ss:$16 sps:$4 sm:$0xff]   ;;  %v6824_v46 = vcombine.low %v114_v62, %v114_v62  ;;  %v7899_v62 = vld [vmem:[%s11070_s8 + $0x2a0] ss:$16 sps:$4 sm:$0xff]  }
 0x4fb   :  { %5092 = vmatpush1.bf16.msra.mxu0 %v7858_v43  ;;  %v7911_v43 = vld [vmem:[%s11070_s8 + $0x2e0] ss:$16 sps:$4 sm:$0xff]  }
 0x4fc   :  { %v7491_v20 = vpop.f32.mrb[52].mxu1  ;;  %794 = vmatmul.mubr.bf16.gmra.mrb[112].mxu0 %v6824_v46  ;;  %v7914_v46 = vld [vmem:[%s11070_s8 + $0x2e8] ss:$16 sps:$4 sm:$0xff]  }
 0x4fd   :  { %v7492_v21 = vpop.f32.mrb[53].mxu1 }
 0x4fe   :  { %v7493_v3 = vadd.f32 %v7492_v21, %v7491_v20  ;;  %v7494_v27 = vpop.f32.mrb[54].mxu1  ;;  %v7867_v21 = vld [vmem:[%s11070_s8 + $0x1ec] ss:$16 sps:$4 sm:$0xff]  }
 0x4ff   :  { %v7495_v30 = vpop.f32.mrb[55].mxu1  ;;  %5093 = vmatprep.subr.bf16.mxu0 %v7867_v21  ;;  %v7920_v21 = vld [vmem:[%s11070_s8 + $0x308] ss:$16 sps:$4 sm:$0xff]  }
 0x500   :  { %v7496_v19 = vadd.f32 %v7495_v30, %v7494_v27  ;;  %v3110_v32 = vadd.f32 %v7493_v3, %v3061_v25  ;;  %v7862_v3 = vld [vmem:[%s11070_s8 + $0x1e0] ss:$16 sps:$4 sm:$0xff]   ;;  %v7865_v27 = vld [vmem:[%s11070_s8 + $0x1e8] ss:$16 sps:$4 sm:$0xff]  }
 0x501   :  { %5094 = vmatpush1.bf16.msra.mxu0 %v7865_v27  ;;  %v7923_v27 = vld [vmem:[%s11070_s8 + $0x320] ss:$16 sps:$4 sm:$0xff]  }
 0x502   :  { %v3113_v38 = vadd.f32 %v7496_v19, %v3064_v31  ;;  %v7873_v31 = vld [vmem:[%s11070_s8 + $0x20c] ss:$16 sps:$4 sm:$0xff]  }
 0x503   :  { %5104 = vmatprep.subr.bf16.mxu0 %v7873_v31  ;;  %v7932_v31 = vld [vmem:[%s11070_s8 + $0x348] ss:$16 sps:$4 sm:$0xff]  }
 0x504   :  { %v7557_v44 = vpop.f32.mrb[56].mxu1 }
 0x505   :  { %v3159_v45 = vadd.f32 %v7557_v44, %v3110_v32  ;;  %v3150_v47 = vpop.f32.mrb[57].mxu1 }
 0x506   :  { %v3151_v49 = vadd.f32 %v3150_v47, %v3102_v18  ;;  %v7558_v51 = vpop.f32.mrb[58].mxu1  ;;  %v7864_v18 = vld [vmem:[%s11070_s8 + $0x1e4] ss:$16 sps:$4 sm:$0xff]  }
 0x507   :  { %v3167_v54 = vmax.f32 %v3159_v45, 0.0  ;;  %v3162_v55 = vadd.f32 %v7558_v51, %v3113_v38  ;;  %v3153_v52 = vpop.f32.mrb[59].mxu1  ;;  %4929 = vmatprep.subr.bf16.mxu1 %v7864_v18  ;;  %v7919_v18 = vld [vmem:[%s11070_s8 + $0x304] ss:$16 sps:$4 sm:$0xff]  }
 0x508   :  { %v3165_v57 = vmax.f32 %v3151_v49, 0.0  ;;  %v3154_v58 = vadd.f32 %v3153_v52, %v3105_v15  ;;  %4930 = vmatpush1.bf16.msra.mxu1 %v7862_v3  ;;  %v7928_v3 = vld [vmem:[%s11070_s8 + $0x32c] ss:$16 sps:$4 sm:$0xff]  }
 0x509   :  { %v3243_v59 = vcombine.high %v3167_v54, %v3167_v54  ;;  %v3168_v42 = vmax.f32 %v3162_v55, 0.0  ;;  %3229 = vst.msk [vmem:[#allocation5 + $0x8] sm:$0x3] %vm3169_vm1, %v3167_v54  ;;  %v3237_v15 = vrot.slane %v3167_v54, %v9772_v48  ;;  %4940 = vmatprep.subr.bf16.mxu1 %v7870_v29  ;;  %v7871_v54 = vld [vmem:[%s11070_s8 + $0x208] ss:$16 sps:$4 sm:$0xff]  }
 0x50a   :  { %v3178_v60 = vrot.slane %v3165_v57, %v9772_v48  ;;  %v3185_v50 = vcombine.high %v3165_v57, %v3165_v57  ;;  %v3166_v61 = vmax.f32 %v3154_v58, 0.0  ;;  %3170 = vst.msk [vmem:[#allocation5] sm:$0x3] %vm3169_vm1, %v3165_v57  ;;  %v7880_v57 = vld [vmem:[%s11070_s8 + $0x22c] ss:$16 sps:$4 sm:$0xff]  }
 0x50b   :  { %v3250_v36 = vrot.slane %v3243_v59, %v9772_v48  ;;  %v3272_v2 = vcombine.high %v3168_v42, %v3168_v42  ;;  %3258 = vst.msk [vmem:[#allocation5 + $0xc] sm:$0x3] %vm3169_vm1, %v3168_v42  ;;  %v3238_v24 = vcombine.high %v3237_v15, %v3237_v15  ;;  %v3266_v28 = vrot.slane %v3168_v42, %v9772_v48  ;;  %v7875_v58 = vld [vmem:[%s11070_s8 + $0x220] ss:$16 sps:$4 sm:$0xff]   ;;  %v7878_v59 = vld [vmem:[%s11070_s8 + $0x228] ss:$16 sps:$4 sm:$0xff]  }
 0x50c   :  { %v3179_v4 = vcombine.high %v3178_v60, %v3178_v60  ;;  %v3192_v6 = vrot.slane %v3185_v50, %v9772_v48  ;;  %v3208_v7 = vrot.slane %v3166_v61, %v9772_v48  ;;  %v3214_v9 = vcombine.high %v3166_v61, %v3166_v61  ;;  %3200 = vst.msk [vmem:[#allocation5 + $0x4] sm:$0x3] %vm3169_vm1, %v3166_v61  ;;  %v7883_v42 = vld [vmem:[%s11070_s8 + $0x244] ss:$16 sps:$4 sm:$0xff]   ;;  %v7881_v60 = vld [vmem:[%s11070_s8 + $0x240] ss:$16 sps:$4 sm:$0xff]  }
 0x50d   :  { %v3279_v5 = vrot.slane %v3272_v2, %v9772_v48  ;;  %3252 = vst.msk [vmem:[#allocation5 + $0xa] sm:$0x3] %vm3169_vm1, %v3250_v36  ;;  %v3253_v30 = vcombine.high %v3250_v36, %v3250_v36  ;;  %v3267_v19 = vcombine.high %v3266_v28, %v3266_v28  ;;  %v7884_v50 = vld [vmem:[%s11070_s8 + $0x248] ss:$16 sps:$4 sm:$0xff]   ;;  %v7889_v61 = vld [vmem:[%s11070_s8 + $0x264] ss:$16 sps:$4 sm:$0xff]  }
 0x50e   :  { %v3221_v12 = vrot.slane %v3214_v9, %v9772_v48  ;;  %3180 = vrot.lane.b32.xlu0 %v3179_v4, %s8433_s19  ;;  %v3195_v13 = vcombine.high %v3192_v6, %v3192_v6  ;;  %3194 = vst.msk [vmem:[#allocation5 + $0x2] sm:$0x3] %vm3169_vm1, %v3192_v6  ;;  %v3209_v20 = vcombine.high %v3208_v7, %v3208_v7  ;;  %v7890_v36 = vld [vmem:[%s11070_s8 + $0x268] ss:$16 sps:$4 sm:$0xff]   ;;  %v7895_v2 = vld [vmem:[%s11070_s8 + $0x284] ss:$16 sps:$4 sm:$0xff]  }
 0x50f   :  { %3281 = vst.msk [vmem:[#allocation5 + $0xe] sm:$0x3] %vm3169_vm1, %v3279_v5  ;;  %v3282_v32 = vcombine.high %v3279_v5, %v3279_v5  ;;  %v7893_v4 = vld [vmem:[%s11070_s8 + $0x280] ss:$16 sps:$4 sm:$0xff]   ;;  %v7896_v6 = vld [vmem:[%s11070_s8 + $0x288] ss:$16 sps:$4 sm:$0xff]  }
 0x510   :  { %3196 = vrot.lane.b32.xlu1 %v3195_v13, %s8433_s19  ;;  %3223 = vst.msk [vmem:[#allocation5 + $0x6] sm:$0x3] %vm3169_vm1, %v3221_v12  ;;  %v3224_v25 = vcombine.high %v3221_v12, %v3221_v12  ;;  %v7901_v7 = vld [vmem:[%s11070_s8 + $0x2a4] ss:$16 sps:$4 sm:$0xff]   ;;  %v7904_v9 = vld [vmem:[%s11070_s8 + $0x2ac] ss:$16 sps:$4 sm:$0xff]  }
 0x511   :  { %v7902_v5 = vld [vmem:[%s11070_s8 + $0x2a8] ss:$16 sps:$4 sm:$0xff]   ;;  %v7905_v12 = vld [vmem:[%s11070_s8 + $0x2c0] ss:$16 sps:$4 sm:$0xff]   ;;  %v7922_v15 = vld [vmem:[%s11070_s8 + $0x30c] ss:$16 sps:$4 sm:$0xff]  }
 0x512   :  { %3210 = vrot.lane.b32.xlu0 %v3209_v20, %s8433_s19  ;;  %v7908_v13 = vld [vmem:[%s11070_s8 + $0x2c8] ss:$16 sps:$4 sm:$0xff]   ;;  %v7917_v20 = vld [vmem:[%s11070_s8 + $0x300] ss:$16 sps:$4 sm:$0xff]   ;;  %v7931_v28 = vld [vmem:[%s11070_s8 + $0x344] ss:$16 sps:$4 sm:$0xff]  }
 0x513   :  { %v7934_v29 = vld [vmem:[%s11070_s8 + $0x34c] ss:$16 sps:$4 sm:$0xff]  }
 0x514   :  { %3225 = vrot.lane.b32.xlu1 %v3224_v25, %s8433_s19  ;;  %v7925_v25 = vld [vmem:[%s11070_s8 + $0x324] ss:$16 sps:$4 sm:$0xff]  }
 0x516   :  { %3239 = vrot.lane.b32.xlu0 %v3238_v24, %s8433_s19  ;;  %v7926_v24 = vld [vmem:[%s11070_s8 + $0x328] ss:$16 sps:$4 sm:$0xff]  }
 0x518   :  { %3254 = vrot.lane.b32.xlu1 %v3253_v30, %s8433_s19  ;;  %v7929_v30 = vld [vmem:[%s11070_s8 + $0x340] ss:$16 sps:$4 sm:$0xff]  }
 0x51a   :  { %3268 = vrot.lane.b32.xlu0 %v3267_v19, %s8433_s19  ;;  %v7937_v19 = vld [vmem:[%s11070_s8 + $0x364] ss:$16 sps:$4 sm:$0xff]  }
 0x51c   :  { %3283 = vrot.lane.b32.xlu1 %v3282_v32, %s8433_s19  ;;  %v7940_v32 = vld [vmem:[%s11070_s8 + $0x36c] ss:$16 sps:$4 sm:$0xff]   ;;  %s11084_s19 = sld [smem:[#allocation10_spill]] }
 0x580   :  { %v3181_v33 = vpop.permute.xlu0 %3180 }
 0x581   :  { %3184 = vst.msk [vmem:[#allocation5] sm:$0x3] %vm3183_vm2, %v3181_v33  ;;  %v7935_v33 = vld [vmem:[%s11070_s8 + $0x360] ss:$16 sps:$4 sm:$0xff]  }
 0x582   :  { %v3197_v22 = vpop.permute.xlu1 %3196 }
 0x583   :  { %3199 = vst.msk [vmem:[#allocation5 + $0x2] sm:$0x3] %vm3183_vm2, %v3197_v22  ;;  %v7938_v22 = vld [vmem:[%s11070_s8 + $0x368] ss:$16 sps:$4 sm:$0xff]  }
 0x584   :  { %v3211_v35 = vpop.permute.xlu0 %3210 }
 0x585   :  { %3213 = vst.msk [vmem:[#allocation5 + $0x4] sm:$0x3] %vm3183_vm2, %v3211_v35  ;;  %v7943_v35 = vld [vmem:[%s11070_s8 + $0x384] ss:$16 sps:$4 sm:$0xff]  }
 0x586   :  { %v3226_v37 = vpop.permute.xlu1 %3225 }
 0x587   :  { %3228 = vst.msk [vmem:[#allocation5 + $0x6] sm:$0x3] %vm3183_vm2, %v3226_v37  ;;  %v7946_v37 = vld [vmem:[%s11070_s8 + $0x38c] ss:$16 sps:$4 sm:$0xff]  }
 0x588   :  { %v3240_v38 = vpop.permute.xlu0 %3239 }
 0x589   :  { %3242 = vst.msk [vmem:[#allocation5 + $0x8] sm:$0x3] %vm3183_vm2, %v3240_v38  ;;  %v7941_v38 = vld [vmem:[%s11070_s8 + $0x380] ss:$16 sps:$4 sm:$0xff]  }
 0x58a   :  { %v3255_v39 = vpop.permute.xlu1 %3254 }
 0x58b   :  { %3257 = vst.msk [vmem:[#allocation5 + $0xa] sm:$0x3] %vm3183_vm2, %v3255_v39  ;;  %v7944_v39 = vld [vmem:[%s11070_s8 + $0x388] ss:$16 sps:$4 sm:$0xff]  }
 0x58c   :  { %v3269_v44 = vpop.permute.xlu0 %3268 }
 0x58d   :  { %3271 = vst.msk [vmem:[#allocation5 + $0xc] sm:$0x3] %vm3183_vm2, %v3269_v44  ;;  %v7949_v44 = vld [vmem:[%s11070_s8 + $0x3a4] ss:$16 sps:$4 sm:$0xff]  }
 0x58e   :  { %v3284_v45 = vpop.permute.xlu1 %3283  ;;  %v3287_v47 = vld [vmem:[#allocation5] sm:$0xff] }
 0x58f   :  { %3286 = vst.msk [vmem:[#allocation5 + $0xe] sm:$0x3] %vm3183_vm2, %v3284_v45  ;;  %v3298_v23 = vrot.slane %v3287_v47, %v9772_v48  ;;  %v3291_v41 = vcombine.high %v3287_v47, %v3287_v47  ;;  %v7952_v45 = vld [vmem:[%s11070_s8 + $0x3ac] ss:$16 sps:$4 sm:$0xff]   ;;  %v7947_v47 = vld [vmem:[%s11070_s8 + $0x3a0] ss:$16 sps:$4 sm:$0xff]  }
 0x591   :  { %v3306_v49 = vcombine.high %v3298_v23, %v3298_v23  ;;  %v9865_v51 = vrot.slane %v3291_v41, %v9772_v48  ;;  %v3333_v52 = vpack.c.bf16 %v3298_v23, %v3298_v23  ;;  %v7950_v23 = vld [vmem:[%s11070_s8 + $0x3a8] ss:$16 sps:$4 sm:$0xff]   ;;  %v7955_v41 = vld [vmem:[%s11070_s8 + $0x3c4] ss:$16 sps:$4 sm:$0xff]  }
 0x593   :  { %v3334_v53 = vpack.c.bf16 %v3306_v49, %v3306_v49  ;;  %v3307_v55 = vcombine.high %v9865_v51, %v9865_v51  ;;  %v7958_v49 = vld [vmem:[%s11070_s8 + $0x3cc] ss:$16 sps:$4 sm:$0xff]  }
 0x595   :  { %4931 = vmatprep.mubr.bf16.mxu1 %v3334_v53  ;;  %5095 = vmatprep.mubr.bf16.mxu0 %v3334_v53  ;;  %v3336_v56 = vpack.c.bf16 %v3307_v55, %v3307_v55  ;;  %v7961_v55 = vld [vmem:[%s11070_s8 + $0x3e4] ss:$16 sps:$4 sm:$0xff]  }
 0x596   :  { %4932 = vmatmul.mubr.bf16.vlgmr.msra.gmra.mrb[60].mxu1 %v3333_v52  ;;  %5096 = vmatmul.mubr.bf16.vlgmr.msra.gmra.mrb[116].mxu0 %v3333_v52  ;;  %v10037_v53 = vld [vmem:[#allocation5 + $0x8] sm:$0xff]  ;;  %v7964_v52 = vld [vmem:[%s11070_s8 + $0x3ec] ss:$16 sps:$4 sm:$0xff]  }
 0x597   :  { %4941 = vmatpush1.bf16.msra.mxu1 %v7868_v16  ;;  %5105 = vmatpush1.bf16.msra.mxu0 %v7871_v54  ;;  %v7953_v16 = vld [vmem:[%s11070_s8 + $0x3c0] ss:$16 sps:$4 sm:$0xff]   ;;  %v7956_v54 = vld [vmem:[%s11070_s8 + $0x3c8] ss:$16 sps:$4 sm:$0xff]  }
 0x598   :  { %4972 = vmatprep.mubr.bf16.mxu1 %v3336_v56  ;;  %5136 = vmatprep.mubr.bf16.mxu0 %v3336_v56  ;;  %v10053_v56 = vrot.slane %v10037_v53, %v9772_v48 }
 0x599   :  { %4942 = vmatprep.subr.bf16.mxu1 %v7877_v26  ;;  %5106 = vmatprep.subr.bf16.mxu0 %v7880_v57  ;;  %v7959_v26 = vld [vmem:[%s11070_s8 + $0x3e0] ss:$16 sps:$4 sm:$0xff]   ;;  %v7962_v57 = vld [vmem:[%s11070_s8 + $0x3e8] ss:$16 sps:$4 sm:$0xff]  }
 0x59b   :  { %4943 = vmatpush1.bf16.msra.mxu1 %v7875_v58  ;;  %5107 = vmatpush1.bf16.msra.mxu0 %v7878_v59  ;;  %v7967_v58 = vld [vmem:[%s11070_s8 + $0x404] ss:$16 sps:$4 sm:$0xff]   ;;  %v7970_v59 = vld [vmem:[%s11070_s8 + $0x40c] ss:$16 sps:$4 sm:$0xff]  }
 0x59c   :  { %4944 = vmatprep.subr.bf16.mxu1 %v7883_v42  ;;  %5108 = vmatprep.subr.bf16.mxu0 %v7886_v40  ;;  %v3323_v42 = vcombine.high %v10053_v56, %v10053_v56  ;;  %v7965_v40 = vld [vmem:[%s11070_s8 + $0x400] ss:$16 sps:$4 sm:$0xff]  }
 0x59f   :  { %4945 = vmatpush1.bf16.msra.mxu1 %v7881_v60  ;;  %5109 = vmatpush1.bf16.msra.mxu0 %v7884_v50  ;;  %v3335_v60 = vpack.c.bf16 %v9865_v51, %v9865_v51  ;;  %v7968_v50 = vld [vmem:[%s11070_s8 + $0x408] ss:$16 sps:$4 sm:$0xff]   ;;  %v7971_v51 = vld [vmem:[%s11070_s8 + $0x420] ss:$16 sps:$4 sm:$0xff]  }
 0x5a0   :  { %4946 = vmatprep.subr.bf16.mxu1 %v7889_v61  ;;  %5110 = vmatprep.subr.bf16.mxu0 %v7892_v63  ;;  %v3338_v61 = vpack.c.bf16 %v3323_v42, %v3323_v42  ;;  %v7973_v63 = vld [vmem:[%s11070_s8 + $0x424] ss:$16 sps:$4 sm:$0xff]   ;;  %v8037_v42 = vld [vmem:[%s11070_s8 + $0x580] ss:$16 sps:$4 sm:$0xff]  }
 0x5a3   :  { %4947 = vmatpush1.bf16.msra.mxu1 %v7887_v0  ;;  %5111 = vmatpush1.bf16.msra.mxu0 %v7890_v36  ;;  %v7976_v0 = vld [vmem:[%s11070_s8 + $0x42c] ss:$16 sps:$4 sm:$0xff]   ;;  %v7974_v36 = vld [vmem:[%s11070_s8 + $0x428] ss:$16 sps:$4 sm:$0xff]  }
 0x5a4   :  { %4948 = vmatprep.subr.bf16.mxu1 %v7895_v2  ;;  %5112 = vmatprep.subr.bf16.mxu0 %v7898_v34  ;;  %v7979_v2 = vld [vmem:[%s11070_s8 + $0x444] ss:$16 sps:$4 sm:$0xff]   ;;  %v7982_v34 = vld [vmem:[%s11070_s8 + $0x44c] ss:$16 sps:$4 sm:$0xff]  }
 0x5a7   :  { %4949 = vmatpush1.bf16.msra.mxu1 %v7893_v4  ;;  %5113 = vmatpush1.bf16.msra.mxu0 %v7896_v6  ;;  %v7977_v4 = vld [vmem:[%s11070_s8 + $0x440] ss:$16 sps:$4 sm:$0xff]   ;;  %v7980_v6 = vld [vmem:[%s11070_s8 + $0x448] ss:$16 sps:$4 sm:$0xff]  }
 0x5a8   :  { %4950 = vmatprep.subr.bf16.mxu1 %v7901_v7  ;;  %5114 = vmatprep.subr.bf16.mxu0 %v7904_v9  ;;  %v7985_v7 = vld [vmem:[%s11070_s8 + $0x464] ss:$16 sps:$4 sm:$0xff]   ;;  %v787_v9 = vpop.f32.mrb[108].mxu0 }
 0x5a9   :  { %v8058_v9 = vld [vmem:[%s11070_s8 + $0x5e8] ss:$16 sps:$4 sm:$0xff]  }
 0x5ab   :  { %4951 = vmatpush1.bf16.msra.mxu1 %v7899_v62  ;;  %5115 = vmatpush1.bf16.msra.mxu0 %v7902_v5  ;;  %v7988_v62 = vld [vmem:[%s11070_s8 + $0x46c] ss:$16 sps:$4 sm:$0xff]   ;;  %v789_v5 = vpop.f32.mrb[109].mxu0 }
 0x5ac   :  { %4952 = vmatprep.subr.bf16.mxu1 %v7907_v10  ;;  %5116 = vmatprep.subr.bf16.mxu0 %v7910_v11  ;;  %v790_v10 = vpop.f32.mrb[110].mxu0  ;;  %v7983_v11 = vld [vmem:[%s11070_s8 + $0x460] ss:$16 sps:$4 sm:$0xff]  }
 0x5ad   :  { %v8061_v10 = vld [vmem:[%s11070_s8 + $0x600] ss:$16 sps:$4 sm:$0xff]  }
 0x5af   :  { %4953 = vmatpush1.bf16.msra.mxu1 %v7905_v12  ;;  %5117 = vmatpush1.bf16.msra.mxu0 %v7908_v13  ;;  %v792_v12 = vpop.f32.mrb[111].mxu0  ;;  %v7986_v13 = vld [vmem:[%s11070_s8 + $0x468] ss:$16 sps:$4 sm:$0xff]  }
 0x5b0   :  { %4954 = vmatprep.subr.bf16.mxu1 %v7913_v14  ;;  %5118 = vmatprep.subr.bf16.mxu0 %v7916_v17  ;;  %v7991_v14 = vld [vmem:[%s11070_s8 + $0x484] ss:$16 sps:$4 sm:$0xff]   ;;  %v7994_v17 = vld [vmem:[%s11070_s8 + $0x48c] ss:$16 sps:$4 sm:$0xff]   ;;  %v8064_v12 = vld [vmem:[%s11070_s8 + $0x608] ss:$16 sps:$4 sm:$0xff]  }
 0x5b3   :  { %4955 = vmatpush1.bf16.msra.mxu1 %v7911_v43  ;;  %5119 = vmatpush1.bf16.msra.mxu0 %v7914_v46  ;;  %v7989_v43 = vld [vmem:[%s11070_s8 + $0x480] ss:$16 sps:$4 sm:$0xff]   ;;  %v7992_v46 = vld [vmem:[%s11070_s8 + $0x488] ss:$16 sps:$4 sm:$0xff]  }
 0x5b4   :  { %4956 = vmatprep.subr.bf16.mxu1 %v7919_v18  ;;  %5120 = vmatprep.subr.bf16.mxu0 %v7922_v15  ;;  %v7997_v18 = vld [vmem:[%s11070_s8 + $0x4a4] ss:$16 sps:$4 sm:$0xff]  }
 0x5b7   :  { %4957 = vmatpush1.bf16.msra.mxu1 %v7917_v20  ;;  %5121 = vmatpush1.bf16.msra.mxu0 %v7920_v21  ;;  %v8000_v20 = vld [vmem:[%s11070_s8 + $0x4ac] ss:$16 sps:$4 sm:$0xff]  }
 0x5b8   :  { %4958 = vmatprep.subr.bf16.mxu1 %v7925_v25  ;;  %5122 = vmatprep.subr.bf16.mxu0 %v7928_v3  ;;  %v7995_v3 = vld [vmem:[%s11070_s8 + $0x4a0] ss:$16 sps:$4 sm:$0xff]  }
 0x5bb   :  { %4959 = vmatpush1.bf16.msra.mxu1 %v7923_v27  ;;  %5123 = vmatpush1.bf16.msra.mxu0 %v7926_v24  ;;  %v7998_v24 = vld [vmem:[%s11070_s8 + $0x4a8] ss:$16 sps:$4 sm:$0xff]  }
 0x5bc   :  { %4960 = vmatprep.subr.bf16.mxu1 %v7931_v28  ;;  %5124 = vmatprep.subr.bf16.mxu0 %v7934_v29  ;;  %v8003_v28 = vld [vmem:[%s11070_s8 + $0x4c4] ss:$16 sps:$4 sm:$0xff]   ;;  %v8006_v29 = vld [vmem:[%s11070_s8 + $0x4cc] ss:$16 sps:$4 sm:$0xff]  }
 0x5bf   :  { %4961 = vmatpush1.bf16.msra.mxu1 %v7929_v30  ;;  %5125 = vmatpush1.bf16.msra.mxu0 %v7932_v31  ;;  %v8001_v30 = vld [vmem:[%s11070_s8 + $0x4c0] ss:$16 sps:$4 sm:$0xff]   ;;  %v8004_v31 = vld [vmem:[%s11070_s8 + $0x4c8] ss:$16 sps:$4 sm:$0xff]  }
 0x5c0   :  { %4962 = vmatprep.subr.bf16.mxu1 %v7937_v19  ;;  %5126 = vmatprep.subr.bf16.mxu0 %v7940_v32  ;;  %v8009_v19 = vld [vmem:[%s11070_s8 + $0x4e4] ss:$16 sps:$4 sm:$0xff]   ;;  %v8012_v32 = vld [vmem:[%s11070_s8 + $0x4ec] ss:$16 sps:$4 sm:$0xff]  }
 0x5c3   :  { %4963 = vmatpush1.bf16.msra.mxu1 %v7935_v33  ;;  %5127 = vmatpush1.bf16.msra.mxu0 %v7938_v22  ;;  %v8007_v33 = vld [vmem:[%s11070_s8 + $0x4e0] ss:$16 sps:$4 sm:$0xff]   ;;  %v8010_v22 = vld [vmem:[%s11070_s8 + $0x4e8] ss:$16 sps:$4 sm:$0xff]  }
 0x5c4   :  { %4964 = vmatprep.subr.bf16.mxu1 %v7943_v35  ;;  %5128 = vmatprep.subr.bf16.mxu0 %v7946_v37  ;;  %v8015_v35 = vld [vmem:[%s11070_s8 + $0x504] ss:$16 sps:$4 sm:$0xff]   ;;  %v8018_v37 = vld [vmem:[%s11070_s8 + $0x50c] ss:$16 sps:$4 sm:$0xff]  }
 0x5c7   :  { %4965 = vmatpush1.bf16.msra.mxu1 %v7941_v38  ;;  %5129 = vmatpush1.bf16.msra.mxu0 %v7944_v39  ;;  %v8013_v38 = vld [vmem:[%s11070_s8 + $0x500] ss:$16 sps:$4 sm:$0xff]   ;;  %v8016_v39 = vld [vmem:[%s11070_s8 + $0x508] ss:$16 sps:$4 sm:$0xff]  }
 0x5c8   :  { %4966 = vmatprep.subr.bf16.mxu1 %v7949_v44  ;;  %5130 = vmatprep.subr.bf16.mxu0 %v7952_v45  ;;  %v8021_v44 = vld [vmem:[%s11070_s8 + $0x524] ss:$16 sps:$4 sm:$0xff]   ;;  %v8024_v45 = vld [vmem:[%s11070_s8 + $0x52c] ss:$16 sps:$4 sm:$0xff]  }
 0x5cb   :  { %4967 = vmatpush1.bf16.msra.mxu1 %v7947_v47  ;;  %5131 = vmatpush1.bf16.msra.mxu0 %v7950_v23  ;;  %v8019_v47 = vld [vmem:[%s11070_s8 + $0x520] ss:$16 sps:$4 sm:$0xff]   ;;  %v8022_v23 = vld [vmem:[%s11070_s8 + $0x528] ss:$16 sps:$4 sm:$0xff]  }
 0x5cc   :  { %4968 = vmatprep.subr.bf16.mxu1 %v7955_v41  ;;  %5132 = vmatprep.subr.bf16.mxu0 %v7958_v49  ;;  %v8027_v41 = vld [vmem:[%s11070_s8 + $0x544] ss:$16 sps:$4 sm:$0xff]   ;;  %v8030_v49 = vld [vmem:[%s11070_s8 + $0x54c] ss:$16 sps:$4 sm:$0xff]  }
 0x5cf   :  { %4969 = vmatpush1.bf16.msra.mxu1 %v7953_v16  ;;  %5133 = vmatpush1.bf16.msra.mxu0 %v7956_v54  ;;  %v795_v15 = vpop.f32.mrb[112].mxu0  ;;  %v8025_v16 = vld [vmem:[%s11070_s8 + $0x540] ss:$16 sps:$4 sm:$0xff]   ;;  %v8028_v54 = vld [vmem:[%s11070_s8 + $0x548] ss:$16 sps:$4 sm:$0xff]  }
 0x5d0   :  { %4970 = vmatprep.subr.bf16.mxu1 %v7961_v55  ;;  %5134 = vmatprep.subr.bf16.mxu0 %v7964_v52  ;;  %v797_v21 = vpop.f32.mrb[113].mxu0  ;;  %v8033_v55 = vld [vmem:[%s11070_s8 + $0x564] ss:$16 sps:$4 sm:$0xff]   ;;  %v8036_v52 = vld [vmem:[%s11070_s8 + $0x56c] ss:$16 sps:$4 sm:$0xff]  }
 0x5d1   :  { %v798_v25 = vpop.f32.mrb[114].mxu0  ;;  %v8074_v15 = vld [vmem:[%s11070_s8 + $0x640] ss:$16 sps:$4 sm:$0xff]   ;;  %v8082_v21 = vld [vmem:[%s11070_s8 + $0x664] ss:$16 sps:$4 sm:$0xff]  }
 0x5d2   :  { %v799_v27 = vpop.f32.mrb[115].mxu0  ;;  %v8085_v25 = vld [vmem:[%s11070_s8 + $0x66c] ss:$16 sps:$4 sm:$0xff]  }
 0x5d3   :  { %4971 = vmatpush1.bf16.msra.mxu1 %v7959_v26  ;;  %5135 = vmatpush1.bf16.msra.mxu0 %v7962_v57  ;;  %v8031_v26 = vld [vmem:[%s11070_s8 + $0x560] ss:$16 sps:$4 sm:$0xff]   ;;  %v8034_v57 = vld [vmem:[%s11070_s8 + $0x568] ss:$16 sps:$4 sm:$0xff]  }
 0x5d4   :  { %4981 = vmatprep.subr.bf16.mxu1 %v7967_v58  ;;  %5145 = vmatprep.subr.bf16.mxu0 %v7970_v59  ;;  %v8039_v58 = vld [vmem:[%s11070_s8 + $0x584] ss:$16 sps:$4 sm:$0xff]   ;;  %v8042_v59 = vld [vmem:[%s11070_s8 + $0x58c] ss:$16 sps:$4 sm:$0xff]   ;;  %v8083_v27 = vld [vmem:[%s11070_s8 + $0x668] ss:$16 sps:$4 sm:$0xff]  }
 0x5d6   :  { %4973 = vmatmul.mubr.bf16.vlgmr.msra.gmra.mrb[60].mxu1 %v3335_v60  ;;  %5137 = vmatmul.mubr.bf16.vlgmr.msra.gmra.mrb[116].mxu0 %v3335_v60  ;;  %v8045_v60 = vld [vmem:[%s11070_s8 + $0x5a4] ss:$16 sps:$4 sm:$0xff]  }
 0x5d7   :  { %4982 = vmatpush1.bf16.msra.mxu1 %v7965_v40  ;;  %5013 = vmatprep.mubr.bf16.mxu1 %v3338_v61  ;;  %v8040_v40 = vld [vmem:[%s11070_s8 + $0x588] ss:$16 sps:$4 sm:$0xff]  }
 0x5d8   :  { %5146 = vmatpush1.bf16.msra.mxu0 %v7968_v50  ;;  %5177 = vmatprep.mubr.bf16.mxu0 %v3338_v61  ;;  %v8048_v50 = vld [vmem:[%s11070_s8 + $0x5ac] ss:$16 sps:$4 sm:$0xff]   ;;  %v8043_v61 = vld [vmem:[%s11070_s8 + $0x5a0] ss:$16 sps:$4 sm:$0xff]  }
 0x5d9   :  { %4983 = vmatprep.subr.bf16.mxu1 %v7973_v63  ;;  %5147 = vmatprep.subr.bf16.mxu0 %v7976_v0  ;;  %v8046_v63 = vld [vmem:[%s11070_s8 + $0x5a8] ss:$16 sps:$4 sm:$0xff]   ;;  %v8051_v0 = vld [vmem:[%s11070_s8 + $0x5c4] ss:$16 sps:$4 sm:$0xff]  }
 0x5db   :  { %4984 = vmatpush1.bf16.msra.mxu1 %v7971_v51  ;;  %v8054_v51 = vld [vmem:[%s11070_s8 + $0x5cc] ss:$16 sps:$4 sm:$0xff]  }
 0x5dc   :  { %5148 = vmatpush1.bf16.msra.mxu0 %v7974_v36  ;;  %4985 = vmatprep.subr.bf16.mxu1 %v7979_v2  ;;  %v3308_v36 = vcombine.high %v10037_v53, %v10037_v53  ;;  %v8049_v2 = vld [vmem:[%s11070_s8 + $0x5c0] ss:$16 sps:$4 sm:$0xff]   ;;  %v8060_v53 = vld [vmem:[%s11070_s8 + $0x5ec] ss:$16 sps:$4 sm:$0xff]  }
 0x5dd   :  { %5149 = vmatprep.subr.bf16.mxu0 %v7982_v34  ;;  %v8052_v34 = vld [vmem:[%s11070_s8 + $0x5c8] ss:$16 sps:$4 sm:$0xff]  }
 0x5df   :  { %4986 = vmatpush1.bf16.msra.mxu1 %v7977_v4  ;;  %v8057_v4 = vld [vmem:[%s11070_s8 + $0x5e4] ss:$16 sps:$4 sm:$0xff]  }
 0x5e0   :  { %5150 = vmatpush1.bf16.msra.mxu0 %v7980_v6  ;;  %4987 = vmatprep.subr.bf16.mxu1 %v7985_v7  ;;  %v10254_v6 = vrot.slane %v3308_v36, %v9772_v48  ;;  %v8055_v7 = vld [vmem:[%s11070_s8 + $0x5e0] ss:$16 sps:$4 sm:$0xff]   ;;  %v8066_v48 = vld [vmem:[%s11070_s8 + $0x60c] ss:$16 sps:$4 sm:$0xff]   ;;  %v8137_v36 = vld [vmem:[%s11070_s8 + $0x788] ss:$16 sps:$4 sm:$0xff]  }
 0x5e1   :  { %5151 = vmatprep.subr.bf16.mxu0 %v7988_v62  ;;  %v8063_v62 = vld [vmem:[%s11070_s8 + $0x604] ss:$16 sps:$4 sm:$0xff]  }
 0x5e2   :  { %v3324_v5 = vcombine.high %v10254_v6, %v10254_v6 }
 0x5e3   :  { %4988 = vmatpush1.bf16.msra.mxu1 %v7983_v11  ;;  %v3337_v11 = vpack.c.bf16 %v10053_v56, %v10053_v56  ;;  %v8068_v56 = vld [vmem:[%s11070_s8 + $0x620] ss:$16 sps:$4 sm:$0xff]  }
 0x5e4   :  { %5152 = vmatpush1.bf16.msra.mxu0 %v7986_v13  ;;  %4989 = vmatprep.subr.bf16.mxu1 %v7991_v14  ;;  %v8070_v13 = vld [vmem:[%s11070_s8 + $0x624] ss:$16 sps:$4 sm:$0xff]   ;;  %v3340_v14 = vpack.c.bf16 %v3324_v5, %v3324_v5 }
 0x5e5   :  { %5153 = vmatprep.subr.bf16.mxu0 %v7994_v17  ;;  %v8073_v17 = vld [vmem:[%s11070_s8 + $0x62c] ss:$16 sps:$4 sm:$0xff]   ;;  %v8154_v5 = vld [vmem:[%s11070_s8 + $0x7e4] ss:$16 sps:$4 sm:$0xff]  }
 0x5e7   :  { %4990 = vmatpush1.bf16.msra.mxu1 %v7989_v43  ;;  %v8071_v43 = vld [vmem:[%s11070_s8 + $0x628] ss:$16 sps:$4 sm:$0xff]  }
 0x5e8   :  { %5154 = vmatpush1.bf16.msra.mxu0 %v7992_v46  ;;  %4991 = vmatprep.subr.bf16.mxu1 %v7997_v18  ;;  %v8076_v46 = vld [vmem:[%s11070_s8 + $0x644] ss:$16 sps:$4 sm:$0xff]   ;;  %v8079_v18 = vld [vmem:[%s11070_s8 + $0x64c] ss:$16 sps:$4 sm:$0xff]  }
 0x5e9   :  { %5155 = vmatprep.subr.bf16.mxu0 %v8000_v20  ;;  %v8077_v20 = vld [vmem:[%s11070_s8 + $0x648] ss:$16 sps:$4 sm:$0xff]  }
 0x5eb   :  { %4992 = vmatpush1.bf16.msra.mxu1 %v7995_v3  ;;  %v8080_v3 = vld [vmem:[%s11070_s8 + $0x660] ss:$16 sps:$4 sm:$0xff]  }
 0x5ec   :  { %5156 = vmatpush1.bf16.msra.mxu0 %v7998_v24  ;;  %4993 = vmatprep.subr.bf16.mxu1 %v8003_v28  ;;  %v8088_v24 = vld [vmem:[%s11070_s8 + $0x684] ss:$16 sps:$4 sm:$0xff]   ;;  %v8091_v28 = vld [vmem:[%s11070_s8 + $0x68c] ss:$16 sps:$4 sm:$0xff]  }
 0x5ed   :  { %5157 = vmatprep.subr.bf16.mxu0 %v8006_v29  ;;  %v8086_v29 = vld [vmem:[%s11070_s8 + $0x680] ss:$16 sps:$4 sm:$0xff]  }
 0x5ef   :  { %4994 = vmatpush1.bf16.msra.mxu1 %v8001_v30  ;;  %v8089_v30 = vld [vmem:[%s11070_s8 + $0x688] ss:$16 sps:$4 sm:$0xff]  }
 0x5f0   :  { %5158 = vmatpush1.bf16.msra.mxu0 %v8004_v31  ;;  %4995 = vmatprep.subr.bf16.mxu1 %v8009_v19  ;;  %v8094_v31 = vld [vmem:[%s11070_s8 + $0x6a4] ss:$16 sps:$4 sm:$0xff]   ;;  %v8097_v19 = vld [vmem:[%s11070_s8 + $0x6ac] ss:$16 sps:$4 sm:$0xff]  }
 0x5f1   :  { %5159 = vmatprep.subr.bf16.mxu0 %v8012_v32  ;;  %v8092_v32 = vld [vmem:[%s11070_s8 + $0x6a0] ss:$16 sps:$4 sm:$0xff]  }
 0x5f3   :  { %4996 = vmatpush1.bf16.msra.mxu1 %v8007_v33  ;;  %v8095_v33 = vld [vmem:[%s11070_s8 + $0x6a8] ss:$16 sps:$4 sm:$0xff]  }
 0x5f4   :  { %5160 = vmatpush1.bf16.msra.mxu0 %v8010_v22  ;;  %4997 = vmatprep.subr.bf16.mxu1 %v8015_v35  ;;  %v8100_v22 = vld [vmem:[%s11070_s8 + $0x6c4] ss:$16 sps:$4 sm:$0xff]   ;;  %v8103_v35 = vld [vmem:[%s11070_s8 + $0x6cc] ss:$16 sps:$4 sm:$0xff]  }
 0x5f5   :  { %5161 = vmatprep.subr.bf16.mxu0 %v8018_v37  ;;  %v8098_v37 = vld [vmem:[%s11070_s8 + $0x6c0] ss:$16 sps:$4 sm:$0xff]  }
 0x5f7   :  { %4998 = vmatpush1.bf16.msra.mxu1 %v8013_v38  ;;  %v8101_v38 = vld [vmem:[%s11070_s8 + $0x6c8] ss:$16 sps:$4 sm:$0xff]  }
 0x5f8   :  { %5162 = vmatpush1.bf16.msra.mxu0 %v8016_v39  ;;  %4999 = vmatprep.subr.bf16.mxu1 %v8021_v44  ;;  %v8106_v39 = vld [vmem:[%s11070_s8 + $0x6e4] ss:$16 sps:$4 sm:$0xff]   ;;  %v8109_v44 = vld [vmem:[%s11070_s8 + $0x6ec] ss:$16 sps:$4 sm:$0xff]  }
 0x5f9   :  { %5163 = vmatprep.subr.bf16.mxu0 %v8024_v45  ;;  %v8104_v45 = vld [vmem:[%s11070_s8 + $0x6e0] ss:$16 sps:$4 sm:$0xff]  }
 0x5fb   :  { %5000 = vmatpush1.bf16.msra.mxu1 %v8019_v47  ;;  %v8107_v47 = vld [vmem:[%s11070_s8 + $0x6e8] ss:$16 sps:$4 sm:$0xff]  }
 0x5fc   :  { %5164 = vmatpush1.bf16.msra.mxu0 %v8022_v23  ;;  %5001 = vmatprep.subr.bf16.mxu1 %v8027_v41  ;;  %v8112_v23 = vld [vmem:[%s11070_s8 + $0x704] ss:$16 sps:$4 sm:$0xff]   ;;  %v8115_v41 = vld [vmem:[%s11070_s8 + $0x70c] ss:$16 sps:$4 sm:$0xff]  }
 0x5fd   :  { %5165 = vmatprep.subr.bf16.mxu0 %v8030_v49  ;;  %v8110_v49 = vld [vmem:[%s11070_s8 + $0x700] ss:$16 sps:$4 sm:$0xff]  }
 0x5ff   :  { %5002 = vmatpush1.bf16.msra.mxu1 %v8025_v16  ;;  %v8113_v16 = vld [vmem:[%s11070_s8 + $0x708] ss:$16 sps:$4 sm:$0xff]  }
 0x600   :  { %5166 = vmatpush1.bf16.msra.mxu0 %v8028_v54  ;;  %5003 = vmatprep.subr.bf16.mxu1 %v8033_v55  ;;  %v8118_v54 = vld [vmem:[%s11070_s8 + $0x724] ss:$16 sps:$4 sm:$0xff]   ;;  %v8121_v55 = vld [vmem:[%s11070_s8 + $0x72c] ss:$16 sps:$4 sm:$0xff]  }
 0x601   :  { %5167 = vmatprep.subr.bf16.mxu0 %v8036_v52  ;;  %v8116_v52 = vld [vmem:[%s11070_s8 + $0x720] ss:$16 sps:$4 sm:$0xff]  }
 0x603   :  { %5004 = vmatpush1.bf16.msra.mxu1 %v8031_v26  ;;  %v8119_v26 = vld [vmem:[%s11070_s8 + $0x728] ss:$16 sps:$4 sm:$0xff]  }
 0x604   :  { %5168 = vmatpush1.bf16.msra.mxu0 %v8034_v57  ;;  %5005 = vmatprep.subr.bf16.mxu1 %v8039_v58  ;;  %v8124_v57 = vld [vmem:[%s11070_s8 + $0x744] ss:$16 sps:$4 sm:$0xff]   ;;  %v8127_v58 = vld [vmem:[%s11070_s8 + $0x74c] ss:$16 sps:$4 sm:$0xff]  }
 0x605   :  { %5169 = vmatprep.subr.bf16.mxu0 %v8042_v59  ;;  %v8122_v59 = vld [vmem:[%s11070_s8 + $0x740] ss:$16 sps:$4 sm:$0xff]  }
 0x607   :  { %5006 = vmatpush1.bf16.msra.mxu1 %v8037_v42  ;;  %v8125_v42 = vld [vmem:[%s11070_s8 + $0x748] ss:$16 sps:$4 sm:$0xff]  }
 0x608   :  { %5170 = vmatpush1.bf16.msra.mxu0 %v8040_v40  ;;  %5007 = vmatprep.subr.bf16.mxu1 %v8045_v60  ;;  %v8130_v40 = vld [vmem:[%s11070_s8 + $0x764] ss:$16 sps:$4 sm:$0xff]   ;;  %v8133_v60 = vld [vmem:[%s11070_s8 + $0x76c] ss:$16 sps:$4 sm:$0xff]  }
 0x609   :  { %5171 = vmatprep.subr.bf16.mxu0 %v8048_v50  ;;  %v8128_v50 = vld [vmem:[%s11070_s8 + $0x760] ss:$16 sps:$4 sm:$0xff]  }
 0x60b   :  { %5008 = vmatpush1.bf16.msra.mxu1 %v8043_v61  ;;  %v8131_v61 = vld [vmem:[%s11070_s8 + $0x768] ss:$16 sps:$4 sm:$0xff]  }
 0x60c   :  { %5172 = vmatpush1.bf16.msra.mxu0 %v8046_v63  ;;  %5009 = vmatprep.subr.bf16.mxu1 %v8051_v0  ;;  %v8136_v63 = vld [vmem:[%s11070_s8 + $0x784] ss:$16 sps:$4 sm:$0xff]   ;;  %v8139_v0 = vld [vmem:[%s11070_s8 + $0x78c] ss:$16 sps:$4 sm:$0xff]  }
 0x60d   :  { %5173 = vmatprep.subr.bf16.mxu0 %v8054_v51  ;;  %v8134_v51 = vld [vmem:[%s11070_s8 + $0x780] ss:$16 sps:$4 sm:$0xff]  }
 0x60f   :  { %5010 = vmatpush1.bf16.msra.mxu1 %v8049_v2  ;;  %v8142_v2 = vld [vmem:[%s11070_s8 + $0x7a4] ss:$16 sps:$4 sm:$0xff]  }
 0x610   :  { %5174 = vmatpush1.bf16.msra.mxu0 %v8052_v34  ;;  %5011 = vmatprep.subr.bf16.mxu1 %v8057_v4  ;;  %v8145_v34 = vld [vmem:[%s11070_s8 + $0x7ac] ss:$16 sps:$4 sm:$0xff]   ;;  %v8140_v4 = vld [vmem:[%s11070_s8 + $0x7a0] ss:$16 sps:$4 sm:$0xff]  }
 0x611   :  { %5175 = vmatprep.subr.bf16.mxu0 %v8060_v53  ;;  %v8143_v53 = vld [vmem:[%s11070_s8 + $0x7a8] ss:$16 sps:$4 sm:$0xff]  }
 0x613   :  { %5012 = vmatpush1.bf16.msra.mxu1 %v8055_v7  ;;  %v8148_v7 = vld [vmem:[%s11070_s8 + $0x7c4] ss:$16 sps:$4 sm:$0xff]  }
 0x614   :  { %5176 = vmatpush1.bf16.msra.mxu0 %v8058_v9  ;;  %5022 = vmatprep.subr.bf16.mxu1 %v8063_v62  ;;  %v8151_v9 = vld [vmem:[%s11070_s8 + $0x7cc] ss:$16 sps:$4 sm:$0xff]   ;;  %v8146_v62 = vld [vmem:[%s11070_s8 + $0x7c0] ss:$16 sps:$4 sm:$0xff]  }
 0x615   :  { %5186 = vmatprep.subr.bf16.mxu0 %v8066_v48  ;;  %v8149_v48 = vld [vmem:[%s11070_s8 + $0x7c8] ss:$16 sps:$4 sm:$0xff]  }
 0x616   :  { %5014 = vmatmul.mubr.bf16.vlgmr.msra.gmra.mrb[60].mxu1 %v3337_v11 }
 0x617   :  { %5178 = vmatmul.mubr.bf16.vlgmr.msra.gmra.mrb[116].mxu0 %v3337_v11  ;;  %5023 = vmatpush1.bf16.msra.mxu1 %v8061_v10  ;;  %v8157_v10 = vld [vmem:[%s11070_s8 + $0x7ec] ss:$16 sps:$4 sm:$0xff]   ;;  %v8152_v11 = vld [vmem:[%s11070_s8 + $0x7e0] ss:$16 sps:$4 sm:$0xff]  }
 0x618   :  { %5054 = vmatprep.mubr.bf16.mxu1 %v3340_v14  ;;  %5187 = vmatpush1.bf16.msra.mxu0 %v8064_v12  ;;  %v8155_v12 = vld [vmem:[%s11070_s8 + $0x7e8] ss:$16 sps:$4 sm:$0xff]  }
 0x619   :  { %5218 = vmatprep.mubr.bf16.mxu0 %v3340_v14  ;;  %5024 = vmatprep.subr.bf16.mxu1 %v8070_v13  ;;  %v8160_v13 = vld [vmem:[%s11072_s10 + $0x4] ss:$8 sps:$4 sm:$0xff]   ;;  %v8158_v14 = vld [vmem:[%s11072_s10] ss:$8 sps:$4 sm:$0xff]  }
 0x61a   :  { %5188 = vmatprep.subr.bf16.mxu0 %v8073_v17  ;;  %v3339_v17 = vpack.c.bf16 %v10254_v6, %v10254_v6  ;;  %v8164_v6 = vld [vmem:[%s11072_s10 + $0x20] ss:$8 sps:$4 sm:$0xff]  }
 0x61b   :  { %5025 = vmatpush1.bf16.msra.mxu1 %v8068_v56  ;;  %v8163_v56 = vld [vmem:[%s11072_s10 + $0x14] ss:$8 sps:$4 sm:$0xff]  }
 0x61c   :  { %5189 = vmatpush1.bf16.msra.mxu0 %v8071_v43  ;;  %5026 = vmatprep.subr.bf16.mxu1 %v8076_v46  ;;  %v8161_v43 = vld [vmem:[%s11072_s10 + $0x10] ss:$8 sps:$4 sm:$0xff]   ;;  %v8166_v46 = vld [vmem:[%s11072_s10 + $0x24] ss:$8 sps:$4 sm:$0xff]  }
 0x61d   :  { %5190 = vmatprep.subr.bf16.mxu0 %v8079_v18  ;;  %v8169_v18 = vld [vmem:[%s11072_s10 + $0x34] ss:$8 sps:$4 sm:$0xff]  }
 0x61f   :  { %5027 = vmatpush1.bf16.msra.mxu1 %v8074_v15  ;;  %v8167_v15 = vld [vmem:[%s11072_s10 + $0x30] ss:$8 sps:$4 sm:$0xff]  }
 0x620   :  { %5191 = vmatpush1.bf16.msra.mxu0 %v8077_v20  ;;  %5028 = vmatprep.subr.bf16.mxu1 %v8082_v21  ;;  %v8172_v20 = vld [vmem:[%s11072_s10 + $0x44] ss:$8 sps:$4 sm:$0xff]   ;;  %v8170_v21 = vld [vmem:[%s11072_s10 + $0x40] ss:$8 sps:$4 sm:$0xff]  }
 0x621   :  { %5192 = vmatprep.subr.bf16.mxu0 %v8085_v25  ;;  %v8175_v25 = vld [vmem:[%s11072_s10 + $0x54] ss:$8 sps:$4 sm:$0xff]  }
 0x623   :  { %5029 = vmatpush1.bf16.msra.mxu1 %v8080_v3  ;;  %v8173_v3 = vld [vmem:[%s11072_s10 + $0x50] ss:$8 sps:$4 sm:$0xff]  }
 0x624   :  { %5193 = vmatpush1.bf16.msra.mxu0 %v8083_v27  ;;  %5030 = vmatprep.subr.bf16.mxu1 %v8088_v24  ;;  %v8178_v27 = vld [vmem:[%s11072_s10 + $0x64] ss:$8 sps:$4 sm:$0xff]   ;;  %v8176_v24 = vld [vmem:[%s11072_s10 + $0x60] ss:$8 sps:$4 sm:$0xff]  }
 0x625   :  { %5194 = vmatprep.subr.bf16.mxu0 %v8091_v28  ;;  %v8181_v28 = vld [vmem:[%s11072_s10 + $0x74] ss:$8 sps:$4 sm:$0xff]  }
 0x627   :  { %5031 = vmatpush1.bf16.msra.mxu1 %v8086_v29  ;;  %v8179_v29 = vld [vmem:[%s11072_s10 + $0x70] ss:$8 sps:$4 sm:$0xff]  }
 0x628   :  { %5195 = vmatpush1.bf16.msra.mxu0 %v8089_v30  ;;  %5032 = vmatprep.subr.bf16.mxu1 %v8094_v31  ;;  %v8184_v30 = vld [vmem:[%s11072_s10 + $0x84] ss:$8 sps:$4 sm:$0xff]   ;;  %v8182_v31 = vld [vmem:[%s11072_s10 + $0x80] ss:$8 sps:$4 sm:$0xff]  }
 0x629   :  { %5196 = vmatprep.subr.bf16.mxu0 %v8097_v19  ;;  %v8187_v19 = vld [vmem:[%s11072_s10 + $0x94] ss:$8 sps:$4 sm:$0xff]  }
 0x62b   :  { %5033 = vmatpush1.bf16.msra.mxu1 %v8092_v32  ;;  %v8185_v32 = vld [vmem:[%s11072_s10 + $0x90] ss:$8 sps:$4 sm:$0xff]  }
 0x62c   :  { %5197 = vmatpush1.bf16.msra.mxu0 %v8095_v33  ;;  %5034 = vmatprep.subr.bf16.mxu1 %v8100_v22  ;;  %v8190_v33 = vld [vmem:[%s11072_s10 + $0xa4] ss:$8 sps:$4 sm:$0xff]   ;;  %v8188_v22 = vld [vmem:[%s11072_s10 + $0xa0] ss:$8 sps:$4 sm:$0xff]  }
 0x62d   :  { %5198 = vmatprep.subr.bf16.mxu0 %v8103_v35  ;;  %v8193_v35 = vld [vmem:[%s11072_s10 + $0xb4] ss:$8 sps:$4 sm:$0xff]  }
 0x62f   :  { %5035 = vmatpush1.bf16.msra.mxu1 %v8098_v37  ;;  %v8191_v37 = vld [vmem:[%s11072_s10 + $0xb0] ss:$8 sps:$4 sm:$0xff]  }
 0x630   :  { %5199 = vmatpush1.bf16.msra.mxu0 %v8101_v38  ;;  %5036 = vmatprep.subr.bf16.mxu1 %v8106_v39  ;;  %v8196_v38 = vld [vmem:[%s11072_s10 + $0xc4] ss:$8 sps:$4 sm:$0xff]   ;;  %v8194_v39 = vld [vmem:[%s11072_s10 + $0xc0] ss:$8 sps:$4 sm:$0xff]  }
 0x631   :  { %5200 = vmatprep.subr.bf16.mxu0 %v8109_v44  ;;  %v8199_v44 = vld [vmem:[%s11072_s10 + $0xd4] ss:$8 sps:$4 sm:$0xff]  }
 0x633   :  { %5037 = vmatpush1.bf16.msra.mxu1 %v8104_v45  ;;  %v8197_v45 = vld [vmem:[%s11072_s10 + $0xd0] ss:$8 sps:$4 sm:$0xff]  }
 0x634   :  { %5201 = vmatpush1.bf16.msra.mxu0 %v8107_v47  ;;  %5038 = vmatprep.subr.bf16.mxu1 %v8112_v23  ;;  %v8202_v47 = vld [vmem:[%s11072_s10 + $0xe4] ss:$8 sps:$4 sm:$0xff]   ;;  %v8200_v23 = vld [vmem:[%s11072_s10 + $0xe0] ss:$8 sps:$4 sm:$0xff]  }
 0x635   :  { %5202 = vmatprep.subr.bf16.mxu0 %v8115_v41  ;;  %v8205_v41 = vld [vmem:[%s11072_s10 + $0xf4] ss:$8 sps:$4 sm:$0xff]  }
 0x637   :  { %5039 = vmatpush1.bf16.msra.mxu1 %v8110_v49  ;;  %v8203_v49 = vld [vmem:[%s11072_s10 + $0xf0] ss:$8 sps:$4 sm:$0xff]  }
 0x638   :  { %5203 = vmatpush1.bf16.msra.mxu0 %v8113_v16  ;;  %5040 = vmatprep.subr.bf16.mxu1 %v8118_v54  ;;  %v8208_v16 = vld [vmem:[%s11072_s10 + $0x104] ss:$8 sps:$4 sm:$0xff]   ;;  %v8254_v54 = vld [vmem:[%s11075_s13] ss:$16 sps:$4 sm:$0xff]  }
 0x639   :  { %5204 = vmatprep.subr.bf16.mxu0 %v8121_v55  ;;  %v8256_v55 = vld [vmem:[%s11075_s13 + $0x4] ss:$16 sps:$4 sm:$0xff]  }
 0x63b   :  { %5041 = vmatpush1.bf16.msra.mxu1 %v8116_v52  ;;  %v8259_v52 = vld [vmem:[%s11075_s13 + $0x24] ss:$16 sps:$4 sm:$0xff]  }
 0x63c   :  { %5205 = vmatpush1.bf16.msra.mxu0 %v8119_v26  ;;  %5042 = vmatprep.subr.bf16.mxu1 %v8124_v57  ;;  %v8257_v26 = vld [vmem:[%s11075_s13 + $0x20] ss:$16 sps:$4 sm:$0xff]   ;;  %v8262_v57 = vld [vmem:[%s11075_s13 + $0x44] ss:$16 sps:$4 sm:$0xff]  }
 0x63d   :  { %5206 = vmatprep.subr.bf16.mxu0 %v8127_v58  ;;  %v8260_v58 = vld [vmem:[%s11075_s13 + $0x40] ss:$16 sps:$4 sm:$0xff]  }
 0x63f   :  { %5043 = vmatpush1.bf16.msra.mxu1 %v8122_v59  ;;  %v8265_v59 = vld [vmem:[%s11075_s13 + $0x64] ss:$16 sps:$4 sm:$0xff]  }
 0x640   :  { %5207 = vmatpush1.bf16.msra.mxu0 %v8125_v42  ;;  %5044 = vmatprep.subr.bf16.mxu1 %v8130_v40  ;;  %v8263_v42 = vld [vmem:[%s11075_s13 + $0x60] ss:$16 sps:$4 sm:$0xff]   ;;  %v8268_v40 = vld [vmem:[%s11075_s13 + $0xc] ss:$16 sps:$4 sm:$0xff]  }
 0x641   :  { %5208 = vmatprep.subr.bf16.mxu0 %v8133_v60  ;;  %v5715_v60 = vld [vmem:[%s11084_s19] sm:$0x1] }
 0x643   :  { %5045 = vmatpush1.bf16.msra.mxu1 %v8128_v50  ;;  %v8266_v50 = vld [vmem:[%s11075_s13 + $0x8] ss:$16 sps:$4 sm:$0xff]  }
 0x644   :  { %5209 = vmatpush1.bf16.msra.mxu0 %v8131_v61  ;;  %5046 = vmatprep.subr.bf16.mxu1 %v8136_v63  ;;  %v8271_v61 = vld [vmem:[%s11075_s13 + $0x2c] ss:$16 sps:$4 sm:$0xff]   ;;  %v8269_v63 = vld [vmem:[%s11075_s13 + $0x28] ss:$16 sps:$4 sm:$0xff]  }
 0x645   :  { %5210 = vmatprep.subr.bf16.mxu0 %v8139_v0  ;;  %v8274_v0 = vld [vmem:[%s11075_s13 + $0x4c] ss:$16 sps:$4 sm:$0xff]  }
 0x647   :  { %5047 = vmatpush1.bf16.msra.mxu1 %v8134_v51  ;;  %v8272_v51 = vld [vmem:[%s11075_s13 + $0x48] ss:$16 sps:$4 sm:$0xff]  }
 0x648   :  { %5211 = vmatpush1.bf16.msra.mxu0 %v8137_v36  ;;  %5048 = vmatprep.subr.bf16.mxu1 %v8142_v2  ;;  %v8277_v36 = vld [vmem:[%s11075_s13 + $0x6c] ss:$16 sps:$4 sm:$0xff]   ;;  %v8280_v2 = vld [vmem:[%s11074_s12 + $0x4] ss:$16 sps:$4 sm:$0xff]  }
 0x649   :  { %5212 = vmatprep.subr.bf16.mxu0 %v8145_v34  ;;  %v8278_v34 = vld [vmem:[%s11074_s12] ss:$16 sps:$4 sm:$0xff]  }
 0x64b   :  { %5049 = vmatpush1.bf16.msra.mxu1 %v8140_v4  ;;  %v8286_v4 = vld [vmem:[%s11074_s12 + $0x24] ss:$16 sps:$4 sm:$0xff]  }
 0x64c   :  { %5213 = vmatpush1.bf16.msra.mxu0 %v8143_v53  ;;  %5050 = vmatprep.subr.bf16.mxu1 %v8148_v7  ;;  %v8284_v53 = vld [vmem:[%s11074_s12 + $0x20] ss:$16 sps:$4 sm:$0xff]   ;;  %v8292_v7 = vld [vmem:[%s11074_s12 + $0x44] ss:$16 sps:$4 sm:$0xff]  }
 0x64d   :  { %5214 = vmatprep.subr.bf16.mxu0 %v8151_v9  ;;  %v8290_v9 = vld [vmem:[%s11074_s12 + $0x40] ss:$16 sps:$4 sm:$0xff]  }
 0x64f   :  { %5051 = vmatpush1.bf16.msra.mxu1 %v8146_v62  ;;  %v8298_v62 = vld [vmem:[%s11074_s12 + $0x64] ss:$16 sps:$4 sm:$0xff]  }
 0x650   :  { %5215 = vmatpush1.bf16.msra.mxu0 %v8149_v48  ;;  %5052 = vmatprep.subr.bf16.mxu1 %v8154_v5  ;;  %v8296_v48 = vld [vmem:[%s11074_s12 + $0x60] ss:$16 sps:$4 sm:$0xff]   ;;  %v8304_v5 = vld [vmem:[%s11074_s12 + $0x84] ss:$16 sps:$4 sm:$0xff]  }
 0x651   :  { %5216 = vmatprep.subr.bf16.mxu0 %v8157_v10  ;;  %v8302_v10 = vld [vmem:[%s11074_s12 + $0x80] ss:$16 sps:$4 sm:$0xff]  }
 0x653   :  { %5053 = vmatpush1.bf16.msra.mxu1 %v8152_v11  ;;  %v10645_v11 = vsub.s32 0, %v9760_v8 }
 0x654   :  { %5217 = vmatpush1.bf16.msra.mxu0 %v8155_v12  ;;  %5631 = vmatprep.subr.bf16.mxu1 %v8160_v13  ;;  %v8310_v12 = vld [vmem:[%s11074_s12 + $0xa4] ss:$16 sps:$4 sm:$0xff]   ;;  %v10653_v13 = vld [vmem:[%s11071_s9] sm:$0xf] }
 0x655   :  { %5879 = vmatprep.subr.bf16.mxu0 %v8256_v55  ;;  %v8332_v55 = vld [vmem:[%s11074_s12 + $0x120] ss:$16 sps:$4 sm:$0xff]  }
 0x656   :  { %5055 = vmatmul.mubr.bf16.vlgmr.msra.gmra.mrb[60].mxu1 %v3339_v17 }
 0x657   :  { %5219 = vmatmul.mubr.bf16.vlgmr.msra.gmra.mrb[116].mxu0 %v3339_v17  ;;  %5632 = vmatpush1.bf16.msra.mxu1 %v8158_v14  ;;  %v10656_v14 = vsub.s32 1, %v9760_v8  ;;  %v3613_v17 = vsub.s32 3, %v9760_v8 }
 0x658   :  { %5633 = vmatprep.subr.bf16.mxu1 %v8163_v56  ;;  %5911 = vmatprep.mubr.bf16.mxu0 %v8432_v1  ;;  %v8308_v56 = vld [vmem:[%s11074_s12 + $0xa0] ss:$16 sps:$4 sm:$0xff]  }
 0x659   :  { %5880 = vmatpush1.bf16.msra.mxu0 %v8254_v54  ;;  %v8214_v54 = vld [vmem:[%s11072_s10 + $0x124] ss:$8 sps:$4 sm:$0xff]  }
 0x65a   :  { %5881 = vmatprep.subr.bf16.mxu0 %v8259_v52  ;;  %v8340_v52 = vld [vmem:[%s11074_s12 + $0x144] ss:$16 sps:$4 sm:$0xff]  }
 0x65b   :  { %5634 = vmatpush1.bf16.msra.mxu1 %v8161_v43  ;;  %v3602_v43 = vrot.slane %v10653_v13, %v10645_v11 }
 0x65c   :  { %5635 = vmatprep.subr.bf16.mxu1 %v8166_v46  ;;  %v8316_v46 = vld [vmem:[%s11074_s12 + $0xc4] ss:$16 sps:$4 sm:$0xff]  }
 0x65d   :  { %5882 = vmatpush1.bf16.msra.mxu0 %v8257_v26  ;;  %v8212_v26 = vld [vmem:[%s11072_s10 + $0x120] ss:$8 sps:$4 sm:$0xff]  }
 0x65e   :  { %5883 = vmatprep.subr.bf16.mxu0 %v8262_v57  ;;  %v8217_v57 = vld [vmem:[%s11072_s10 + $0x134] ss:$8 sps:$4 sm:$0xff]  }
 0x65f   :  { %5636 = vmatpush1.bf16.msra.mxu1 %v8164_v6  ;;  %v3606_v6 = vrot.slane %v10653_v13, %v10656_v14 }
 0x660   :  { %5637 = vmatprep.subr.bf16.mxu1 %v8169_v18  ;;  %v3614_v18 = vrot.slane %v10653_v13, %v3613_v17 }
 0x661   :  { %5884 = vmatpush1.bf16.msra.mxu0 %v8260_v58  ;;  %v8338_v58 = vld [vmem:[%s11074_s12 + $0x140] ss:$16 sps:$4 sm:$0xff]  }
 0x662   :  { %5885 = vmatprep.subr.bf16.mxu0 %v8265_v59  ;;  %v8346_v59 = vld [vmem:[%s11074_s12 + $0x164] ss:$16 sps:$4 sm:$0xff]  }
 0x663   :  { %5638 = vmatpush1.bf16.msra.mxu1 %v8167_v15 }
 0x664   :  { %5639 = vmatprep.subr.bf16.mxu1 %v8172_v20  ;;  %v8314_v20 = vld [vmem:[%s11074_s12 + $0xc0] ss:$16 sps:$4 sm:$0xff]  }
 0x665   :  { %5886 = vmatpush1.bf16.msra.mxu0 %v8263_v42  ;;  %v8215_v42 = vld [vmem:[%s11072_s10 + $0x130] ss:$8 sps:$4 sm:$0xff]  }
 0x666   :  { %5920 = vmatprep.subr.bf16.mxu0 %v8268_v40  ;;  %v8220_v40 = vld [vmem:[%s11072_s10 + $0x144] ss:$8 sps:$4 sm:$0xff]  }
 0x667   :  { %5640 = vmatpush1.bf16.msra.mxu1 %v8170_v21 }
 0x668   :  { %5641 = vmatprep.subr.bf16.mxu1 %v8175_v25  ;;  %7250 = vmatmul.mubr.msk.bf16.vlgmr.msra.gmra.mrb[120].mxu0 %vm2553_vm13, %v5715_v60 }
 0x669   :  { %5921 = vmatpush1.bf16.msra.mxu0 %v8266_v50  ;;  %5952 = vmatprep.mubr.bf16.mxu0 %v8432_v1  ;;  %v8275_v1 = vld [vmem:[%s11075_s13 + $0x68] ss:$16 sps:$4 sm:$0xff]   ;;  %v8352_v50 = vld [vmem:[%s11074_s12 + $0x184] ss:$16 sps:$4 sm:$0xff]  }
 0x66a   :  { %5922 = vmatprep.subr.bf16.mxu0 %v8271_v61  ;;  %v8218_v61 = vld [vmem:[%s11072_s10 + $0x140] ss:$8 sps:$4 sm:$0xff]  }
 0x66b   :  { %5642 = vmatpush1.bf16.msra.mxu1 %v8173_v3 }
 0x66c   :  { %5643 = vmatprep.subr.bf16.mxu1 %v8178_v27  ;;  %v8322_v27 = vld [vmem:[%s11074_s12 + $0xe4] ss:$16 sps:$4 sm:$0xff]  }
 0x66d   :  { %5923 = vmatpush1.bf16.msra.mxu0 %v8269_v63  ;;  %v8223_v63 = vld [vmem:[%s11072_s10 + $0x154] ss:$8 sps:$4 sm:$0xff]  }
 0x66e   :  { %5924 = vmatprep.subr.bf16.mxu0 %v8274_v0  ;;  %v8350_v0 = vld [vmem:[%s11074_s12 + $0x180] ss:$16 sps:$4 sm:$0xff]  }
 0x66f   :  { %5644 = vmatpush1.bf16.msra.mxu1 %v8176_v24 }
 0x670   :  { %5645 = vmatprep.subr.bf16.mxu1 %v8181_v28 }
 0x671   :  { %5925 = vmatpush1.bf16.msra.mxu0 %v8272_v51  ;;  %v8358_v51 = vld [vmem:[%s11074_s12 + $0x1a4] ss:$16 sps:$4 sm:$0xff]  }
 0x672   :  { %5926 = vmatprep.subr.bf16.mxu0 %v8277_v36  ;;  %v8221_v36 = vld [vmem:[%s11072_s10 + $0x150] ss:$8 sps:$4 sm:$0xff]  }
 0x673   :  { %5646 = vmatpush1.bf16.msra.mxu1 %v8179_v29 }
 0x674   :  { %5647 = vmatprep.subr.bf16.mxu1 %v8184_v30 }
 0x675   :  { %5927 = vmatpush1.bf16.msra.mxu0 %v8275_v1  ;;  %v8226_v1 = vld [vmem:[%s11072_s10 + $0x164] ss:$8 sps:$4 sm:$0xff]  }
 0x676   :  { %6281 = vmatprep.subr.bf16.mxu0 %v8280_v2  ;;  %v8356_v2 = vld [vmem:[%s11074_s12 + $0x1a0] ss:$16 sps:$4 sm:$0xff]  }
 0x677   :  { %5648 = vmatpush1.bf16.msra.mxu1 %v8182_v31 }
 0x678   :  { %5649 = vmatprep.subr.bf16.mxu1 %v8187_v19  ;;  %7251 = vmatmul.mubr.msk.bf16.vlgmr.msra.gmra.mrb[124].mxu0 %vm2553_vm13, %v5715_v60  ;;  %v8344_v60 = vld [vmem:[%s11074_s12 + $0x160] ss:$16 sps:$4 sm:$0xff]  }
 0x679   :  { %6282 = vmatpush1.bf16.msra.mxu0 %v8278_v34  ;;  %v8364_v34 = vld [vmem:[%s11074_s12 + $0x1c4] ss:$16 sps:$4 sm:$0xff]  }
 0x67a   :  { %6283 = vmatprep.subr.bf16.mxu0 %v8286_v4  ;;  %v8224_v4 = vld [vmem:[%s11072_s10 + $0x160] ss:$8 sps:$4 sm:$0xff]  }
 0x67b   :  { %5650 = vmatpush1.bf16.msra.mxu1 %v8185_v32 }
 0x67c   :  { %5651 = vmatprep.subr.bf16.mxu1 %v8190_v33 }
 0x67d   :  { %6284 = vmatpush1.bf16.msra.mxu0 %v8284_v53  ;;  %v8229_v53 = vld [vmem:[%s11072_s10 + $0x174] ss:$8 sps:$4 sm:$0xff]  }
 0x67e   :  { %6285 = vmatprep.subr.bf16.mxu0 %v8292_v7  ;;  %v8362_v7 = vld [vmem:[%s11074_s12 + $0x1c0] ss:$16 sps:$4 sm:$0xff]  }
 0x67f   :  { %5652 = vmatpush1.bf16.msra.mxu1 %v8188_v22 }
 0x680   :  { %5653 = vmatprep.subr.bf16.mxu1 %v8193_v35  ;;  %v8320_v35 = vld [vmem:[%s11074_s12 + $0xe0] ss:$16 sps:$4 sm:$0xff]  }
 0x681   :  { %6286 = vmatpush1.bf16.msra.mxu0 %v8290_v9  ;;  %v8227_v9 = vld [vmem:[%s11072_s10 + $0x170] ss:$8 sps:$4 sm:$0xff]  }
 0x682   :  { %6287 = vmatprep.subr.bf16.mxu0 %v8298_v62  ;;  %v8232_v62 = vld [vmem:[%s11072_s10 + $0x184] ss:$8 sps:$4 sm:$0xff]  }
 0x683   :  { %5654 = vmatpush1.bf16.msra.mxu1 %v8191_v37 }
 0x684   :  { %5655 = vmatprep.subr.bf16.mxu1 %v8196_v38  ;;  %v8328_v38 = vld [vmem:[%s11074_s12 + $0x104] ss:$16 sps:$4 sm:$0xff]  }
 0x685   :  { %6288 = vmatpush1.bf16.msra.mxu0 %v8296_v48  ;;  %v8230_v48 = vld [vmem:[%s11072_s10 + $0x180] ss:$8 sps:$4 sm:$0xff]  }
 0x686   :  { %6289 = vmatprep.subr.bf16.mxu0 %v8304_v5  ;;  %v8235_v5 = vld [vmem:[%s11072_s10 + $0x194] ss:$8 sps:$4 sm:$0xff]  }
 0x687   :  { %5656 = vmatpush1.bf16.msra.mxu1 %v8194_v39 }
 0x688   :  { %5657 = vmatprep.subr.bf16.mxu1 %v8199_v44  ;;  %v8206_v44 = vld [vmem:[%s11072_s10 + $0x100] ss:$8 sps:$4 sm:$0xff]  }
 0x689   :  { %6290 = vmatpush1.bf16.msra.mxu0 %v8302_v10  ;;  %v8233_v10 = vld [vmem:[%s11072_s10 + $0x190] ss:$8 sps:$4 sm:$0xff]  }
 0x68a   :  { %6291 = vmatprep.subr.bf16.mxu0 %v8310_v12  ;;  %v8238_v12 = vld [vmem:[%s11072_s10 + $0x1a4] ss:$8 sps:$4 sm:$0xff]  }
 0x68b   :  { %5658 = vmatpush1.bf16.msra.mxu1 %v8197_v45 }
 0x68c   :  { %5659 = vmatprep.subr.bf16.mxu1 %v8202_v47  ;;  %v8211_v47 = vld [vmem:[%s11072_s10 + $0x114] ss:$8 sps:$4 sm:$0xff]  }
 0x68d   :  { %6292 = vmatpush1.bf16.msra.mxu0 %v8308_v56  ;;  %v8236_v56 = vld [vmem:[%s11072_s10 + $0x1a0] ss:$8 sps:$4 sm:$0xff]  }
 0x68e   :  { %6293 = vmatprep.subr.bf16.mxu0 %v8316_v46  ;;  %v8239_v46 = vld [vmem:[%s11072_s10 + $0x1b0] ss:$8 sps:$4 sm:$0xff]  }
 0x68f   :  { %5660 = vmatpush1.bf16.msra.mxu1 %v8200_v23 }
 0x690   :  { %5661 = vmatprep.subr.bf16.mxu1 %v8205_v41  ;;  %v8326_v41 = vld [vmem:[%s11074_s12 + $0x100] ss:$16 sps:$4 sm:$0xff]  }
 0x691   :  { %6294 = vmatpush1.bf16.msra.mxu0 %v8314_v20  ;;  %v8247_v20 = vld [vmem:[%s11072_s10 + $0x1d4] ss:$8 sps:$4 sm:$0xff]  }
 0x692   :  { %6295 = vmatprep.subr.bf16.mxu0 %v8322_v27  ;;  %v8250_v27 = vld [vmem:[%s11072_s10 + $0x1e4] ss:$8 sps:$4 sm:$0xff]  }
 0x693   :  { %5662 = vmatpush1.bf16.msra.mxu1 %v8203_v49  ;;  %v8334_v49 = vld [vmem:[%s11074_s12 + $0x124] ss:$16 sps:$4 sm:$0xff]  }
 0x694   :  { %5672 = vmatprep.subr.bf16.mxu1 %v8208_v16  ;;  %v8209_v16 = vld [vmem:[%s11072_s10 + $0x110] ss:$8 sps:$4 sm:$0xff]  }
 0x695   :  { %6296 = vmatpush1.bf16.msra.mxu0 %v8320_v35  ;;  %v8293_v35 = vld [vmem:[%s11074_s12 + $0x48] ss:$16 sps:$4 sm:$0xff]  }
 0x696   :  { %6297 = vmatprep.subr.bf16.mxu0 %v8328_v38  ;;  %v8299_v38 = vld [vmem:[%s11074_s12 + $0x68] ss:$16 sps:$4 sm:$0xff]  }
 0x699   :  { %6298 = vmatpush1.bf16.msra.mxu0 %v8326_v41  ;;  %v8317_v41 = vld [vmem:[%s11074_s12 + $0xc8] ss:$16 sps:$4 sm:$0xff]  }
 0x69a   :  { %6299 = vmatprep.subr.bf16.mxu0 %v8334_v49  ;;  %v8325_v49 = vld [vmem:[%s11074_s12 + $0xec] ss:$16 sps:$4 sm:$0xff]  }
 0x69d   :  { %6300 = vmatpush1.bf16.msra.mxu0 %v8332_v55  ;;  %v8329_v55 = vld [vmem:[%s11074_s12 + $0x108] ss:$16 sps:$4 sm:$0xff]  }
 0x69e   :  { %6301 = vmatprep.subr.bf16.mxu0 %v8340_v52  ;;  %v8337_v52 = vld [vmem:[%s11074_s12 + $0x12c] ss:$16 sps:$4 sm:$0xff]  }
 0x6a1   :  { %6302 = vmatpush1.bf16.msra.mxu0 %v8338_v58  ;;  %v8341_v58 = vld [vmem:[%s11074_s12 + $0x148] ss:$16 sps:$4 sm:$0xff]  }
 0x6a2   :  { %6303 = vmatprep.subr.bf16.mxu0 %v8346_v59  ;;  %v8349_v59 = vld [vmem:[%s11074_s12 + $0x16c] ss:$16 sps:$4 sm:$0xff]  }
 0x6a5   :  { %6304 = vmatpush1.bf16.msra.mxu0 %v8344_v60  ;;  %v8353_v60 = vld [vmem:[%s11074_s12 + $0x188] ss:$16 sps:$4 sm:$0xff]  }
 0x6a6   :  { %6305 = vmatprep.subr.bf16.mxu0 %v8352_v50  ;;  %v8361_v50 = vld [vmem:[%s11074_s12 + $0x1ac] ss:$16 sps:$4 sm:$0xff]  }
 0x6a9   :  { %6306 = vmatpush1.bf16.msra.mxu0 %v8350_v0  ;;  %v8365_v0 = vld [vmem:[%s11074_s12 + $0x1c8] ss:$16 sps:$4 sm:$0xff]  }
 0x6aa   :  { %6307 = vmatprep.subr.bf16.mxu0 %v8358_v51  ;;  %v8370_v51 = vld [vmem:[%s11074_s12 + $0x1e4] ss:$16 sps:$4 sm:$0xff]  }
 0x6ad   :  { %6308 = vmatpush1.bf16.msra.mxu0 %v8356_v2  ;;  %v8371_v2 = vld [vmem:[%s11074_s12 + $0x1e8] ss:$16 sps:$4 sm:$0xff]  }
 0x6ae   :  { %6309 = vmatprep.subr.bf16.mxu0 %v8364_v34  ;;  %v8374_v34 = vld [vmem:[%s11077_s15 + $0x40] sm:$0xff]  }
 0x6b1   :  { %6310 = vmatpush1.bf16.msra.mxu0 %v8362_v7 }
 0x6b2   :  { %6311 = vmatprep.subr.bf16.mxu0 %v8370_v51 }
 0x729   :  { %v5056_v15 = vpop.f32.mrb[60].mxu1 }
 0x72a   :  { %v7559_v21 = vadd.f32 %v5056_v15, %v3602_v43  ;;  %v10675_v25 = vpop.f32.mrb[116].mxu0  ;;  %v5058_v3 = vpop.f32.mrb[61].mxu1  ;;  %v8241_v43 = vld [vmem:[%s11072_s10 + $0x1b4] ss:$8 sps:$4 sm:$0xff]   ;;  %v3609_v15 = vsub.s32 2, %v9760_v8 }
 0x72b   :  { %v7560_v24 = vadd.f32 %v5058_v3, %v3606_v6  ;;  %v5222_v28 = vpop.f32.mrb[117].mxu0  ;;  %v5060_v29 = vpop.f32.mrb[62].mxu1  ;;  %v8244_v6 = vld [vmem:[%s11072_s10 + $0x1c4] ss:$8 sps:$4 sm:$0xff]  }
 0x72c   :  { %v5227_v30 = vmax.f32 %v7559_v21, 0.0  ;;  %v7562_v31 = vadd.f32 %v5222_v28, %v3614_v18  ;;  %v5224_v19 = vpop.f32.mrb[118].mxu0  ;;  %v5061_v32 = vpop.f32.mrb[63].mxu1  ;;  %v8242_v18 = vld [vmem:[%s11072_s10 + $0x1c0] ss:$8 sps:$4 sm:$0xff]   ;;  %v3610_v3 = vrot.slane %v10653_v13, %v3609_v15 }
 0x72d   :  { %v5228_v33 = vmax.f32 %v7560_v24, 0.0  ;;  %v5225_v22 = vpop.f32.mrb[119].mxu0  ;;  %v8245_v21 = vld [vmem:[%s11072_s10 + $0x1d0] ss:$8 sps:$4 sm:$0xff]   ;;  %v8248_v24 = vld [vmem:[%s11072_s10 + $0x1e0] ss:$8 sps:$4 sm:$0xff]  }
 0x72e   :  { %v5230_v37 = vmax.f32 %v7562_v31, 0.0  ;;  %v5231_v45 = vpack.c.bf16 %v5227_v30, %v5227_v30  ;;  %v7561_v28 = vadd.f32 %v10675_v25, %v3610_v3  ;;  %v8253_v29 = vld [vmem:[%s11072_s10 + $0x1f4] ss:$8 sps:$4 sm:$0xff]   ;;  %v8251_v13 = vld [vmem:[%s11072_s10 + $0x1f0] ss:$8 sps:$4 sm:$0xff]   ;;  %s6759_s10 = sshll.u32 %s8438_s2, 4  ;;  %s6760_s10 = int_to_ptr.vmem [resolvable:$true] %s6759_s10 }
 0x72f   :  { %v5232_v39 = vpack.c.bf16 %v5228_v33, %v5228_v33  ;;  %v8283_v31 = vld [vmem:[%s11074_s12 + $0xc] ss:$16 sps:$4 sm:$0xff]   ;;  %v8281_v25 = vld [vmem:[%s11074_s12 + $0x8] ss:$16 sps:$4 sm:$0xff]   ;;  %p8413_p1 = scmp.lt.s32.totalorder %s6760_s10, %s6760_s10 }
 0x730   :  { %v5234_v23 = vpack.c.bf16 %v5230_v37, %v5230_v37  ;;  %v5229_v30 = vmax.f32 %v7561_v28, 0.0  ;;  %v8289_v32 = vld [vmem:[%s11074_s12 + $0x2c] ss:$16 sps:$4 sm:$0xff]   ;;  %v8287_v33 = vld [vmem:[%s11074_s12 + $0x28] ss:$16 sps:$4 sm:$0xff]   ;;  %v8376_v28 = vld [vmem:[%s11077_s15] sm:$0xff]  }
 0x731   :  { %5663 = vmatprep.mubr.bf16.mxu1 %v5232_v39  ;;  %v8295_v22 = vld [vmem:[%s11074_s12 + $0x4c] ss:$16 sps:$4 sm:$0xff]  }
 0x732   :  { %5664 = vmatmul.mubr.bf16.vlgmr.msra.gmra.mrb[64].mxu1 %v5231_v45  ;;  %v5233_v19 = vpack.c.bf16 %v5229_v30, %v5229_v30  ;;  %v8301_v37 = vld [vmem:[%s11074_s12 + $0x6c] ss:$16 sps:$4 sm:$0xff]  }
 0x733   :  { %5673 = vmatpush1.bf16.msra.mxu1 %v8206_v44  ;;  %5704 = vmatprep.mubr.bf16.mxu1 %v5234_v23  ;;  %v8307_v39 = vld [vmem:[%s11074_s12 + $0x8c] ss:$16 sps:$4 sm:$0xff]   ;;  %v8305_v44 = vld [vmem:[%s11074_s12 + $0x88] ss:$16 sps:$4 sm:$0xff]  }
 0x734   :  { %5674 = vmatprep.subr.bf16.mxu1 %v8211_v47  ;;  %v8313_v45 = vld [vmem:[%s11074_s12 + $0xac] ss:$16 sps:$4 sm:$0xff]   ;;  %v8311_v47 = vld [vmem:[%s11074_s12 + $0xa8] ss:$16 sps:$4 sm:$0xff]  }
 0x735   :  { %v8319_v23 = vld [vmem:[%s11074_s12 + $0xcc] ss:$16 sps:$4 sm:$0xff]  }
 0x736   :  { %v8378_v30 = vld [vmem:[%s11077_s15 + $0x48] sm:$0xff]  }
 0x737   :  { %5675 = vmatpush1.bf16.msra.mxu1 %v8209_v16  ;;  %v8323_v16 = vld [vmem:[%s11074_s12 + $0xe8] ss:$16 sps:$4 sm:$0xff]  }
 0x738   :  { %5676 = vmatprep.subr.bf16.mxu1 %v8214_v54  ;;  %v8331_v54 = vld [vmem:[%s11074_s12 + $0x10c] ss:$16 sps:$4 sm:$0xff]  }
 0x73b   :  { %5677 = vmatpush1.bf16.msra.mxu1 %v8212_v26  ;;  %v8335_v26 = vld [vmem:[%s11074_s12 + $0x128] ss:$16 sps:$4 sm:$0xff]  }
 0x73c   :  { %5678 = vmatprep.subr.bf16.mxu1 %v8217_v57  ;;  %v8343_v57 = vld [vmem:[%s11074_s12 + $0x14c] ss:$16 sps:$4 sm:$0xff]  }
 0x73f   :  { %5679 = vmatpush1.bf16.msra.mxu1 %v8215_v42  ;;  %v8347_v42 = vld [vmem:[%s11074_s12 + $0x168] ss:$16 sps:$4 sm:$0xff]  }
 0x740   :  { %5680 = vmatprep.subr.bf16.mxu1 %v8220_v40  ;;  %v8355_v40 = vld [vmem:[%s11074_s12 + $0x18c] ss:$16 sps:$4 sm:$0xff]  }
 0x743   :  { %5681 = vmatpush1.bf16.msra.mxu1 %v8218_v61  ;;  %v8359_v61 = vld [vmem:[%s11074_s12 + $0x1a8] ss:$16 sps:$4 sm:$0xff]  }
 0x744   :  { %5682 = vmatprep.subr.bf16.mxu1 %v8223_v63  ;;  %v8367_v63 = vld [vmem:[%s11074_s12 + $0x1cc] ss:$16 sps:$4 sm:$0xff]  }
 0x747   :  { %5683 = vmatpush1.bf16.msra.mxu1 %v8221_v36  ;;  %v8373_v36 = vld [vmem:[%s11074_s12 + $0x1ec] ss:$16 sps:$4 sm:$0xff]  }
 0x748   :  { %5684 = vmatprep.subr.bf16.mxu1 %v8226_v1  ;;  %v8368_v1 = vld [vmem:[%s11074_s12 + $0x1e0] ss:$16 sps:$4 sm:$0xff]  }
 0x749   :  { %6312 = vmatpush1.bf16.msra.mxu0 %v8368_v1 }
 0x74a   :  { %7503 = vmatprep.subr.bf16.mxu0 %v8374_v34 }
 0x74b   :  { %5685 = vmatpush1.bf16.msra.mxu1 %v8224_v4  ;;  %v8375_v4 = vld [vmem:[%s11077_s15 + $0xc0] sm:$0xff]  }
 0x74c   :  { %5686 = vmatprep.subr.bf16.mxu1 %v8229_v53  ;;  %v10931_v53 = vpop.f32.mrb[120].mxu0 }
 0x74d   :  { %v10933_v7 = vpop.f32.mrb[121].mxu0 }
 0x74f   :  { %5687 = vmatpush1.bf16.msra.mxu1 %v8227_v9  ;;  %v5917_v9 = vpop.f32.mrb[122].mxu0 }
 0x750   :  { %5688 = vmatprep.subr.bf16.mxu1 %v8232_v62  ;;  %v5918_v62 = vpop.f32.mrb[123].mxu0 }
 0x753   :  { %5689 = vmatpush1.bf16.msra.mxu1 %v8230_v48  ;;  %v10935_v48 = vpop.f32.mrb[124].mxu0 }
 0x754   :  { %5690 = vmatprep.subr.bf16.mxu1 %v8235_v5  ;;  %v10937_v5 = vpop.f32.mrb[125].mxu0 }
 0x757   :  { %5691 = vmatpush1.bf16.msra.mxu1 %v8233_v10  ;;  %v5958_v10 = vpop.f32.mrb[126].mxu0 }
 0x758   :  { %5692 = vmatprep.subr.bf16.mxu1 %v8238_v12  ;;  %v5959_v12 = vpop.f32.mrb[127].mxu0 }
 0x75b   :  { %5693 = vmatpush1.bf16.msra.mxu1 %v8236_v56  ;;  %v5299_v56 = vld [vmem:[%s11073_s11] sm:$0x3] }
 0x75c   :  { %5694 = vmatprep.subr.bf16.mxu1 %v8241_v43  ;;  %v5304_v43 = vrot.slane %v5299_v56, %v10645_v11 }
 0x75f   :  { %5695 = vmatpush1.bf16.msra.mxu1 %v8239_v46  ;;  %v5308_v46 = vrot.slane %v5299_v56, %v10656_v14 }
 0x760   :  { %5696 = vmatprep.subr.bf16.mxu1 %v8244_v6 }
 0x763   :  { %5697 = vmatpush1.bf16.msra.mxu1 %v8242_v18 }
 0x764   :  { %5698 = vmatprep.subr.bf16.mxu1 %v8247_v20 }
 0x767   :  { %5699 = vmatpush1.bf16.msra.mxu1 %v8245_v21 }
 0x768   :  { %5700 = vmatprep.subr.bf16.mxu1 %v8250_v27 }
 0x76b   :  { %5701 = vmatpush1.bf16.msra.mxu1 %v8248_v24 }
 0x76c   :  { %5702 = vmatprep.subr.bf16.mxu1 %v8253_v29  ;;  %v8377_v29 = vld [vmem:[%s11077_s15 + $0x80] sm:$0xff]  }
 0x76f   :  { %5703 = vmatpush1.bf16.msra.mxu1 %v8251_v13 }
 0x770   :  { %6322 = vmatprep.subr.bf16.mxu1 %v8283_v31  ;;  %v8379_v31 = vld [vmem:[%s11077_s15 + $0xc8] sm:$0xff]  }
 0x772   :  { %5705 = vmatmul.mubr.bf16.vlgmr.msra.gmra.mrb[64].mxu1 %v5233_v19  ;;  %v8381_v19 = vld [vmem:[%s11077_s15 + $0x88] sm:$0xff]  }
 0x773   :  { %6323 = vmatpush1.bf16.msra.mxu1 %v8281_v25  ;;  %v8380_v25 = vld [vmem:[%s11077_s15 + $0x8] sm:$0xff]  }
 0x774   :  { %6324 = vmatprep.subr.bf16.mxu1 %v8289_v32  ;;  %v8382_v32 = vld [vmem:[%s11077_s15 + $0x50] sm:$0xff]  }
 0x777   :  { %6325 = vmatpush1.bf16.msra.mxu1 %v8287_v33  ;;  %v8383_v33 = vld [vmem:[%s11077_s15 + $0xd0] sm:$0xff]  }
 0x778   :  { %6326 = vmatprep.subr.bf16.mxu1 %v8295_v22  ;;  %v8384_v22 = vld [vmem:[%s11077_s15 + $0x10] sm:$0xff]  }
 0x77b   :  { %6327 = vmatpush1.bf16.msra.mxu1 %v8293_v35  ;;  %v8385_v35 = vld [vmem:[%s11077_s15 + $0x90] sm:$0xff]  }
 0x77c   :  { %6328 = vmatprep.subr.bf16.mxu1 %v8301_v37  ;;  %v8386_v37 = vld [vmem:[%s11077_s15 + $0x58] sm:$0xff]  }
 0x77f   :  { %6329 = vmatpush1.bf16.msra.mxu1 %v8299_v38  ;;  %v8387_v38 = vld [vmem:[%s11077_s15 + $0xd8] sm:$0xff]  }
 0x780   :  { %6330 = vmatprep.subr.bf16.mxu1 %v8307_v39  ;;  %v8388_v39 = vld [vmem:[%s11077_s15 + $0x18] sm:$0xff]  }
 0x783   :  { %6331 = vmatpush1.bf16.msra.mxu1 %v8305_v44  ;;  %v8389_v44 = vld [vmem:[%s11077_s15 + $0x98] sm:$0xff]  }
 0x784   :  { %6332 = vmatprep.subr.bf16.mxu1 %v8313_v45  ;;  %v8390_v45 = vld [vmem:[%s11077_s15 + $0x60] sm:$0xff]  }
 0x787   :  { %6333 = vmatpush1.bf16.msra.mxu1 %v8311_v47  ;;  %v8391_v47 = vld [vmem:[%s11077_s15 + $0xe0] sm:$0xff]  }
 0x788   :  { %6334 = vmatprep.subr.bf16.mxu1 %v8319_v23  ;;  %v8392_v23 = vld [vmem:[%s11077_s15 + $0x20] sm:$0xff]  }
 0x78b   :  { %6335 = vmatpush1.bf16.msra.mxu1 %v8317_v41  ;;  %v8393_v41 = vld [vmem:[%s11077_s15 + $0xa0] sm:$0xff]  }
 0x78c   :  { %6336 = vmatprep.subr.bf16.mxu1 %v8325_v49  ;;  %v8394_v49 = vld [vmem:[%s11077_s15 + $0x68] sm:$0xff]  }
 0x78f   :  { %6337 = vmatpush1.bf16.msra.mxu1 %v8323_v16  ;;  %v8395_v16 = vld [vmem:[%s11077_s15 + $0xe8] sm:$0xff]  }
 0x790   :  { %6338 = vmatprep.subr.bf16.mxu1 %v8331_v54  ;;  %v8396_v54 = vld [vmem:[%s11077_s15 + $0x28] sm:$0xff]  }
 0x793   :  { %6339 = vmatpush1.bf16.msra.mxu1 %v8329_v55  ;;  %v8397_v55 = vld [vmem:[%s11077_s15 + $0xa8] sm:$0xff]  }
 0x794   :  { %6340 = vmatprep.subr.bf16.mxu1 %v8337_v52  ;;  %v8398_v52 = vld [vmem:[%s11077_s15 + $0x70] sm:$0xff]  }
 0x797   :  { %6341 = vmatpush1.bf16.msra.mxu1 %v8335_v26  ;;  %v8399_v26 = vld [vmem:[%s11077_s15 + $0xf0] sm:$0xff]  }
 0x798   :  { %6342 = vmatprep.subr.bf16.mxu1 %v8343_v57  ;;  %v8400_v57 = vld [vmem:[%s11077_s15 + $0x30] sm:$0xff]  }
 0x79b   :  { %6343 = vmatpush1.bf16.msra.mxu1 %v8341_v58  ;;  %v8401_v58 = vld [vmem:[%s11077_s15 + $0xb0] sm:$0xff]  }
 0x79c   :  { %6344 = vmatprep.subr.bf16.mxu1 %v8349_v59  ;;  %v8402_v59 = vld [vmem:[%s11077_s15 + $0x78] sm:$0xff]  }
 0x79f   :  { %6345 = vmatpush1.bf16.msra.mxu1 %v8347_v42  ;;  %v8403_v42 = vld [vmem:[%s11077_s15 + $0xf8] sm:$0xff]  }
 0x7a0   :  { %6346 = vmatprep.subr.bf16.mxu1 %v8355_v40  ;;  %v8404_v40 = vld [vmem:[%s11077_s15 + $0x38] sm:$0xff]  }
 0x7a3   :  { %6347 = vmatpush1.bf16.msra.mxu1 %v8353_v60  ;;  %v8405_v60 = vld [vmem:[%s11077_s15 + $0xb8] sm:$0xff]  }
 0x7a4   :  { %6348 = vmatprep.subr.bf16.mxu1 %v8361_v50  ;;  %v6363_v50 = vld [vmem:[%s11076_s14] sm:$0xf] }
 0x7a5   :  { %v6380_v1 = vrot.slane %v6363_v50, %v3613_v17 }
 0x7a7   :  { %6349 = vmatpush1.bf16.msra.mxu1 %v8359_v61  ;;  %v6368_v61 = vrot.slane %v6363_v50, %v10645_v11 }
 0x7a8   :  { %6350 = vmatprep.subr.bf16.mxu1 %v8367_v63  ;;  %v6376_v63 = vrot.slane %v6363_v50, %v3609_v15 }
 0x7ab   :  { %6351 = vmatpush1.bf16.msra.mxu1 %v8365_v0 }
 0x7ac   :  { %6352 = vmatprep.subr.bf16.mxu1 %v8373_v36  ;;  %v6372_v36 = vrot.slane %v6363_v50, %v10656_v14 }
 0x7af   :  { %6353 = vmatpush1.bf16.msra.mxu1 %v8371_v2 }
 0x7b0   :  { %7525 = vmatprep.subr.bf16.mxu1 %v8375_v4 }
 0x845   :  { %v5706_v6 = vpop.f32.mrb[64].mxu1 }
 0x846   :  { %v7563_v18 = vadd.f32 %v5706_v6, %v5304_v43  ;;  %v5708_v20 = vpop.f32.mrb[65].mxu1 }
 0x847   :  { %v7564_v21 = vadd.f32 %v5708_v20, %v5308_v46  ;;  %v5710_v3 = vpop.f32.mrb[66].mxu1 }
 0x848   :  { %v5711_v27 = vpop.f32.mrb[67].mxu1  ;;  %v5713_v13 = vpack.c.bf16 %v7563_v18, %v7563_v18 }
 0x849   :  { %v5714_v24 = vpack.c.bf16 %v7564_v21, %v7564_v21 }
 0x84b   :  { %6313 = vmatprep.mubr.bf16.mxu0 %v5714_v24  ;;  %6354 = vmatprep.mubr.bf16.mxu1 %v5714_v24  ;;  %v7316_v24 = vld [vmem:[%s11078_s16] ss:$0 sm:$0xff]  ;;  %s8408_s16 = scalar_lea.vmem %s6760_s10, 32 }
 0x84c   :  { %6314 = vmatmul.mubr.bf16.vlgmr.msra.gmra.mrb[128].mxu0 %v5713_v13  ;;  %6355 = vmatmul.mubr.bf16.vlgmr.msra.gmra.mrb[68].mxu1 %v5713_v13  ;;  %p8409_p0 = scmp.ne.s32.totalorder %s6760_s10, %s8408_s16  ;;  %p8414_p2 = scmp.lt.s32.totalorder %s8408_s16, %s8408_s16 }
 0x84d   :  { %7504 = vmatpush3.bf16.msra.mxu0 %v8376_v28  ;;  %7526 = vmatpush3.bf16.msra.mxu1 %v8377_v29 }
 0x84e   :  { %7505 = vmatprep.subr.bf16.mxu0 %v8378_v30  ;;  %7527 = vmatprep.subr.bf16.mxu1 %v8379_v31  ;;  %p8415_p3 = por %p8414_p2, %p8413_p1 }
 0x850   :  { %p8416_p4 = pnand %p8415_p3, %p8409_p0 }
 0x851   :  { %7506 = vmatpush3.bf16.msra.mxu0 %v8380_v25  ;;  %7528 = vmatpush3.bf16.msra.mxu1 %v8381_v19 }
 0x852   :  { %7507 = vmatprep.subr.bf16.mxu0 %v8382_v32  ;;  %7529 = vmatprep.subr.bf16.mxu1 %v8383_v33 }
 0x855   :  { %7508 = vmatpush3.bf16.msra.mxu0 %v8384_v22  ;;  %7530 = vmatpush3.bf16.msra.mxu1 %v8385_v35 }
 0x856   :  { %7509 = vmatprep.subr.bf16.mxu0 %v8386_v37  ;;  %7531 = vmatprep.subr.bf16.mxu1 %v8387_v38 }
 0x859   :  { %7510 = vmatpush3.bf16.msra.mxu0 %v8388_v39  ;;  %7532 = vmatpush3.bf16.msra.mxu1 %v8389_v44 }
 0x85a   :  { %7511 = vmatprep.subr.bf16.mxu0 %v8390_v45  ;;  %7533 = vmatprep.subr.bf16.mxu1 %v8391_v47 }
 0x85d   :  { %7512 = vmatpush3.bf16.msra.mxu0 %v8392_v23  ;;  %7534 = vmatpush3.bf16.msra.mxu1 %v8393_v41 }
 0x85e   :  { %7513 = vmatprep.subr.bf16.mxu0 %v8394_v49  ;;  %7535 = vmatprep.subr.bf16.mxu1 %v8395_v16 }
 0x861   :  { %7514 = vmatpush3.bf16.msra.mxu0 %v8396_v54  ;;  %7536 = vmatpush3.bf16.msra.mxu1 %v8397_v55 }
 0x862   :  { %7515 = vmatprep.subr.bf16.mxu0 %v8398_v52  ;;  %7537 = vmatprep.subr.bf16.mxu1 %v8399_v26 }
 0x865   :  { %7516 = vmatpush3.bf16.msra.mxu0 %v8400_v57  ;;  %7538 = vmatpush3.bf16.msra.mxu1 %v8401_v58 }
 0x866   :  { %7517 = vmatprep.subr.bf16.mxu0 %v8402_v59  ;;  %7539 = vmatprep.subr.bf16.mxu1 %v8403_v42 }
 0x869   :  { %7518 = vmatpush3.bf16.msra.mxu0 %v8404_v40  ;;  %7540 = vmatpush3.bf16.msra.mxu1 %v8405_v60 }
 0x91f   :  { %v6315_v0 = vpop.f32.mrb[128].mxu0  ;;  %v6356_v51 = vpop.f32.mrb[68].mxu1 }
 0x920   :  { %v6316_v2 = vadd.f32 %v6315_v0, %v10931_v53  ;;  %v6357_v34 = vadd.f32 %v6356_v51, %v10935_v48  ;;  %v6317_v4 = vpop.f32.mrb[129].mxu0  ;;  %v6358_v9 = vpop.f32.mrb[69].mxu1 }
 0x921   :  { %v6318_v62 = vadd.f32 %v6317_v4, %v10933_v7  ;;  %v6359_v11 = vadd.f32 %v6358_v9, %v10937_v5  ;;  %v6319_v10 = vpop.f32.mrb[130].mxu0  ;;  %v6360_v12 = vpop.f32.mrb[70].mxu1  ;;  %v8437_v7 = vmov 6  }
 0x922   :  { %v6385_v15 = vadd.f32 %v6368_v61, %v6316_v2  ;;  %v6387_v56 = vadd.f32 %v6376_v63, %v6357_v34  ;;  %v6320_v43 = vpop.f32.mrb[131].mxu0  ;;  %v6361_v46 = vpop.f32.mrb[71].mxu1  ;;  %7600 = vset.pattern.permute.xlu1 %v8437_v7  ;;  %7601 = vset.pattern.permute.xlu0 %v8437_v7 }
 0x923   :  { %v6386_v14 = vadd.f32 %v6372_v36, %v6318_v62  ;;  %v6388_v6 = vadd.f32 %v6380_v1, %v6359_v11 }
 0x924   :  { %v6389_v8 = vmax.f32 %v6385_v15, 0.0  ;;  %v6391_v17 = vmax.f32 %v6387_v56, 0.0 }
 0x925   :  { %v6390_v18 = vmax.f32 %v6386_v14, 0.0  ;;  %v6392_v53 = vmax.f32 %v6388_v6, 0.0 }
 0x926   :  { %v6393_v21 = vpack.c.bf16 %v6389_v8, %v6389_v8  ;;  %v6395_v3 = vpack.c.bf16 %v6391_v17, %v6391_v17 }
 0x927   :  { %v6394_v20 = vpack.c.bf16 %v6390_v18, %v6390_v18  ;;  %v6396_v48 = vpack.c.bf16 %v6392_v53, %v6392_v53 }
 0x929   :  { %6692 = vmatprep.mubr.bf16.mxu0 %v6394_v20  ;;  %6732 = vmatprep.mubr.bf16.mxu1 %v6396_v48 }
 0x92a   :  { %6693 = vmatmul.mubr.bf16.vlgmr.msra.gmra.mrb[132].mxu0 %v6393_v21  ;;  %6733 = vmatmul.mubr.bf16.vlgmr.msra.gmra.mrb[72].mxu1 %v6395_v3 }
 0x9fd   :  { %v7519_v5 = vpop.f32.mrb[132].mxu0  ;;  %v7541_v27 = vpop.f32.mrb[72].mxu1 }
 0x9fe   :  { %v7520_v28 = vpop.f32.mrb[133].mxu0  ;;  %v7542_v29 = vpop.f32.mrb[73].mxu1 }
 0x9ff   :  { %v7521_v13 = vadd.f32 %v7520_v28, %v7519_v5  ;;  %v7543_v30 = vadd.f32 %v7542_v29, %v7541_v27  ;;  %v7522_v31 = vpop.f32.mrb[134].mxu0  ;;  %v7544_v25 = vpop.f32.mrb[74].mxu1 }
 0xa00   :  { %v7523_v19 = vpop.f32.mrb[135].mxu0  ;;  %v7545_v32 = vpop.f32.mrb[75].mxu1 }
 0xa01   :  { %v6695_v33 = vadd.f32 %v7521_v13, %v7316_v24 }
 0xa03   :  { %v6735_v22 = vadd.f32 %v7543_v30, %v6695_v33 }
 0xa05   :  { %6748 = vperm.xlu1 %7600, %v6735_v22   ;;  %v6741_v35 = vsel %vm6740_vm3, %v6735_v22, 0.0 }
 0xa06   :  { %6742 = vadd.xlane.f32.xlu0 %v6741_v35 }
 0xa84   :  { %v6749_v44 = vpop.permute.xlu1 %6748 }
 0xa93   :  { %v6743_v37 = vpop.xlane.xlu0 %6742 }
 0xa94   :  { %v6744_v38 = vmul.f32 0.16666667, %v6743_v37 }
 0xa96   :  { %v6745_v39 = vsub.f32 %v6735_v22, %v6744_v38 }
 0xa98   :  { %v6751_v45 = vadd.f32 %v6749_v44, %v6745_v39 }
 0xa9a   :  { %6752 = vst.msk [vmem:[#allocation6] sm:$0x3] %vm6740_vm3, %v6751_v45 }
 0xa9b   :  { %8419 = shalt.err (!%p8416_p4)
}
 0xa9c   :  { %s8420_s20 = scalar_lea.hbm %s11079_s17, 32 }
 0xa9d   :  { %p8421_p5 = scmp.ne.s32.totalorder %s11079_s17, %s8420_s20  ;;  %p8424_p6 = scmp.lt.u32.totalorder %s8420_s20, %s11079_s17 }
 0xa9f   :  { %p8426_p7 = pnand %p8424_p6, %p8421_p5 }
 0xaa1   :  { %8429 = shalt.err (!%p8426_p7)
}
 0xaa2   :  { %6762 = dma.vmem_to_hbm [thread:$0]  %s6760_s10, 32, %s11079_s17, [#allocation7]  }
 0xaa3   :  { %8430 = dma.done.wait [#allocation7], 32  }
 0xaa4   :  { %8431 = vsyncadd [#allocation7], 4294967264 }
 0xaa5   :  { %6766 = vsyncpa [#allocation7], 1 }

</bundles_post_ra>
